<compile_context>
chip_gen: v7x
topology: tpu7x:2x2x1
jax: 0.10.0
libtpu: 0.0.40
codegen_flags: <defaults>
</compile_context>

<pallas_src>
import jax
import jax.numpy as jnp
import numpy as np
from jax import lax
from jax.experimental import pallas as pl
from jax.experimental.pallas import tpu as pltpu


# ---------------------------------------------------------------------------
# Constant builders (tiny, plain-JAX wrapper glue; everything hoisted out of
# the kernel and passed in as operands).
# ---------------------------------------------------------------------------

def _shift_mats(h):
    """(5, h, h): S[kh] @ x == x shifted by (kh - 2) rows, out-of-range rows
    read as zero (== the conv's height padding of 2)."""
    rows = jnp.arange(h)[:, None]
    cols = jnp.arange(h)[None, :]
    kh = jnp.arange(5)[:, None, None]
    return (cols[None] == rows[None] + kh - 2).astype(jnp.float32)


def _band_out_channels(w, width):
    """conv weights (Cout, 5, 5) -> (5, width, Cout*width) band matrices:
    band[kh, s, c*width + t] = w[c, kh, s - t + 2] (zero outside the band), so
    row_slab @ band[kh] does the kw accumulation of a pad-2 conv for all output
    channels at once (width zero-padding comes from clipping s to [0, width))."""
    c = w.shape[0]
    s = jnp.arange(width)[:, None]
    t = jnp.arange(width)[None, :]
    d = s - t + 2
    taps = w[:, :, jnp.clip(d, 0, 4)]                       # (C, 5, width, width)
    taps = jnp.where(((d >= 0) & (d < 5))[None, None], taps, 0.0)
    return taps.transpose(1, 2, 0, 3).reshape(5, width, c * width)


def _band_in_channels(w, width):
    """conv weights (Cin, 5, 5) -> (5, Cin*width, width) band matrices
    (single output channel; input channels folded into the contraction dim)."""
    c = w.shape[0]
    s = jnp.arange(width)[:, None]
    t = jnp.arange(width)[None, :]
    d = s - t + 2
    taps = w[:, :, jnp.clip(d, 0, 4)]
    taps = jnp.where(((d >= 0) & (d < 5))[None, None], taps, 0.0)
    return taps.transpose(1, 0, 2, 3).reshape(5, c * width, width)


def _pool_row_sel(h_in):
    """(2, h_in//2, h_in): E[p][i, 2*i + p] = 1 -> exact 2x1 row-max via two
    selection matmuls + elementwise max (batch independent)."""
    i = jnp.arange(h_in // 2)[:, None]
    r = jnp.arange(h_in)[None, :]
    p = jnp.arange(2)[:, None, None]
    return (r[None] == 2 * i[None] + p).astype(jnp.float32)


def _pool_col_sel(channels, w_in):
    """(2, channels*w_in, channels*w_in//2): per-channel-block 1x2 column max."""
    w_out = w_in // 2
    rows = jnp.arange(channels * w_in)[:, None]
    cols = jnp.arange(channels * w_out)[None, :]
    q = jnp.arange(2)[:, None, None]
    same_c = (rows // w_in)[None] == (cols // w_out)[None]
    hit = (rows % w_in)[None] == 2 * (cols % w_out)[None] + q
    return (same_c & hit).astype(jnp.float32)


def _flatten_consts():
    """(32, 1024) tile + mask so that sum_h((p2 @ tile) * mask, axis=0) is the
    row-major flatten of the (32, 32) pooled map -- no in-kernel reshape."""
    n = jnp.arange(32 * 32)[None, :]
    k = jnp.arange(32)[:, None]
    tile = (n % 32 == k).astype(jnp.float32)
    mask = (n // 32 == k).astype(jnp.float32)
    return tile, mask


# ---------------------------------------------------------------------------
# The fused kernel: one program == one batch element.
# ---------------------------------------------------------------------------

def _face_attr_kernel(x_ref, s1_ref, band1_ref, cb1_ref, e1_ref, f1_ref,
                      s2_ref, band2_ref, cb2_ref, e2_ref, f2_ref,
                      tile_ref, mask_ref,
                      w2_ref, b2_ref, w3_ref, b3_ref, w4_ref, b4_ref,
                      o_ref):
    f32 = jnp.float32
    x = x_ref[0]                                                    # (128, 128)

    # --- conv1: 1 -> 3 channels, 5x5, pad 2 (all on the MXU) -----------------
    acc1 = jnp.zeros((128, 3 * 128), f32)
    for kh in range(5):
        shifted = jnp.dot(s1_ref[kh], x, preferred_element_type=f32)
        acc1 = acc1 + jnp.dot(shifted, band1_ref[kh], preferred_element_type=f32)
    acc1 = jnp.maximum(acc1 + cb1_ref[...], 0.0)                    # bias + ReLU

    # --- 2x2 max-pool (exact selection matmuls) ------------------------------
    rmax = jnp.maximum(jnp.dot(e1_ref[0], acc1, preferred_element_type=f32),
                       jnp.dot(e1_ref[1], acc1, preferred_element_type=f32))
    y1 = jnp.maximum(jnp.dot(rmax, f1_ref[0], preferred_element_type=f32),
                     jnp.dot(rmax, f1_ref[1], preferred_element_type=f32))   # (64, 192)

    # --- conv2: 3 -> 1 channel, 5x5, pad 2 -----------------------------------
    acc2 = jnp.zeros((64, 64), f32)
    for kh in range(5):
        shifted = jnp.dot(s2_ref[kh], y1, preferred_element_type=f32)
        acc2 = acc2 + jnp.dot(shifted, band2_ref[kh], preferred_element_type=f32)
    acc2 = jnp.maximum(acc2 + cb2_ref[...], 0.0)

    # --- 2x2 max-pool -> (32, 32) --------------------------------------------
    rmax2 = jnp.maximum(jnp.dot(e2_ref[0], acc2, preferred_element_type=f32),
                        jnp.dot(e2_ref[1], acc2, preferred_element_type=f32))
    p2 = jnp.maximum(jnp.dot(rmax2, f2_ref[0], preferred_element_type=f32),
                     jnp.dot(rmax2, f2_ref[1], preferred_element_type=f32))

    # --- flatten (row-major) to lane-dense (1, 1024) without a reshape -------
    q = jnp.dot(p2, tile_ref[...], preferred_element_type=f32)      # (32, 1024)
    flat = jnp.sum(q * mask_ref[...], axis=0, keepdims=True)        # (1, 1024)

    # --- MLP: relu -> fc2 -> relu -> fc3 -> fc4 (bf16 MXU, f32 accumulate) ---
    # TODO(synk): nn.Dropout(p=0.5) is identity in eval mode; training-mode RNG
    # dropout (pltpu.prng_*) is intentionally not implemented.
    h = jnp.maximum(flat, 0.0)
    h = jnp.dot(h.astype(jnp.bfloat16), w2_ref[...],
                preferred_element_type=f32) + b2_ref[...]
    h = jnp.maximum(h, 0.0)
    h = jnp.dot(h.astype(jnp.bfloat16), w3_ref[...],
                preferred_element_type=f32) + b3_ref[...]
    out = jnp.dot(h.astype(jnp.bfloat16), w4_ref[...],
                  preferred_element_type=f32) + b4_ref[...]         # (1, 128)
    o_ref[0] = out


# ---------------------------------------------------------------------------
# Public entry.
# ---------------------------------------------------------------------------

def face_attr_forward(x, params):
    """x: (B, 1, 128, 128) float32 NCHW -> (B, 42) float32 (eval mode)."""
    B = x.shape[0]
    f32 = jnp.float32
    xs = x[:, 0].astype(f32)                                        # (B, 128, 128)

    # Precomputed constant operands (shift / band / pool / flatten matrices).
    s1 = _shift_mats(128)                                           # (5, 128, 128)
    band1 = _band_out_channels(params["conv1_w"].astype(f32), 128)  # (5, 128, 384)
    cb1 = jnp.repeat(params["conv1_b"].astype(f32), 128)[None, :]   # (1, 384)
    e1 = _pool_row_sel(128)                                         # (2, 64, 128)
    f1 = _pool_col_sel(3, 128)                                      # (2, 384, 192)
    s2 = _shift_mats(64)                                            # (5, 64, 64)
    band2 = _band_in_channels(params["conv2_w"].astype(f32), 64)    # (5, 192, 64)
    cb2 = jnp.broadcast_to(params["conv2_b"].astype(f32), (64,))[None, :]  # (1, 64)
    e2 = _pool_row_sel(64)                                          # (2, 32, 64)
    f2 = _pool_col_sel(1, 64)                                       # (2, 64, 32)
    tile, mask = _flatten_consts()                                  # (32, 1024) x2

    bf16 = jnp.bfloat16
    w2 = params["fc2_w"].astype(bf16)
    w3 = params["fc3_w"].astype(bf16)
    w4 = jnp.zeros((256, 128), bf16).at[:, :42].set(params["fc4_w"].astype(bf16))
    b2 = params["fc2_b"].astype(f32)
    b3 = params["fc3_b"].astype(f32)
    b4 = jnp.zeros((1, 128), f32).at[:, :42].set(params["fc4_b"].astype(f32))

    const3 = lambda i: (0, 0, 0)
    const2 = lambda i: (0, 0)

    out = pl.pallas_call(
        _face_attr_kernel,
        out_shape=jax.ShapeDtypeStruct((B, 1, 128), f32),
        grid=(B,),
        in_specs=[
            pl.BlockSpec((1, 128, 128), lambda i: (i, 0, 0)),       # x
            pl.BlockSpec((5, 128, 128), const3),                    # conv1 row shifts
            pl.BlockSpec((5, 128, 384), const3),                    # conv1 bands
            pl.BlockSpec((1, 384), const2),                         # conv1 bias row
            pl.BlockSpec((2, 64, 128), const3),                     # pool1 rows
            pl.BlockSpec((2, 384, 192), const3),                    # pool1 cols
            pl.BlockSpec((5, 64, 64), const3),                      # conv2 row shifts
            pl.BlockSpec((5, 192, 64), const3),                     # conv2 bands
            pl.BlockSpec((1, 64), const2),                          # conv2 bias row
            pl.BlockSpec((2, 32, 64), const3),                      # pool2 rows
            pl.BlockSpec((2, 64, 32), const3),                      # pool2 cols
            pl.BlockSpec((32, 1024), const2),                       # flatten tile
            pl.BlockSpec((32, 1024), const2),                       # flatten mask
            pl.BlockSpec((1024, 512), const2),                      # fc2_w (bf16)
            pl.BlockSpec((1, 512), const2),                         # fc2_b
            pl.BlockSpec((512, 256), const2),                       # fc3_w (bf16)
            pl.BlockSpec((1, 256), const2),                         # fc3_b
            pl.BlockSpec((256, 128), const2),                       # fc4_w (padded)
            pl.BlockSpec((1, 128), const2),                         # fc4_b (padded)
        ],
        out_specs=pl.BlockSpec((1, 1, 128), lambda i: (i, 0, 0)),
        compiler_params=pltpu.CompilerParams(
            dimension_semantics=("parallel",),
            vmem_limit_bytes=32 * 1024 * 1024),
    )(xs, s1, band1, cb1, e1, f1, s2, band2, cb2, e2, f2, tile, mask,
      w2, b2, w3, b3, w4, b4)

    return out.reshape(B, 128)[:, :42]


# ---------------------------------------------------------------------------
# Parameters & pure-JAX reference.
# ---------------------------------------------------------------------------

def init_params(key):
    ks = jax.random.split(key, 10)

    def uni(k, shape, fan_in):
        bound = 1.0 / np.sqrt(fan_in)
        return jax.random.uniform(k, shape, jnp.float32, -bound, bound)

    return {
        "conv1_w": uni(ks[0], (3, 5, 5), 1 * 5 * 5),   # (out=3, kh, kw), in_ch = 1
        "conv1_b": uni(ks[1], (3,), 1 * 5 * 5),
        "conv2_w": uni(ks[2], (3, 5, 5), 3 * 5 * 5),   # (in=3, kh, kw), out_ch = 1
        "conv2_b": uni(ks[3], (1,), 3 * 5 * 5),
        "fc2_w": uni(ks[4], (1024, 512), 1024),        # stored (in, out)
        "fc2_b": uni(ks[5], (1, 512), 1024),
        "fc3_w": uni(ks[6], (512, 256), 512),
        "fc3_b": uni(ks[7], (1, 256), 512),
        "fc4_w": uni(ks[8], (256, 42), 256),
        "fc4_b": uni(ks[9], (1, 42), 256),
    }


def reference_forward(x, p):
    """Pure-JAX reference matching the PyTorch forward (eval mode)."""
    hp = lax.Precision.HIGHEST
    w1 = p["conv1_w"][:, None]                         # (3, 1, 5, 5)
    y = lax.conv_general_dilated(x, w1, (1, 1), ((2, 2), (2, 2)),
                                 dimension_numbers=("NCHW", "OIHW", "NCHW"),
                                 precision=hp)
    y = jnp.maximum(y + p["conv1_b"][None, :, None, None], 0.0)
    y = lax.reduce_window(y, -jnp.inf, lax.max, (1, 1, 2, 2), (1, 1, 2, 2), "VALID")
    w2 = p["conv2_w"][None]                            # (1, 3, 5, 5)
    z = lax.conv_general_dilated(y, w2, (1, 1), ((2, 2), (2, 2)),
                                 dimension_numbers=("NCHW", "OIHW", "NCHW"),
                                 precision=hp)
    z = jnp.maximum(z + p["conv2_b"][None, :, None, None], 0.0)
    z = lax.reduce_window(z, -jnp.inf, lax.max, (1, 1, 2, 2), (1, 1, 2, 2), "VALID")
    flat = z.reshape(z.shape[0], -1)
    h = jnp.maximum(flat, 0.0)
    h = jnp.dot(h, p["fc2_w"], precision=hp) + p["fc2_b"][0]
    h = jnp.maximum(h, 0.0)
    h = jnp.dot(h, p["fc3_w"], precision=hp) + p["fc3_b"][0]
    return jnp.dot(h, p["fc4_w"], precision=hp) + p["fc4_b"][0]


if __name__ == "__main__":
    key = jax.random.PRNGKey(0)
    pkey, xkey = jax.random.split(key)
    params = init_params(pkey)

    # 128x128 single-channel input is implied by the module (fc2 expects 32*32
    # features after two 2x2 max-pools).
    x = jax.random.normal(xkey, (2, 1, 128, 128), jnp.float32)

    fwd = jax.jit(face_attr_forward)
    out = jax.block_until_ready(fwd(x, params))
    assert out.shape == (2, 42) and out.dtype == jnp.float32

    ref = jax.block_until_ready(reference_forward(x, params))
    np.testing.assert_allclose(np.asarray(out), np.asarray(ref),
                               rtol=5e-2, atol=1e-2)

    print("KERNEL_OK")
</pallas_src>

<mosaic_0001>
module attributes {stable_mosaic.version = 11 : i64} {
  func.func @_face_attr_kernel(%arg0: i32, %arg1: memref<1x128x128xf32, #tpu.memory_space<vmem>>, %arg2: memref<5x128x128xf32, #tpu.memory_space<vmem>>, %arg3: memref<5x128x384xf32, #tpu.memory_space<vmem>>, %arg4: memref<1x384xf32, #tpu.memory_space<vmem>>, %arg5: memref<2x64x128xf32, #tpu.memory_space<vmem>>, %arg6: memref<2x384x192xf32, #tpu.memory_space<vmem>>, %arg7: memref<5x64x64xf32, #tpu.memory_space<vmem>>, %arg8: memref<5x192x64xf32, #tpu.memory_space<vmem>>, %arg9: memref<1x64xf32, #tpu.memory_space<vmem>>, %arg10: memref<2x32x64xf32, #tpu.memory_space<vmem>>, %arg11: memref<2x64x32xf32, #tpu.memory_space<vmem>>, %arg12: memref<32x1024xf32, #tpu.memory_space<vmem>>, %arg13: memref<32x1024xf32, #tpu.memory_space<vmem>>, %arg14: memref<1024x512xbf16, #tpu.memory_space<vmem>>, %arg15: memref<1x512xf32, #tpu.memory_space<vmem>>, %arg16: memref<512x256xbf16, #tpu.memory_space<vmem>>, %arg17: memref<1x256xf32, #tpu.memory_space<vmem>>, %arg18: memref<256x128xbf16, #tpu.memory_space<vmem>>, %arg19: memref<1x128xf32, #tpu.memory_space<vmem>>, %arg20: memref<1x1x128xf32, #tpu.memory_space<vmem>>) attributes {dimension_semantics = [#tpu.dimension_semantics<parallel>], iteration_bounds = array<i64: 2>, scalar_prefetch = 0 : i64, scratch_operands = 0 : i64, tpu.core_type = #tpu.core_type<tc>, window_params = [{transform_indices = @transform_0, window_bounds = array<i64: 1, 128, 128>}, {pipeline_mode = #tpu.pipeline_mode<synchronous>, transform_indices = @transform_1, window_bounds = array<i64: 5, 128, 128>}, {pipeline_mode = #tpu.pipeline_mode<synchronous>, transform_indices = @transform_2, window_bounds = array<i64: 5, 128, 384>}, {pipeline_mode = #tpu.pipeline_mode<synchronous>, transform_indices = @transform_3, window_bounds = array<i64: 1, 384>}, {pipeline_mode = #tpu.pipeline_mode<synchronous>, transform_indices = @transform_4, window_bounds = array<i64: 2, 64, 128>}, {pipeline_mode = #tpu.pipeline_mode<synchronous>, transform_indices = @transform_5, window_bounds = array<i64: 2, 384, 192>}, {pipeline_mode = #tpu.pipeline_mode<synchronous>, transform_indices = @transform_6, window_bounds = array<i64: 5, 64, 64>}, {pipeline_mode = #tpu.pipeline_mode<synchronous>, transform_indices = @transform_7, window_bounds = array<i64: 5, 192, 64>}, {pipeline_mode = #tpu.pipeline_mode<synchronous>, transform_indices = @transform_8, window_bounds = array<i64: 1, 64>}, {pipeline_mode = #tpu.pipeline_mode<synchronous>, transform_indices = @transform_9, window_bounds = array<i64: 2, 32, 64>}, {pipeline_mode = #tpu.pipeline_mode<synchronous>, transform_indices = @transform_10, window_bounds = array<i64: 2, 64, 32>}, {pipeline_mode = #tpu.pipeline_mode<synchronous>, transform_indices = @transform_11, window_bounds = array<i64: 32, 1024>}, {pipeline_mode = #tpu.pipeline_mode<synchronous>, transform_indices = @transform_12, window_bounds = array<i64: 32, 1024>}, {pipeline_mode = #tpu.pipeline_mode<synchronous>, transform_indices = @transform_13, window_bounds = array<i64: 1024, 512>}, {pipeline_mode = #tpu.pipeline_mode<synchronous>, transform_indices = @transform_14, window_bounds = array<i64: 1, 512>}, {pipeline_mode = #tpu.pipeline_mode<synchronous>, transform_indices = @transform_15, window_bounds = array<i64: 512, 256>}, {pipeline_mode = #tpu.pipeline_mode<synchronous>, transform_indices = @transform_16, window_bounds = array<i64: 1, 256>}, {pipeline_mode = #tpu.pipeline_mode<synchronous>, transform_indices = @transform_17, window_bounds = array<i64: 256, 128>}, {pipeline_mode = #tpu.pipeline_mode<synchronous>, transform_indices = @transform_18, window_bounds = array<i64: 1, 128>}, {transform_indices = @transform_19, window_bounds = array<i64: 1, 1, 128>}]} {
    %c0 = arith.constant 0 : index
    %c0_0 = arith.constant 0 : index
    %c0_1 = arith.constant 0 : index
    %0 = vector.load %arg1[%c0, %c0_0, %c0_1] : memref<1x128x128xf32, #tpu.memory_space<vmem>>, vector<1x128x128xf32>
    %1 = vector.shape_cast %0 : vector<1x128x128xf32> to vector<128x128xf32>
    %cst = arith.constant 0.000000e+00 : f32
    %2 = vector.broadcast %cst : f32 to vector<128x384xf32>
    %c0_2 = arith.constant 0 : index
    %c0_3 = arith.constant 0 : index
    %c0_4 = arith.constant 0 : index
    %3 = vector.load %arg2[%c0_2, %c0_3, %c0_4] : memref<5x128x128xf32, #tpu.memory_space<vmem>>, vector<1x128x128xf32>
    %4 = vector.shape_cast %3 : vector<1x128x128xf32> to vector<128x128xf32>
    %cst_5 = arith.constant dense<0.000000e+00> : vector<128x128xf32>
    %5 = tpu.matmul %4, %1, %cst_5 {dimension_numbers = #tpu.dot_dimension_numbers<[1], [0], [0], [1], [0, 0, 1, 1], [], []>} : vector<128x128xf32>, vector<128x128xf32>, vector<128x128xf32> -> vector<128x128xf32>
    %c0_6 = arith.constant 0 : index
    %c0_7 = arith.constant 0 : index
    %c0_8 = arith.constant 0 : index
    %6 = vector.load %arg3[%c0_6, %c0_7, %c0_8] : memref<5x128x384xf32, #tpu.memory_space<vmem>>, vector<1x128x384xf32>
    %7 = vector.shape_cast %6 : vector<1x128x384xf32> to vector<128x384xf32>
    %cst_9 = arith.constant dense<0.000000e+00> : vector<128x384xf32>
    %8 = tpu.matmul %5, %7, %cst_9 {dimension_numbers = #tpu.dot_dimension_numbers<[1], [0], [0], [1], [0, 0, 1, 1], [], []>} : vector<128x128xf32>, vector<128x384xf32>, vector<128x384xf32> -> vector<128x384xf32>
    %9 = arith.addf %2, %8 : vector<128x384xf32>
    %c1 = arith.constant 1 : index
    %c0_10 = arith.constant 0 : index
    %c0_11 = arith.constant 0 : index
    %10 = vector.load %arg2[%c1, %c0_10, %c0_11] : memref<5x128x128xf32, #tpu.memory_space<vmem>>, vector<1x128x128xf32>
    %11 = vector.shape_cast %10 : vector<1x128x128xf32> to vector<128x128xf32>
    %cst_12 = arith.constant dense<0.000000e+00> : vector<128x128xf32>
    %12 = tpu.matmul %11, %1, %cst_12 {dimension_numbers = #tpu.dot_dimension_numbers<[1], [0], [0], [1], [0, 0, 1, 1], [], []>} : vector<128x128xf32>, vector<128x128xf32>, vector<128x128xf32> -> vector<128x128xf32>
    %c1_13 = arith.constant 1 : index
    %c0_14 = arith.constant 0 : index
    %c0_15 = arith.constant 0 : index
    %13 = vector.load %arg3[%c1_13, %c0_14, %c0_15] : memref<5x128x384xf32, #tpu.memory_space<vmem>>, vector<1x128x384xf32>
    %14 = vector.shape_cast %13 : vector<1x128x384xf32> to vector<128x384xf32>
    %cst_16 = arith.constant dense<0.000000e+00> : vector<128x384xf32>
    %15 = tpu.matmul %12, %14, %cst_16 {dimension_numbers = #tpu.dot_dimension_numbers<[1], [0], [0], [1], [0, 0, 1, 1], [], []>} : vector<128x128xf32>, vector<128x384xf32>, vector<128x384xf32> -> vector<128x384xf32>
    %16 = arith.addf %9, %15 : vector<128x384xf32>
    %c2 = arith.constant 2 : index
    %c0_17 = arith.constant 0 : index
    %c0_18 = arith.constant 0 : index
    %17 = vector.load %arg2[%c2, %c0_17, %c0_18] : memref<5x128x128xf32, #tpu.memory_space<vmem>>, vector<1x128x128xf32>
    %18 = vector.shape_cast %17 : vector<1x128x128xf32> to vector<128x128xf32>
    %cst_19 = arith.constant dense<0.000000e+00> : vector<128x128xf32>
    %19 = tpu.matmul %18, %1, %cst_19 {dimension_numbers = #tpu.dot_dimension_numbers<[1], [0], [0], [1], [0, 0, 1, 1], [], []>} : vector<128x128xf32>, vector<128x128xf32>, vector<128x128xf32> -> vector<128x128xf32>
    %c2_20 = arith.constant 2 : index
    %c0_21 = arith.constant 0 : index
    %c0_22 = arith.constant 0 : index
    %20 = vector.load %arg3[%c2_20, %c0_21, %c0_22] : memref<5x128x384xf32, #tpu.memory_space<vmem>>, vector<1x128x384xf32>
    %21 = vector.shape_cast %20 : vector<1x128x384xf32> to vector<128x384xf32>
    %cst_23 = arith.constant dense<0.000000e+00> : vector<128x384xf32>
    %22 = tpu.matmul %19, %21, %cst_23 {dimension_numbers = #tpu.dot_dimension_numbers<[1], [0], [0], [1], [0, 0, 1, 1], [], []>} : vector<128x128xf32>, vector<128x384xf32>, vector<128x384xf32> -> vector<128x384xf32>
    %23 = arith.addf %16, %22 : vector<128x384xf32>
    %c3 = arith.constant 3 : index
    %c0_24 = arith.constant 0 : index
    %c0_25 = arith.constant 0 : index
    %24 = vector.load %arg2[%c3, %c0_24, %c0_25] : memref<5x128x128xf32, #tpu.memory_space<vmem>>, vector<1x128x128xf32>
    %25 = vector.shape_cast %24 : vector<1x128x128xf32> to vector<128x128xf32>
    %cst_26 = arith.constant dense<0.000000e+00> : vector<128x128xf32>
    %26 = tpu.matmul %25, %1, %cst_26 {dimension_numbers = #tpu.dot_dimension_numbers<[1], [0], [0], [1], [0, 0, 1, 1], [], []>} : vector<128x128xf32>, vector<128x128xf32>, vector<128x128xf32> -> vector<128x128xf32>
    %c3_27 = arith.constant 3 : index
    %c0_28 = arith.constant 0 : index
    %c0_29 = arith.constant 0 : index
    %27 = vector.load %arg3[%c3_27, %c0_28, %c0_29] : memref<5x128x384xf32, #tpu.memory_space<vmem>>, vector<1x128x384xf32>
    %28 = vector.shape_cast %27 : vector<1x128x384xf32> to vector<128x384xf32>
    %cst_30 = arith.constant dense<0.000000e+00> : vector<128x384xf32>
    %29 = tpu.matmul %26, %28, %cst_30 {dimension_numbers = #tpu.dot_dimension_numbers<[1], [0], [0], [1], [0, 0, 1, 1], [], []>} : vector<128x128xf32>, vector<128x384xf32>, vector<128x384xf32> -> vector<128x384xf32>
    %30 = arith.addf %23, %29 : vector<128x384xf32>
    %c4 = arith.constant 4 : index
    %c0_31 = arith.constant 0 : index
    %c0_32 = arith.constant 0 : index
    %31 = vector.load %arg2[%c4, %c0_31, %c0_32] : memref<5x128x128xf32, #tpu.memory_space<vmem>>, vector<1x128x128xf32>
    %32 = vector.shape_cast %31 : vector<1x128x128xf32> to vector<128x128xf32>
    %cst_33 = arith.constant dense<0.000000e+00> : vector<128x128xf32>
    %33 = tpu.matmul %32, %1, %cst_33 {dimension_numbers = #tpu.dot_dimension_numbers<[1], [0], [0], [1], [0, 0, 1, 1], [], []>} : vector<128x128xf32>, vector<128x128xf32>, vector<128x128xf32> -> vector<128x128xf32>
    %c4_34 = arith.constant 4 : index
    %c0_35 = arith.constant 0 : index
    %c0_36 = arith.constant 0 : index
    %34 = vector.load %arg3[%c4_34, %c0_35, %c0_36] : memref<5x128x384xf32, #tpu.memory_space<vmem>>, vector<1x128x384xf32>
    %35 = vector.shape_cast %34 : vector<1x128x384xf32> to vector<128x384xf32>
    %cst_37 = arith.constant dense<0.000000e+00> : vector<128x384xf32>
    %36 = tpu.matmul %33, %35, %cst_37 {dimension_numbers = #tpu.dot_dimension_numbers<[1], [0], [0], [1], [0, 0, 1, 1], [], []>} : vector<128x128xf32>, vector<128x384xf32>, vector<128x384xf32> -> vector<128x384xf32>
    %37 = arith.addf %30, %36 : vector<128x384xf32>
    %c0_38 = arith.constant 0 : index
    %c0_39 = arith.constant 0 : index
    %38 = vector.load %arg4[%c0_38, %c0_39] : memref<1x384xf32, #tpu.memory_space<vmem>>, vector<1x384xf32>
    %39 = vector.broadcast %38 : vector<1x384xf32> to vector<128x384xf32>
    %40 = arith.addf %37, %39 : vector<128x384xf32>
    %cst_40 = arith.constant 0.000000e+00 : f32
    %41 = vector.broadcast %cst_40 : f32 to vector<128x384xf32>
    %42 = arith.maximumf %40, %41 : vector<128x384xf32>
    %c0_41 = arith.constant 0 : index
    %c0_42 = arith.constant 0 : index
    %c0_43 = arith.constant 0 : index
    %43 = vector.load %arg5[%c0_41, %c0_42, %c0_43] : memref<2x64x128xf32, #tpu.memory_space<vmem>>, vector<1x64x128xf32>
    %44 = vector.shape_cast %43 : vector<1x64x128xf32> to vector<64x128xf32>
    %cst_44 = arith.constant dense<0.000000e+00> : vector<64x384xf32>
    %45 = tpu.matmul %44, %42, %cst_44 {dimension_numbers = #tpu.dot_dimension_numbers<[1], [0], [0], [1], [0, 0, 1, 1], [], []>} : vector<64x128xf32>, vector<128x384xf32>, vector<64x384xf32> -> vector<64x384xf32>
    %c1_45 = arith.constant 1 : index
    %c0_46 = arith.constant 0 : index
    %c0_47 = arith.constant 0 : index
    %46 = vector.load %arg5[%c1_45, %c0_46, %c0_47] : memref<2x64x128xf32, #tpu.memory_space<vmem>>, vector<1x64x128xf32>
    %47 = vector.shape_cast %46 : vector<1x64x128xf32> to vector<64x128xf32>
    %cst_48 = arith.constant dense<0.000000e+00> : vector<64x384xf32>
    %48 = tpu.matmul %47, %42, %cst_48 {dimension_numbers = #tpu.dot_dimension_numbers<[1], [0], [0], [1], [0, 0, 1, 1], [], []>} : vector<64x128xf32>, vector<128x384xf32>, vector<64x384xf32> -> vector<64x384xf32>
    %49 = arith.maximumf %45, %48 : vector<64x384xf32>
    %c0_49 = arith.constant 0 : index
    %c0_50 = arith.constant 0 : index
    %c0_51 = arith.constant 0 : index
    %50 = vector.load %arg6[%c0_49, %c0_50, %c0_51] : memref<2x384x192xf32, #tpu.memory_space<vmem>>, vector<1x384x192xf32>
    %51 = vector.shape_cast %50 : vector<1x384x192xf32> to vector<384x192xf32>
    %cst_52 = arith.constant dense<0.000000e+00> : vector<64x192xf32>
    %52 = tpu.matmul %49, %51, %cst_52 {dimension_numbers = #tpu.dot_dimension_numbers<[1], [0], [0], [1], [0, 0, 1, 1], [], []>} : vector<64x384xf32>, vector<384x192xf32>, vector<64x192xf32> -> vector<64x192xf32>
    %c1_53 = arith.constant 1 : index
    %c0_54 = arith.constant 0 : index
    %c0_55 = arith.constant 0 : index
    %53 = vector.load %arg6[%c1_53, %c0_54, %c0_55] : memref<2x384x192xf32, #tpu.memory_space<vmem>>, vector<1x384x192xf32>
    %54 = vector.shape_cast %53 : vector<1x384x192xf32> to vector<384x192xf32>
    %cst_56 = arith.constant dense<0.000000e+00> : vector<64x192xf32>
    %55 = tpu.matmul %49, %54, %cst_56 {dimension_numbers = #tpu.dot_dimension_numbers<[1], [0], [0], [1], [0, 0, 1, 1], [], []>} : vector<64x384xf32>, vector<384x192xf32>, vector<64x192xf32> -> vector<64x192xf32>
    %56 = arith.maximumf %52, %55 : vector<64x192xf32>
    %cst_57 = arith.constant 0.000000e+00 : f32
    %57 = vector.broadcast %cst_57 : f32 to vector<64x64xf32>
    %c0_58 = arith.constant 0 : index
    %c0_59 = arith.constant 0 : index
    %c0_60 = arith.constant 0 : index
    %58 = vector.load %arg7[%c0_58, %c0_59, %c0_60] : memref<5x64x64xf32, #tpu.memory_space<vmem>>, vector<1x64x64xf32>
    %59 = vector.shape_cast %58 : vector<1x64x64xf32> to vector<64x64xf32>
    %cst_61 = arith.constant dense<0.000000e+00> : vector<64x192xf32>
    %60 = tpu.matmul %59, %56, %cst_61 {dimension_numbers = #tpu.dot_dimension_numbers<[1], [0], [0], [1], [0, 0, 1, 1], [], []>} : vector<64x64xf32>, vector<64x192xf32>, vector<64x192xf32> -> vector<64x192xf32>
    %c0_62 = arith.constant 0 : index
    %c0_63 = arith.constant 0 : index
    %c0_64 = arith.constant 0 : index
    %61 = vector.load %arg8[%c0_62, %c0_63, %c0_64] : memref<5x192x64xf32, #tpu.memory_space<vmem>>, vector<1x192x64xf32>
    %62 = vector.shape_cast %61 : vector<1x192x64xf32> to vector<192x64xf32>
    %cst_65 = arith.constant dense<0.000000e+00> : vector<64x64xf32>
    %63 = tpu.matmul %60, %62, %cst_65 {dimension_numbers = #tpu.dot_dimension_numbers<[1], [0], [0], [1], [0, 0, 1, 1], [], []>} : vector<64x192xf32>, vector<192x64xf32>, vector<64x64xf32> -> vector<64x64xf32>
    %64 = arith.addf %57, %63 : vector<64x64xf32>
    %c1_66 = arith.constant 1 : index
    %c0_67 = arith.constant 0 : index
    %c0_68 = arith.constant 0 : index
    %65 = vector.load %arg7[%c1_66, %c0_67, %c0_68] : memref<5x64x64xf32, #tpu.memory_space<vmem>>, vector<1x64x64xf32>
    %66 = vector.shape_cast %65 : vector<1x64x64xf32> to vector<64x64xf32>
    %cst_69 = arith.constant dense<0.000000e+00> : vector<64x192xf32>
    %67 = tpu.matmul %66, %56, %cst_69 {dimension_numbers = #tpu.dot_dimension_numbers<[1], [0], [0], [1], [0, 0, 1, 1], [], []>} : vector<64x64xf32>, vector<64x192xf32>, vector<64x192xf32> -> vector<64x192xf32>
    %c1_70 = arith.constant 1 : index
    %c0_71 = arith.constant 0 : index
    %c0_72 = arith.constant 0 : index
    %68 = vector.load %arg8[%c1_70, %c0_71, %c0_72] : memref<5x192x64xf32, #tpu.memory_space<vmem>>, vector<1x192x64xf32>
    %69 = vector.shape_cast %68 : vector<1x192x64xf32> to vector<192x64xf32>
    %cst_73 = arith.constant dense<0.000000e+00> : vector<64x64xf32>
    %70 = tpu.matmul %67, %69, %cst_73 {dimension_numbers = #tpu.dot_dimension_numbers<[1], [0], [0], [1], [0, 0, 1, 1], [], []>} : vector<64x192xf32>, vector<192x64xf32>, vector<64x64xf32> -> vector<64x64xf32>
    %71 = arith.addf %64, %70 : vector<64x64xf32>
    %c2_74 = arith.constant 2 : index
    %c0_75 = arith.constant 0 : index
    %c0_76 = arith.constant 0 : index
    %72 = vector.load %arg7[%c2_74, %c0_75, %c0_76] : memref<5x64x64xf32, #tpu.memory_space<vmem>>, vector<1x64x64xf32>
    %73 = vector.shape_cast %72 : vector<1x64x64xf32> to vector<64x64xf32>
    %cst_77 = arith.constant dense<0.000000e+00> : vector<64x192xf32>
    %74 = tpu.matmul %73, %56, %cst_77 {dimension_numbers = #tpu.dot_dimension_numbers<[1], [0], [0], [1], [0, 0, 1, 1], [], []>} : vector<64x64xf32>, vector<64x192xf32>, vector<64x192xf32> -> vector<64x192xf32>
    %c2_78 = arith.constant 2 : index
    %c0_79 = arith.constant 0 : index
    %c0_80 = arith.constant 0 : index
    %75 = vector.load %arg8[%c2_78, %c0_79, %c0_80] : memref<5x192x64xf32, #tpu.memory_space<vmem>>, vector<1x192x64xf32>
    %76 = vector.shape_cast %75 : vector<1x192x64xf32> to vector<192x64xf32>
    %cst_81 = arith.constant dense<0.000000e+00> : vector<64x64xf32>
    %77 = tpu.matmul %74, %76, %cst_81 {dimension_numbers = #tpu.dot_dimension_numbers<[1], [0], [0], [1], [0, 0, 1, 1], [], []>} : vector<64x192xf32>, vector<192x64xf32>, vector<64x64xf32> -> vector<64x64xf32>
    %78 = arith.addf %71, %77 : vector<64x64xf32>
    %c3_82 = arith.constant 3 : index
    %c0_83 = arith.constant 0 : index
    %c0_84 = arith.constant 0 : index
    %79 = vector.load %arg7[%c3_82, %c0_83, %c0_84] : memref<5x64x64xf32, #tpu.memory_space<vmem>>, vector<1x64x64xf32>
    %80 = vector.shape_cast %79 : vector<1x64x64xf32> to vector<64x64xf32>
    %cst_85 = arith.constant dense<0.000000e+00> : vector<64x192xf32>
    %81 = tpu.matmul %80, %56, %cst_85 {dimension_numbers = #tpu.dot_dimension_numbers<[1], [0], [0], [1], [0, 0, 1, 1], [], []>} : vector<64x64xf32>, vector<64x192xf32>, vector<64x192xf32> -> vector<64x192xf32>
    %c3_86 = arith.constant 3 : index
    %c0_87 = arith.constant 0 : index
    %c0_88 = arith.constant 0 : index
    %82 = vector.load %arg8[%c3_86, %c0_87, %c0_88] : memref<5x192x64xf32, #tpu.memory_space<vmem>>, vector<1x192x64xf32>
    %83 = vector.shape_cast %82 : vector<1x192x64xf32> to vector<192x64xf32>
    %cst_89 = arith.constant dense<0.000000e+00> : vector<64x64xf32>
    %84 = tpu.matmul %81, %83, %cst_89 {dimension_numbers = #tpu.dot_dimension_numbers<[1], [0], [0], [1], [0, 0, 1, 1], [], []>} : vector<64x192xf32>, vector<192x64xf32>, vector<64x64xf32> -> vector<64x64xf32>
    %85 = arith.addf %78, %84 : vector<64x64xf32>
    %c4_90 = arith.constant 4 : index
    %c0_91 = arith.constant 0 : index
    %c0_92 = arith.constant 0 : index
    %86 = vector.load %arg7[%c4_90, %c0_91, %c0_92] : memref<5x64x64xf32, #tpu.memory_space<vmem>>, vector<1x64x64xf32>
    %87 = vector.shape_cast %86 : vector<1x64x64xf32> to vector<64x64xf32>
    %cst_93 = arith.constant dense<0.000000e+00> : vector<64x192xf32>
    %88 = tpu.matmul %87, %56, %cst_93 {dimension_numbers = #tpu.dot_dimension_numbers<[1], [0], [0], [1], [0, 0, 1, 1], [], []>} : vector<64x64xf32>, vector<64x192xf32>, vector<64x192xf32> -> vector<64x192xf32>
    %c4_94 = arith.constant 4 : index
    %c0_95 = arith.constant 0 : index
    %c0_96 = arith.constant 0 : index
    %89 = vector.load %arg8[%c4_94, %c0_95, %c0_96] : memref<5x192x64xf32, #tpu.memory_space<vmem>>, vector<1x192x64xf32>
    %90 = vector.shape_cast %89 : vector<1x192x64xf32> to vector<192x64xf32>
    %cst_97 = arith.constant dense<0.000000e+00> : vector<64x64xf32>
    %91 = tpu.matmul %88, %90, %cst_97 {dimension_numbers = #tpu.dot_dimension_numbers<[1], [0], [0], [1], [0, 0, 1, 1], [], []>} : vector<64x192xf32>, vector<192x64xf32>, vector<64x64xf32> -> vector<64x64xf32>
    %92 = arith.addf %85, %91 : vector<64x64xf32>
    %c0_98 = arith.constant 0 : index
    %c0_99 = arith.constant 0 : index
    %93 = vector.load %arg9[%c0_98, %c0_99] : memref<1x64xf32, #tpu.memory_space<vmem>>, vector<1x64xf32>
    %94 = vector.broadcast %93 : vector<1x64xf32> to vector<64x64xf32>
    %95 = arith.addf %92, %94 : vector<64x64xf32>
    %cst_100 = arith.constant 0.000000e+00 : f32
    %96 = vector.broadcast %cst_100 : f32 to vector<64x64xf32>
    %97 = arith.maximumf %95, %96 : vector<64x64xf32>
    %c0_101 = arith.constant 0 : index
    %c0_102 = arith.constant 0 : index
    %c0_103 = arith.constant 0 : index
    %98 = vector.load %arg10[%c0_101, %c0_102, %c0_103] : memref<2x32x64xf32, #tpu.memory_space<vmem>>, vector<1x32x64xf32>
    %99 = vector.shape_cast %98 : vector<1x32x64xf32> to vector<32x64xf32>
    %cst_104 = arith.constant dense<0.000000e+00> : vector<32x64xf32>
    %100 = tpu.matmul %99, %97, %cst_104 {dimension_numbers = #tpu.dot_dimension_numbers<[1], [0], [0], [1], [0, 0, 1, 1], [], []>} : vector<32x64xf32>, vector<64x64xf32>, vector<32x64xf32> -> vector<32x64xf32>
    %c1_105 = arith.constant 1 : index
    %c0_106 = arith.constant 0 : index
    %c0_107 = arith.constant 0 : index
    %101 = vector.load %arg10[%c1_105, %c0_106, %c0_107] : memref<2x32x64xf32, #tpu.memory_space<vmem>>, vector<1x32x64xf32>
    %102 = vector.shape_cast %101 : vector<1x32x64xf32> to vector<32x64xf32>
    %cst_108 = arith.constant dense<0.000000e+00> : vector<32x64xf32>
    %103 = tpu.matmul %102, %97, %cst_108 {dimension_numbers = #tpu.dot_dimension_numbers<[1], [0], [0], [1], [0, 0, 1, 1], [], []>} : vector<32x64xf32>, vector<64x64xf32>, vector<32x64xf32> -> vector<32x64xf32>
    %104 = arith.maximumf %100, %103 : vector<32x64xf32>
    %c0_109 = arith.constant 0 : index
    %c0_110 = arith.constant 0 : index
    %c0_111 = arith.constant 0 : index
    %105 = vector.load %arg11[%c0_109, %c0_110, %c0_111] : memref<2x64x32xf32, #tpu.memory_space<vmem>>, vector<1x64x32xf32>
    %106 = vector.shape_cast %105 : vector<1x64x32xf32> to vector<64x32xf32>
    %cst_112 = arith.constant dense<0.000000e+00> : vector<32x32xf32>
    %107 = tpu.matmul %104, %106, %cst_112 {dimension_numbers = #tpu.dot_dimension_numbers<[1], [0], [0], [1], [0, 0, 1, 1], [], []>} : vector<32x64xf32>, vector<64x32xf32>, vector<32x32xf32> -> vector<32x32xf32>
    %c1_113 = arith.constant 1 : index
    %c0_114 = arith.constant 0 : index
    %c0_115 = arith.constant 0 : index
    %108 = vector.load %arg11[%c1_113, %c0_114, %c0_115] : memref<2x64x32xf32, #tpu.memory_space<vmem>>, vector<1x64x32xf32>
    %109 = vector.shape_cast %108 : vector<1x64x32xf32> to vector<64x32xf32>
    %cst_116 = arith.constant dense<0.000000e+00> : vector<32x32xf32>
    %110 = tpu.matmul %104, %109, %cst_116 {dimension_numbers = #tpu.dot_dimension_numbers<[1], [0], [0], [1], [0, 0, 1, 1], [], []>} : vector<32x64xf32>, vector<64x32xf32>, vector<32x32xf32> -> vector<32x32xf32>
    %111 = arith.maximumf %107, %110 : vector<32x32xf32>
    %c0_117 = arith.constant 0 : index
    %c0_118 = arith.constant 0 : index
    %112 = vector.load %arg12[%c0_117, %c0_118] : memref<32x1024xf32, #tpu.memory_space<vmem>>, vector<32x1024xf32>
    %cst_119 = arith.constant dense<0.000000e+00> : vector<32x1024xf32>
    %113 = tpu.matmul %111, %112, %cst_119 {dimension_numbers = #tpu.dot_dimension_numbers<[1], [0], [0], [1], [0, 0, 1, 1], [], []>} : vector<32x32xf32>, vector<32x1024xf32>, vector<32x1024xf32> -> vector<32x1024xf32>
    %c0_120 = arith.constant 0 : index
    %c0_121 = arith.constant 0 : index
    %114 = vector.load %arg13[%c0_120, %c0_121] : memref<32x1024xf32, #tpu.memory_space<vmem>>, vector<32x1024xf32>
    %115 = arith.mulf %113, %114 : vector<32x1024xf32>
    %cst_122 = arith.constant dense<0.000000e+00> : vector<1024xf32>
    %116 = vector.multi_reduction <add>, %115, %cst_122 [0] : vector<32x1024xf32> to vector<1024xf32>
    %117 = vector.shape_cast %116 : vector<1024xf32> to vector<1x1024xf32>
    %cst_123 = arith.constant 0.000000e+00 : f32
    %118 = vector.broadcast %cst_123 : f32 to vector<1x1024xf32>
    %119 = arith.maximumf %117, %118 : vector<1x1024xf32>
    %120 = arith.truncf %119 : vector<1x1024xf32> to vector<1x1024xbf16>
    %c0_124 = arith.constant 0 : index
    %c0_125 = arith.constant 0 : index
    %121 = vector.load %arg14[%c0_124, %c0_125] : memref<1024x512xbf16, #tpu.memory_space<vmem>>, vector<1024x512xbf16>
    %cst_126 = arith.constant dense<0.000000e+00> : vector<1x512xf32>
    %122 = tpu.matmul %120, %121, %cst_126 {dimension_numbers = #tpu.dot_dimension_numbers<[1], [0], [0], [1], [0, 0, 1, 1], [], []>} : vector<1x1024xbf16>, vector<1024x512xbf16>, vector<1x512xf32> -> vector<1x512xf32>
    %c0_127 = arith.constant 0 : index
    %c0_128 = arith.constant 0 : index
    %123 = vector.load %arg15[%c0_127, %c0_128] : memref<1x512xf32, #tpu.memory_space<vmem>>, vector<1x512xf32>
    %124 = arith.addf %122, %123 : vector<1x512xf32>
    %cst_129 = arith.constant 0.000000e+00 : f32
    %125 = vector.broadcast %cst_129 : f32 to vector<1x512xf32>
    %126 = arith.maximumf %124, %125 : vector<1x512xf32>
    %127 = arith.truncf %126 : vector<1x512xf32> to vector<1x512xbf16>
    %c0_130 = arith.constant 0 : index
    %c0_131 = arith.constant 0 : index
    %128 = vector.load %arg16[%c0_130, %c0_131] : memref<512x256xbf16, #tpu.memory_space<vmem>>, vector<512x256xbf16>
    %cst_132 = arith.constant dense<0.000000e+00> : vector<1x256xf32>
    %129 = tpu.matmul %127, %128, %cst_132 {dimension_numbers = #tpu.dot_dimension_numbers<[1], [0], [0], [1], [0, 0, 1, 1], [], []>} : vector<1x512xbf16>, vector<512x256xbf16>, vector<1x256xf32> -> vector<1x256xf32>
    %c0_133 = arith.constant 0 : index
    %c0_134 = arith.constant 0 : index
    %130 = vector.load %arg17[%c0_133, %c0_134] : memref<1x256xf32, #tpu.memory_space<vmem>>, vector<1x256xf32>
    %131 = arith.addf %129, %130 : vector<1x256xf32>
    %132 = arith.truncf %131 : vector<1x256xf32> to vector<1x256xbf16>
    %c0_135 = arith.constant 0 : index
    %c0_136 = arith.constant 0 : index
    %133 = vector.load %arg18[%c0_135, %c0_136] : memref<256x128xbf16, #tpu.memory_space<vmem>>, vector<256x128xbf16>
    %cst_137 = arith.constant dense<0.000000e+00> : vector<1x128xf32>
    %134 = tpu.matmul %132, %133, %cst_137 {dimension_numbers = #tpu.dot_dimension_numbers<[1], [0], [0], [1], [0, 0, 1, 1], [], []>} : vector<1x256xbf16>, vector<256x128xbf16>, vector<1x128xf32> -> vector<1x128xf32>
    %c0_138 = arith.constant 0 : index
    %c0_139 = arith.constant 0 : index
    %135 = vector.load %arg19[%c0_138, %c0_139] : memref<1x128xf32, #tpu.memory_space<vmem>>, vector<1x128xf32>
    %136 = arith.addf %134, %135 : vector<1x128xf32>
    %c0_140 = arith.constant 0 : index
    %c0_141 = arith.constant 0 : index
    %c0_142 = arith.constant 0 : index
    %137 = vector.load %arg20[%c0_140, %c0_141, %c0_142] : memref<1x1x128xf32, #tpu.memory_space<vmem>>, vector<1x1x128xf32>
    %138 = vector.shape_cast %137 : vector<1x1x128xf32> to vector<1x128xf32>
    %139 = vector.shape_cast %136 : vector<1x128xf32> to vector<1x1x128xf32>
    tpu.vector_store %arg20[%c0_140, %c0_141, %c0_142], %139 {strides = array<i32>} : memref<1x1x128xf32, #tpu.memory_space<vmem>>, vector<1x1x128xf32>,
    return
  }
  func.func @transform_0(%arg0: i32) -> (i32, i32, i32) {
    %c0_i32 = arith.constant 0 : i32
    %c0_i32_0 = arith.constant 0 : i32
    %c0_i32_1 = arith.constant 0 : i32
    return %arg0, %c0_i32, %c0_i32_0 : i32, i32, i32
  }
  func.func @transform_1(%arg0: i32) -> (i32, i32, i32) {
    %c0_i32 = arith.constant 0 : i32
    %c0_i32_0 = arith.constant 0 : i32
    %c0_i32_1 = arith.constant 0 : i32
    %c0_i32_2 = arith.constant 0 : i32
    return %c0_i32, %c0_i32_0, %c0_i32_1 : i32, i32, i32
  }
  func.func @transform_2(%arg0: i32) -> (i32, i32, i32) {
    %c0_i32 = arith.constant 0 : i32
    %c0_i32_0 = arith.constant 0 : i32
    %c0_i32_1 = arith.constant 0 : i32
    %c0_i32_2 = arith.constant 0 : i32
    return %c0_i32, %c0_i32_0, %c0_i32_1 : i32, i32, i32
  }
  func.func @transform_3(%arg0: i32) -> (i32, i32) {
    %c0_i32 = arith.constant 0 : i32
    %c0_i32_0 = arith.constant 0 : i32
    %c0_i32_1 = arith.constant 0 : i32
    return %c0_i32, %c0_i32_0 : i32, i32
  }
  func.func @transform_4(%arg0: i32) -> (i32, i32, i32) {
    %c0_i32 = arith.constant 0 : i32
    %c0_i32_0 = arith.constant 0 : i32
    %c0_i32_1 = arith.constant 0 : i32
    %c0_i32_2 = arith.constant 0 : i32
    return %c0_i32, %c0_i32_0, %c0_i32_1 : i32, i32, i32
  }
  func.func @transform_5(%arg0: i32) -> (i32, i32, i32) {
    %c0_i32 = arith.constant 0 : i32
    %c0_i32_0 = arith.constant 0 : i32
    %c0_i32_1 = arith.constant 0 : i32
    %c0_i32_2 = arith.constant 0 : i32
    return %c0_i32, %c0_i32_0, %c0_i32_1 : i32, i32, i32
  }
  func.func @transform_6(%arg0: i32) -> (i32, i32, i32) {
    %c0_i32 = arith.constant 0 : i32
    %c0_i32_0 = arith.constant 0 : i32
    %c0_i32_1 = arith.constant 0 : i32
    %c0_i32_2 = arith.constant 0 : i32
    return %c0_i32, %c0_i32_0, %c0_i32_1 : i32, i32, i32
  }
  func.func @transform_7(%arg0: i32) -> (i32, i32, i32) {
    %c0_i32 = arith.constant 0 : i32
    %c0_i32_0 = arith.constant 0 : i32
    %c0_i32_1 = arith.constant 0 : i32
    %c0_i32_2 = arith.constant 0 : i32
    return %c0_i32, %c0_i32_0, %c0_i32_1 : i32, i32, i32
  }
  func.func @transform_8(%arg0: i32) -> (i32, i32) {
    %c0_i32 = arith.constant 0 : i32
    %c0_i32_0 = arith.constant 0 : i32
    %c0_i32_1 = arith.constant 0 : i32
    return %c0_i32, %c0_i32_0 : i32, i32
  }
  func.func @transform_9(%arg0: i32) -> (i32, i32, i32) {
    %c0_i32 = arith.constant 0 : i32
    %c0_i32_0 = arith.constant 0 : i32
    %c0_i32_1 = arith.constant 0 : i32
    %c0_i32_2 = arith.constant 0 : i32
    return %c0_i32, %c0_i32_0, %c0_i32_1 : i32, i32, i32
  }
  func.func @transform_10(%arg0: i32) -> (i32, i32, i32) {
    %c0_i32 = arith.constant 0 : i32
    %c0_i32_0 = arith.constant 0 : i32
    %c0_i32_1 = arith.constant 0 : i32
    %c0_i32_2 = arith.constant 0 : i32
    return %c0_i32, %c0_i32_0, %c0_i32_1 : i32, i32, i32
  }
  func.func @transform_11(%arg0: i32) -> (i32, i32) {
    %c0_i32 = arith.constant 0 : i32
    %c0_i32_0 = arith.constant 0 : i32
    %c0_i32_1 = arith.constant 0 : i32
    return %c0_i32, %c0_i32_0 : i32, i32
  }
  func.func @transform_12(%arg0: i32) -> (i32, i32) {
    %c0_i32 = arith.constant 0 : i32
    %c0_i32_0 = arith.constant 0 : i32
    %c0_i32_1 = arith.constant 0 : i32
    return %c0_i32, %c0_i32_0 : i32, i32
  }
  func.func @transform_13(%arg0: i32) -> (i32, i32) {
    %c0_i32 = arith.constant 0 : i32
    %c0_i32_0 = arith.constant 0 : i32
    %c0_i32_1 = arith.constant 0 : i32
    return %c0_i32, %c0_i32_0 : i32, i32
  }
  func.func @transform_14(%arg0: i32) -> (i32, i32) {
    %c0_i32 = arith.constant 0 : i32
    %c0_i32_0 = arith.constant 0 : i32
    %c0_i32_1 = arith.constant 0 : i32
    return %c0_i32, %c0_i32_0 : i32, i32
  }
  func.func @transform_15(%arg0: i32) -> (i32, i32) {
    %c0_i32 = arith.constant 0 : i32
    %c0_i32_0 = arith.constant 0 : i32
    %c0_i32_1 = arith.constant 0 : i32
    return %c0_i32, %c0_i32_0 : i32, i32
  }
  func.func @transform_16(%arg0: i32) -> (i32, i32) {
    %c0_i32 = arith.constant 0 : i32
    %c0_i32_0 = arith.constant 0 : i32
    %c0_i32_1 = arith.constant 0 : i32
    return %c0_i32, %c0_i32_0 : i32, i32
  }
  func.func @transform_17(%arg0: i32) -> (i32, i32) {
    %c0_i32 = arith.constant 0 : i32
    %c0_i32_0 = arith.constant 0 : i32
    %c0_i32_1 = arith.constant 0 : i32
    return %c0_i32, %c0_i32_0 : i32, i32
  }
  func.func @transform_18(%arg0: i32) -> (i32, i32) {
    %c0_i32 = arith.constant 0 : i32
    %c0_i32_0 = arith.constant 0 : i32
    %c0_i32_1 = arith.constant 0 : i32
    return %c0_i32, %c0_i32_0 : i32, i32
  }
  func.func @transform_19(%arg0: i32) -> (i32, i32, i32) {
    %c0_i32 = arith.constant 0 : i32
    %c0_i32_0 = arith.constant 0 : i32
    %c0_i32_1 = arith.constant 0 : i32
    return %arg0, %c0_i32, %c0_i32_0 : i32, i32, i32
  }
}

</mosaic_0001>

<bundles_post_ra>
// kernel: face_attr_forward.1
= control target key start
LH: loop header
LB: loop body
LE: loop exit
PB: predicated region body
PF: predicated region fallthrough
CT: control target
= control target key end

     0   :  { %s18355_s0 = inlined_call_operand.vmem [shape: f32[2,128,128], index: 0, kind: input, shape index: {}]   ;;  %s18356_s1 = inlined_call_operand.vmem [shape: f32[5,128,128], index: 1, kind: input, shape index: {}]   ;;  %s18357_s2 = inlined_call_operand.vmem [shape: f32[5,128,384], index: 2, kind: input, shape index: {}]   ;;  %s18358_s3 = inlined_call_operand.vmem [shape: f32[1,384], index: 3, kind: input, shape index: {}]   ;;  %s18359_s4 = inlined_call_operand.vmem [shape: f32[2,64,128], index: 4, kind: input, shape index: {}]   ;;  %s18360_s5 = inlined_call_operand.vmem [shape: f32[2,384,192], index: 5, kind: input, shape index: {}]   ;;  %s18361_s6 = inlined_call_operand.vmem [shape: f32[5,64,64], index: 6, kind: input, shape index: {}]   ;;  %s18362_s7 = inlined_call_operand.vmem [shape: f32[5,192,64], index: 7, kind: input, shape index: {}]   ;;  %s18363_s8 = inlined_call_operand.vmem [shape: f32[1,64], index: 8, kind: input, shape index: {}]   ;;  %s18364_s9 = inlined_call_operand.vmem [shape: f32[2,32,64], index: 9, kind: input, shape index: {}]   ;;  %s18365_s10 = inlined_call_operand.vmem [shape: f32[2,64,32], index: 10, kind: input, shape index: {}]   ;;  %s18366_s11 = inlined_call_operand.vmem [shape: f32[32,1024], index: 11, kind: input, shape index: {}]   ;;  %s18367_s12 = inlined_call_operand.vmem [shape: f32[32,1024], index: 12, kind: input, shape index: {}]   ;;  %s18368_s13 = inlined_call_operand.vmem [shape: bf16[1024,512], index: 13, kind: input, shape index: {}]   ;;  %s18369_s14 = inlined_call_operand.vmem [shape: f32[1,512], index: 14, kind: input, shape index: {}]   ;;  %s18370_s15 = inlined_call_operand.vmem [shape: bf16[512,256], index: 15, kind: input, shape index: {}]   ;;  %s18371_s16 = inlined_call_operand.vmem [shape: f32[1,256], index: 16, kind: input, shape index: {}]   ;;  %s18372_s17 = inlined_call_operand.vmem [shape: bf16[256,128], index: 17, kind: input, shape index: {}]   ;;  %s18373_s18 = inlined_call_operand.vmem [shape: f32[1,128], index: 18, kind: input, shape index: {}]   ;;  %s18374_s19 = inlined_call_operand.hbm [shape: f32[2,1,128], index: 19, kind: output, shape index: {}]  }
   0x1   :  { %18386 = sst [smem:[#allocation12_spill]] %s18355_s0 }
   0x2   :  { %18387 = sst [smem:[#allocation13_spill]] %s18356_s1 }
   0x3   :  { %18388 = sst [smem:[#allocation14_spill]] %s18357_s2 }
   0x4   :  { %18389 = sst [smem:[#allocation15_spill]] %s18358_s3 }
   0x5   :  { %18390 = sst [smem:[#allocation16_spill]] %s18359_s4 }
   0x6   :  { %18391 = sst [smem:[#allocation17_spill]] %s18374_s19 }
   0x7   :  { %24 = vsyncpa [#allocation3], 0 }
   0x8   :  { %26 = vsyncpa [#allocation3 + $0x1], 0  ;;  %s13971_s0 = smov 0   ;;  %s13973_s30 = smov 0  }
   0x9   :  { %s13975_s20 = smov 0   ;;  %s13977_s21 = smov 0  }
   0xa LB: > { %18392 = sst [smem:[#allocation5_spill]] %s13854_s0  ;;  %s13992_s1 = sadd.s32 4294967295, %s13866_s21   ;;  %s13866_s21 = sphi %s13977_s21, %s18412_s21   ;;  %s13862_s20 = sphi %s13975_s20, %s18414_s20   ;;  %s13858_s30 = sphi %s13973_s30, %s18416_s30   ;;  %s13854_s0 = sphi %s13971_s0, %s18415_s0  }
   0xb   : > { %18393 = sst [smem:[#allocation6_spill]] %s13862_s20  ;;  %s9716_s22 = sadd.s32 4294967294, %s13866_s21  }
   0xc   : > { %18394 = sst [smem:[#allocation7_spill]] %s13866_s21  ;;  %s13996_s2 = sadd.s32 1, %s13866_s21  }
   0xd   : > { %18395 = sst [smem:[#allocation8_spill]] %s13996_s2  ;;  %s443_s23 = sadd.s32 1, %s13862_s20 }
   0xe   : > { %s440_s24 = ssub.s32 %s13866_s21, %s13996_s2  ;;  %p453_p0 = scmp.ne.s32.totalorder %s13862_s20, %s13858_s30 }
   0xf   : > { %p441_p1 = scmp.eq.s32.totalorder %s440_s24, 0  ;;  %p454_p2 = scmp.eq.s32.totalorder %s13992_s1, 1 }
  0x10   : > { %p459_p3 = scmp.ne.s32.totalorder %s13858_s30, %s13854_s0  ;;  %p460_p4 = scmp.eq.s32.totalorder %s9716_s22, 1 }
  0x11   : > { %s14007_s25 = scalar_select %p441_p1, %s13862_s20, %s443_s23  }
  0x12   : > { %p14009_p5 = por %p454_p2, %p453_p0  ;;  %p14013_p6 = por %p460_p4, %p459_p3 }
  0x13   : > { %18396 = sst [smem:[#allocation9_spill]] %s14007_s25  ;;  %p9719_p7 = scmp.ge.s32.totalorder %s13866_s21, 1 }
  0x14   : > { %s18397_s3 = scalar_select %p14009_p5, 1, 0 }
  0x15   : > { %s18399_s26 = scalar_select %p14013_p6, 1, 0 }
  0x16   : > { %18398 = sst [smem:[#allocation10_spill]] %s18397_s3  ;;  %p540_p8 = scmp.lt.s32.totalorder %s13866_s21, 3 }
  0x17   : > { %18400 = sst [smem:[#allocation11_spill]] %s18399_s26 }
  0x18   : > { %p541_p9 = pnand %p9719_p7, %p540_p8 }
  0x19   : > { %p595_p10 = scmp.lt.s32.totalorder (!%p541_p9), %s13992_s1, 1  ;;  %s18401_s29 = sld [smem:[#allocation13_spill]] (!%p541_p9)  ;;  %vm4603_vm0 = vcmask (!%p541_p9), 523264   ;;  %vm6583_vm1 = vcmask (!%p541_p9), 261120  }
  0x1a   : > { %544 = sbr.rel (%p541_p9) target bundleno = 4288 (0x10c0), region = 96  ;;  %s18402_s20 = sld [smem:[#allocation12_spill]] (!%p541_p9) }
  0x1b   : > { %s18403_s0 = sld [smem:[#allocation14_spill]] (!%p541_p9)  ;;  %s18405_s3 = sld [smem:[#allocation15_spill]] (!%p541_p9) }
  0x1c   : > { %s18406_s4 = sld [smem:[#allocation16_spill]] (!%p541_p9)  ;;  %s10671_s27 = sshll.u32 (!%p541_p9), %s13992_s1, 4 }
  0x1d   : > { %s18408_s28 = sld [smem:[#allocation17_spill]] (!%p541_p9) }
  0x1f   : > { %v617_v0 = vld [vmem:[%s18401_s29] sm:$0xff] (!%p541_p9)  ;;  %v618_v25 = vld [vmem:[%s18401_s29 + $0x8] sm:$0xff] (!%p541_p9)  ;;  %v619_v26 = vld [vmem:[%s18401_s29 + $0x10] sm:$0xff] (!%p541_p9) }
  0x20   : > { %11145 = vmatprep.mubr.f32.mxu0 (!%p541_p9), %v617_v0  ;;  %v620_v27 = vld [vmem:[%s18401_s29 + $0x18] sm:$0xff] (!%p541_p9)  ;;  %v621_v28 = vld [vmem:[%s18401_s29 + $0x20] sm:$0xff] (!%p541_p9)  ;;  %v622_v29 = vld [vmem:[%s18401_s29 + $0x28] sm:$0xff] (!%p541_p9) }
  0x21   : > { %s596_s22 = scalar_select %p595_p10, %s13992_s1, 1  ;;  %v623_v30 = vld [vmem:[%s18401_s29 + $0x30] sm:$0xff]  ;;  %v624_v31 = vld [vmem:[%s18401_s29 + $0x38] sm:$0xff]  ;;  %v625_v32 = vld [vmem:[%s18401_s29 + $0x40] sm:$0xff] }
  0x22   : > { %v626_v33 = vld [vmem:[%s18401_s29 + $0x48] sm:$0xff]  ;;  %v627_v34 = vld [vmem:[%s18401_s29 + $0x50] sm:$0xff]  ;;  %v628_v35 = vld [vmem:[%s18401_s29 + $0x58] sm:$0xff]  ;;  %s18404_s26 = smov %s18403_s0  ;;  %s13870_s1 = smov [#allocation2]  }
  0x23   : > { %s10674_s23 = sshll.u32 %s596_s22, 7  ;;  %v629_v36 = vld [vmem:[%s18401_s29 + $0x60] sm:$0xff]  ;;  %v630_v37 = vld [vmem:[%s18401_s29 + $0x68] sm:$0xff]  ;;  %v631_v38 = vld [vmem:[%s18401_s29 + $0x70] sm:$0xff]  ;;  %s18313_s22 = scalar_lea.hbm %s18408_s28, %s10671_s27 }
  0x24   : > { %s14027_s2 = scalar_lea.vmem %s18402_s20, %s10674_s23  ;;  %v632_v39 = vld [vmem:[%s18401_s29 + $0x78] sm:$0xff]  ;;  %v9722_v40 = vld [vmem:[%s18401_s29 + $0x80] sm:$0xff]  ;;  %v9723_v41 = vld [vmem:[%s18401_s29 + $0x88] sm:$0xff]  ;;  %s593_s23 = sand.u32 1, %s13858_s30  }
  0x25   : > { %v601_v1 = vld [vmem:[%s14027_s2] sm:$0xff]  ;;  %v602_v2 = vld [vmem:[%s14027_s2 + $0x8] sm:$0xff]  ;;  %v603_v3 = vld [vmem:[%s14027_s2 + $0x10] sm:$0xff]  ;;  %s9649_s19 = scalar_lea.sflag [#allocation3], %s593_s23  ;;  %s13808_s20 = sshll.u32 %s13870_s1, 4  ;;  %s13809_s20 = int_to_ptr.vmem [resolvable:$false] %s13808_s20 }
  0x26   : > { %v14032_v4 = vpack.c.bf16 %v602_v2, %v601_v1  ;;  %v604_v5 = vld [vmem:[%s14027_s2 + $0x18] sm:$0xff]  ;;  %v605_v7 = vld [vmem:[%s14027_s2 + $0x20] sm:$0xff]  ;;  %v606_v8 = vld [vmem:[%s14027_s2 + $0x28] sm:$0xff] }
  0x27   : > { %v14035_v6 = vpack.c.bf16 %v604_v5, %v603_v3  ;;  %v14042_v9 = vpack.c.bf16 %v606_v8, %v605_v7  ;;  %v607_v10 = vld [vmem:[%s14027_s2 + $0x30] sm:$0xff]  ;;  %v608_v11 = vld [vmem:[%s14027_s2 + $0x38] sm:$0xff]  ;;  %v609_v13 = vld [vmem:[%s14027_s2 + $0x40] sm:$0xff] }
  0x28   : > { %11850 = vmatprep.subr.bf16.mxu0 %v14032_v4  ;;  %v14048_v12 = vpack.c.bf16 %v608_v11, %v607_v10  ;;  %v610_v14 = vld [vmem:[%s14027_s2 + $0x48] sm:$0xff]  ;;  %v611_v15 = vld [vmem:[%s14027_s2 + $0x50] sm:$0xff]  ;;  %v612_v16 = vld [vmem:[%s14027_s2 + $0x58] sm:$0xff] }
  0x29   : > { %11852 = vmatpush3.bf16.msra.mxu0 %v14032_v4  ;;  %v14056_v17 = vpack.c.bf16 %v610_v14, %v609_v13  ;;  %v613_v18 = vld [vmem:[%s14027_s2 + $0x60] sm:$0xff]  ;;  %v614_v19 = vld [vmem:[%s14027_s2 + $0x68] sm:$0xff]  ;;  %v14062_v20 = vpack.c.bf16 %v612_v16, %v611_v15  ;;  %v615_v21 = vld [vmem:[%s14027_s2 + $0x70] sm:$0xff] }
  0x2a   : > { %11854 = vmatprep.subr.bf16.mxu0 %v14035_v6  ;;  %v616_v22 = vld [vmem:[%s14027_s2 + $0x78] sm:$0xff]  ;;  %v14068_v23 = vpack.c.bf16 %v614_v19, %v613_v18  ;;  %v9724_v42 = vld [vmem:[%s18401_s29 + $0x90] sm:$0xff]  ;;  %v9726_v44 = vld [vmem:[%s18401_s29 + $0xa0] sm:$0xff] }
  0x2b   : > { %v14072_v24 = vpack.c.bf16 %v616_v22, %v615_v21  ;;  %v9725_v43 = vld [vmem:[%s18401_s29 + $0x98] sm:$0xff]  ;;  %v9727_v45 = vld [vmem:[%s18401_s29 + $0xa8] sm:$0xff]  ;;  %v9728_v46 = vld [vmem:[%s18401_s29 + $0xb0] sm:$0xff] }
  0x2c   : > { %v9729_v47 = vld [vmem:[%s18401_s29 + $0xb8] sm:$0xff]  ;;  %v9730_v48 = vld [vmem:[%s18401_s29 + $0xc0] sm:$0xff]  ;;  %v9731_v49 = vld [vmem:[%s18401_s29 + $0xc8] sm:$0xff] }
  0x2d   : > { %11856 = vmatpush3.bf16.msra.mxu0 %v14035_v6  ;;  %v9732_v50 = vld [vmem:[%s18401_s29 + $0xd0] sm:$0xff]  ;;  %v9733_v51 = vld [vmem:[%s18401_s29 + $0xd8] sm:$0xff]  ;;  %v9734_v52 = vld [vmem:[%s18401_s29 + $0xe0] sm:$0xff] }
  0x2e   : > { %11858 = vmatprep.subr.bf16.mxu0 %v14042_v9  ;;  %v9735_v53 = vld [vmem:[%s18401_s29 + $0xe8] sm:$0xff]  ;;  %v9736_v54 = vld [vmem:[%s18401_s29 + $0xf0] sm:$0xff]  ;;  %v9737_v55 = vld [vmem:[%s18401_s29 + $0xf8] sm:$0xff] }
  0x2f   : > { %v9739_v56 = vld [vmem:[%s18403_s0 + $0x188] sm:$0xff]  ;;  %v9742_v57 = vld [vmem:[%s18404_s26 + $0x1a0] sm:$0xff]  ;;  %v9741_v60 = vld [vmem:[%s18404_s26 + $0x198] sm:$0xff] }
  0x30   : > { %v11913_v58 = vpack.c.bf16 %v9742_v57, %v9739_v56  ;;  %v9738_v59 = vld [vmem:[%s18404_s26 + $0x180] sm:$0xff]  ;;  %v9740_v61 = vld [vmem:[%s18404_s26 + $0x190] sm:$0xff]  ;;  %v9743_v63 = vld [vmem:[%s18404_s26 + $0x1a8] sm:$0xff] }
  0x31   : > { %11860 = vmatpush3.bf16.msra.mxu0 %v14042_v9  ;;  %v11915_v62 = vpack.c.bf16 %v9741_v60, %v9738_v59  ;;  %v11945_v0 = vpack.c.bf16 %v9743_v63, %v9740_v61  ;;  %v9745_v1 = vld [vmem:[%s18404_s26 + $0x1b8] sm:$0xff]  ;;  %v9748_v2 = vld [vmem:[%s18404_s26 + $0x1d0] sm:$0xff]  ;;  %v9747_v7 = vld [vmem:[%s18404_s26 + $0x1c8] sm:$0xff] }
  0x32   : > { %11862 = vmatprep.subr.bf16.mxu0 %v14048_v12  ;;  %v11917_v3 = vpack.c.bf16 %v9748_v2, %v9745_v1  ;;  %v9744_v5 = vld [vmem:[%s18404_s26 + $0x1b0] sm:$0xff]  ;;  %v9746_v8 = vld [vmem:[%s18404_s26 + $0x1c0] sm:$0xff]  ;;  %v9749_v11 = vld [vmem:[%s18404_s26 + $0x1d8] sm:$0xff] }
  0x33   : > { %11946 = vmatprep.subr.bf16.mxu1 %v11945_v0  ;;  %v11919_v10 = vpack.c.bf16 %v9747_v7, %v9744_v5  ;;  %v11949_v13 = vpack.c.bf16 %v9749_v11, %v9746_v8  ;;  %v9751_v14 = vld [vmem:[%s18404_s26 + $0x1e8] sm:$0xff]  ;;  %v9754_v15 = vld [vmem:[%s18404_s26 + $0x200] sm:$0xff]  ;;  %v9753_v19 = vld [vmem:[%s18404_s26 + $0x1f8] sm:$0xff] }
  0x34   : > { %11948 = vmatpush3.bf16.msra.mxu1 %v11945_v0  ;;  %v11921_v16 = vpack.c.bf16 %v9754_v15, %v9751_v14  ;;  %v9750_v18 = vld [vmem:[%s18404_s26 + $0x1e0] sm:$0xff]  ;;  %v9752_v21 = vld [vmem:[%s18404_s26 + $0x1f0] sm:$0xff]  ;;  %v9779_v61 = vld [vmem:[%s18404_s26 + $0x2c8] sm:$0xff]  ;;  %v13868_v14 = vmov 0.0  }
  0x35   : > { %11864 = vmatpush3.bf16.msra.mxu0 %v14048_v12  ;;  %11950 = vmatprep.subr.bf16.mxu1 %v11949_v13  ;;  %v11923_v22 = vpack.c.bf16 %v9753_v19, %v9750_v18  ;;  %v9774_v57 = vld [vmem:[%s18404_s26 + $0x2a0] sm:$0xff]  ;;  %v9776_v59 = vld [vmem:[%s18404_s26 + $0x2b0] sm:$0xff]  ;;  %v9781_v63 = vld [vmem:[%s18404_s26 + $0x2d8] sm:$0xff] }
  0x36   : > { %11866 = vmatprep.subr.bf16.mxu0 %v14056_v17  ;;  %v9784_v0 = vld [vmem:[%s18404_s26 + $0x2f0] sm:$0xff]  ;;  %v9782_v5 = vld [vmem:[%s18404_s26 + $0x2e0] sm:$0xff]  ;;  %v9785_v8 = vld [vmem:[%s18404_s26 + $0x2f8] sm:$0xff] }
  0x37   : > { %v11941_v1 = vpack.c.bf16 %v9784_v0, %v9781_v63  ;;  %v9780_v2 = vld [vmem:[%s18404_s26 + $0x2d0] sm:$0xff]  ;;  %v782_v18 = vld [vmem:[%s18404_s26 + $0x20] sm:$0xff]  ;;  %v793_v63 = vld [vmem:[%s18404_s26 + $0x78] sm:$0xff] }
  0x38   : > { %11952 = vmatpush3.bf16.msra.mxu1 %v11949_v13  ;;  %v780_v11 = vld [vmem:[%s18404_s26 + $0x10] sm:$0xff]  ;;  %v783_v13 = vld [vmem:[%s18404_s26 + $0x28] sm:$0xff]  ;;  %v801_v0 = vld [vmem:[%s18404_s26 + $0xb8] sm:$0xff] }
  0x39   : > { %11868 = vmatpush3.bf16.msra.mxu0 %v14056_v17  ;;  %v12009_v15 = vpack.c.bf16 %v783_v13, %v780_v11  ;;  %v796_v13 = vld [vmem:[%s18404_s26 + $0x90] sm:$0xff] }
  0x3a   : > { %11870 = vmatprep.subr.bf16.mxu0 %v14062_v20 }
  0x3d   : > { %11872 = vmatpush3.bf16.msra.mxu0 %v14062_v20 }
  0x3e   : > { %11874 = vmatprep.subr.bf16.mxu0 %v14068_v23 }
  0x41   : > { %11876 = vmatpush3.bf16.msra.mxu0 %v14068_v23 }
  0x42   : > { %11878 = vmatprep.subr.bf16.mxu0 %v14072_v24 }
  0x45   : > { %11880 = vmatpush3.bf16.msra.mxu0 %v14072_v24 }
  0x46   : > { %11882 = vmatprep.subr.bf16.mxu0 %v14032_v4 }
  0x48   : > { %11146 = vmatmul.mubr.f32.vlgmr.msra.gmra.mrb[0].mxu0 %v618_v25  ;;  %v9755_v25 = vld [vmem:[%s18404_s26 + $0x208] sm:$0xff] }
  0x49   : > { %11884 = vmatpush3.bf16.msra.mxu0 %v14032_v4  ;;  %11148 = vmatprep.mubr.f32.mxu0 %v619_v26  ;;  %v11953_v26 = vpack.c.bf16 %v9755_v25, %v9752_v21 }
  0x4a   : > { %11886 = vmatprep.subr.bf16.mxu0 %v14035_v6 }
  0x4b   : > { %11954 = vmatprep.subr.bf16.mxu1 %v11953_v26 }
  0x4c   : > { %11149 = vmatmul.mubr.f32.gmra.mrb[2].mxu0 %v620_v27  ;;  %v9757_v27 = vld [vmem:[%s18404_s26 + $0x218] sm:$0xff]  ;;  %11956 = vmatpush3.bf16.msra.mxu1 %v11953_v26 }
  0x4d   : > { %11888 = vmatpush3.bf16.msra.mxu0 %v14035_v6  ;;  %11151 = vmatprep.mubr.f32.mxu0 %v621_v28  ;;  %v9760_v28 = vld [vmem:[%s18404_s26 + $0x230] sm:$0xff] }
  0x4e   : > { %11890 = vmatprep.subr.bf16.mxu0 %v14042_v9 }
  0x50   : > { %11152 = vmatmul.mubr.f32.gmra.mrb[4].mxu0 %v622_v29  ;;  %v11925_v29 = vpack.c.bf16 %v9760_v28, %v9757_v27 }
  0x51   : > { %11892 = vmatpush3.bf16.msra.mxu0 %v14042_v9  ;;  %11154 = vmatprep.mubr.f32.mxu0 %v623_v30  ;;  %v9756_v30 = vld [vmem:[%s18404_s26 + $0x210] sm:$0xff] }
  0x52   : > { %11894 = vmatprep.subr.bf16.mxu0 %v14048_v12 }
  0x54   : > { %11155 = vmatmul.mubr.f32.gmra.mrb[6].mxu0 %v624_v31  ;;  %v9759_v31 = vld [vmem:[%s18404_s26 + $0x228] sm:$0xff] }
  0x55   : > { %11896 = vmatpush3.bf16.msra.mxu0 %v14048_v12  ;;  %11157 = vmatprep.mubr.f32.mxu0 %v625_v32  ;;  %v9758_v32 = vld [vmem:[%s18404_s26 + $0x220] sm:$0xff] }
  0x56   : > { %11898 = vmatprep.subr.bf16.mxu0 %v14056_v17 }
  0x58   : > { %11158 = vmatmul.mubr.f32.gmra.mrb[8].mxu0 %v626_v33  ;;  %v11927_v33 = vpack.c.bf16 %v9759_v31, %v9756_v30 }
  0x59   : > { %11900 = vmatpush3.bf16.msra.mxu0 %v14056_v17  ;;  %11160 = vmatprep.mubr.f32.mxu0 %v627_v34  ;;  %v9761_v34 = vld [vmem:[%s18404_s26 + $0x238] sm:$0xff] }
  0x5a   : > { %11902 = vmatprep.subr.bf16.mxu0 %v14062_v20 }
  0x5c   : > { %11161 = vmatmul.mubr.f32.gmra.mrb[10].mxu0 %v628_v35  ;;  %v11957_v35 = vpack.c.bf16 %v9761_v34, %v9758_v32 }
  0x5d   : > { %11904 = vmatpush3.bf16.msra.mxu0 %v14062_v20  ;;  %11163 = vmatprep.mubr.f32.mxu0 %v629_v36  ;;  %v9763_v36 = vld [vmem:[%s18404_s26 + $0x248] sm:$0xff] }
  0x5e   : > { %11906 = vmatprep.subr.bf16.mxu0 %v14068_v23  ;;  %11958 = vmatprep.subr.bf16.mxu1 %v11957_v35 }
  0x5f   : > { %11960 = vmatpush3.bf16.msra.mxu1 %v11957_v35 }
  0x60   : > { %11164 = vmatmul.mubr.f32.gmra.mrb[12].mxu0 %v630_v37  ;;  %v9766_v37 = vld [vmem:[%s18404_s26 + $0x260] sm:$0xff] }
  0x61   : > { %11908 = vmatpush3.bf16.msra.mxu0 %v14068_v23  ;;  %11166 = vmatprep.mubr.f32.mxu0 %v631_v38  ;;  %v11929_v38 = vpack.c.bf16 %v9766_v37, %v9763_v36 }
  0x62   : > { %11910 = vmatprep.subr.bf16.mxu0 %v14072_v24 }
  0x64   : > { %11167 = vmatmul.mubr.f32.gmra.mrb[14].mxu0 %v632_v39  ;;  %v9762_v39 = vld [vmem:[%s18404_s26 + $0x240] sm:$0xff] }
  0x65   : > { %11912 = vmatpush3.bf16.msra.mxu0 %v14072_v24  ;;  %11201 = vmatprep.mubr.f32.mxu0 %v9722_v40  ;;  %v9765_v40 = vld [vmem:[%s18404_s26 + $0x258] sm:$0xff] }
  0x66   : > { %11914 = vmatprep.subr.bf16.mxu0 %v11913_v58  ;;  %v9777_v58 = vld [vmem:[%s18404_s26 + $0x2b8] sm:$0xff] }
  0x67   : > { %v11939_v60 = vpack.c.bf16 %v9777_v58, %v9774_v57 }
  0x68   : > { %11202 = vmatmul.mubr.f32.vlgmr.msra.gmra.mrb[16].mxu0 %v9723_v41  ;;  %v9764_v41 = vld [vmem:[%s18404_s26 + $0x250] sm:$0xff] }
  0x69   : > { %11204 = vmatprep.mubr.f32.mxu0 %v9724_v42  ;;  %11916 = vmatpush1.bf16.msra.mxu0 %v11915_v62  ;;  %v11931_v42 = vpack.c.bf16 %v9765_v40, %v9762_v39  ;;  %v11969_v62 = vpack.c.bf16 %v9779_v61, %v9776_v59  ;;  %v786_v39 = vld [vmem:[%s18404_s26 + $0x40] sm:$0xff] }
  0x6a   : > { %11918 = vmatprep.subr.bf16.mxu0 %v11917_v3  ;;  %v9783_v3 = vld [vmem:[%s18404_s26 + $0x2e8] sm:$0xff]  ;;  %v778_v40 = vld [vmem:[%s18404_s26] sm:$0xff] }
  0x6b   : > { %v11943_v7 = vpack.c.bf16 %v9783_v3, %v9780_v2  ;;  %v800_v2 = vld [vmem:[%s18404_s26 + $0xb0] sm:$0xff] }
  0x6c   : > { %11205 = vmatmul.mubr.f32.gmra.mrb[18].mxu0 %v9725_v43  ;;  %v9767_v43 = vld [vmem:[%s18404_s26 + $0x268] sm:$0xff] }
  0x6d   : > { %11207 = vmatprep.mubr.f32.mxu0 %v9726_v44  ;;  %11920 = vmatpush1.bf16.msra.mxu0 %v11919_v10  ;;  %v11961_v44 = vpack.c.bf16 %v9767_v43, %v9764_v41  ;;  %v11973_v10 = vpack.c.bf16 %v9785_v8, %v9782_v5  ;;  %v781_v41 = vld [vmem:[%s18404_s26 + $0x18] sm:$0xff] }
  0x6e   : > { %11922 = vmatprep.subr.bf16.mxu0 %v11921_v16  ;;  %v779_v16 = vld [vmem:[%s18404_s26 + $0x8] sm:$0xff]  ;;  %v785_v43 = vld [vmem:[%s18404_s26 + $0x38] sm:$0xff] }
  0x6f   : > { %11962 = vmatprep.subr.bf16.mxu1 %v11961_v44  ;;  %v11977_v19 = vpack.c.bf16 %v782_v18, %v779_v16  ;;  %v807_v16 = vld [vmem:[%s18404_s26 + $0xe8] sm:$0xff] }
  0x70   : > { %11208 = vmatmul.mubr.f32.gmra.mrb[20].mxu0 %v9727_v45  ;;  %v9769_v45 = vld [vmem:[%s18404_s26 + $0x278] sm:$0xff]  ;;  %11964 = vmatpush3.bf16.msra.mxu1 %v11961_v44  ;;  %v788_v44 = vld [vmem:[%s18404_s26 + $0x50] sm:$0xff]  ;;  %v803_v18 = vld [vmem:[%s18404_s26 + $0xc8] sm:$0xff] }
  0x71   : > { %11210 = vmatprep.mubr.f32.mxu0 %v9728_v46  ;;  %11924 = vmatpush1.bf16.msra.mxu0 %v11923_v22  ;;  %v9772_v46 = vld [vmem:[%s18404_s26 + $0x290] sm:$0xff] }
  0x72   : > { %11926 = vmatprep.subr.bf16.mxu0 %v11925_v29 }
  0x74   : > { %11211 = vmatmul.mubr.f32.gmra.mrb[22].mxu0 %v9729_v47  ;;  %v11933_v47 = vpack.c.bf16 %v9772_v46, %v9769_v45  ;;  %v11979_v46 = vpack.c.bf16 %v781_v41, %v778_v40 }
  0x75   : > { %11213 = vmatprep.mubr.f32.mxu0 %v9730_v48  ;;  %11928 = vmatpush1.bf16.msra.mxu0 %v11927_v33  ;;  %v9768_v48 = vld [vmem:[%s18404_s26 + $0x270] sm:$0xff] }
  0x76   : > { %11930 = vmatprep.subr.bf16.mxu0 %v11929_v38 }
  0x78   : > { %11214 = vmatmul.mubr.f32.gmra.mrb[24].mxu0 %v9731_v49  ;;  %v9771_v49 = vld [vmem:[%s18404_s26 + $0x288] sm:$0xff] }
  0x79   : > { %11216 = vmatprep.mubr.f32.mxu0 %v9732_v50  ;;  %11932 = vmatpush1.bf16.msra.mxu0 %v11931_v42  ;;  %v9770_v50 = vld [vmem:[%s18404_s26 + $0x280] sm:$0xff]  ;;  %v789_v42 = vld [vmem:[%s18404_s26 + $0x58] sm:$0xff] }
  0x7a   : > { %11934 = vmatprep.subr.bf16.mxu0 %v11933_v47 }
  0x7c   : > { %11217 = vmatmul.mubr.f32.gmra.mrb[26].mxu0 %v9733_v51  ;;  %v11935_v51 = vpack.c.bf16 %v9771_v49, %v9768_v48  ;;  %v12013_v48 = vpack.c.bf16 %v789_v42, %v786_v39  ;;  %v792_v49 = vld [vmem:[%s18404_s26 + $0x70] sm:$0xff] }
  0x7d   : > { %11219 = vmatprep.mubr.f32.mxu0 %v9734_v52  ;;  %v9773_v52 = vld [vmem:[%s18404_s26 + $0x298] sm:$0xff] }
  0x7e   : > { %11936 = vmatpush1.bf16.msra.mxu0 %v11935_v51  ;;  %v784_v51 = vld [vmem:[%s18404_s26 + $0x30] sm:$0xff] }
  0x80   : > { %11220 = vmatmul.mubr.f32.gmra.mrb[28].mxu0 %v9735_v53  ;;  %v11965_v53 = vpack.c.bf16 %v9773_v52, %v9770_v50  ;;  %v11981_v50 = vpack.c.bf16 %v788_v44, %v785_v43  ;;  %v787_v52 = vld [vmem:[%s18404_s26 + $0x48] sm:$0xff]  ;;  %v810_v43 = vld [vmem:[%s18404_s26 + $0x100] sm:$0xff] }
  0x81   : > { %11222 = vmatprep.mubr.f32.mxu0 %v9736_v54  ;;  %v9775_v54 = vld [vmem:[%s18404_s26 + $0x2a8] sm:$0xff]  ;;  %v11983_v57 = vpack.c.bf16 %v787_v52, %v784_v51 }
  0x82   : > { %11966 = vmatprep.subr.bf16.mxu1 %v11965_v53 }
  0x83   : > { %11968 = vmatpush3.bf16.msra.mxu1 %v11965_v53  ;;  %v795_v53 = vld [vmem:[%s18404_s26 + $0x88] sm:$0xff] }
  0x84   : > { %11223 = vmatmul.mubr.f32.gmra.mrb[30].mxu0 %v9737_v55  ;;  %v9778_v55 = vld [vmem:[%s18404_s26 + $0x2c0] sm:$0xff]  ;;  %11970 = vmatprep.subr.bf16.mxu1 %v11969_v62  ;;  %v12017_v59 = vpack.c.bf16 %v795_v53, %v792_v49  ;;  %v812_v49 = vld [vmem:[%s18404_s26 + $0x110] sm:$0xff] }
  0x85   : > { %v11937_v56 = vpack.c.bf16 %v9778_v55, %v9775_v54  ;;  %1101 = vmatprep.mubr.f32.mxu0 %v13868_v14  ;;  %v791_v54 = vld [vmem:[%s18404_s26 + $0x68] sm:$0xff]  ;;  %v794_v55 = vld [vmem:[%s18404_s26 + $0x80] sm:$0xff] }
  0x86   : > { %v11985_v61 = vpack.c.bf16 %v794_v55, %v791_v54  ;;  %v816_v54 = vld [vmem:[%s18404_s26 + $0x130] sm:$0xff] }
  0x87   : > { %11938 = vmatprep.subr.bf16.mxu0 %v11937_v56  ;;  %11972 = vmatpush3.bf16.msra.mxu1 %v11969_v62  ;;  %v790_v62 = vld [vmem:[%s18404_s26 + $0x60] sm:$0xff] }
  0x88   : > { %11940 = vmatpush1.bf16.msra.mxu0 %v11939_v60  ;;  %11974 = vmatprep.subr.bf16.mxu1 %v11973_v10  ;;  %v798_v60 = vld [vmem:[%s18404_s26 + $0xa0] sm:$0xff]  ;;  %v11987_v5 = vpack.c.bf16 %v793_v63, %v790_v62 }
  0x89   : > { %11942 = vmatprep.subr.bf16.mxu0 %v11941_v1  ;;  %v797_v1 = vld [vmem:[%s18404_s26 + $0x98] sm:$0xff]  ;;  %v12021_v8 = vpack.c.bf16 %v801_v0, %v798_v60  ;;  %v818_v60 = vld [vmem:[%s18404_s26 + $0x140] sm:$0xff] }
  0x8a   : > { %v11989_v11 = vpack.c.bf16 %v800_v2, %v797_v1  ;;  %v822_v1 = vld [vmem:[%s18404_s26 + $0x160] sm:$0xff] }
  0x8b   : > { %11976 = vmatpush3.bf16.msra.mxu1 %v11973_v10  ;;  %v804_v10 = vld [vmem:[%s18404_s26 + $0xd0] sm:$0xff] }
  0x8c   : > { %11944 = vmatpush1.bf16.msra.mxu0 %v11943_v7  ;;  %12010 = vmatprep.subr.bf16.mxu1 %v12009_v15  ;;  %v12025_v42 = vpack.c.bf16 %v807_v16, %v804_v10  ;;  %v821_v10 = vld [vmem:[%s18404_s26 + $0x158] sm:$0xff] }
  0x8d   : > { %11978 = vmatprep.subr.bf16.mxu0 %v11977_v19  ;;  %v806_v19 = vld [vmem:[%s18404_s26 + $0xe0] sm:$0xff] }
  0x8e   : > { %v11993_v44 = vpack.c.bf16 %v806_v19, %v803_v18  ;;  %v820_v19 = vld [vmem:[%s18404_s26 + $0x150] sm:$0xff] }
 0x11b   : > { %v14343_v21 = vpop.f32.mrb[0].mxu0 }
 0x11c   : > { %v14345_v22 = vpop.f32.mrb[1].mxu0 }
 0x11f   : > { %v14347_v25 = vpop.f32.mrb[2].mxu0 }
 0x120   : > { %v14349_v26 = vpop.f32.mrb[3].mxu0 }
 0x123   : > { %v14351_v27 = vpop.f32.mrb[4].mxu0 }
 0x124   : > { %v14353_v28 = vpop.f32.mrb[5].mxu0 }
 0x127   : > { %v14355_v29 = vpop.f32.mrb[6].mxu0 }
 0x128   : > { %v14357_v30 = vpop.f32.mrb[7].mxu0 }
 0x12b   : > { %v14359_v31 = vpop.f32.mrb[8].mxu0 }
 0x12c   : > { %v14361_v32 = vpop.f32.mrb[9].mxu0 }
 0x12f   : > { %v14363_v33 = vpop.f32.mrb[10].mxu0 }
 0x130   : > { %v14365_v34 = vpop.f32.mrb[11].mxu0 }
 0x133   : > { %v14367_v35 = vpop.f32.mrb[12].mxu0 }
 0x134   : > { %v14369_v36 = vpop.f32.mrb[13].mxu0 }
 0x137   : > { %v14371_v37 = vpop.f32.mrb[14].mxu0 }
 0x138   : > { %v14373_v38 = vpop.f32.mrb[15].mxu0 }
 0x13b   : > { %v11203_v45 = vpop.f32.mrb[16].mxu0 }
 0x13c   : > { %v909_v47 = vpop.f32.mrb[17].mxu0 }
 0x13d   : > { %1102 = vmatmul.mubr.f32.vlgmr.msra.gmra.mrb[32].mxu0 %v909_v47  ;;  %11257 = vmatprep.mubr.f32.mxu1 %v909_v47  ;;  %v813_v47 = vld [vmem:[%s18404_s26 + $0x118] sm:$0xff] }
 0x13e   : > { %11258 = vmatmul.mubr.f32.vlgmr.msra.gmra.mrb[0].mxu1 %v11203_v45  ;;  %1107 = vmatprep.mubr.f32.mxu0 %v13868_v14  ;;  %v12029_v53 = vpack.c.bf16 %v813_v47, %v810_v43  ;;  %v9807_v47 = vld [vmem:[%s18404_s26 + $0x328] sm:$0xff] }
 0x13f   : > { %v11206_v56 = vpop.f32.mrb[18].mxu0  ;;  %12012 = vmatpush3.bf16.msra.mxu1 %v12009_v15  ;;  %11980 = vmatpush1.bf16.msra.mxu0 %v11979_v46  ;;  %v799_v15 = vld [vmem:[%s18404_s26 + $0xa8] sm:$0xff]  ;;  %v805_v46 = vld [vmem:[%s18404_s26 + $0xd8] sm:$0xff] }
 0x140   : > { %v919_v58 = vpop.f32.mrb[19].mxu0  ;;  %12014 = vmatprep.subr.bf16.mxu1 %v12013_v48  ;;  %11982 = vmatprep.subr.bf16.mxu0 %v11981_v50  ;;  %v11991_v40 = vpack.c.bf16 %v799_v15, %v796_v13 }
 0x141   : > { %1108 = vmatmul.mubr.f32.gmra.mrb[34].mxu0 %v11203_v45  ;;  %11260 = vmatprep.mubr.f32.mxu1 %v919_v58  ;;  %v802_v45 = vld [vmem:[%s18404_s26 + $0xc0] sm:$0xff] }
 0x142   : > { %11261 = vmatmul.mubr.f32.gmra.mrb[2].mxu1 %v11206_v56  ;;  %1113 = vmatprep.mubr.f32.mxu0 %v13868_v14  ;;  %v11995_v51 = vpack.c.bf16 %v805_v46, %v802_v45 }
 0x143   : > { %v14431_v3 = vpop.f32.mrb[20].mxu0  ;;  %12016 = vmatpush3.bf16.msra.mxu1 %v12013_v48  ;;  %11984 = vmatpush1.bf16.msra.mxu0 %v11983_v57  ;;  %v809_v48 = vld [vmem:[%s18404_s26 + $0xf8] sm:$0xff]  ;;  %v811_v57 = vld [vmem:[%s18404_s26 + $0x108] sm:$0xff] }
 0x144   : > { %v929_v7 = vpop.f32.mrb[21].mxu0  ;;  %12018 = vmatprep.subr.bf16.mxu1 %v12017_v59  ;;  %11986 = vmatprep.subr.bf16.mxu0 %v11985_v61  ;;  %v11997_v55 = vpack.c.bf16 %v812_v49, %v809_v48  ;;  %v9786_v48 = vld [vmem:[%s18401_s29 + $0x100] sm:$0xff] }
 0x145   : > { %1114 = vmatmul.mubr.f32.gmra.mrb[36].mxu0 %v919_v58  ;;  %11263 = vmatprep.mubr.f32.mxu1 %v929_v7  ;;  %v819_v58 = vld [vmem:[%s18404_s26 + $0x148] sm:$0xff]  ;;  %v9802_v49 = vld [vmem:[%s18404_s26 + $0x300] sm:$0xff] }
 0x146   : > { %11264 = vmatmul.mubr.f32.gmra.mrb[4].mxu1 %v14431_v3  ;;  %1119 = vmatprep.mubr.f32.mxu0 %v13868_v14  ;;  %v12033_v0 = vpack.c.bf16 %v819_v58, %v816_v54  ;;  %v9810_v54 = vld [vmem:[%s18404_s26 + $0x340] sm:$0xff]  ;;  %v9788_v58 = vld [vmem:[%s18401_s29 + $0x110] sm:$0xff] }
 0x147   : > { %v14453_v39 = vpop.f32.mrb[22].mxu0  ;;  %12020 = vmatpush3.bf16.msra.mxu1 %v12017_v59  ;;  %11988 = vmatpush1.bf16.msra.mxu0 %v11987_v5  ;;  %v815_v59 = vld [vmem:[%s18404_s26 + $0x128] sm:$0xff]  ;;  %v814_v5 = vld [vmem:[%s18404_s26 + $0x120] sm:$0xff] }
 0x148   : > { %v939_v41 = vpop.f32.mrb[23].mxu0  ;;  %12022 = vmatprep.subr.bf16.mxu1 %v12021_v8  ;;  %11990 = vmatprep.subr.bf16.mxu0 %v11989_v11  ;;  %v12001_v2 = vpack.c.bf16 %v818_v60, %v815_v59  ;;  %v824_v11 = vld [vmem:[%s18404_s26 + $0x170] sm:$0xff] }
 0x149   : > { %1120 = vmatmul.mubr.f32.gmra.mrb[38].mxu0 %v11206_v56  ;;  %11266 = vmatprep.mubr.f32.mxu1 %v939_v41  ;;  %v808_v56 = vld [vmem:[%s18404_s26 + $0xf0] sm:$0xff]  ;;  %v12005_v18 = vpack.c.bf16 %v824_v11, %v821_v10  ;;  %v9814_v10 = vld [vmem:[%s18404_s26 + $0x360] sm:$0xff]  ;;  %v9817_v11 = vld [vmem:[%s18404_s26 + $0x378] sm:$0xff] }
 0x14a   : > { %11267 = vmatmul.mubr.f32.gmra.mrb[6].mxu1 %v14453_v39  ;;  %1125 = vmatprep.mubr.f32.mxu0 %v13868_v14  ;;  %v11999_v62 = vpack.c.bf16 %v811_v57, %v808_v56  ;;  %v9787_v56 = vld [vmem:[%s18401_s29 + $0x108] sm:$0xff]  ;;  %v9808_v60 = vld [vmem:[%s18404_s26 + $0x330] sm:$0xff] }
 0x14b   : > { %v14475_v50 = vpop.f32.mrb[24].mxu0  ;;  %12024 = vmatpush3.bf16.msra.mxu1 %v12021_v8  ;;  %11992 = vmatpush1.bf16.msra.mxu0 %v11991_v40  ;;  %v825_v8 = vld [vmem:[%s18404_s26 + $0x178] sm:$0xff]  ;;  %v823_v40 = vld [vmem:[%s18404_s26 + $0x168] sm:$0xff] }
 0x14c   : > { %v14477_v52 = vpop.f32.mrb[25].mxu0  ;;  %12026 = vmatprep.subr.bf16.mxu1 %v12025_v42  ;;  %11994 = vmatprep.subr.bf16.mxu0 %v11993_v44  ;;  %v12037_v16 = vpack.c.bf16 %v825_v8, %v822_v1  ;;  %v12007_v45 = vpack.c.bf16 %v823_v40, %v820_v19  ;;  %v9816_v1 = vld [vmem:[%s18404_s26 + $0x370] sm:$0xff]  ;;  %v12083_v19 = vpack.c.bf16 %v9817_v11, %v9814_v10  ;;  %v9838_v10 = vld [vmem:[%s18404_s26 + $0x420] sm:$0xff]  ;;  %v9841_v11 = vld [vmem:[%s18404_s26 + $0x438] sm:$0xff] }
 0x14d   : > { %1126 = vmatmul.mubr.f32.gmra.mrb[40].mxu0 %v929_v7  ;;  %11269 = vmatprep.mubr.f32.mxu1 %v14477_v52  ;;  %v817_v7 = vld [vmem:[%s18404_s26 + $0x138] sm:$0xff]  ;;  %v9792_v40 = vld [vmem:[%s18401_s29 + $0x130] sm:$0xff] }
 0x14e   : > { %11270 = vmatmul.mubr.f32.gmra.mrb[8].mxu1 %v14475_v50  ;;  %1131 = vmatprep.mubr.f32.mxu0 %v13868_v14 }
 0x14f   : > { %v14500_v61 = vpop.f32.mrb[26].mxu0  ;;  %12028 = vmatpush3.bf16.msra.mxu1 %v12025_v42  ;;  %11996 = vmatpush1.bf16.msra.mxu0 %v11995_v51  ;;  %v9803_v42 = vld [vmem:[%s18404_s26 + $0x308] sm:$0xff] }
 0x150   : > { %v959_v63 = vpop.f32.mrb[27].mxu0  ;;  %12030 = vmatprep.subr.bf16.mxu1 %v12029_v53  ;;  %11998 = vmatprep.subr.bf16.mxu0 %v11997_v55  ;;  %v9813_v55 = vld [vmem:[%s18404_s26 + $0x358] sm:$0xff] }
 0x151   : > { %1132 = vmatmul.mubr.f32.gmra.mrb[42].mxu0 %v14431_v3  ;;  %11272 = vmatprep.mubr.f32.mxu1 %v959_v63  ;;  %v12003_v3 = vpack.c.bf16 %v817_v7, %v814_v5  ;;  %v9790_v7 = vld [vmem:[%s18401_s29 + $0x120] sm:$0xff] }
 0x152   : > { %11273 = vmatmul.mubr.f32.gmra.mrb[10].mxu1 %v14500_v61  ;;  %1137 = vmatprep.mubr.f32.mxu0 %v13868_v14 }
 0x153   : > { %v14523_v13 = vpop.f32.mrb[28].mxu0  ;;  %12032 = vmatpush3.bf16.msra.mxu1 %v12029_v53  ;;  %12000 = vmatpush1.bf16.msra.mxu0 %v11999_v62  ;;  %v9812_v53 = vld [vmem:[%s18404_s26 + $0x350] sm:$0xff]  ;;  %v12109_v62 = vpack.c.bf16 %v9813_v55, %v9810_v54  ;;  %v9833_v54 = vld [vmem:[%s18404_s26 + $0x3f8] sm:$0xff] }
 0x154   : > { %v969_v15 = vpop.f32.mrb[29].mxu0  ;;  %12034 = vmatprep.subr.bf16.mxu1 %v12033_v0  ;;  %12002 = vmatprep.subr.bf16.mxu0 %v12001_v2  ;;  %v9789_v2 = vld [vmem:[%s18401_s29 + $0x118] sm:$0xff]  ;;  %v9836_v55 = vld [vmem:[%s18404_s26 + $0x410] sm:$0xff] }
 0x155   : > { %1138 = vmatmul.mubr.f32.gmra.mrb[44].mxu0 %v939_v41  ;;  %11275 = vmatprep.mubr.f32.mxu1 %v969_v15  ;;  %v9806_v41 = vld [vmem:[%s18404_s26 + $0x320] sm:$0xff] }
 0x156   : > { %11276 = vmatmul.mubr.f32.gmra.mrb[12].mxu1 %v14523_v13  ;;  %1143 = vmatprep.mubr.f32.mxu0 %v13868_v14  ;;  %v12073_v46 = vpack.c.bf16 %v9806_v41, %v9803_v42  ;;  %v9820_v41 = vld [vmem:[%s18404_s26 + $0x390] sm:$0xff] }
 0x157   : > { %v14539_v43 = vpop.f32.mrb[30].mxu0  ;;  %12036 = vmatpush3.bf16.msra.mxu1 %v12033_v0  ;;  %12004 = vmatpush1.bf16.msra.mxu0 %v12003_v3  ;;  %v9818_v0 = vld [vmem:[%s18404_s26 + $0x380] sm:$0xff]  ;;  %v9821_v3 = vld [vmem:[%s18404_s26 + $0x398] sm:$0xff] }
 0x158   : > { %v979_v44 = vpop.f32.mrb[31].mxu0  ;;  %12038 = vmatprep.subr.bf16.mxu1 %v12037_v16  ;;  %12006 = vmatprep.subr.bf16.mxu0 %v12005_v18  ;;  %v9791_v18 = vld [vmem:[%s18401_s29 + $0x128] sm:$0xff] }
 0x159   : > { %1144 = vmatmul.mubr.f32.gmra.mrb[46].mxu0 %v14453_v39  ;;  %11278 = vmatprep.mubr.f32.mxu1 %v979_v44  ;;  %v9804_v39 = vld [vmem:[%s18404_s26 + $0x310] sm:$0xff] }
 0x15a   : > { %11279 = vmatmul.mubr.f32.gmra.mrb[14].mxu1 %v14539_v43  ;;  %1149 = vmatprep.mubr.f32.mxu0 %v13868_v14  ;;  %v12105_v51 = vpack.c.bf16 %v9807_v47, %v9804_v39  ;;  %v9828_v39 = vld [vmem:[%s18404_s26 + $0x3d0] sm:$0xff]  ;;  %v9793_v47 = vld [vmem:[%s18401_s29 + $0x138] sm:$0xff] }
 0x15b   : > { %12040 = vmatpush3.bf16.msra.mxu1 %v12037_v16  ;;  %11313 = vmatprep.mubr.f32.mxu1 %v14345_v22  ;;  %v9822_v16 = vld [vmem:[%s18404_s26 + $0x3a0] sm:$0xff] }
 0x15c   : > { %12042 = vmatprep.subr.bf16.mxu1 %v14032_v4  ;;  %12008 = vmatpush1.bf16.msra.mxu0 %v12007_v45  ;;  %v9827_v45 = vld [vmem:[%s18404_s26 + $0x3c8] sm:$0xff] }
 0x15d   : > { %1150 = vmatmul.mubr.f32.gmra.mrb[48].mxu0 %v14477_v52  ;;  %12074 = vmatprep.subr.bf16.mxu0 %v12073_v46  ;;  %v9809_v52 = vld [vmem:[%s18404_s26 + $0x338] sm:$0xff]  ;;  %v9830_v46 = vld [vmem:[%s18404_s26 + $0x3e0] sm:$0xff] }
 0x15e   : > { %11314 = vmatmul.mubr.f32.vlgmr.msra.gmra.mrb[0].mxu1 %v14343_v21  ;;  %1155 = vmatprep.mubr.f32.mxu0 %v13868_v14  ;;  %v12077_v59 = vpack.c.bf16 %v9812_v53, %v9809_v52  ;;  %v9829_v52 = vld [vmem:[%s18404_s26 + $0x3d8] sm:$0xff] }
 0x15f   : > { %11316 = vmatprep.mubr.f32.mxu1 %v14349_v26  ;;  %12044 = vmatpush3.bf16.msra.mxu1 %v14032_v4 }
 0x160   : > { %12046 = vmatprep.subr.bf16.mxu1 %v14035_v6 }
 0x161   : > { %1156 = vmatmul.mubr.f32.gmra.mrb[50].mxu0 %v14475_v50  ;;  %v9805_v50 = vld [vmem:[%s18404_s26 + $0x318] sm:$0xff] }
 0x162   : > { %11317 = vmatmul.mubr.f32.gmra.mrb[2].mxu1 %v14347_v25  ;;  %1161 = vmatprep.mubr.f32.mxu0 %v13868_v14  ;;  %v12075_v57 = vpack.c.bf16 %v9805_v50, %v9802_v49  ;;  %v9794_v49 = vld [vmem:[%s18401_s29 + $0x140] sm:$0xff]  ;;  %v12089_v50 = vpack.c.bf16 %v9830_v46, %v9827_v45 }
 0x163   : > { %11319 = vmatprep.mubr.f32.mxu1 %v14353_v28  ;;  %12048 = vmatpush3.bf16.msra.mxu1 %v14035_v6 }
 0x164   : > { %12050 = vmatprep.subr.bf16.mxu1 %v14042_v9 }
 0x165   : > { %1162 = vmatmul.mubr.f32.gmra.mrb[52].mxu0 %v959_v63  ;;  %v9815_v63 = vld [vmem:[%s18404_s26 + $0x368] sm:$0xff] }
 0x166   : > { %11320 = vmatmul.mubr.f32.gmra.mrb[4].mxu1 %v14351_v27  ;;  %1167 = vmatprep.mubr.f32.mxu0 %v13868_v14  ;;  %v12081_v8 = vpack.c.bf16 %v9818_v0, %v9815_v63  ;;  %v9839_v0 = vld [vmem:[%s18404_s26 + $0x428] sm:$0xff] }
 0x167   : > { %11322 = vmatprep.mubr.f32.mxu1 %v14357_v30  ;;  %12052 = vmatpush3.bf16.msra.mxu1 %v14042_v9 }
 0x168   : > { %12054 = vmatprep.subr.bf16.mxu1 %v14048_v12 }
 0x169   : > { %1168 = vmatmul.mubr.f32.gmra.mrb[54].mxu0 %v14500_v61  ;;  %v9811_v61 = vld [vmem:[%s18404_s26 + $0x348] sm:$0xff] }
 0x16a   : > { %11323 = vmatmul.mubr.f32.gmra.mrb[6].mxu1 %v14355_v29  ;;  %1173 = vmatprep.mubr.f32.mxu0 %v13868_v14  ;;  %v12079_v5 = vpack.c.bf16 %v9811_v61, %v9808_v60  ;;  %v12093_v60 = vpack.c.bf16 %v9836_v55, %v9833_v54  ;;  %v9832_v61 = vld [vmem:[%s18404_s26 + $0x3f0] sm:$0xff]  ;;  %v9881_v54 = vld [vmem:[%s18404_s26 + $0x4f8] sm:$0xff] }
 0x16b   : > { %11325 = vmatprep.mubr.f32.mxu1 %v14361_v32  ;;  %12056 = vmatpush3.bf16.msra.mxu1 %v14048_v12  ;;  %v9885_v55 = vld [vmem:[%s18404_s26 + $0x518] sm:$0xff] }
 0x16c   : > { %12058 = vmatprep.subr.bf16.mxu1 %v14056_v17 }
 0x16d   : > { %1174 = vmatmul.mubr.f32.gmra.mrb[56].mxu0 %v969_v15  ;;  %v9824_v15 = vld [vmem:[%s18404_s26 + $0x3b0] sm:$0xff] }
 0x16e   : > { %11326 = vmatmul.mubr.f32.gmra.mrb[8].mxu1 %v14359_v31  ;;  %1179 = vmatprep.mubr.f32.mxu0 %v13868_v14  ;;  %v12085_v42 = vpack.c.bf16 %v9824_v15, %v9821_v3  ;;  %v9845_v3 = vld [vmem:[%s18404_s26 + $0x458] sm:$0xff]  ;;  %v9848_v15 = vld [vmem:[%s18404_s26 + $0x470] sm:$0xff] }
 0x16f   : > { %11328 = vmatprep.mubr.f32.mxu1 %v14365_v34  ;;  %12060 = vmatpush3.bf16.msra.mxu1 %v14056_v17 }
 0x170   : > { %12062 = vmatprep.subr.bf16.mxu1 %v14062_v20 }
 0x171   : > { %1180 = vmatmul.mubr.f32.gmra.mrb[58].mxu0 %v14523_v13 }
 0x172   : > { %11329 = vmatmul.mubr.f32.gmra.mrb[10].mxu1 %v14363_v33  ;;  %1185 = vmatprep.mubr.f32.mxu0 %v13868_v14 }
 0x173   : > { %11331 = vmatprep.mubr.f32.mxu1 %v14369_v36  ;;  %12064 = vmatpush3.bf16.msra.mxu1 %v14062_v20 }
 0x174   : > { %12066 = vmatprep.subr.bf16.mxu1 %v14068_v23 }
 0x175   : > { %1186 = vmatmul.mubr.f32.gmra.mrb[60].mxu0 %v979_v44 }
 0x176   : > { %11332 = vmatmul.mubr.f32.gmra.mrb[12].mxu1 %v14367_v35  ;;  %1191 = vmatprep.mubr.f32.mxu0 %v13868_v14 }
 0x177   : > { %11334 = vmatprep.mubr.f32.mxu1 %v14373_v38  ;;  %12068 = vmatpush3.bf16.msra.mxu1 %v14068_v23 }
 0x178   : > { %12070 = vmatprep.subr.bf16.mxu1 %v14072_v24 }
 0x179   : > { %1192 = vmatmul.mubr.f32.gmra.mrb[62].mxu0 %v14539_v43  ;;  %v9823_v43 = vld [vmem:[%s18404_s26 + $0x3a8] sm:$0xff] }
 0x17a   : > { %11335 = vmatmul.mubr.f32.gmra.mrb[14].mxu1 %v14371_v37  ;;  %1407 = vmatprep.mubr.f32.mxu0 %v13868_v14 }
 0x17b   : > { %12072 = vmatpush3.bf16.msra.mxu1 %v14072_v24  ;;  %11369 = vmatprep.mubr.f32.mxu1 %v9786_v48  ;;  %v12087_v48 = vpack.c.bf16 %v9823_v43, %v9820_v41  ;;  %v9847_v41 = vld [vmem:[%s18404_s26 + $0x468] sm:$0xff] }
 0x17c   : > { %12106 = vmatprep.subr.bf16.mxu1 %v12105_v51 }
 0x17d   : > { %1408 = vmatmul.mubr.f32.vlgmr.msra.gmra.mrb[32].mxu0 %v14345_v22  ;;  %v9819_v22 = vld [vmem:[%s18404_s26 + $0x388] sm:$0xff] }
 0x17e   : > { %11370 = vmatmul.mubr.f32.vlgmr.msra.gmra.mrb[16].mxu1 %v9787_v56  ;;  %1413 = vmatprep.mubr.f32.mxu0 %v13868_v14  ;;  %v12113_v13 = vpack.c.bf16 %v9819_v22, %v9816_v1  ;;  %v9834_v56 = vld [vmem:[%s18404_s26 + $0x400] sm:$0xff]  ;;  %v9840_v22 = vld [vmem:[%s18404_s26 + $0x430] sm:$0xff] }
 0x17f   : > { %11372 = vmatprep.mubr.f32.mxu1 %v9788_v58  ;;  %12076 = vmatpush1.bf16.msra.mxu0 %v12075_v57  ;;  %v9795_v57 = vld [vmem:[%s18401_s29 + $0x148] sm:$0xff]  ;;  %v9842_v1 = vld [vmem:[%s18404_s26 + $0x440] sm:$0xff] }
 0x180   : > { %12108 = vmatpush3.bf16.msra.mxu1 %v12105_v51  ;;  %12078 = vmatprep.subr.bf16.mxu0 %v12077_v59  ;;  %v9826_v51 = vld [vmem:[%s18404_s26 + $0x3c0] sm:$0xff]  ;;  %v9796_v59 = vld [vmem:[%s18401_s29 + $0x150] sm:$0xff] }
 0x181   : > { %1414 = vmatmul.mubr.f32.gmra.mrb[34].mxu0 %v14343_v21  ;;  %12110 = vmatprep.subr.bf16.mxu1 %v12109_v62  ;;  %v9825_v21 = vld [vmem:[%s18404_s26 + $0x3b8] sm:$0xff]  ;;  %v12091_v58 = vpack.c.bf16 %v9829_v52, %v9826_v51 }
 0x182   : > { %11373 = vmatmul.mubr.f32.gmra.mrb[18].mxu1 %v9789_v2  ;;  %1419 = vmatprep.mubr.f32.mxu0 %v13868_v14  ;;  %v12117_v44 = vpack.c.bf16 %v9825_v21, %v9822_v16  ;;  %v9797_v2 = vld [vmem:[%s18401_s29 + $0x158] sm:$0xff]  ;;  %v9846_v16 = vld [vmem:[%s18404_s26 + $0x460] sm:$0xff]  ;;  %v9799_v21 = vld [vmem:[%s18401_s29 + $0x168] sm:$0xff] }
 0x183   : > { %11375 = vmatprep.mubr.f32.mxu1 %v9790_v7  ;;  %12080 = vmatpush1.bf16.msra.mxu0 %v12079_v5  ;;  %v9798_v7 = vld [vmem:[%s18401_s29 + $0x160] sm:$0xff] }
 0x184   : > { %12112 = vmatpush3.bf16.msra.mxu1 %v12109_v62  ;;  %12082 = vmatprep.subr.bf16.mxu0 %v12081_v8  ;;  %v9835_v62 = vld [vmem:[%s18404_s26 + $0x408] sm:$0xff]  ;;  %v12097_v8 = vpack.c.bf16 %v9842_v1, %v9839_v0 }
 0x185   : > { %1420 = vmatmul.mubr.f32.gmra.mrb[36].mxu0 %v14349_v26  ;;  %12114 = vmatprep.subr.bf16.mxu1 %v12113_v13  ;;  %v9831_v26 = vld [vmem:[%s18404_s26 + $0x3e8] sm:$0xff]  ;;  %v12095_v5 = vpack.c.bf16 %v9835_v62, %v9832_v61 }
 0x186   : > { %11376 = vmatmul.mubr.f32.gmra.mrb[20].mxu1 %v9791_v18  ;;  %1425 = vmatprep.mubr.f32.mxu0 %v13868_v14  ;;  %v12121_v53 = vpack.c.bf16 %v9831_v26, %v9828_v39  ;;  %v12099_v18 = vpack.c.bf16 %v9841_v11, %v9838_v10  ;;  %v9872_v39 = vld [vmem:[%s18404_s26 + $0x4b0] sm:$0xff]  ;;  %v9875_v26 = vld [vmem:[%s18404_s26 + $0x4c8] sm:$0xff] }
 0x187   : > { %11378 = vmatprep.mubr.f32.mxu1 %v9792_v40  ;;  %12084 = vmatpush1.bf16.msra.mxu0 %v12083_v19  ;;  %v9800_v19 = vld [vmem:[%s18401_s29 + $0x170] sm:$0xff]  ;;  %v12101_v40 = vpack.c.bf16 %v9848_v15, %v9845_v3  ;;  %v9887_v61 = vld [vmem:[%s18404_s26 + $0x528] sm:$0xff] }
 0x188   : > { %12116 = vmatpush3.bf16.msra.mxu1 %v12113_v13  ;;  %12086 = vmatprep.subr.bf16.mxu0 %v12085_v42  ;;  %v9844_v42 = vld [vmem:[%s18404_s26 + $0x450] sm:$0xff]  ;;  %v9891_v62 = vld [vmem:[%s18404_s26 + $0x548] sm:$0xff] }
 0x189   : > { %1426 = vmatmul.mubr.f32.gmra.mrb[38].mxu0 %v14347_v25  ;;  %12118 = vmatprep.subr.bf16.mxu1 %v12117_v44  ;;  %v9837_v25 = vld [vmem:[%s18404_s26 + $0x418] sm:$0xff]  ;;  %v12103_v45 = vpack.c.bf16 %v9847_v41, %v9844_v42  ;;  %v9896_v15 = vld [vmem:[%s18404_s26 + $0x570] sm:$0xff]  ;;  %v9902_v41 = vld [vmem:[%s18404_s26 + $0x5a0] sm:$0xff] }
 0x18a   : > { %11379 = vmatmul.mubr.f32.gmra.mrb[22].mxu1 %v9793_v47  ;;  %1431 = vmatprep.mubr.f32.mxu0 %v13868_v14  ;;  %v12125_v63 = vpack.c.bf16 %v9837_v25, %v9834_v56  ;;  %v9879_v47 = vld [vmem:[%s18404_s26 + $0x4e8] sm:$0xff]  ;;  %v9888_v56 = vld [vmem:[%s18404_s26 + $0x530] sm:$0xff] }
 0x18b   : > { %11381 = vmatprep.mubr.f32.mxu1 %v9794_v49  ;;  %12088 = vmatpush1.bf16.msra.mxu0 %v12087_v48  ;;  %v9882_v48 = vld [vmem:[%s18404_s26 + $0x500] sm:$0xff] }
 0x18c   : > { %12120 = vmatpush3.bf16.msra.mxu1 %v12117_v44  ;;  %12090 = vmatprep.subr.bf16.mxu0 %v12089_v50  ;;  %v9801_v44 = vld [vmem:[%s18401_s29 + $0x178] sm:$0xff]  ;;  %v12175_v50 = vpack.c.bf16 %v9875_v26, %v9872_v39  ;;  %v12177_v52 = vpack.c.bf16 %v9882_v48, %v9879_v47  ;;  %v9874_v47 = vld [vmem:[%s18404_s26 + $0x4c0] sm:$0xff] }
 0x18d   : > { %1432 = vmatmul.mubr.f32.gmra.mrb[40].mxu0 %v14353_v28  ;;  %12122 = vmatprep.subr.bf16.mxu1 %v12121_v53  ;;  %v9843_v28 = vld [vmem:[%s18404_s26 + $0x448] sm:$0xff]  ;;  %v9877_v48 = vld [vmem:[%s18404_s26 + $0x4d8] sm:$0xff] }
 0x18e   : > { %11382 = vmatmul.mubr.f32.gmra.mrb[24].mxu1 %v9795_v57  ;;  %1437 = vmatprep.mubr.f32.mxu0 %v13868_v14  ;;  %v12129_v13 = vpack.c.bf16 %v9843_v28, %v9840_v22 }
 0x18f   : > { %11384 = vmatprep.mubr.f32.mxu1 %v9796_v59  ;;  %12092 = vmatpush1.bf16.msra.mxu0 %v12091_v58  ;;  %v12181_v59 = vpack.c.bf16 %v9888_v56, %v9885_v55  ;;  %v9854_v55 = vld [vmem:[%s18401_s29 + $0x1a0] sm:$0xff] }
 0x190   : > { %12124 = vmatpush3.bf16.msra.mxu1 %v12121_v53  ;;  %12094 = vmatprep.subr.bf16.mxu0 %v12093_v60  ;;  %v9878_v53 = vld [vmem:[%s18404_s26 + $0x4e0] sm:$0xff]  ;;  %v9884_v60 = vld [vmem:[%s18404_s26 + $0x510] sm:$0xff] }
 0x191   : > { %1438 = vmatmul.mubr.f32.gmra.mrb[42].mxu0 %v14351_v27  ;;  %12126 = vmatprep.subr.bf16.mxu1 %v12125_v63  ;;  %v9849_v27 = vld [vmem:[%s18404_s26 + $0x478] sm:$0xff]  ;;  %v12179_v57 = vpack.c.bf16 %v9881_v54, %v9878_v53  ;;  %v12183_v1 = vpack.c.bf16 %v9887_v61, %v9884_v60  ;;  %v9883_v53 = vld [vmem:[%s18404_s26 + $0x508] sm:$0xff]  ;;  %v9892_v61 = vld [vmem:[%s18404_s26 + $0x550] sm:$0xff] }
 0x192   : > { %11385 = vmatmul.mubr.f32.gmra.mrb[26].mxu1 %v9797_v2  ;;  %1443 = vmatprep.mubr.f32.mxu0 %v13868_v14  ;;  %v12133_v43 = vpack.c.bf16 %v9849_v27, %v9846_v16  ;;  %v9890_v2 = vld [vmem:[%s18404_s26 + $0x540] sm:$0xff]  ;;  %v9899_v16 = vld [vmem:[%s18404_s26 + $0x588] sm:$0xff]  ;;  %v9853_v54 = vld [vmem:[%s18401_s29 + $0x198] sm:$0xff] }
 0x193   : > { %11387 = vmatprep.mubr.f32.mxu1 %v9798_v7  ;;  %12096 = vmatpush1.bf16.msra.mxu0 %v12095_v5  ;;  %v9893_v5 = vld [vmem:[%s18404_s26 + $0x558] sm:$0xff]  ;;  %v9903_v27 = vld [vmem:[%s18404_s26 + $0x5a8] sm:$0xff] }
 0x194   : > { %12128 = vmatpush3.bf16.msra.mxu1 %v12125_v63  ;;  %12098 = vmatprep.subr.bf16.mxu0 %v12097_v8  ;;  %v9894_v63 = vld [vmem:[%s18404_s26 + $0x560] sm:$0xff]  ;;  %v9897_v7 = vld [vmem:[%s18404_s26 + $0x578] sm:$0xff]  ;;  %v9900_v8 = vld [vmem:[%s18404_s26 + $0x590] sm:$0xff]  ;;  %v12187_v11 = vpack.c.bf16 %v9893_v5, %v9890_v2 }
 0x195   : > { %1444 = vmatmul.mubr.f32.gmra.mrb[44].mxu0 %v14357_v30  ;;  %12130 = vmatprep.subr.bf16.mxu1 %v12129_v13  ;;  %v9870_v30 = vld [vmem:[%s18404_s26 + $0x4a0] sm:$0xff]  ;;  %v12185_v28 = vpack.c.bf16 %v9894_v63, %v9891_v62  ;;  %v12189_v3 = vpack.c.bf16 %v9900_v8, %v9897_v7  ;;  %v9895_v62 = vld [vmem:[%s18404_s26 + $0x568] sm:$0xff]  ;;  %v9857_v63 = vld [vmem:[%s18401_s29 + $0x1b8] sm:$0xff] }
 0x196   : > { %11388 = vmatmul.mubr.f32.gmra.mrb[28].mxu1 %v9799_v21  ;;  %1449 = vmatprep.mubr.f32.mxu0 %v13868_v14  ;;  %v9906_v21 = vld [vmem:[%s18404_s26 + $0x5c0] sm:$0xff]  ;;  %v9859_v2 = vld [vmem:[%s18401_s29 + $0x1c8] sm:$0xff]  ;;  %v9860_v5 = vld [vmem:[%s18401_s29 + $0x1d0] sm:$0xff] }
 0x197   : > { %11390 = vmatprep.mubr.f32.mxu1 %v9800_v19  ;;  %12100 = vmatpush1.bf16.msra.mxu0 %v12099_v18  ;;  %v12191_v19 = vpack.c.bf16 %v9899_v16, %v9896_v15  ;;  %v12193_v42 = vpack.c.bf16 %v9906_v21, %v9903_v27  ;;  %v9904_v8 = vld [vmem:[%s18404_s26 + $0x5b0] sm:$0xff]  ;;  %v9910_v15 = vld [vmem:[%s18404_s26 + $0x5e0] sm:$0xff]  ;;  %v9913_v16 = vld [vmem:[%s18404_s26 + $0x5f8] sm:$0xff] }
 0x198   : > { %12132 = vmatpush3.bf16.msra.mxu1 %v12129_v13  ;;  %12102 = vmatprep.subr.bf16.mxu0 %v12101_v40  ;;  %v9863_v27 = vld [vmem:[%s18401_s29 + $0x1e8] sm:$0xff]  ;;  %v9864_v21 = vld [vmem:[%s18401_s29 + $0x1f0] sm:$0xff] }
 0x199   : > { %1450 = vmatmul.mubr.f32.gmra.mrb[46].mxu0 %v14355_v29  ;;  %12134 = vmatprep.subr.bf16.mxu1 %v12133_v43  ;;  %v9867_v29 = vld [vmem:[%s18404_s26 + $0x488] sm:$0xff] }
 0x19a   : > { %11391 = vmatmul.mubr.f32.gmra.mrb[30].mxu1 %v9801_v44  ;;  %1455 = vmatprep.mubr.f32.mxu0 %v13868_v14  ;;  %v9909_v44 = vld [vmem:[%s18404_s26 + $0x5d8] sm:$0xff] }
 0x19b   : > { %12104 = vmatpush1.bf16.msra.mxu0 %v12103_v45  ;;  %v9912_v45 = vld [vmem:[%s18404_s26 + $0x5f0] sm:$0xff] }
 0x19c   : > { %12136 = vmatpush3.bf16.msra.mxu1 %v12133_v43  ;;  %v9905_v43 = vld [vmem:[%s18404_s26 + $0x5b8] sm:$0xff] }
 0x19d   : > { %1456 = vmatmul.mubr.f32.gmra.mrb[48].mxu0 %v14361_v32  ;;  %12138 = vmatprep.subr.bf16.mxu1 %v14032_v4  ;;  %v9866_v32 = vld [vmem:[%s18404_s26 + $0x480] sm:$0xff] }
 0x19e   : > { %1461 = vmatprep.mubr.f32.mxu0 %v13868_v14 }
 0x1a1   : > { %1462 = vmatmul.mubr.f32.gmra.mrb[50].mxu0 %v14359_v31  ;;  %v12169_v31 = vpack.c.bf16 %v9870_v30, %v9867_v29  ;;  %v12195_v30 = vpack.c.bf16 %v9905_v43, %v9902_v41  ;;  %v9930_v43 = vld [vmem:[%s18404_s26 + $0x600] sm:$0xff] }
 0x1a2   : > { %1467 = vmatprep.mubr.f32.mxu0 %v13868_v14 }
 0x1a3   : > { %12170 = vmatprep.subr.bf16.mxu0 %v12169_v31 }
 0x1a5   : > { %1468 = vmatmul.mubr.f32.gmra.mrb[52].mxu0 %v14365_v34  ;;  %v9873_v34 = vld [vmem:[%s18404_s26 + $0x4b8] sm:$0xff] }
 0x1a6   : > { %1473 = vmatprep.mubr.f32.mxu0 %v13868_v14 }
 0x1a9   : > { %1474 = vmatmul.mubr.f32.gmra.mrb[54].mxu0 %v14363_v33  ;;  %v9869_v33 = vld [vmem:[%s18404_s26 + $0x498] sm:$0xff] }
 0x1aa   : > { %1479 = vmatprep.mubr.f32.mxu0 %v13868_v14 }
 0x1ad   : > { %1480 = vmatmul.mubr.f32.gmra.mrb[56].mxu0 %v14369_v36 }
 0x1ae   : > { %1485 = vmatprep.mubr.f32.mxu0 %v13868_v14 }
 0x1b1   : > { %1486 = vmatmul.mubr.f32.gmra.mrb[58].mxu0 %v14367_v35  ;;  %v9876_v35 = vld [vmem:[%s18404_s26 + $0x4d0] sm:$0xff] }
 0x1b2   : > { %1491 = vmatprep.mubr.f32.mxu0 %v13868_v14  ;;  %v12173_v46 = vpack.c.bf16 %v9876_v35, %v9873_v34  ;;  %v9871_v34 = vld [vmem:[%s18404_s26 + $0x4a8] sm:$0xff]  ;;  %v9908_v35 = vld [vmem:[%s18404_s26 + $0x5d0] sm:$0xff] }
 0x1b5   : > { %1492 = vmatmul.mubr.f32.gmra.mrb[60].mxu0 %v14373_v38 }
 0x1b6   : > { %1497 = vmatprep.mubr.f32.mxu0 %v13868_v14 }
 0x1b9   : > { %1498 = vmatmul.mubr.f32.gmra.mrb[62].mxu0 %v14371_v37  ;;  %v12171_v37 = vpack.c.bf16 %v9869_v33, %v9866_v32  ;;  %v9868_v32 = vld [vmem:[%s18404_s26 + $0x490] sm:$0xff]  ;;  %v12197_v33 = vpack.c.bf16 %v9912_v45, %v9909_v44  ;;  %v9933_v44 = vld [vmem:[%s18404_s26 + $0x618] sm:$0xff] }
 0x1ba   : > { %1924 = vmatprep.mubr.f32.mxu0 %v13868_v14  ;;  %v12201_v39 = vpack.c.bf16 %v9871_v34, %v9868_v32  ;;  %v9937_v45 = vld [vmem:[%s18404_s26 + $0x638] sm:$0xff]  ;;  %v9936_v34 = vld [vmem:[%s18404_s26 + $0x630] sm:$0xff] }
 0x251   : > { %v11371_v36 = vpop.f32.mrb[16].mxu1 }
 0x252   : > { %v1732_v38 = vpop.f32.mrb[17].mxu1 }
 0x253   : > { %1925 = vmatmul.mubr.f32.vlgmr.msra.gmra.mrb[32].mxu0 %v1732_v38  ;;  %11425 = vmatprep.mubr.f32.mxu1 %v1732_v38 }
 0x254   : > { %11426 = vmatmul.mubr.f32.vlgmr.msra.gmra.mrb[0].mxu1 %v11371_v36  ;;  %1930 = vmatprep.mubr.f32.mxu0 %v13868_v14 }
 0x255   : > { %v11374_v49 = vpop.f32.mrb[18].mxu1  ;;  %12140 = vmatpush3.bf16.msra.mxu1 %v14032_v4  ;;  %12172 = vmatpush1.bf16.msra.mxu0 %v12171_v37 }
 0x256   : > { %v1742_v51 = vpop.f32.mrb[19].mxu1  ;;  %12142 = vmatprep.subr.bf16.mxu1 %v14035_v6  ;;  %12174 = vmatprep.subr.bf16.mxu0 %v12173_v46  ;;  %v9850_v46 = vld [vmem:[%s18401_s29 + $0x180] sm:$0xff] }
 0x257   : > { %1931 = vmatmul.mubr.f32.gmra.mrb[34].mxu0 %v11371_v36  ;;  %11428 = vmatprep.mubr.f32.mxu1 %v1742_v51  ;;  %v9911_v36 = vld [vmem:[%s18404_s26 + $0x5e8] sm:$0xff] }
 0x258   : > { %11429 = vmatmul.mubr.f32.gmra.mrb[2].mxu1 %v11374_v49  ;;  %1936 = vmatprep.mubr.f32.mxu0 %v13868_v14  ;;  %v12199_v26 = vpack.c.bf16 %v9911_v36, %v9908_v35  ;;  %v9939_v35 = vld [vmem:[%s18404_s26 + $0x648] sm:$0xff] }
 0x259   : > { %v11377_v25 = vpop.f32.mrb[20].mxu1  ;;  %12144 = vmatpush3.bf16.msra.mxu1 %v14035_v6  ;;  %12176 = vmatpush1.bf16.msra.mxu0 %v12175_v50  ;;  %v9852_v50 = vld [vmem:[%s18401_s29 + $0x190] sm:$0xff]  ;;  %v9943_v36 = vld [vmem:[%s18404_s26 + $0x668] sm:$0xff] }
 0x25a   : > { %v1752_v58 = vpop.f32.mrb[21].mxu1  ;;  %12146 = vmatprep.subr.bf16.mxu1 %v14042_v9  ;;  %12178 = vmatprep.subr.bf16.mxu0 %v12177_v52  ;;  %v9880_v52 = vld [vmem:[%s18404_s26 + $0x4f0] sm:$0xff] }
 0x25b   : > { %1937 = vmatmul.mubr.f32.gmra.mrb[36].mxu0 %v1742_v51  ;;  %11431 = vmatprep.mubr.f32.mxu1 %v1752_v58  ;;  %v12205_v51 = vpack.c.bf16 %v9877_v48, %v9874_v47  ;;  %v12209_v56 = vpack.c.bf16 %v9883_v53, %v9880_v52  ;;  %v9942_v47 = vld [vmem:[%s18404_s26 + $0x660] sm:$0xff]  ;;  %v9945_v48 = vld [vmem:[%s18404_s26 + $0x678] sm:$0xff] }
 0x25c   : > { %11432 = vmatmul.mubr.f32.gmra.mrb[4].mxu1 %v11377_v25  ;;  %1942 = vmatprep.mubr.f32.mxu0 %v13868_v14 }
 0x25d   : > { %v14869_v0 = vpop.f32.mrb[22].mxu1  ;;  %12148 = vmatpush3.bf16.msra.mxu1 %v14042_v9  ;;  %12180 = vmatpush1.bf16.msra.mxu0 %v12179_v57  ;;  %v9889_v57 = vld [vmem:[%s18404_s26 + $0x538] sm:$0xff] }
 0x25e   : > { %v1762_v22 = vpop.f32.mrb[23].mxu1  ;;  %12150 = vmatprep.subr.bf16.mxu1 %v14048_v12  ;;  %12182 = vmatprep.subr.bf16.mxu0 %v12181_v59  ;;  %v9856_v59 = vld [vmem:[%s18401_s29 + $0x1b0] sm:$0xff] }
 0x25f   : > { %1943 = vmatmul.mubr.f32.gmra.mrb[38].mxu0 %v11374_v49  ;;  %11434 = vmatprep.mubr.f32.mxu1 %v1762_v22  ;;  %v9851_v49 = vld [vmem:[%s18401_s29 + $0x188] sm:$0xff] }
 0x260   : > { %11435 = vmatmul.mubr.f32.gmra.mrb[6].mxu1 %v14869_v0  ;;  %1948 = vmatprep.mubr.f32.mxu0 %v13868_v14 }
 0x261   : > { %v14887_v10 = vpop.f32.mrb[24].mxu1  ;;  %12152 = vmatpush3.bf16.msra.mxu1 %v14048_v12  ;;  %12184 = vmatpush1.bf16.msra.mxu0 %v12183_v1  ;;  %v12217_v1 = vpack.c.bf16 %v9895_v62, %v9892_v61  ;;  %v9957_v61 = vld [vmem:[%s18404_s26 + $0x6d8] sm:$0xff]  ;;  %v9964_v62 = vld [vmem:[%s18404_s26 + $0x710] sm:$0xff] }
 0x262   : > { %v14890_v13 = vpop.f32.mrb[25].mxu1  ;;  %12154 = vmatprep.subr.bf16.mxu1 %v14056_v17  ;;  %12186 = vmatprep.subr.bf16.mxu0 %v12185_v28  ;;  %v9901_v28 = vld [vmem:[%s18404_s26 + $0x598] sm:$0xff] }
 0x263   : > { %1949 = vmatmul.mubr.f32.gmra.mrb[40].mxu0 %v1752_v58  ;;  %11437 = vmatprep.mubr.f32.mxu1 %v14890_v13  ;;  %v9855_v58 = vld [vmem:[%s18401_s29 + $0x1a8] sm:$0xff] }
 0x264   : > { %11438 = vmatmul.mubr.f32.gmra.mrb[8].mxu1 %v14887_v10  ;;  %1954 = vmatprep.mubr.f32.mxu0 %v13868_v14 }
 0x265   : > { %v14908_v18 = vpop.f32.mrb[26].mxu1  ;;  %12156 = vmatpush3.bf16.msra.mxu1 %v14056_v17  ;;  %12188 = vmatpush1.bf16.msra.mxu0 %v12187_v11  ;;  %v9861_v11 = vld [vmem:[%s18401_s29 + $0x1d8] sm:$0xff] }
 0x266   : > { %v14911_v40 = vpop.f32.mrb[27].mxu1  ;;  %12158 = vmatprep.subr.bf16.mxu1 %v14062_v20  ;;  %12190 = vmatprep.subr.bf16.mxu0 %v12189_v3 }
 0x267   : > { %1955 = vmatmul.mubr.f32.gmra.mrb[42].mxu0 %v11377_v25  ;;  %11440 = vmatprep.mubr.f32.mxu1 %v14911_v40  ;;  %v9886_v25 = vld [vmem:[%s18404_s26 + $0x520] sm:$0xff] }
 0x268   : > { %11441 = vmatmul.mubr.f32.gmra.mrb[10].mxu1 %v14908_v18  ;;  %1960 = vmatprep.mubr.f32.mxu0 %v13868_v14  ;;  %v12213_v60 = vpack.c.bf16 %v9889_v57, %v9886_v25 }
 0x269   : > { %v14929_v29 = vpop.f32.mrb[28].mxu1  ;;  %12160 = vmatpush3.bf16.msra.mxu1 %v14062_v20  ;;  %12192 = vmatpush1.bf16.msra.mxu0 %v12191_v19  ;;  %v9865_v19 = vld [vmem:[%s18401_s29 + $0x1f8] sm:$0xff] }
 0x26a   : > { %v14932_v31 = vpop.f32.mrb[29].mxu1  ;;  %12162 = vmatprep.subr.bf16.mxu1 %v14068_v23  ;;  %12194 = vmatprep.subr.bf16.mxu0 %v12193_v42  ;;  %v9934_v42 = vld [vmem:[%s18404_s26 + $0x620] sm:$0xff] }
 0x26b   : > { %1961 = vmatmul.mubr.f32.gmra.mrb[44].mxu0 %v1762_v22  ;;  %11443 = vmatprep.mubr.f32.mxu1 %v14932_v31  ;;  %v9898_v22 = vld [vmem:[%s18404_s26 + $0x580] sm:$0xff] }
 0x26c   : > { %11444 = vmatmul.mubr.f32.gmra.mrb[12].mxu1 %v14929_v29  ;;  %1966 = vmatprep.mubr.f32.mxu0 %v13868_v14  ;;  %v12221_v7 = vpack.c.bf16 %v9901_v28, %v9898_v22  ;;  %v9960_v28 = vld [vmem:[%s18404_s26 + $0x6f0] sm:$0xff] }
 0x26d   : > { %v14950_v37 = vpop.f32.mrb[30].mxu1  ;;  %12164 = vmatpush3.bf16.msra.mxu1 %v14068_v23  ;;  %12196 = vmatpush1.bf16.msra.mxu0 %v12195_v30 }
 0x26e   : > { %v14953_v38 = vpop.f32.mrb[31].mxu1  ;;  %12166 = vmatprep.subr.bf16.mxu1 %v14072_v24  ;;  %12198 = vmatprep.subr.bf16.mxu0 %v12197_v33 }
 0x26f   : > { %1967 = vmatmul.mubr.f32.gmra.mrb[46].mxu0 %v14869_v0  ;;  %11446 = vmatprep.mubr.f32.mxu1 %v14953_v38  ;;  %v9858_v0 = vld [vmem:[%s18401_s29 + $0x1c0] sm:$0xff] }
 0x270   : > { %11447 = vmatmul.mubr.f32.gmra.mrb[14].mxu1 %v14950_v37  ;;  %1972 = vmatprep.mubr.f32.mxu0 %v13868_v14 }
 0x271   : > { %12168 = vmatpush3.bf16.msra.mxu1 %v14072_v24  ;;  %11481 = vmatprep.mubr.f32.mxu1 %v9850_v46  ;;  %v12271_v46 = vpack.c.bf16 %v9939_v35, %v9936_v34  ;;  %v9944_v34 = vld [vmem:[%s18404_s26 + $0x670] sm:$0xff]  ;;  %v9917_v35 = vld [vmem:[%s18401_s29 + $0x218] sm:$0xff] }
 0x272   : > { %12202 = vmatprep.subr.bf16.mxu1 %v12201_v39  ;;  %12200 = vmatpush1.bf16.msra.mxu0 %v12199_v26 }
 0x273   : > { %1973 = vmatmul.mubr.f32.gmra.mrb[48].mxu0 %v14890_v13  ;;  %v9862_v13 = vld [vmem:[%s18401_s29 + $0x1e0] sm:$0xff] }
 0x274   : > { %11482 = vmatmul.mubr.f32.vlgmr.msra.gmra.mrb[32].mxu1 %v9851_v49  ;;  %1978 = vmatprep.mubr.f32.mxu0 %v13868_v14  ;;  %v9952_v49 = vld [vmem:[%s18404_s26 + $0x6b0] sm:$0xff] }
 0x275   : > { %11484 = vmatprep.mubr.f32.mxu1 %v9852_v50  ;;  %12204 = vmatpush3.bf16.msra.mxu1 %v12201_v39 }
 0x276   : > { %12206 = vmatprep.subr.bf16.mxu1 %v12205_v51 }
 0x277   : > { %1979 = vmatmul.mubr.f32.gmra.mrb[50].mxu0 %v14887_v10  ;;  %v9907_v10 = vld [vmem:[%s18404_s26 + $0x5c8] sm:$0xff] }
 0x278   : > { %11485 = vmatmul.mubr.f32.gmra.mrb[34].mxu1 %v9853_v54  ;;  %1984 = vmatprep.mubr.f32.mxu0 %v13868_v14  ;;  %v12225_v3 = vpack.c.bf16 %v9907_v10, %v9904_v8  ;;  %v9948_v54 = vld [vmem:[%s18404_s26 + $0x690] sm:$0xff] }
 0x279   : > { %11487 = vmatprep.mubr.f32.mxu1 %v9854_v55  ;;  %12208 = vmatpush3.bf16.msra.mxu1 %v12205_v51  ;;  %v12275_v51 = vpack.c.bf16 %v9945_v48, %v9942_v47  ;;  %v9951_v55 = vld [vmem:[%s18404_s26 + $0x6a8] sm:$0xff]  ;;  %v9956_v48 = vld [vmem:[%s18404_s26 + $0x6d0] sm:$0xff] }
 0x27a   : > { %12210 = vmatprep.subr.bf16.mxu1 %v12209_v56  ;;  %v12279_v57 = vpack.c.bf16 %v9951_v55, %v9948_v54  ;;  %v9923_v54 = vld [vmem:[%s18401_s29 + $0x248] sm:$0xff]  ;;  %v9924_v55 = vld [vmem:[%s18401_s29 + $0x250] sm:$0xff] }
 0x27b   : > { %1985 = vmatmul.mubr.f32.gmra.mrb[52].mxu0 %v14911_v40  ;;  %v9931_v40 = vld [vmem:[%s18404_s26 + $0x608] sm:$0xff] }
 0x27c   : > { %11488 = vmatmul.mubr.f32.gmra.mrb[36].mxu1 %v9855_v58  ;;  %1990 = vmatprep.mubr.f32.mxu0 %v13868_v14  ;;  %v12265_v41 = vpack.c.bf16 %v9934_v42, %v9931_v40  ;;  %v9935_v40 = vld [vmem:[%s18404_s26 + $0x628] sm:$0xff] }
 0x27d   : > { %11490 = vmatprep.mubr.f32.mxu1 %v9856_v59  ;;  %12212 = vmatpush3.bf16.msra.mxu1 %v12209_v56  ;;  %v9958_v56 = vld [vmem:[%s18404_s26 + $0x6e0] sm:$0xff]  ;;  %v9975_v42 = vld [vmem:[%s18404_s26 + $0x768] sm:$0xff] }
 0x27e   : > { %12214 = vmatprep.subr.bf16.mxu1 %v12213_v60  ;;  %12266 = vmatprep.subr.bf16.mxu0 %v12265_v41 }
 0x27f   : > { %1991 = vmatmul.mubr.f32.gmra.mrb[54].mxu0 %v14908_v18  ;;  %v12229_v18 = vpack.c.bf16 %v9913_v16, %v9910_v15  ;;  %v9976_v15 = vld [vmem:[%s18404_s26 + $0x770] sm:$0xff] }
 0x280   : > { %11491 = vmatmul.mubr.f32.gmra.mrb[38].mxu1 %v9857_v63  ;;  %1996 = vmatprep.mubr.f32.mxu0 %v13868_v14 }
 0x281   : > { %11493 = vmatprep.mubr.f32.mxu1 %v9858_v0  ;;  %12216 = vmatpush3.bf16.msra.mxu1 %v12213_v60  ;;  %v9954_v60 = vld [vmem:[%s18404_s26 + $0x6c0] sm:$0xff] }
 0x282   : > { %12218 = vmatprep.subr.bf16.mxu1 %v12217_v1  ;;  %v12283_v0 = vpack.c.bf16 %v9957_v61, %v9954_v60  ;;  %v9974_v60 = vld [vmem:[%s18404_s26 + $0x760] sm:$0xff]  ;;  %v9977_v61 = vld [vmem:[%s18404_s26 + $0x778] sm:$0xff] }
 0x283   : > { %1997 = vmatmul.mubr.f32.gmra.mrb[56].mxu0 %v14932_v31  ;;  %v12267_v31 = vpack.c.bf16 %v9933_v44, %v9930_v43  ;;  %v9914_v44 = vld [vmem:[%s18401_s29 + $0x200] sm:$0xff] }
 0x284   : > { %11494 = vmatmul.mubr.f32.gmra.mrb[40].mxu1 %v9859_v2  ;;  %2002 = vmatprep.mubr.f32.mxu0 %v13868_v14  ;;  %v9963_v2 = vld [vmem:[%s18404_s26 + $0x708] sm:$0xff] }
 0x285   : > { %11496 = vmatprep.mubr.f32.mxu1 %v9860_v5  ;;  %12220 = vmatpush3.bf16.msra.mxu1 %v12217_v1  ;;  %v9970_v5 = vld [vmem:[%s18404_s26 + $0x740] sm:$0xff]  ;;  %v12287_v8 = vpack.c.bf16 %v9963_v2, %v9960_v28 }
 0x286   : > { %12222 = vmatprep.subr.bf16.mxu1 %v12221_v7 }
 0x287   : > { %2003 = vmatmul.mubr.f32.gmra.mrb[58].mxu0 %v14929_v29  ;;  %v9940_v29 = vld [vmem:[%s18404_s26 + $0x650] sm:$0xff] }
 0x288   : > { %11497 = vmatmul.mubr.f32.gmra.mrb[42].mxu1 %v9861_v11  ;;  %2008 = vmatprep.mubr.f32.mxu0 %v13868_v14  ;;  %v12269_v33 = vpack.c.bf16 %v9940_v29, %v9937_v45 }
 0x289   : > { %11499 = vmatprep.mubr.f32.mxu1 %v9862_v13  ;;  %12224 = vmatpush3.bf16.msra.mxu1 %v12221_v7  ;;  %v9966_v13 = vld [vmem:[%s18404_s26 + $0x720] sm:$0xff] }
 0x28a   : > { %12226 = vmatprep.subr.bf16.mxu1 %v12225_v3 }
 0x28b   : > { %2009 = vmatmul.mubr.f32.gmra.mrb[60].mxu0 %v14953_v38 }
 0x28c   : > { %11500 = vmatmul.mubr.f32.gmra.mrb[44].mxu1 %v9863_v27  ;;  %2014 = vmatprep.mubr.f32.mxu0 %v13868_v14 }
 0x28d   : > { %11502 = vmatprep.mubr.f32.mxu1 %v9864_v21  ;;  %12228 = vmatpush3.bf16.msra.mxu1 %v12225_v3  ;;  %v9969_v3 = vld [vmem:[%s18404_s26 + $0x738] sm:$0xff] }
 0x28e   : > { %12230 = vmatprep.subr.bf16.mxu1 %v12229_v18  ;;  %v12291_v27 = vpack.c.bf16 %v9969_v3, %v9966_v13 }
 0x28f   : > { %2015 = vmatmul.mubr.f32.gmra.mrb[62].mxu0 %v14950_v37  ;;  %v9946_v37 = vld [vmem:[%s18404_s26 + $0x680] sm:$0xff] }
 0x290   : > { %11503 = vmatmul.mubr.f32.gmra.mrb[46].mxu1 %v9865_v19  ;;  %2489 = vmatprep.mubr.f32.mxu0 %v13868_v14  ;;  %v12273_v26 = vpack.c.bf16 %v9946_v37, %v9943_v36  ;;  %v9918_v36 = vld [vmem:[%s18401_s29 + $0x220] sm:$0xff] }
 0x291   : > { %12232 = vmatpush3.bf16.msra.mxu1 %v12229_v18  ;;  %v9932_v18 = vld [vmem:[%s18404_s26 + $0x610] sm:$0xff] }
 0x292   : > { %12234 = vmatprep.subr.bf16.mxu1 %v14032_v4  ;;  %v12297_v45 = vpack.c.bf16 %v9935_v40, %v9932_v18  ;;  %v3344_v40 = vld [vmem:[%s18405_s3] sm:$0x7]  ;;  %s594_s3 = scalar_lea.vmem [#allocation2], %s593_s23 }
 0x293   : > { %s9661_s2 = sshll.u32 %s594_s3, 4  ;;  %s18315_s2 = int_to_ptr.vmem [resolvable:$true] %s9661_s2 }
 0x294   : > { %s13804_s24 = scalar_lea.vmem %s18315_s2, 16  ;;  %p13811_p0 = scmp.lt.s32.totalorder %s18315_s2, %s13809_s20 }
 0x295   : > { %p13805_p11 = scmp.ne.s32.totalorder %s18315_s2, %s13804_s24 }
 0x297   : > { %p13806_p12 = pnand %p13805_p11, %p14009_p5 }
 0x299   : > { %p13807_p13 = pneg %p13806_p12 }
 0x347   : > { %v11483_v30 = vpop.f32.mrb[32].mxu1 }
 0x348   : > { %v2297_v32 = vpop.f32.mrb[33].mxu1 }
 0x349   : > { %2490 = vmatmul.mubr.f32.vlgmr.msra.gmra.mrb[32].mxu0 %v2297_v32  ;;  %11537 = vmatprep.mubr.f32.mxu1 %v2297_v32  ;;  %v9916_v32 = vld [vmem:[%s18401_s29 + $0x210] sm:$0xff] }
 0x34a   : > { %11538 = vmatmul.mubr.f32.vlgmr.msra.gmra.mrb[0].mxu1 %v11483_v30  ;;  %2495 = vmatprep.mubr.f32.mxu0 %v13868_v14 }
 0x34b   : > { %v11486_v38 = vpop.f32.mrb[34].mxu1  ;;  %12236 = vmatpush3.bf16.msra.mxu1 %v14032_v4  ;;  %12268 = vmatpush1.bf16.msra.mxu0 %v12267_v31  ;;  %v9949_v4 = vld [vmem:[%s18404_s26 + $0x698] sm:$0xff]  ;;  %v9915_v31 = vld [vmem:[%s18401_s29 + $0x208] sm:$0xff] }
 0x34c   : > { %v2307_v39 = vpop.f32.mrb[35].mxu1  ;;  %12238 = vmatprep.subr.bf16.mxu1 %v14035_v6  ;;  %12270 = vmatprep.subr.bf16.mxu0 %v12269_v33  ;;  %v12277_v53 = vpack.c.bf16 %v9952_v49, %v9949_v4  ;;  %v9959_v4 = vld [vmem:[%s18404_s26 + $0x6e8] sm:$0xff]  ;;  %v9921_v49 = vld [vmem:[%s18401_s29 + $0x238] sm:$0xff] }
 0x34d   : > { %2496 = vmatmul.mubr.f32.gmra.mrb[34].mxu0 %v11483_v30  ;;  %11540 = vmatprep.mubr.f32.mxu1 %v2307_v39  ;;  %v9941_v30 = vld [vmem:[%s18404_s26 + $0x658] sm:$0xff] }
 0x34e   : > { %11541 = vmatmul.mubr.f32.gmra.mrb[2].mxu1 %v11486_v38  ;;  %2501 = vmatprep.mubr.f32.mxu0 %v13868_v14 }
 0x34f   : > { %v11489_v50 = vpop.f32.mrb[36].mxu1  ;;  %12240 = vmatpush3.bf16.msra.mxu1 %v14035_v6  ;;  %12272 = vmatpush1.bf16.msra.mxu0 %v12271_v46  ;;  %v9955_v6 = vld [vmem:[%s18404_s26 + $0x6c8] sm:$0xff]  ;;  %v9953_v46 = vld [vmem:[%s18404_s26 + $0x6b8] sm:$0xff] }
 0x350   : > { %v2317_v52 = vpop.f32.mrb[37].mxu1  ;;  %12242 = vmatprep.subr.bf16.mxu1 %v14042_v9  ;;  %12274 = vmatprep.subr.bf16.mxu0 %v12273_v26  ;;  %v12281_v59 = vpack.c.bf16 %v9958_v56, %v9955_v6  ;;  %v9920_v26 = vld [vmem:[%s18401_s29 + $0x230] sm:$0xff] }
 0x351   : > { %2502 = vmatmul.mubr.f32.gmra.mrb[36].mxu0 %v2307_v39  ;;  %11543 = vmatprep.mubr.f32.mxu1 %v2317_v52  ;;  %v9919_v39 = vld [vmem:[%s18401_s29 + $0x228] sm:$0xff]  ;;  %v9968_v56 = vld [vmem:[%s18404_s26 + $0x730] sm:$0xff] }
 0x352   : > { %11544 = vmatmul.mubr.f32.gmra.mrb[4].mxu1 %v11489_v50  ;;  %2507 = vmatprep.mubr.f32.mxu0 %v13868_v14 }
 0x353   : > { %v15129_v25 = vpop.f32.mrb[38].mxu1  ;;  %12244 = vmatpush3.bf16.msra.mxu1 %v14042_v9  ;;  %12276 = vmatpush1.bf16.msra.mxu0 %v12275_v51  ;;  %v9961_v9 = vld [vmem:[%s18404_s26 + $0x6f8] sm:$0xff]  ;;  %v12313_v51 = vpack.c.bf16 %v9959_v4, %v9956_v48 }
 0x354   : > { %v2327_v58 = vpop.f32.mrb[39].mxu1  ;;  %12246 = vmatprep.subr.bf16.mxu1 %v14048_v12  ;;  %12278 = vmatprep.subr.bf16.mxu0 %v12277_v53  ;;  %v12285_v22 = vpack.c.bf16 %v9964_v62, %v9961_v9  ;;  %v9965_v53 = vld [vmem:[%s18404_s26 + $0x718] sm:$0xff]  ;;  %v9927_v9 = vld [vmem:[%s18401_s29 + $0x268] sm:$0xff]  ;;  %v9928_v62 = vld [vmem:[%s18401_s29 + $0x270] sm:$0xff] }
 0x355   : > { %2508 = vmatmul.mubr.f32.gmra.mrb[38].mxu0 %v11486_v38  ;;  %11546 = vmatprep.mubr.f32.mxu1 %v2327_v58  ;;  %v9950_v38 = vld [vmem:[%s18404_s26 + $0x6a0] sm:$0xff] }
 0x356   : > { %11547 = vmatmul.mubr.f32.gmra.mrb[6].mxu1 %v15129_v25  ;;  %2513 = vmatprep.mubr.f32.mxu0 %v13868_v14  ;;  %v12309_v47 = vpack.c.bf16 %v9953_v46, %v9950_v38 }
 0x357   : > { %v15147_v63 = vpop.f32.mrb[40].mxu1  ;;  %12248 = vmatpush3.bf16.msra.mxu1 %v14048_v12  ;;  %12280 = vmatpush1.bf16.msra.mxu0 %v12279_v57  ;;  %v9967_v12 = vld [vmem:[%s18404_s26 + $0x728] sm:$0xff]  ;;  %v9925_v57 = vld [vmem:[%s18401_s29 + $0x258] sm:$0xff] }
 0x358   : > { %v15150_v1 = vpop.f32.mrb[41].mxu1  ;;  %12250 = vmatprep.subr.bf16.mxu1 %v14056_v17  ;;  %12282 = vmatprep.subr.bf16.mxu0 %v12281_v59  ;;  %v12289_v11 = vpack.c.bf16 %v9970_v5, %v9967_v12 }
 0x359   : > { %2514 = vmatmul.mubr.f32.gmra.mrb[40].mxu0 %v2317_v52  ;;  %11549 = vmatprep.mubr.f32.mxu1 %v15150_v1  ;;  %v9962_v52 = vld [vmem:[%s18404_s26 + $0x700] sm:$0xff] }
 0x35a   : > { %11550 = vmatmul.mubr.f32.gmra.mrb[8].mxu1 %v15147_v63  ;;  %2519 = vmatprep.mubr.f32.mxu0 %v13868_v14  ;;  %v12317_v6 = vpack.c.bf16 %v9965_v53, %v9962_v52 }
 0x35b   : > { %v15168_v7 = vpop.f32.mrb[42].mxu1  ;;  %12252 = vmatpush3.bf16.msra.mxu1 %v14056_v17  ;;  %12284 = vmatpush1.bf16.msra.mxu0 %v12283_v0  ;;  %v9973_v17 = vld [vmem:[%s18404_s26 + $0x758] sm:$0xff] }
 0x35c   : > { %v15171_v10 = vpop.f32.mrb[43].mxu1  ;;  %12254 = vmatprep.subr.bf16.mxu1 %v14062_v20  ;;  %12286 = vmatprep.subr.bf16.mxu0 %v12285_v22  ;;  %v12293_v19 = vpack.c.bf16 %v9976_v15, %v9973_v17  ;;  %v9929_v0 = vld [vmem:[%s18401_s29 + $0x278] sm:$0xff] }
 0x35d   : > { %2520 = vmatmul.mubr.f32.gmra.mrb[42].mxu0 %v11489_v50  ;;  %11552 = vmatprep.mubr.f32.mxu1 %v15171_v10  ;;  %v9922_v50 = vld [vmem:[%s18401_s29 + $0x240] sm:$0xff] }
 0x35e   : > { %11553 = vmatmul.mubr.f32.gmra.mrb[10].mxu1 %v15168_v7  ;;  %2525 = vmatprep.mubr.f32.mxu0 %v13868_v14 }
 0x35f   : > { %v15189_v16 = vpop.f32.mrb[44].mxu1  ;;  %12256 = vmatpush3.bf16.msra.mxu1 %v14062_v20  ;;  %12288 = vmatpush1.bf16.msra.mxu0 %v12287_v8  ;;  %v9972_v20 = vld [vmem:[%s18404_s26 + $0x750] sm:$0xff] }
 0x360   : > { %v15192_v21 = vpop.f32.mrb[45].mxu1  ;;  %12258 = vmatprep.subr.bf16.mxu1 %v14068_v23  ;;  %12290 = vmatprep.subr.bf16.mxu0 %v12289_v11  ;;  %v12295_v29 = vpack.c.bf16 %v9975_v42, %v9972_v20 }
 0x361   : > { %2526 = vmatmul.mubr.f32.gmra.mrb[44].mxu0 %v2327_v58  ;;  %11555 = vmatprep.mubr.f32.mxu1 %v15192_v21  ;;  %v9926_v58 = vld [vmem:[%s18401_s29 + $0x260] sm:$0xff] }
 0x362   : > { %11556 = vmatmul.mubr.f32.gmra.mrb[12].mxu1 %v15189_v16  ;;  %2531 = vmatprep.mubr.f32.mxu0 %v13868_v14 }
 0x363   : > { %v15210_v41 = vpop.f32.mrb[46].mxu1  ;;  %12260 = vmatpush3.bf16.msra.mxu1 %v14068_v23  ;;  %12292 = vmatpush1.bf16.msra.mxu0 %v12291_v27  ;;  %v9938_v23 = vld [vmem:[%s18404_s26 + $0x640] sm:$0xff] }
 0x364   : > { %v15213_v43 = vpop.f32.mrb[47].mxu1  ;;  %12262 = vmatprep.subr.bf16.mxu1 %v14072_v24  ;;  %12294 = vmatprep.subr.bf16.mxu0 %v12293_v19  ;;  %v12301_v33 = vpack.c.bf16 %v9941_v30, %v9938_v23 }
 0x365   : > { %2532 = vmatmul.mubr.f32.gmra.mrb[46].mxu0 %v15129_v25  ;;  %11558 = vmatprep.mubr.f32.mxu1 %v15213_v43  ;;  %v9971_v25 = vld [vmem:[%s18404_s26 + $0x748] sm:$0xff] }
 0x366   : > { %11559 = vmatmul.mubr.f32.gmra.mrb[14].mxu1 %v15210_v41  ;;  %2537 = vmatprep.mubr.f32.mxu0 %v13868_v14  ;;  %v12321_v59 = vpack.c.bf16 %v9971_v25, %v9968_v56 }
 0x367   : > { %12264 = vmatpush3.bf16.msra.mxu1 %v14072_v24  ;;  %11593 = vmatprep.mubr.f32.mxu1 %v9914_v44  ;;  %v9947_v24 = vld [vmem:[%s18404_s26 + $0x688] sm:$0xff] }
 0x368   : > { %12298 = vmatprep.subr.bf16.mxu1 %v12297_v45  ;;  %12296 = vmatpush1.bf16.msra.mxu0 %v12295_v29  ;;  %v12305_v37 = vpack.c.bf16 %v9947_v24, %v9944_v34 }
 0x369   : > { %2538 = vmatmul.mubr.f32.gmra.mrb[48].mxu0 %v15150_v1 }
 0x36a   : > { %11594 = vmatmul.mubr.f32.vlgmr.msra.gmra.mrb[48].mxu1 %v9915_v31  ;;  %2543 = vmatprep.mubr.f32.mxu0 %v13868_v14 }
 0x36b   : > { %11596 = vmatprep.mubr.f32.mxu1 %v9916_v32  ;;  %12300 = vmatpush3.bf16.msra.mxu1 %v12297_v45 }
 0x36c   : > { %12302 = vmatprep.subr.bf16.mxu1 %v12301_v33 }
 0x36d   : > { %2544 = vmatmul.mubr.f32.gmra.mrb[50].mxu0 %v15147_v63  ;;  %v12325_v63 = vpack.c.bf16 %v9977_v61, %v9974_v60 }
 0x36e   : > { %11597 = vmatmul.mubr.f32.gmra.mrb[50].mxu1 %v9917_v35  ;;  %2549 = vmatprep.mubr.f32.mxu0 %v13868_v14 }
 0x36f   : > { %11599 = vmatprep.mubr.f32.mxu1 %v9918_v36  ;;  %12304 = vmatpush3.bf16.msra.mxu1 %v12301_v33 }
 0x370   : > { %12306 = vmatprep.subr.bf16.mxu1 %v12305_v37 }
 0x371   : > { %2550 = vmatmul.mubr.f32.gmra.mrb[52].mxu0 %v15171_v10 }
 0x372   : > { %11600 = vmatmul.mubr.f32.gmra.mrb[52].mxu1 %v9919_v39  ;;  %2555 = vmatprep.mubr.f32.mxu0 %v13868_v14 }
 0x373   : > { %11602 = vmatprep.mubr.f32.mxu1 %v9920_v26  ;;  %12308 = vmatpush3.bf16.msra.mxu1 %v12305_v37 }
 0x374   : > { %12310 = vmatprep.subr.bf16.mxu1 %v12309_v47 }
 0x375   : > { %2556 = vmatmul.mubr.f32.gmra.mrb[54].mxu0 %v15168_v7 }
 0x376   : > { %11603 = vmatmul.mubr.f32.gmra.mrb[54].mxu1 %v9921_v49  ;;  %2561 = vmatprep.mubr.f32.mxu0 %v13868_v14 }
 0x377   : > { %11605 = vmatprep.mubr.f32.mxu1 %v9922_v50  ;;  %12312 = vmatpush3.bf16.msra.mxu1 %v12309_v47 }
 0x378   : > { %12314 = vmatprep.subr.bf16.mxu1 %v12313_v51 }
 0x379   : > { %2562 = vmatmul.mubr.f32.gmra.mrb[56].mxu0 %v15192_v21  ;;  %v3346_v21 = vlaneseq }
 0x37a   : > { %11606 = vmatmul.mubr.f32.gmra.mrb[56].mxu1 %v9923_v54  ;;  %2567 = vmatprep.mubr.f32.mxu0 %v13868_v14 }
 0x37b   : > { %11608 = vmatprep.mubr.f32.mxu1 %v9924_v55  ;;  %12316 = vmatpush3.bf16.msra.mxu1 %v12313_v51  ;;  %v15344_v18 = vshrl.u32 %v3346_v21, 7 }
 0x37c   : > { %12318 = vmatprep.subr.bf16.mxu1 %v12317_v6 }
 0x37d   : > { %2568 = vmatmul.mubr.f32.gmra.mrb[58].mxu0 %v15189_v16  ;;  %v3356_v19 = vsub.s32 2, %v15344_v18  ;;  %v15351_v20 = vsub.s32 0, %v15344_v18  ;;  %v15354_v42 = vsub.s32 1, %v15344_v18 }
 0x37e   : > { %11609 = vmatmul.mubr.f32.gmra.mrb[58].mxu1 %v9925_v57  ;;  %2573 = vmatprep.mubr.f32.mxu0 %v13868_v14 }
 0x37f   : > { %11611 = vmatprep.mubr.f32.mxu1 %v9926_v58  ;;  %12320 = vmatpush3.bf16.msra.mxu1 %v12317_v6  ;;  %v15364_v45 = vrot.slane %v3344_v40, %v15354_v42 }
 0x380   : > { %12322 = vmatprep.subr.bf16.mxu1 %v12321_v59 }
 0x381   : > { %2574 = vmatmul.mubr.f32.gmra.mrb[60].mxu0 %v15213_v43  ;;  %v15361_v43 = vrot.slane %v3344_v40, %v15351_v20 }
 0x382   : > { %11612 = vmatmul.mubr.f32.gmra.mrb[60].mxu1 %v9927_v9  ;;  %2579 = vmatprep.mubr.f32.mxu0 %v13868_v14 }
 0x383   : > { %11614 = vmatprep.mubr.f32.mxu1 %v9928_v62  ;;  %12324 = vmatpush3.bf16.msra.mxu1 %v12321_v59 }
 0x384   : > { %12326 = vmatprep.subr.bf16.mxu1 %v12325_v63 }
 0x385   : > { %2580 = vmatmul.mubr.f32.gmra.mrb[62].mxu0 %v15210_v41  ;;  %v15358_v41 = vrot.slane %v3344_v40, %v3356_v19 }
 0x386   : > { %11615 = vmatmul.mubr.f32.gmra.mrb[62].mxu1 %v9929_v0  ;;  %3054 = vmatprep.mubr.f32.mxu0 %v13868_v14 }
 0x387   : > { %12328 = vmatpush3.bf16.msra.mxu1 %v12325_v63 }
 0x43d   : > { %v11595_v1 = vpop.f32.mrb[48].mxu1 }
 0x43e   : > { %v2862_v22 = vpop.f32.mrb[49].mxu1 }
 0x43f   : > { %3055 = vmatmul.mubr.f32.vlgmr.msra.gmra.mrb[32].mxu0 %v2862_v22  ;;  %11649 = vmatprep.mubr.f32.mxu1 %v2862_v22 }
 0x440   : > { %11650 = vmatmul.mubr.f32.vlgmr.msra.gmra.mrb[0].mxu1 %v11595_v1  ;;  %3060 = vmatprep.mubr.f32.mxu0 %v13868_v14 }
 0x441   : > { %v11598_v28 = vpop.f32.mrb[50].mxu1 }
 0x442   : > { %v2872_v2 = vpop.f32.mrb[51].mxu1 }
 0x443   : > { %3061 = vmatmul.mubr.f32.gmra.mrb[34].mxu0 %v11595_v1  ;;  %11652 = vmatprep.mubr.f32.mxu1 %v2872_v2 }
 0x444   : > { %11653 = vmatmul.mubr.f32.gmra.mrb[2].mxu1 %v11598_v28  ;;  %3066 = vmatprep.mubr.f32.mxu0 %v13868_v14 }
 0x445   : > { %v11601_v12 = vpop.f32.mrb[52].mxu1 }
 0x446   : > { %v2882_v5 = vpop.f32.mrb[53].mxu1 }
 0x447   : > { %3067 = vmatmul.mubr.f32.gmra.mrb[36].mxu0 %v2872_v2  ;;  %11655 = vmatprep.mubr.f32.mxu1 %v2882_v5 }
 0x448   : > { %11656 = vmatmul.mubr.f32.gmra.mrb[4].mxu1 %v11601_v12  ;;  %3072 = vmatprep.mubr.f32.mxu0 %v13868_v14 }
 0x449   : > { %v11604_v7 = vpop.f32.mrb[54].mxu1 }
 0x44a   : > { %v2892_v8 = vpop.f32.mrb[55].mxu1 }
 0x44b   : > { %3073 = vmatmul.mubr.f32.gmra.mrb[38].mxu0 %v11598_v28  ;;  %11658 = vmatprep.mubr.f32.mxu1 %v2892_v8 }
 0x44c   : > { %11659 = vmatmul.mubr.f32.gmra.mrb[6].mxu1 %v11604_v7  ;;  %3078 = vmatprep.mubr.f32.mxu0 %v13868_v14 }
 0x44d   : > { %v11607_v10 = vpop.f32.mrb[56].mxu1 }
 0x44e   : > { %v2902_v11 = vpop.f32.mrb[57].mxu1 }
 0x44f   : > { %3079 = vmatmul.mubr.f32.gmra.mrb[40].mxu0 %v2882_v5  ;;  %11661 = vmatprep.mubr.f32.mxu1 %v2902_v11 }
 0x450   : > { %11662 = vmatmul.mubr.f32.gmra.mrb[8].mxu1 %v11607_v10  ;;  %3084 = vmatprep.mubr.f32.mxu0 %v13868_v14 }
 0x451   : > { %v11610_v13 = vpop.f32.mrb[58].mxu1 }
 0x452   : > { %v2912_v3 = vpop.f32.mrb[59].mxu1 }
 0x453   : > { %3085 = vmatmul.mubr.f32.gmra.mrb[42].mxu0 %v11601_v12  ;;  %11664 = vmatprep.mubr.f32.mxu1 %v2912_v3 }
 0x454   : > { %11665 = vmatmul.mubr.f32.gmra.mrb[10].mxu1 %v11610_v13  ;;  %3090 = vmatprep.mubr.f32.mxu0 %v13868_v14 }
 0x455   : > { %v11613_v17 = vpop.f32.mrb[60].mxu1 }
 0x456   : > { %v2922_v15 = vpop.f32.mrb[61].mxu1 }
 0x457   : > { %3091 = vmatmul.mubr.f32.gmra.mrb[44].mxu0 %v2892_v8  ;;  %11667 = vmatprep.mubr.f32.mxu1 %v2922_v15 }
 0x458   : > { %11668 = vmatmul.mubr.f32.gmra.mrb[12].mxu1 %v11613_v17  ;;  %3096 = vmatprep.mubr.f32.mxu0 %v13868_v14 }
 0x459   : > { %v11616_v16 = vpop.f32.mrb[62].mxu1 }
 0x45a   : > { %v2932_v27 = vpop.f32.mrb[63].mxu1 }
 0x45b   : > { %3097 = vmatmul.mubr.f32.gmra.mrb[46].mxu0 %v11604_v7  ;;  %11670 = vmatprep.mubr.f32.mxu1 %v2932_v27 }
 0x45c   : > { %11671 = vmatmul.mubr.f32.gmra.mrb[14].mxu1 %v11616_v16  ;;  %3102 = vmatprep.mubr.f32.mxu0 %v13868_v14 }
 0x45d   : > { %3529 = vmatprep.mubr.f32.mxu1 %v13868_v14 }
 0x45f   : > { %3103 = vmatmul.mubr.f32.gmra.mrb[48].mxu0 %v2902_v11 }
 0x460   : > { %3108 = vmatprep.mubr.f32.mxu0 %v13868_v14 }
 0x463   : > { %3109 = vmatmul.mubr.f32.gmra.mrb[50].mxu0 %v11607_v10 }
 0x464   : > { %3114 = vmatprep.mubr.f32.mxu0 %v13868_v14 }
 0x467   : > { %3115 = vmatmul.mubr.f32.gmra.mrb[52].mxu0 %v2912_v3 }
 0x468   : > { %3120 = vmatprep.mubr.f32.mxu0 %v13868_v14 }
 0x46b   : > { %3121 = vmatmul.mubr.f32.gmra.mrb[54].mxu0 %v11610_v13 }
 0x46c   : > { %3126 = vmatprep.mubr.f32.mxu0 %v13868_v14 }
 0x46f   : > { %3127 = vmatmul.mubr.f32.gmra.mrb[56].mxu0 %v2922_v15 }
 0x470   : > { %3132 = vmatprep.mubr.f32.mxu0 %v13868_v14 }
 0x473   : > { %3133 = vmatmul.mubr.f32.gmra.mrb[58].mxu0 %v11613_v17 }
 0x474   : > { %3138 = vmatprep.mubr.f32.mxu0 %v13868_v14 }
 0x477   : > { %3139 = vmatmul.mubr.f32.gmra.mrb[60].mxu0 %v2932_v27 }
 0x478   : > { %3144 = vmatprep.mubr.f32.mxu0 %v13868_v14 }
 0x47b   : > { %3145 = vmatmul.mubr.f32.gmra.mrb[62].mxu0 %v11616_v16 }
 0x47c   : > { %3756 = vmatprep.mubr.f32.mxu0 %v13868_v14 }
 0x512   : > { %v3056_v44 = vpop.f32.mrb[32].mxu0 }
 0x513   : > { %v3058_v29 = vpop.f32.mrb[33].mxu0  ;;  %v11651_v23 = vpop.f32.mrb[0].mxu1  ;;  %v3361_v32 = vadd.f32 %v15361_v43, %v3056_v44 }
 0x514   : > { %v3366_v30 = vadd.f32 %v11651_v23, %v15358_v41  ;;  %v3217_v31 = vpop.f32.mrb[1].mxu1  ;;  %v3362_v34 = vadd.f32 %v15364_v45, %v3058_v29 }
 0x515   : > { %v3363_v33 = vadd.f32 %v15358_v41, %v3217_v31  ;;  %v3409_v48 = vmax.f32 %v3361_v32, 0.0 }
 0x516   : > { %v3414_v24 = vmax.f32 %v3366_v30, 0.0  ;;  %v3062_v35 = vpop.f32.mrb[34].mxu0  ;;  %v3410_v51 = vmax.f32 %v3362_v34, 0.0 }
 0x517   : > { %v3411_v36 = vmax.f32 %v3363_v33, 0.0  ;;  %v3364_v37 = vadd.f32 %v15361_v43, %v3062_v35  ;;  %v3064_v38 = vpop.f32.mrb[35].mxu0  ;;  %v11654_v46 = vpop.f32.mrb[2].mxu1 }
 0x518   : > { %v3365_v39 = vadd.f32 %v15364_v45, %v3064_v38  ;;  %v3372_v26 = vadd.f32 %v11654_v46, %v15358_v41  ;;  %v3227_v47 = vpop.f32.mrb[3].mxu1 }
 0x519   : > { %v15373_v4 = vpack.c.bf16 %v3414_v24, %v3411_v36  ;;  %v3412_v49 = vmax.f32 %v3364_v37, 0.0  ;;  %v3369_v50 = vadd.f32 %v15358_v41, %v3227_v47 }
 0x51a   : > { %v3413_v52 = vmax.f32 %v3365_v39, 0.0  ;;  %v3420_v53 = vmax.f32 %v3372_v26, 0.0  ;;  %v3068_v54 = vpop.f32.mrb[36].mxu0 }
 0x51b   : > { %v12331_v55 = vpack.c.bf16 %v3412_v49, %v3409_v48  ;;  %v3417_v6 = vmax.f32 %v3369_v50, 0.0  ;;  %v3070_v56 = vpop.f32.mrb[37].mxu0  ;;  %v11657_v25 = vpop.f32.mrb[4].mxu1  ;;  %v3367_v61 = vadd.f32 %v15361_v43, %v3068_v54 }
 0x51c   : > { %v12329_v57 = vpack.c.bf16 %v3413_v52, %v3410_v51  ;;  %v3378_v58 = vadd.f32 %v11657_v25, %v15358_v41  ;;  %v3237_v59 = vpop.f32.mrb[5].mxu1  ;;  %v3368_v62 = vadd.f32 %v15364_v45, %v3070_v56 }
 0x51d   : > { %v15377_v60 = vpack.c.bf16 %v3420_v53, %v3417_v6  ;;  %v3375_v9 = vadd.f32 %v15358_v41, %v3237_v59  ;;  %v3415_v8 = vmax.f32 %v3367_v61, 0.0 }
 0x51e   : > { %v3426_v63 = vmax.f32 %v3378_v58, 0.0  ;;  %v3074_v0 = vpop.f32.mrb[38].mxu0  ;;  %12330 = vmatprep.subr.bf16.mxu1 %v12329_v57  ;;  %12394 = vmatprep.subr.bf16.mxu0 %v12329_v57  ;;  %v3416_v3 = vmax.f32 %v3368_v62, 0.0 }
 0x51f   : > { %v3423_v1 = vmax.f32 %v3375_v9, 0.0  ;;  %v3370_v22 = vadd.f32 %v15361_v43, %v3074_v0  ;;  %v3076_v28 = vpop.f32.mrb[39].mxu0  ;;  %v11660_v2 = vpop.f32.mrb[6].mxu1  ;;  %12332 = vmatpush1.bf16.msra.mxu1 %v12331_v55  ;;  %12396 = vmatpush1.bf16.msra.mxu0 %v12331_v55 }
 0x520   : > { %v3371_v12 = vadd.f32 %v15364_v45, %v3076_v28  ;;  %v3384_v5 = vadd.f32 %v11660_v2, %v15358_v41  ;;  %v3247_v7 = vpop.f32.mrb[7].mxu1 }
 0x521   : > { %v15385_v10 = vpack.c.bf16 %v3426_v63, %v3423_v1  ;;  %v3418_v11 = vmax.f32 %v3370_v22, 0.0  ;;  %v3381_v13 = vadd.f32 %v15358_v41, %v3247_v7 }
 0x522   : > { %v3419_v17 = vmax.f32 %v3371_v12, 0.0  ;;  %v3432_v15 = vmax.f32 %v3384_v5, 0.0  ;;  %v3080_v16 = vpop.f32.mrb[40].mxu0 }
 0x523   : > { %v12335_v27 = vpack.c.bf16 %v3418_v11, %v3415_v8  ;;  %v3429_v21 = vmax.f32 %v3381_v13, 0.0  ;;  %v3082_v40 = vpop.f32.mrb[41].mxu0  ;;  %v11663_v44 = vpop.f32.mrb[8].mxu1  ;;  %v3373_v32 = vadd.f32 %v15361_v43, %v3080_v16 }
 0x524   : > { %v12333_v29 = vpack.c.bf16 %v3419_v17, %v3416_v3  ;;  %v3390_v23 = vadd.f32 %v11663_v44, %v15358_v41  ;;  %v3257_v30 = vpop.f32.mrb[9].mxu1  ;;  %v3374_v34 = vadd.f32 %v15364_v45, %v3082_v40 }
 0x525   : > { %v15389_v31 = vpack.c.bf16 %v3432_v15, %v3429_v21  ;;  %v3387_v33 = vadd.f32 %v15358_v41, %v3257_v30  ;;  %v3421_v48 = vmax.f32 %v3373_v32, 0.0 }
 0x526   : > { %v3438_v24 = vmax.f32 %v3390_v23, 0.0  ;;  %v3086_v35 = vpop.f32.mrb[42].mxu0  ;;  %12334 = vmatprep.subr.bf16.mxu1 %v12333_v29  ;;  %12398 = vmatprep.subr.bf16.mxu0 %v12333_v29  ;;  %v3422_v52 = vmax.f32 %v3374_v34, 0.0 }
 0x527   : > { %v3435_v36 = vmax.f32 %v3387_v33, 0.0  ;;  %v3376_v37 = vadd.f32 %v15361_v43, %v3086_v35  ;;  %v3088_v38 = vpop.f32.mrb[43].mxu0  ;;  %v11666_v46 = vpop.f32.mrb[10].mxu1  ;;  %12336 = vmatpush1.bf16.msra.mxu1 %v12335_v27  ;;  %12400 = vmatpush1.bf16.msra.mxu0 %v12335_v27 }
 0x528   : > { %v3377_v39 = vadd.f32 %v15364_v45, %v3088_v38  ;;  %v3396_v26 = vadd.f32 %v11666_v46, %v15358_v41  ;;  %v3267_v47 = vpop.f32.mrb[11].mxu1 }
 0x529   : > { %v15397_v49 = vpack.c.bf16 %v3438_v24, %v3435_v36  ;;  %v3424_v50 = vmax.f32 %v3376_v37, 0.0  ;;  %v3393_v51 = vadd.f32 %v15358_v41, %v3267_v47 }
 0x52a   : > { %v3425_v53 = vmax.f32 %v3377_v39, 0.0  ;;  %v3444_v54 = vmax.f32 %v3396_v26, 0.0  ;;  %v3092_v55 = vpop.f32.mrb[44].mxu0 }
 0x52b   : > { %v12339_v6 = vpack.c.bf16 %v3424_v50, %v3421_v48  ;;  %v3441_v56 = vmax.f32 %v3393_v51, 0.0  ;;  %v3094_v25 = vpop.f32.mrb[45].mxu0  ;;  %v11669_v57 = vpop.f32.mrb[12].mxu1  ;;  %v3379_v62 = vadd.f32 %v15361_v43, %v3092_v55 }
 0x52c   : > { %v12337_v58 = vpack.c.bf16 %v3425_v53, %v3422_v52  ;;  %v3402_v59 = vadd.f32 %v11669_v57, %v15358_v41  ;;  %v3277_v61 = vpop.f32.mrb[13].mxu1  ;;  %v3380_v0 = vadd.f32 %v15364_v45, %v3094_v25 }
 0x52d   : > { %v15401_v9 = vpack.c.bf16 %v3444_v54, %v3441_v56  ;;  %v3399_v63 = vadd.f32 %v15358_v41, %v3277_v61  ;;  %v3427_v13 = vmax.f32 %v3379_v62, 0.0 }
 0x52e   : > { %v3450_v1 = vmax.f32 %v3402_v59, 0.0  ;;  %v3098_v22 = vpop.f32.mrb[46].mxu0  ;;  %12338 = vmatprep.subr.bf16.mxu1 %v12337_v58  ;;  %12402 = vmatprep.subr.bf16.mxu0 %v12337_v58  ;;  %v3428_v16 = vmax.f32 %v3380_v0, 0.0 }
 0x52f   : > { %v3447_v28 = vmax.f32 %v3399_v63, 0.0  ;;  %v3382_v2 = vadd.f32 %v15361_v43, %v3098_v22  ;;  %v3100_v12 = vpop.f32.mrb[47].mxu0  ;;  %v11672_v5 = vpop.f32.mrb[14].mxu1  ;;  %12340 = vmatpush1.bf16.msra.mxu1 %v12339_v6  ;;  %12404 = vmatpush1.bf16.msra.mxu0 %v12339_v6 }
 0x530   : > { %v3383_v7 = vadd.f32 %v15364_v45, %v3100_v12  ;;  %v3408_v8 = vadd.f32 %v11672_v5, %v15358_v41  ;;  %v3287_v11 = vpop.f32.mrb[15].mxu1 }
 0x531   : > { %v15409_v3 = vpack.c.bf16 %v3450_v1, %v3447_v28  ;;  %v3430_v17 = vmax.f32 %v3382_v2, 0.0  ;;  %v3405_v15 = vadd.f32 %v15358_v41, %v3287_v11 }
 0x532   : > { %v3431_v27 = vmax.f32 %v3383_v7, 0.0  ;;  %v3456_v21 = vmax.f32 %v3408_v8, 0.0  ;;  %v3104_v40 = vpop.f32.mrb[48].mxu0 }
 0x533   : > { %v12343_v44 = vpack.c.bf16 %v3430_v17, %v3427_v13  ;;  %v3453_v29 = vmax.f32 %v3405_v15, 0.0  ;;  %v3106_v23 = vpop.f32.mrb[49].mxu0  ;;  %v3385_v33 = vadd.f32 %v15361_v43, %v3104_v40 }
 0x534   : > { %v12341_v30 = vpack.c.bf16 %v3431_v27, %v3428_v16  ;;  %v3386_v34 = vadd.f32 %v15364_v45, %v3106_v23 }
 0x535   : > { %v15412_v32 = vpack.c.bf16 %v3456_v21, %v3453_v29  ;;  %v3433_v37 = vmax.f32 %v3385_v33, 0.0 }
 0x536   : > { %v3110_v24 = vpop.f32.mrb[50].mxu0  ;;  %12342 = vmatprep.subr.bf16.mxu1 %v12341_v30  ;;  %12406 = vmatprep.subr.bf16.mxu0 %v12341_v30  ;;  %v3434_v46 = vmax.f32 %v3386_v34, 0.0  ;;  %v3935_v34 = vld [vmem:[%s18360_s5 + $0x8] sm:$0xff] }
 0x537   : > { %v3388_v35 = vadd.f32 %v15361_v43, %v3110_v24  ;;  %v3112_v41 = vpop.f32.mrb[51].mxu0  ;;  %12344 = vmatpush1.bf16.msra.mxu1 %v12343_v44  ;;  %12408 = vmatpush1.bf16.msra.mxu0 %v12343_v44  ;;  %v3937_v24 = vld [vmem:[%s18360_s5 + $0x18] sm:$0xff] }
 0x538   : > { %v3389_v36 = vadd.f32 %v15364_v45, %v3112_v41 }
 0x539   : > { %v3436_v38 = vmax.f32 %v3388_v35, 0.0 }
 0x53a   : > { %v3437_v39 = vmax.f32 %v3389_v36, 0.0  ;;  %v3116_v26 = vpop.f32.mrb[52].mxu0 }
 0x53b   : > { %v12347_v47 = vpack.c.bf16 %v3436_v38, %v3433_v37  ;;  %v3118_v48 = vpop.f32.mrb[53].mxu0  ;;  %v3391_v51 = vadd.f32 %v15361_v43, %v3116_v26  ;;  %v3936_v38 = vld [vmem:[%s18360_s5 + $0x10] sm:$0xff] }
 0x53c   : > { %v12345_v50 = vpack.c.bf16 %v3437_v39, %v3434_v46  ;;  %v3392_v52 = vadd.f32 %v15364_v45, %v3118_v48  ;;  %v15445_v46 = vld [vmem:[%s18406_s4] sm:$0xff]  ;;  %v3941_v48 = vld [vmem:[%s18360_s5 + $0x38] sm:$0xff] }
 0x53d   : > { %v3439_v56 = vmax.f32 %v3391_v51, 0.0  ;;  %v15450_v39 = vld [vmem:[%s18406_s4 + $0x40] sm:$0xff]  ;;  %v15471_v51 = vld [vmem:[%s18406_s4 + $0x48] sm:$0xff] }
 0x53e   : > { %v3122_v53 = vpop.f32.mrb[54].mxu0  ;;  %12346 = vmatprep.subr.bf16.mxu1 %v12345_v50  ;;  %12410 = vmatprep.subr.bf16.mxu0 %v12345_v50  ;;  %v3440_v57 = vmax.f32 %v3392_v52, 0.0  ;;  %v15466_v50 = vld [vmem:[%s18406_s4 + $0x8] sm:$0xff] }
 0x53f   : > { %v3394_v54 = vadd.f32 %v15361_v43, %v3122_v53  ;;  %v3124_v55 = vpop.f32.mrb[55].mxu0  ;;  %12348 = vmatpush1.bf16.msra.mxu1 %v12347_v47  ;;  %12412 = vmatpush1.bf16.msra.mxu0 %v12347_v47  ;;  %v3939_v47 = vld [vmem:[%s18360_s5 + $0x28] sm:$0xff]  ;;  %v3938_v53 = vld [vmem:[%s18360_s5 + $0x20] sm:$0xff] }
 0x540   : > { %v3395_v6 = vadd.f32 %v15364_v45, %v3124_v55  ;;  %v12461_v52 = vpack.c.bf16 %v3941_v48, %v3939_v47  ;;  %v15488_v55 = vld [vmem:[%s18406_s4 + $0x10] sm:$0xff]  ;;  %v3965_v47 = vld [vmem:[%s18360_s5 + $0xf8] sm:$0xff] }
 0x541   : > { %v3442_v25 = vmax.f32 %v3394_v54, 0.0  ;;  %v3940_v54 = vld [vmem:[%s18360_s5 + $0x30] sm:$0xff] }
 0x542   : > { %v3443_v58 = vmax.f32 %v3395_v6, 0.0  ;;  %v3128_v59 = vpop.f32.mrb[56].mxu0  ;;  %v15493_v6 = vld [vmem:[%s18406_s4 + $0x50] sm:$0xff] }
 0x543   : > { %v12351_v61 = vpack.c.bf16 %v3442_v25, %v3439_v56  ;;  %v3130_v62 = vpop.f32.mrb[57].mxu0  ;;  %v3397_v0 = vadd.f32 %v15361_v43, %v3128_v59  ;;  %v12463_v56 = vpack.c.bf16 %v3940_v54, %v3938_v53  ;;  %v3943_v25 = vld [vmem:[%s18360_s5 + $0x48] sm:$0xff]  ;;  %v15515_v59 = vld [vmem:[%s18406_s4 + $0x58] sm:$0xff] }
 0x544   : > { %v12349_v63 = vpack.c.bf16 %v3443_v58, %v3440_v57  ;;  %v3398_v1 = vadd.f32 %v15364_v45, %v3130_v62  ;;  %v3945_v57 = vld [vmem:[%s18360_s5 + $0x58] sm:$0xff]  ;;  %v3942_v62 = vld [vmem:[%s18360_s5 + $0x40] sm:$0xff]  ;;  %v3967_v53 = vld [vmem:[%s18360_s5 + $0x108] sm:$0xff] }
 0x545   : > { %v3445_v5 = vmax.f32 %v3397_v0, 0.0  ;;  %v15510_v58 = vld [vmem:[%s18406_s4 + $0x18] sm:$0xff]  ;;  %v15532_v0 = vld [vmem:[%s18406_s4 + $0x20] sm:$0xff] }
 0x546   : > { %v3134_v22 = vpop.f32.mrb[58].mxu0  ;;  %12350 = vmatprep.subr.bf16.mxu1 %v12349_v63  ;;  %12414 = vmatprep.subr.bf16.mxu0 %v12349_v63  ;;  %v3446_v8 = vmax.f32 %v3398_v1, 0.0  ;;  %v3944_v63 = vld [vmem:[%s18360_s5 + $0x50] sm:$0xff]  ;;  %v15537_v1 = vld [vmem:[%s18406_s4 + $0x60] sm:$0xff]  ;;  %v3969_v54 = vld [vmem:[%s18360_s5 + $0x118] sm:$0xff] }
 0x547   : > { %v3400_v28 = vadd.f32 %v15361_v43, %v3134_v22  ;;  %v3136_v2 = vpop.f32.mrb[59].mxu0  ;;  %12352 = vmatpush1.bf16.msra.mxu1 %v12351_v61  ;;  %12416 = vmatpush1.bf16.msra.mxu0 %v12351_v61  ;;  %v12465_v61 = vpack.c.bf16 %v3945_v57, %v3943_v25  ;;  %v12467_v22 = vpack.c.bf16 %v3944_v63, %v3942_v62  ;;  %v3968_v25 = vld [vmem:[%s18360_s5 + $0x110] sm:$0xff]  ;;  %v3971_v57 = vld [vmem:[%s18360_s5 + $0x128] sm:$0xff] }
 0x548   : > { %v3401_v12 = vadd.f32 %v15364_v45, %v3136_v2  ;;  %v3949_v2 = vld [vmem:[%s18360_s5 + $0x78] sm:$0xff]  ;;  %v3972_v63 = vld [vmem:[%s18360_s5 + $0x130] sm:$0xff] }
 0x549   : > { %v3448_v7 = vmax.f32 %v3400_v28, 0.0  ;;  %v3947_v28 = vld [vmem:[%s18360_s5 + $0x68] sm:$0xff] }
 0x54a   : > { %v3449_v11 = vmax.f32 %v3401_v12, 0.0  ;;  %v3140_v13 = vpop.f32.mrb[60].mxu0  ;;  %v15554_v12 = vld [vmem:[%s18406_s4 + $0x28] sm:$0xff] }
 0x54b   : > { %v12355_v17 = vpack.c.bf16 %v3448_v7, %v3445_v5  ;;  %v3142_v15 = vpop.f32.mrb[61].mxu0  ;;  %v3403_v27 = vadd.f32 %v15361_v43, %v3140_v13  ;;  %v15559_v5 = vld [vmem:[%s18406_s4 + $0x68] sm:$0xff]  ;;  %v12469_v7 = vpack.c.bf16 %v3949_v2, %v3947_v28  ;;  %v15576_v13 = vld [vmem:[%s18406_s4 + $0x30] sm:$0xff] }
 0x54c   : > { %v12353_v16 = vpack.c.bf16 %v3449_v11, %v3446_v8  ;;  %v3404_v21 = vadd.f32 %v15364_v45, %v3142_v15  ;;  %v3946_v8 = vld [vmem:[%s18360_s5 + $0x60] sm:$0xff]  ;;  %v3948_v11 = vld [vmem:[%s18360_s5 + $0x70] sm:$0xff] }
 0x54d   : > { %v3451_v30 = vmax.f32 %v3403_v27, 0.0  ;;  %v12471_v15 = vpack.c.bf16 %v3948_v11, %v3946_v8  ;;  %v3953_v27 = vld [vmem:[%s18360_s5 + $0x98] sm:$0xff] }
 0x54e   : > { %v3146_v40 = vpop.f32.mrb[62].mxu0  ;;  %12354 = vmatprep.subr.bf16.mxu1 %v12353_v16  ;;  %12418 = vmatprep.subr.bf16.mxu0 %v12353_v16  ;;  %v3452_v35 = vmax.f32 %v3404_v21, 0.0  ;;  %v3951_v16 = vld [vmem:[%s18360_s5 + $0x88] sm:$0xff]  ;;  %v3464_v21 = vld [vmem:[%s18406_s4 + $0x38] sm:$0xff] }
 0x54f   : > { %v3406_v44 = vadd.f32 %v15361_v43, %v3146_v40  ;;  %v3148_v29 = vpop.f32.mrb[63].mxu0  ;;  %12356 = vmatpush1.bf16.msra.mxu1 %v12355_v17  ;;  %12420 = vmatpush1.bf16.msra.mxu0 %v12355_v17  ;;  %v12457_v43 = vpack.c.bf16 %v3937_v24, %v3935_v34  ;;  %v15581_v17 = vld [vmem:[%s18406_s4 + $0x70] sm:$0xff]  ;;  %v3950_v40 = vld [vmem:[%s18360_s5 + $0x80] sm:$0xff] }
 0x550   : > { %v3407_v23 = vadd.f32 %v15364_v45, %v3148_v29  ;;  %v3934_v45 = vld [vmem:[%s18360_s5] sm:$0xff]  ;;  %v15607_v29 = vld [vmem:[%s18406_s4 + $0x78] sm:$0xff]  ;;  %s13810_s4 = scalar_lea.vmem %s13809_s20, 32 }
 0x551   : > { %v3454_v33 = vmax.f32 %v3406_v44, 0.0  ;;  %v12459_v26 = vpack.c.bf16 %v3936_v38, %v3934_v45  ;;  %v3952_v44 = vld [vmem:[%s18360_s5 + $0x90] sm:$0xff]  ;;  %v3958_v38 = vld [vmem:[%s18360_s5 + $0xc0] sm:$0xff]  ;;  %p13812_p1 = scmp.lt.s32.totalorder %s13810_s4, %s13804_s24 }
 0x552   : > { %v3455_v41 = vmax.f32 %v3407_v23, 0.0  ;;  %v3955_v23 = vld [vmem:[%s18360_s5 + $0xa8] sm:$0xff]  ;;  %v12475_v34 = vpack.c.bf16 %v3952_v44, %v3950_v40  ;;  %v3982_v44 = vld [vmem:[%s18360_s5 + $0x180] sm:$0xff] }
 0x553   : > { %v12359_v36 = vpack.c.bf16 %v3454_v33, %v3451_v30  ;;  %v3957_v30 = vld [vmem:[%s18360_s5 + $0xb8] sm:$0xff]  ;;  %v12473_v33 = vpack.c.bf16 %v3953_v27, %v3951_v16  ;;  %v9987_v27 = vld [vmem:[%s18360_s5 + $0x308] sm:$0xff]  ;;  %p13813_p2 = por %p13812_p1, %p13811_p0 }
 0x554   : > { %v12357_v37 = vpack.c.bf16 %v3455_v41, %v3452_v35  ;;  %v12477_v24 = vpack.c.bf16 %v3957_v30, %v3955_v23  ;;  %v3954_v35 = vld [vmem:[%s18360_s5 + $0xa0] sm:$0xff]  ;;  %v3956_v41 = vld [vmem:[%s18360_s5 + $0xb0] sm:$0xff]  ;;  %v3985_v16 = vld [vmem:[%s18360_s5 + $0x198] sm:$0xff] }
 0x555   : > { %v3984_v23 = vld [vmem:[%s18360_s5 + $0x190] sm:$0xff]  ;;  %v3987_v30 = vld [vmem:[%s18360_s5 + $0x1a8] sm:$0xff]  ;;  %p13814_p3 = pnand %p13813_p2, %p13807_p13 }
 0x556   : > { %12358 = vmatprep.subr.bf16.mxu1 %v12357_v37  ;;  %12422 = vmatprep.subr.bf16.mxu0 %v12357_v37  ;;  %v3961_v37 = vld [vmem:[%s18360_s5 + $0xd8] sm:$0xff] }
 0x557   : > { %12360 = vmatpush1.bf16.msra.mxu1 %v12359_v36  ;;  %12424 = vmatpush1.bf16.msra.mxu0 %v12359_v36  ;;  %v3959_v36 = vld [vmem:[%s18360_s5 + $0xc8] sm:$0xff] }
 0x558   : > { %12362 = vmatprep.subr.bf16.mxu1 %v15373_v4  ;;  %12458 = vmatprep.subr.bf16.mxu0 %v12457_v43  ;;  %v12479_v43 = vpack.c.bf16 %v3956_v41, %v3954_v35  ;;  %v12481_v45 = vpack.c.bf16 %v3961_v37, %v3959_v36  ;;  %v9988_v35 = vld [vmem:[%s18360_s5 + $0x310] sm:$0xff]  ;;  %v9993_v41 = vld [vmem:[%s18360_s5 + $0x338] sm:$0xff]  ;;  %v12507_v36 = vpack.c.bf16 %v3984_v23, %v3982_v44  ;;  %v10015_v44 = vld [vmem:[%s18360_s5 + $0x3e8] sm:$0xff] }
 0x559   : > { %v10017_v23 = vld [vmem:[%s18360_s5 + $0x3f8] sm:$0xff] }
 0x55a   : > { %3530 = vmatmul.mubr.f32.vlgmr.msra.gmra.mrb[64].mxu1 %v15445_v46  ;;  %3757 = vmatmul.mubr.f32.vlgmr.msra.gmra.mrb[64].mxu0 %v15450_v39 }
 0x55b   : > { %12364 = vmatpush3.bf16.msra.mxu1 %v15373_v4  ;;  %3535 = vmatprep.mubr.f32.mxu1 %v13868_v14 }
 0x55c   : > { %12366 = vmatprep.subr.bf16.mxu1 %v15377_v60  ;;  %3762 = vmatprep.mubr.f32.mxu0 %v13868_v14 }
 0x55d   : > { %12460 = vmatpush1.bf16.msra.mxu0 %v12459_v26  ;;  %v3963_v26 = vld [vmem:[%s18360_s5 + $0xe8] sm:$0xff] }
 0x55e   : > { %3536 = vmatmul.mubr.f32.gmra.mrb[66].mxu1 %v15466_v50  ;;  %3763 = vmatmul.mubr.f32.gmra.mrb[66].mxu0 %v15471_v51 }
 0x55f   : > { %12368 = vmatpush3.bf16.msra.mxu1 %v15377_v60  ;;  %3541 = vmatprep.mubr.f32.mxu1 %v13868_v14 }
 0x560   : > { %12370 = vmatprep.subr.bf16.mxu1 %v15385_v10  ;;  %3768 = vmatprep.mubr.f32.mxu0 %v13868_v14 }
 0x561   : > { %12462 = vmatprep.subr.bf16.mxu0 %v12461_v52  ;;  %v3964_v52 = vld [vmem:[%s18360_s5 + $0xf0] sm:$0xff] }
 0x562   : > { %3542 = vmatmul.mubr.f32.gmra.mrb[68].mxu1 %v15488_v55  ;;  %3769 = vmatmul.mubr.f32.gmra.mrb[68].mxu0 %v15493_v6 }
 0x563   : > { %12372 = vmatpush3.bf16.msra.mxu1 %v15385_v10  ;;  %3547 = vmatprep.mubr.f32.mxu1 %v13868_v14 }
 0x564   : > { %12374 = vmatprep.subr.bf16.mxu1 %v15389_v31  ;;  %3774 = vmatprep.mubr.f32.mxu0 %v13868_v14 }
 0x565   : > { %12464 = vmatpush1.bf16.msra.mxu0 %v12463_v56  ;;  %v12489_v56 = vpack.c.bf16 %v3969_v54, %v3967_v53  ;;  %v3990_v54 = vld [vmem:[%s18360_s5 + $0x1c0] sm:$0xff] }
 0x566   : > { %3548 = vmatmul.mubr.f32.gmra.mrb[70].mxu1 %v15510_v58  ;;  %3775 = vmatmul.mubr.f32.gmra.mrb[70].mxu0 %v15515_v59 }
 0x567   : > { %12376 = vmatpush3.bf16.msra.mxu1 %v15389_v31  ;;  %3553 = vmatprep.mubr.f32.mxu1 %v13868_v14 }
 0x568   : > { %12378 = vmatprep.subr.bf16.mxu1 %v15397_v49  ;;  %3780 = vmatprep.mubr.f32.mxu0 %v13868_v14 }
 0x569   : > { %12466 = vmatprep.subr.bf16.mxu0 %v12465_v61 }
 0x56a   : > { %3554 = vmatmul.mubr.f32.gmra.mrb[72].mxu1 %v15532_v0  ;;  %3781 = vmatmul.mubr.f32.gmra.mrb[72].mxu0 %v15537_v1 }
 0x56b   : > { %12380 = vmatpush3.bf16.msra.mxu1 %v15397_v49  ;;  %3559 = vmatprep.mubr.f32.mxu1 %v13868_v14 }
 0x56c   : > { %12382 = vmatprep.subr.bf16.mxu1 %v15401_v9  ;;  %3786 = vmatprep.mubr.f32.mxu0 %v13868_v14 }
 0x56d   : > { %12468 = vmatpush1.bf16.msra.mxu0 %v12467_v22  ;;  %v3977_v22 = vld [vmem:[%s18360_s5 + $0x158] sm:$0xff] }
 0x56e   : > { %3560 = vmatmul.mubr.f32.gmra.mrb[74].mxu1 %v15554_v12  ;;  %3787 = vmatmul.mubr.f32.gmra.mrb[74].mxu0 %v15559_v5 }
 0x56f   : > { %12384 = vmatpush3.bf16.msra.mxu1 %v15401_v9  ;;  %3565 = vmatprep.mubr.f32.mxu1 %v13868_v14 }
 0x570   : > { %12386 = vmatprep.subr.bf16.mxu1 %v15409_v3  ;;  %3792 = vmatprep.mubr.f32.mxu0 %v13868_v14 }
 0x571   : > { %12470 = vmatprep.subr.bf16.mxu0 %v12469_v7  ;;  %v3981_v7 = vld [vmem:[%s18360_s5 + $0x178] sm:$0xff] }
 0x572   : > { %3566 = vmatmul.mubr.f32.gmra.mrb[76].mxu1 %v15576_v13  ;;  %3793 = vmatmul.mubr.f32.gmra.mrb[76].mxu0 %v15581_v17 }
 0x573   : > { %12388 = vmatpush3.bf16.msra.mxu1 %v15409_v3  ;;  %3571 = vmatprep.mubr.f32.mxu1 %v13868_v14 }
 0x574   : > { %12390 = vmatprep.subr.bf16.mxu1 %v15412_v32  ;;  %3798 = vmatprep.mubr.f32.mxu0 %v13868_v14 }
 0x575   : > { %12472 = vmatpush1.bf16.msra.mxu0 %v12471_v15  ;;  %v3983_v15 = vld [vmem:[%s18360_s5 + $0x188] sm:$0xff] }
 0x576   : > { %3572 = vmatmul.mubr.f32.gmra.mrb[78].mxu1 %v3464_v21  ;;  %3799 = vmatmul.mubr.f32.gmra.mrb[78].mxu0 %v15607_v29  ;;  %v12505_v40 = vpack.c.bf16 %v3985_v16, %v3983_v15  ;;  %v3997_v15 = vld [vmem:[%s18360_s5 + $0x1f8] sm:$0xff] }
 0x577   : > { %12392 = vmatpush3.bf16.msra.mxu1 %v15412_v32  ;;  %11705 = vmatprep.mubr.f32.mxu1 %v15445_v46  ;;  %v3960_v46 = vld [vmem:[%s18360_s5 + $0xd0] sm:$0xff] }
 0x578   : > { %12426 = vmatprep.subr.bf16.mxu1 %v15373_v4  ;;  %12474 = vmatprep.subr.bf16.mxu0 %v12473_v33  ;;  %v12483_v48 = vpack.c.bf16 %v3960_v46, %v3958_v38  ;;  %v3989_v33 = vld [vmem:[%s18360_s5 + $0x1b8] sm:$0xff]  ;;  %v3991_v46 = vld [vmem:[%s18360_s5 + $0x1c8] sm:$0xff] }
 0x579   : > { %12476 = vmatpush1.bf16.msra.mxu0 %v12475_v34  ;;  %v12509_v37 = vpack.c.bf16 %v3989_v33, %v3987_v30 }
 0x57a   : > { %11706 = vmatmul.mubr.f32.vlgmr.msra.gmra.mrb[80].mxu1 %v15466_v50  ;;  %12478 = vmatprep.subr.bf16.mxu0 %v12477_v24  ;;  %v12485_v50 = vpack.c.bf16 %v3965_v47, %v3963_v26  ;;  %v9986_v24 = vld [vmem:[%s18360_s5 + $0x300] sm:$0xff]  ;;  %v3993_v26 = vld [vmem:[%s18360_s5 + $0x1d8] sm:$0xff] }
 0x57b   : > { %12428 = vmatpush3.bf16.msra.mxu1 %v15373_v4  ;;  %11708 = vmatprep.mubr.f32.mxu1 %v15488_v55  ;;  %v3962_v4 = vld [vmem:[%s18360_s5 + $0xe0] sm:$0xff]  ;;  %v12555_v38 = vpack.c.bf16 %v9988_v35, %v9986_v24  ;;  %v12513_v53 = vpack.c.bf16 %v3993_v26, %v3991_v46  ;;  %v10016_v35 = vld [vmem:[%s18360_s5 + $0x3f0] sm:$0xff]  ;;  %v10025_v46 = vld [vmem:[%s18360_s5 + $0x438] sm:$0xff] }
 0x57c   : > { %12430 = vmatprep.subr.bf16.mxu1 %v15377_v60  ;;  %v12487_v55 = vpack.c.bf16 %v3964_v52, %v3962_v4  ;;  %v9997_v4 = vld [vmem:[%s18360_s5 + $0x358] sm:$0xff]  ;;  %v10014_v24 = vld [vmem:[%s18360_s5 + $0x3e0] sm:$0xff] }
 0x57d   : > { %12480 = vmatpush1.bf16.msra.mxu0 %v12479_v43  ;;  %v3986_v43 = vld [vmem:[%s18360_s5 + $0x1a0] sm:$0xff] }
 0x57e   : > { %11709 = vmatmul.mubr.f32.gmra.mrb[82].mxu1 %v15510_v58  ;;  %12482 = vmatprep.subr.bf16.mxu0 %v12481_v45  ;;  %v3973_v58 = vld [vmem:[%s18360_s5 + $0x138] sm:$0xff]  ;;  %v3988_v45 = vld [vmem:[%s18360_s5 + $0x1b0] sm:$0xff] }
 0x57f   : > { %12432 = vmatpush3.bf16.msra.mxu1 %v15377_v60  ;;  %11711 = vmatprep.mubr.f32.mxu1 %v15532_v0  ;;  %v3966_v60 = vld [vmem:[%s18360_s5 + $0x100] sm:$0xff]  ;;  %v12493_v62 = vpack.c.bf16 %v3973_v58, %v3971_v57  ;;  %v3975_v0 = vld [vmem:[%s18360_s5 + $0x148] sm:$0xff]  ;;  %v12511_v52 = vpack.c.bf16 %v3988_v45, %v3986_v43  ;;  %v10020_v45 = vld [vmem:[%s18360_s5 + $0x410] sm:$0xff] }
 0x580   : > { %12434 = vmatprep.subr.bf16.mxu1 %v15385_v10  ;;  %v12491_v61 = vpack.c.bf16 %v3968_v25, %v3966_v60  ;;  %v12497_v2 = vpack.c.bf16 %v3977_v22, %v3975_v0  ;;  %v9996_v25 = vld [vmem:[%s18360_s5 + $0x350] sm:$0xff]  ;;  %v9999_v57 = vld [vmem:[%s18360_s5 + $0x368] sm:$0xff]  ;;  %v10018_v43 = vld [vmem:[%s18360_s5 + $0x400] sm:$0xff] }
 0x581   : > { %12484 = vmatpush1.bf16.msra.mxu0 %v12483_v48  ;;  %v9990_v48 = vld [vmem:[%s18360_s5 + $0x320] sm:$0xff]  ;;  %v10003_v0 = vld [vmem:[%s18360_s5 + $0x388] sm:$0xff]  ;;  %v12587_v26 = vpack.c.bf16 %v10020_v45, %v10018_v43  ;;  %v10057_v45 = vld [vmem:[%s18360_s5 + $0x538] sm:$0xff] }
 0x582   : > { %11712 = vmatmul.mubr.f32.gmra.mrb[84].mxu1 %v15554_v12  ;;  %12486 = vmatprep.subr.bf16.mxu0 %v12485_v50  ;;  %v3979_v12 = vld [vmem:[%s18360_s5 + $0x168] sm:$0xff]  ;;  %v9992_v50 = vld [vmem:[%s18360_s5 + $0x330] sm:$0xff] }
 0x583   : > { %12436 = vmatpush3.bf16.msra.mxu1 %v15385_v10  ;;  %11714 = vmatprep.mubr.f32.mxu1 %v15576_v13  ;;  %v3970_v10 = vld [vmem:[%s18360_s5 + $0x120] sm:$0xff]  ;;  %v12501_v11 = vpack.c.bf16 %v3981_v7, %v3979_v12  ;;  %v10008_v7 = vld [vmem:[%s18360_s5 + $0x3b0] sm:$0xff]  ;;  %v10055_v43 = vld [vmem:[%s18360_s5 + $0x528] sm:$0xff] }
 0x584   : > { %12438 = vmatprep.subr.bf16.mxu1 %v15389_v31  ;;  %v12495_v28 = vpack.c.bf16 %v3972_v63, %v3970_v10  ;;  %v3978_v13 = vld [vmem:[%s18360_s5 + $0x160] sm:$0xff]  ;;  %v10000_v63 = vld [vmem:[%s18360_s5 + $0x370] sm:$0xff] }
 0x585   : > { %12488 = vmatpush1.bf16.msra.mxu0 %v12487_v55  ;;  %v3992_v55 = vld [vmem:[%s18360_s5 + $0x1d0] sm:$0xff]  ;;  %v9998_v10 = vld [vmem:[%s18360_s5 + $0x360] sm:$0xff] }
 0x586   : > { %11715 = vmatmul.mubr.f32.gmra.mrb[86].mxu1 %v3464_v21  ;;  %12490 = vmatprep.subr.bf16.mxu0 %v12489_v56  ;;  %v9989_v21 = vld [vmem:[%s18360_s5 + $0x318] sm:$0xff]  ;;  %v12559_v56 = vpack.c.bf16 %v9992_v50, %v9990_v48  ;;  %v12515_v58 = vpack.c.bf16 %v3992_v55, %v3990_v54  ;;  %v10006_v12 = vld [vmem:[%s18360_s5 + $0x3a0] sm:$0xff]  ;;  %v10024_v50 = vld [vmem:[%s18360_s5 + $0x430] sm:$0xff] }
 0x587   : > { %12440 = vmatpush3.bf16.msra.mxu1 %v15389_v31  ;;  %11749 = vmatprep.mubr.f32.mxu1 %v15450_v39  ;;  %v3974_v31 = vld [vmem:[%s18360_s5 + $0x140] sm:$0xff]  ;;  %v3976_v39 = vld [vmem:[%s18360_s5 + $0x150] sm:$0xff]  ;;  %v12553_v34 = vpack.c.bf16 %v9989_v21, %v9987_v27 }
 0x588   : > { %12442 = vmatprep.subr.bf16.mxu1 %v15397_v49  ;;  %v12499_v8 = vpack.c.bf16 %v3976_v39, %v3974_v31  ;;  %v10007_v31 = vld [vmem:[%s18360_s5 + $0x3a8] sm:$0xff]  ;;  %v10012_v27 = vld [vmem:[%s18360_s5 + $0x3d0] sm:$0xff]  ;;  %v10022_v48 = vld [vmem:[%s18360_s5 + $0x420] sm:$0xff] }
 0x589   : > { %12492 = vmatpush1.bf16.msra.mxu0 %v12491_v61  ;;  %v10026_v54 = vld [vmem:[%s18360_s5 + $0x440] sm:$0xff]  ;;  %v10028_v55 = vld [vmem:[%s18360_s5 + $0x450] sm:$0xff] }
 0x58a   : > { %12494 = vmatprep.subr.bf16.mxu0 %v12493_v62 }
 0x58b   : > { %12444 = vmatpush3.bf16.msra.mxu1 %v15397_v49  ;;  %v3980_v49 = vld [vmem:[%s18360_s5 + $0x170] sm:$0xff] }
 0x58c   : > { %12446 = vmatprep.subr.bf16.mxu1 %v15401_v9 }
 0x58d   : > { %12496 = vmatpush1.bf16.msra.mxu0 %v12495_v28  ;;  %v10002_v28 = vld [vmem:[%s18360_s5 + $0x380] sm:$0xff] }
 0x58e   : > { %12498 = vmatprep.subr.bf16.mxu0 %v12497_v2  ;;  %v10004_v2 = vld [vmem:[%s18360_s5 + $0x390] sm:$0xff] }
 0x58f   : > { %12448 = vmatpush3.bf16.msra.mxu1 %v15401_v9  ;;  %v12503_v9 = vpack.c.bf16 %v3980_v49, %v3978_v13  ;;  %v10010_v13 = vld [vmem:[%s18360_s5 + $0x3c0] sm:$0xff]  ;;  %v3995_v49 = vld [vmem:[%s18360_s5 + $0x1e8] sm:$0xff] }
 0x590   : > { %12450 = vmatprep.subr.bf16.mxu1 %v15409_v3  ;;  %v12517_v21 = vpack.c.bf16 %v3997_v15, %v3995_v49  ;;  %v12579_v33 = vpack.c.bf16 %v10012_v27, %v10010_v13  ;;  %v3999_v13 = vld [vmem:[%s18360_s5 + $0x208] sm:$0xff]  ;;  %v4001_v49 = vld [vmem:[%s18360_s5 + $0x218] sm:$0xff] }
 0x591   : > { %12500 = vmatpush1.bf16.msra.mxu0 %v12499_v8  ;;  %v10011_v8 = vld [vmem:[%s18360_s5 + $0x3c8] sm:$0xff] }
 0x592   : > { %12502 = vmatprep.subr.bf16.mxu0 %v12501_v11  ;;  %v12575_v11 = vpack.c.bf16 %v10008_v7, %v10006_v12  ;;  %v10042_v7 = vld [vmem:[%s18360_s5 + $0x4c0] sm:$0xff] }
 0x593   : > { %12452 = vmatpush3.bf16.msra.mxu1 %v15409_v3  ;;  %v9991_v3 = vld [vmem:[%s18360_s5 + $0x328] sm:$0xff] }
 0x594   : > { %12454 = vmatprep.subr.bf16.mxu1 %v15412_v32  ;;  %v12557_v47 = vpack.c.bf16 %v9993_v41, %v9991_v3  ;;  %v10019_v3 = vld [vmem:[%s18360_s5 + $0x408] sm:$0xff]  ;;  %v10021_v41 = vld [vmem:[%s18360_s5 + $0x418] sm:$0xff] }
 0x595   : > { %12504 = vmatpush1.bf16.msra.mxu0 %v12503_v9  ;;  %v3994_v9 = vld [vmem:[%s18360_s5 + $0x1e0] sm:$0xff] }
 0x596   : > { %12506 = vmatprep.subr.bf16.mxu0 %v12505_v40  ;;  %v3996_v40 = vld [vmem:[%s18360_s5 + $0x1f0] sm:$0xff] }
 0x597   : > { %12456 = vmatpush3.bf16.msra.mxu1 %v15412_v32  ;;  %v9995_v32 = vld [vmem:[%s18360_s5 + $0x348] sm:$0xff]  ;;  %v12519_v30 = vpack.c.bf16 %v3996_v40, %v3994_v9  ;;  %v10048_v9 = vld [vmem:[%s18360_s5 + $0x4f0] sm:$0xff] }
 0x598   : > { %12554 = vmatprep.subr.bf16.mxu1 %v12553_v34  ;;  %v12561_v60 = vpack.c.bf16 %v9997_v4, %v9995_v32  ;;  %v12581_v34 = vpack.c.bf16 %v10017_v23, %v10015_v44  ;;  %v10027_v32 = vld [vmem:[%s18360_s5 + $0x448] sm:$0xff]  ;;  %v10029_v4 = vld [vmem:[%s18360_s5 + $0x458] sm:$0xff] }
 0x599   : > { %12508 = vmatpush1.bf16.msra.mxu0 %v12507_v36  ;;  %v12583_v36 = vpack.c.bf16 %v10016_v35, %v10014_v24  ;;  %v10051_v40 = vld [vmem:[%s18360_s5 + $0x508] sm:$0xff]  ;;  %v10053_v44 = vld [vmem:[%s18360_s5 + $0x518] sm:$0xff]  ;;  %v10050_v24 = vld [vmem:[%s18360_s5 + $0x500] sm:$0xff] }
 0x59a   : > { %11750 = vmatmul.mubr.f32.vlgmr.msra.gmra.mrb[88].mxu1 %v15471_v51  ;;  %12510 = vmatprep.subr.bf16.mxu0 %v12509_v37  ;;  %v9994_v51 = vld [vmem:[%s18360_s5 + $0x340] sm:$0xff]  ;;  %v12585_v37 = vpack.c.bf16 %v10021_v41, %v10019_v3  ;;  %v10052_v35 = vld [vmem:[%s18360_s5 + $0x510] sm:$0xff]  ;;  %v4003_v3 = vld [vmem:[%s18360_s5 + $0x228] sm:$0xff] }
 0x59b   : > { %11752 = vmatprep.mubr.f32.mxu1 %v15493_v6  ;;  %12556 = vmatpush1.bf16.msra.mxu1 %v12555_v38  ;;  %v10001_v6 = vld [vmem:[%s18360_s5 + $0x378] sm:$0xff]  ;;  %v12563_v61 = vpack.c.bf16 %v9996_v25, %v9994_v51  ;;  %v10023_v38 = vld [vmem:[%s18360_s5 + $0x428] sm:$0xff]  ;;  %v12595_v51 = vpack.c.bf16 %v10028_v55, %v10026_v54  ;;  %v10054_v54 = vld [vmem:[%s18360_s5 + $0x520] sm:$0xff] }
 0x59c   : > { %12558 = vmatprep.subr.bf16.mxu1 %v12557_v47  ;;  %v12565_v62 = vpack.c.bf16 %v10001_v6, %v9999_v57  ;;  %v12589_v47 = vpack.c.bf16 %v10025_v46, %v10023_v38  ;;  %v10030_v57 = vld [vmem:[%s18360_s5 + $0x460] sm:$0xff]  ;;  %v10032_v6 = vld [vmem:[%s18360_s5 + $0x470] sm:$0xff] }
 0x59d   : > { %12512 = vmatpush1.bf16.msra.mxu0 %v12511_v52  ;;  %v12591_v52 = vpack.c.bf16 %v10024_v50, %v10022_v48  ;;  %v12619_v50 = vpack.c.bf16 %v10052_v35, %v10050_v24  ;;  %v10056_v55 = vld [vmem:[%s18360_s5 + $0x530] sm:$0xff]  ;;  %v4017_v24 = vld [vmem:[%s18360_s5 + $0x298] sm:$0xff]  ;;  %v10067_v35 = vld [vmem:[%s18360_s5 + $0x588] sm:$0xff] }
 0x59e   : > { %11753 = vmatmul.mubr.f32.gmra.mrb[90].mxu1 %v15515_v59  ;;  %12514 = vmatprep.subr.bf16.mxu0 %v12513_v53  ;;  %v10005_v59 = vld [vmem:[%s18360_s5 + $0x398] sm:$0xff]  ;;  %v12593_v53 = vpack.c.bf16 %v10029_v4, %v10027_v32  ;;  %v4002_v32 = vld [vmem:[%s18360_s5 + $0x220] sm:$0xff]  ;;  %v4004_v4 = vld [vmem:[%s18360_s5 + $0x230] sm:$0xff] }
 0x59f   : > { %11755 = vmatprep.mubr.f32.mxu1 %v15537_v1  ;;  %12560 = vmatpush1.bf16.msra.mxu1 %v12559_v56  ;;  %v12567_v1 = vpack.c.bf16 %v10000_v63, %v9998_v10  ;;  %v12569_v22 = vpack.c.bf16 %v10005_v59, %v10003_v0  ;;  %v10031_v56 = vld [vmem:[%s18360_s5 + $0x468] sm:$0xff]  ;;  %v10034_v63 = vld [vmem:[%s18360_s5 + $0x480] sm:$0xff]  ;;  %v10036_v0 = vld [vmem:[%s18360_s5 + $0x490] sm:$0xff] }
 0x5a0   : > { %12562 = vmatprep.subr.bf16.mxu1 %v12561_v60  ;;  %v10033_v60 = vld [vmem:[%s18360_s5 + $0x478] sm:$0xff]  ;;  %v10039_v59 = vld [vmem:[%s18360_s5 + $0x4a8] sm:$0xff] }
 0x5a1   : > { %12516 = vmatpush1.bf16.msra.mxu0 %v12515_v58  ;;  %v12597_v25 = vpack.c.bf16 %v10033_v60, %v10031_v56  ;;  %v10035_v58 = vld [vmem:[%s18360_s5 + $0x488] sm:$0xff] }
 0x5a2   : > { %11756 = vmatmul.mubr.f32.gmra.mrb[92].mxu1 %v15559_v5  ;;  %v10009_v5 = vld [vmem:[%s18360_s5 + $0x3b8] sm:$0xff]  ;;  %12518 = vmatprep.subr.bf16.mxu0 %v12517_v21  ;;  %v10046_v21 = vld [vmem:[%s18360_s5 + $0x4e0] sm:$0xff]  ;;  %v4007_v56 = vld [vmem:[%s18360_s5 + $0x248] sm:$0xff] }
 0x5a3   : > { %11758 = vmatprep.mubr.f32.mxu1 %v15581_v17  ;;  %12564 = vmatpush1.bf16.msra.mxu1 %v12563_v61  ;;  %v12571_v17 = vpack.c.bf16 %v10004_v2, %v10002_v28  ;;  %v12573_v39 = vpack.c.bf16 %v10009_v5, %v10007_v31  ;;  %v10037_v61 = vld [vmem:[%s18360_s5 + $0x498] sm:$0xff]  ;;  %v10038_v2 = vld [vmem:[%s18360_s5 + $0x4a0] sm:$0xff]  ;;  %v10040_v31 = vld [vmem:[%s18360_s5 + $0x4b0] sm:$0xff]  ;;  %v12615_v23 = vpack.c.bf16 %v10048_v9, %v10046_v21 }
 0x5a4   : > { %12566 = vmatprep.subr.bf16.mxu1 %v12565_v62  ;;  %v12599_v62 = vpack.c.bf16 %v10032_v6, %v10030_v57  ;;  %v12601_v10 = vpack.c.bf16 %v10037_v61, %v10035_v58  ;;  %v10043_v5 = vld [vmem:[%s18360_s5 + $0x4c8] sm:$0xff]  ;;  %v10061_v6 = vld [vmem:[%s18360_s5 + $0x558] sm:$0xff]  ;;  %v4012_v21 = vld [vmem:[%s18360_s5 + $0x270] sm:$0xff] }
 0x5a5   : > { %12520 = vmatpush1.bf16.msra.mxu0 %v12519_v30  ;;  %v12617_v30 = vpack.c.bf16 %v10053_v44, %v10051_v40  ;;  %v10059_v57 = vld [vmem:[%s18360_s5 + $0x548] sm:$0xff]  ;;  %v10062_v44 = vld [vmem:[%s18360_s5 + $0x560] sm:$0xff] }
 0x5a6   : > { %11759 = vmatmul.mubr.f32.gmra.mrb[94].mxu1 %v15607_v29  ;;  %v10013_v29 = vld [vmem:[%s18360_s5 + $0x3d8] sm:$0xff] }
 0x5a7   : > { %12568 = vmatpush1.bf16.msra.mxu1 %v12567_v1  ;;  %v12577_v16 = vpack.c.bf16 %v10013_v29, %v10011_v8  ;;  %v10041_v1 = vld [vmem:[%s18360_s5 + $0x4b8] sm:$0xff]  ;;  %v10044_v8 = vld [vmem:[%s18360_s5 + $0x4d0] sm:$0xff]  ;;  %v10047_v29 = vld [vmem:[%s18360_s5 + $0x4e8] sm:$0xff] }
 0x5a8   : > { %12570 = vmatprep.subr.bf16.mxu1 %v12569_v22  ;;  %v12603_v22 = vpack.c.bf16 %v10036_v0, %v10034_v63  ;;  %v12605_v28 = vpack.c.bf16 %v10041_v1, %v10039_v59  ;;  %v12611_v15 = vpack.c.bf16 %v10044_v8, %v10042_v7  ;;  %v12527_v63 = vpack.c.bf16 %v4004_v4, %v4002_v32  ;;  %v4006_v59 = vld [vmem:[%s18360_s5 + $0x240] sm:$0xff]  ;;  %v4008_v1 = vld [vmem:[%s18360_s5 + $0x250] sm:$0xff]  ;;  %v10063_v7 = vld [vmem:[%s18360_s5 + $0x568] sm:$0xff] }
 0x5a9   : > { %v12623_v0 = vpack.c.bf16 %v10056_v55, %v10054_v54  ;;  %v10065_v8 = vld [vmem:[%s18360_s5 + $0x578] sm:$0xff]  ;;  %v10068_v32 = vld [vmem:[%s18360_s5 + $0x590] sm:$0xff]  ;;  %v4019_v4 = vld [vmem:[%s18360_s5 + $0x2a8] sm:$0xff] }
 0x5aa   : > { %v12629_v40 = vpack.c.bf16 %v10065_v8, %v10063_v7  ;;  %v4021_v54 = vld [vmem:[%s18360_s5 + $0x2b8] sm:$0xff]  ;;  %v10071_v55 = vld [vmem:[%s18360_s5 + $0x5a8] sm:$0xff] }
 0x5ab   : > { %12572 = vmatpush1.bf16.msra.mxu1 %v12571_v17  ;;  %v10045_v17 = vld [vmem:[%s18360_s5 + $0x4d8] sm:$0xff] }
 0x5ac   : > { %12574 = vmatprep.subr.bf16.mxu1 %v12573_v39  ;;  %v12607_v39 = vpack.c.bf16 %v10040_v31, %v10038_v2  ;;  %v12609_v12 = vpack.c.bf16 %v10045_v17, %v10043_v5  ;;  %v10058_v2 = vld [vmem:[%s18360_s5 + $0x540] sm:$0xff]  ;;  %v10060_v31 = vld [vmem:[%s18360_s5 + $0x550] sm:$0xff]  ;;  %v4011_v5 = vld [vmem:[%s18360_s5 + $0x268] sm:$0xff] }
 0x5af   : > { %12576 = vmatpush1.bf16.msra.mxu1 %v12575_v11  ;;  %v10049_v11 = vld [vmem:[%s18360_s5 + $0x4f8] sm:$0xff] }
 0x5b0   : > { %12578 = vmatprep.subr.bf16.mxu1 %v12577_v16  ;;  %v12521_v16 = vpack.c.bf16 %v4001_v49, %v3999_v13  ;;  %v12613_v27 = vpack.c.bf16 %v10049_v11, %v10047_v29 }
 0x5b2   : > { %12522 = vmatprep.subr.bf16.mxu0 %v12521_v16  ;;  %v12627_v16 = vpack.c.bf16 %v10060_v31, %v10058_v2  ;;  %v4025_v2 = vld [vmem:[%s18360_s5 + $0x2d8] sm:$0xff]  ;;  %v10075_v31 = vld [vmem:[%s18360_s5 + $0x5c8] sm:$0xff] }
 0x5b3   : > { %12580 = vmatpush1.bf16.msra.mxu1 %v12579_v33  ;;  %v3998_v33 = vld [vmem:[%s18360_s5 + $0x200] sm:$0xff] }
 0x5b4   : > { %12582 = vmatprep.subr.bf16.mxu1 %v12581_v34  ;;  %v4000_v34 = vld [vmem:[%s18360_s5 + $0x210] sm:$0xff] }
 0x5b5   : > { %v12523_v48 = vpack.c.bf16 %v4000_v34, %v3998_v33 }
 0x5b7   : > { %12584 = vmatpush1.bf16.msra.mxu1 %v12583_v36 }
 0x5b8   : > { %12586 = vmatprep.subr.bf16.mxu1 %v12585_v37  ;;  %v4005_v37 = vld [vmem:[%s18360_s5 + $0x238] sm:$0xff] }
 0x5bb   : > { %12588 = vmatpush1.bf16.msra.mxu1 %v12587_v26 }
 0x5bc   : > { %12590 = vmatprep.subr.bf16.mxu1 %v12589_v47 }
 0x5bf   : > { %12592 = vmatpush1.bf16.msra.mxu1 %v12591_v52  ;;  %v12525_v52 = vpack.c.bf16 %v4005_v37, %v4003_v3  ;;  %v10069_v3 = vld [vmem:[%s18360_s5 + $0x598] sm:$0xff] }
 0x5c0   : > { %12594 = vmatprep.subr.bf16.mxu1 %v12593_v53  ;;  %v12621_v53 = vpack.c.bf16 %v10057_v45, %v10055_v43 }
 0x5c3   : > { %12596 = vmatpush1.bf16.msra.mxu1 %v12595_v51 }
 0x5c4   : > { %12598 = vmatprep.subr.bf16.mxu1 %v12597_v25  ;;  %v4009_v25 = vld [vmem:[%s18360_s5 + $0x258] sm:$0xff] }
 0x5c7   : > { %12600 = vmatpush1.bf16.msra.mxu1 %v12599_v62 }
 0x5c8   : > { %12602 = vmatprep.subr.bf16.mxu1 %v12601_v10 }
 0x5cb   : > { %12604 = vmatpush1.bf16.msra.mxu1 %v12603_v22  ;;  %v12529_v22 = vpack.c.bf16 %v4009_v25, %v4007_v56  ;;  %v10073_v56 = vld [vmem:[%s18360_s5 + $0x5b8] sm:$0xff] }
 0x5cc   : > { %12606 = vmatprep.subr.bf16.mxu1 %v12605_v28  ;;  %v12625_v28 = vpack.c.bf16 %v10061_v6, %v10059_v57 }
 0x5cf   : > { %12608 = vmatpush1.bf16.msra.mxu1 %v12607_v39 }
 0x5d0   : > { %12610 = vmatprep.subr.bf16.mxu1 %v12609_v12  ;;  %v4013_v12 = vld [vmem:[%s18360_s5 + $0x278] sm:$0xff] }
 0x5d1   : > { %v12533_v9 = vpack.c.bf16 %v4013_v12, %v4011_v5  ;;  %v10077_v5 = vld [vmem:[%s18360_s5 + $0x5d8] sm:$0xff] }
 0x5d3   : > { %12612 = vmatpush1.bf16.msra.mxu1 %v12611_v15  ;;  %v12531_v15 = vpack.c.bf16 %v4008_v1, %v4006_v59  ;;  %v10072_v59 = vld [vmem:[%s18360_s5 + $0x5b0] sm:$0xff]  ;;  %v4023_v1 = vld [vmem:[%s18360_s5 + $0x2c8] sm:$0xff] }
 0x5d4   : > { %12614 = vmatprep.subr.bf16.mxu1 %v12613_v27  ;;  %v4010_v27 = vld [vmem:[%s18360_s5 + $0x260] sm:$0xff] }
 0x5d5   : > { %v12535_v45 = vpack.c.bf16 %v4012_v21, %v4010_v27  ;;  %v10076_v27 = vld [vmem:[%s18360_s5 + $0x5d0] sm:$0xff]  ;;  %v4027_v21 = vld [vmem:[%s18360_s5 + $0x2e8] sm:$0xff] }
 0x5d7   : > { %12616 = vmatpush1.bf16.msra.mxu1 %v12615_v23  ;;  %v10064_v23 = vld [vmem:[%s18360_s5 + $0x570] sm:$0xff] }
 0x5d8   : > { %12618 = vmatprep.subr.bf16.mxu1 %v12617_v30  ;;  %v4015_v30 = vld [vmem:[%s18360_s5 + $0x288] sm:$0xff] }
 0x62d   : > { %v3531_v41 = vpop.f32.mrb[64].mxu1  ;;  %v3758_v36 = vpop.f32.mrb[64].mxu0 }
 0x62e   : > { %v3910_v38 = vmax.f32 %v3531_v41, %v3758_v36  ;;  %v3533_v46 = vpop.f32.mrb[65].mxu1  ;;  %v3760_v26 = vpop.f32.mrb[65].mxu0 }
 0x62f   : > { %v3911_v47 = vmax.f32 %v3533_v46, %v3760_v26  ;;  %v4014_v46 = vld [vmem:[%s18360_s5 + $0x280] sm:$0xff]  ;;  %v4016_v26 = vld [vmem:[%s18360_s5 + $0x290] sm:$0xff] }
 0x630   : > { %v12539_v6 = vpack.c.bf16 %v4016_v26, %v4014_v46  ;;  %v10080_v46 = vld [vmem:[%s18360_s5 + $0x5f0] sm:$0xff] }
 0x631   : > { %v3537_v60 = vpop.f32.mrb[66].mxu1  ;;  %v3764_v51 = vpop.f32.mrb[66].mxu0  ;;  %4094 = vmatprep.mubr.f32.mxu0 %v3911_v47  ;;  %4417 = vmatprep.mubr.f32.mxu1 %v3911_v47  ;;  %v12537_v47 = vpack.c.bf16 %v4017_v24, %v4015_v30  ;;  %v10081_v30 = vld [vmem:[%s18360_s5 + $0x5f8] sm:$0xff] }
 0x632   : > { %v3913_v58 = vmax.f32 %v3537_v60, %v3764_v51  ;;  %v3539_v61 = vpop.f32.mrb[67].mxu1  ;;  %v3766_v62 = vpop.f32.mrb[67].mxu0  ;;  %4095 = vmatmul.mubr.f32.vlgmr.msra.gmra.mrb[80].mxu0 %v3910_v38  ;;  %4418 = vmatmul.mubr.f32.vlgmr.msra.gmra.mrb[96].mxu1 %v3910_v38  ;;  %v12631_v38 = vpack.c.bf16 %v10064_v23, %v10062_v44  ;;  %v4029_v44 = vld [vmem:[%s18360_s5 + $0x2f8] sm:$0xff]  ;;  %v10079_v23 = vld [vmem:[%s18360_s5 + $0x5e8] sm:$0xff] }
 0x633   : > { %v3914_v10 = vmax.f32 %v3539_v61, %v3766_v62  ;;  %12524 = vmatpush1.bf16.msra.mxu0 %v12523_v48  ;;  %12620 = vmatpush1.bf16.msra.mxu1 %v12619_v50  ;;  %v12633_v48 = vpack.c.bf16 %v10069_v3, %v10067_v35  ;;  %v10066_v50 = vld [vmem:[%s18360_s5 + $0x580] sm:$0xff]  ;;  %v4020_v62 = vld [vmem:[%s18360_s5 + $0x2b0] sm:$0xff] }
 0x634   : > { %12526 = vmatprep.subr.bf16.mxu0 %v12525_v52  ;;  %12622 = vmatprep.subr.bf16.mxu1 %v12621_v53  ;;  %v4018_v61 = vld [vmem:[%s18360_s5 + $0x2a0] sm:$0xff] }
 0x635   : > { %v3543_v17 = vpop.f32.mrb[68].mxu1  ;;  %v3770_v39 = vpop.f32.mrb[68].mxu0  ;;  %4100 = vmatprep.mubr.f32.mxu0 %v3914_v10  ;;  %4423 = vmatprep.mubr.f32.mxu1 %v3914_v10  ;;  %v12541_v10 = vpack.c.bf16 %v4021_v54, %v4019_v4  ;;  %v12543_v8 = vpack.c.bf16 %v4020_v62, %v4018_v61 }
 0x636   : > { %v3916_v29 = vmax.f32 %v3543_v17, %v3770_v39  ;;  %v3545_v11 = vpop.f32.mrb[69].mxu1  ;;  %v3772_v13 = vpop.f32.mrb[69].mxu0  ;;  %4101 = vmatmul.mubr.f32.gmra.mrb[82].mxu0 %v3913_v58  ;;  %4424 = vmatmul.mubr.f32.gmra.mrb[98].mxu1 %v3913_v58  ;;  %v12635_v58 = vpack.c.bf16 %v10068_v32, %v10066_v50 }
 0x637   : > { %v3917_v49 = vmax.f32 %v3545_v11, %v3772_v13  ;;  %12528 = vmatpush1.bf16.msra.mxu0 %v12527_v63  ;;  %12624 = vmatpush1.bf16.msra.mxu1 %v12623_v0  ;;  %v12637_v63 = vpack.c.bf16 %v10073_v56, %v10071_v55  ;;  %v10070_v0 = vld [vmem:[%s18360_s5 + $0x5a0] sm:$0xff]  ;;  %v4024_v13 = vld [vmem:[%s18360_s5 + $0x2d0] sm:$0xff] }
 0x638   : > { %12530 = vmatprep.subr.bf16.mxu0 %v12529_v22  ;;  %12626 = vmatprep.subr.bf16.mxu1 %v12625_v28  ;;  %v4022_v11 = vld [vmem:[%s18360_s5 + $0x2c0] sm:$0xff] }
 0x639   : > { %v3549_v33 = vpop.f32.mrb[70].mxu1  ;;  %v3776_v34 = vpop.f32.mrb[70].mxu0  ;;  %4106 = vmatprep.mubr.f32.mxu0 %v3917_v49  ;;  %4429 = vmatprep.mubr.f32.mxu1 %v3917_v49  ;;  %v12545_v49 = vpack.c.bf16 %v4025_v2, %v4023_v1  ;;  %v12547_v3 = vpack.c.bf16 %v4024_v13, %v4022_v11 }
 0x63a   : > { %v3919_v41 = vmax.f32 %v3549_v33, %v3776_v34  ;;  %v3551_v36 = vpop.f32.mrb[71].mxu1  ;;  %v3778_v37 = vpop.f32.mrb[71].mxu0  ;;  %4107 = vmatmul.mubr.f32.gmra.mrb[84].mxu0 %v3916_v29  ;;  %4430 = vmatmul.mubr.f32.gmra.mrb[100].mxu1 %v3916_v29  ;;  %v12639_v29 = vpack.c.bf16 %v10072_v59, %v10070_v0 }
 0x63b   : > { %v3920_v43 = vmax.f32 %v3551_v36, %v3778_v37  ;;  %12532 = vmatpush1.bf16.msra.mxu0 %v12531_v15  ;;  %12628 = vmatpush1.bf16.msra.mxu1 %v12627_v16  ;;  %v12641_v15 = vpack.c.bf16 %v10077_v5, %v10075_v31  ;;  %v10074_v16 = vld [vmem:[%s18360_s5 + $0x5c0] sm:$0xff]  ;;  %v12549_v37 = vpack.c.bf16 %v4029_v44, %v4027_v21 }
 0x63c   : > { %12534 = vmatprep.subr.bf16.mxu0 %v12533_v9  ;;  %12630 = vmatprep.subr.bf16.mxu1 %v12629_v40  ;;  %v4026_v36 = vld [vmem:[%s18360_s5 + $0x2e0] sm:$0xff] }
 0x63d   : > { %v3555_v52 = vpop.f32.mrb[72].mxu1  ;;  %v3782_v53 = vpop.f32.mrb[72].mxu0  ;;  %4112 = vmatprep.mubr.f32.mxu0 %v3920_v43  ;;  %4435 = vmatprep.mubr.f32.mxu1 %v3920_v43  ;;  %v12645_v43 = vpack.c.bf16 %v10081_v30, %v10079_v23 }
 0x63e   : > { %v3922_v60 = vmax.f32 %v3555_v52, %v3782_v53  ;;  %v3557_v51 = vpop.f32.mrb[73].mxu1  ;;  %v3784_v25 = vpop.f32.mrb[73].mxu0  ;;  %4113 = vmatmul.mubr.f32.gmra.mrb[86].mxu0 %v3919_v41  ;;  %4436 = vmatmul.mubr.f32.gmra.mrb[102].mxu1 %v3919_v41  ;;  %v12643_v41 = vpack.c.bf16 %v10076_v27, %v10074_v16 }
 0x63f   : > { %v3923_v57 = vmax.f32 %v3557_v51, %v3784_v25  ;;  %12536 = vmatpush1.bf16.msra.mxu0 %v12535_v45  ;;  %12632 = vmatpush1.bf16.msra.mxu1 %v12631_v38  ;;  %v4028_v45 = vld [vmem:[%s18360_s5 + $0x2f0] sm:$0xff]  ;;  %v10078_v38 = vld [vmem:[%s18360_s5 + $0x5e0] sm:$0xff] }
 0x640   : > { %12538 = vmatprep.subr.bf16.mxu0 %v12537_v47  ;;  %12634 = vmatprep.subr.bf16.mxu1 %v12633_v48  ;;  %v12551_v52 = vpack.c.bf16 %v4028_v45, %v4026_v36  ;;  %v12647_v53 = vpack.c.bf16 %v10080_v46, %v10078_v38 }
 0x641   : > { %v3561_v22 = vpop.f32.mrb[74].mxu1  ;;  %v3788_v28 = vpop.f32.mrb[74].mxu0  ;;  %4118 = vmatprep.mubr.f32.mxu0 %v3923_v57  ;;  %4441 = vmatprep.mubr.f32.mxu1 %v3923_v57 }
 0x642   : > { %v3925_v17 = vmax.f32 %v3561_v22, %v3788_v28  ;;  %v3563_v39 = vpop.f32.mrb[75].mxu1  ;;  %v3790_v12 = vpop.f32.mrb[75].mxu0  ;;  %4119 = vmatmul.mubr.f32.gmra.mrb[88].mxu0 %v3922_v60  ;;  %4442 = vmatmul.mubr.f32.gmra.mrb[104].mxu1 %v3922_v60 }
 0x643   : > { %v3926_v7 = vmax.f32 %v3563_v39, %v3790_v12  ;;  %12540 = vmatpush1.bf16.msra.mxu0 %v12539_v6  ;;  %12636 = vmatpush1.bf16.msra.mxu1 %v12635_v58 }
 0x644   : > { %12542 = vmatprep.subr.bf16.mxu0 %v12541_v10  ;;  %12638 = vmatprep.subr.bf16.mxu1 %v12637_v63 }
 0x645   : > { %v3567_v9 = vpop.f32.mrb[76].mxu1  ;;  %v3794_v40 = vpop.f32.mrb[76].mxu0  ;;  %4124 = vmatprep.mubr.f32.mxu0 %v3926_v7  ;;  %4447 = vmatprep.mubr.f32.mxu1 %v3926_v7 }
 0x646   : > { %v3928_v33 = vmax.f32 %v3567_v9, %v3794_v40  ;;  %v3569_v34 = vpop.f32.mrb[77].mxu1  ;;  %v3796_v24 = vpop.f32.mrb[77].mxu0  ;;  %4125 = vmatmul.mubr.f32.gmra.mrb[90].mxu0 %v3925_v17  ;;  %4448 = vmatmul.mubr.f32.gmra.mrb[106].mxu1 %v3925_v17 }
 0x647   : > { %v3929_v35 = vmax.f32 %v3569_v34, %v3796_v24  ;;  %12544 = vmatpush1.bf16.msra.mxu0 %v12543_v8  ;;  %12640 = vmatpush1.bf16.msra.mxu1 %v12639_v29 }
 0x648   : > { %12546 = vmatprep.subr.bf16.mxu0 %v12545_v49  ;;  %12642 = vmatprep.subr.bf16.mxu1 %v12641_v15 }
 0x649   : > { %v3573_v26 = vpop.f32.mrb[78].mxu1  ;;  %v3800_v47 = vpop.f32.mrb[78].mxu0  ;;  %4130 = vmatprep.mubr.f32.mxu0 %v3929_v35  ;;  %4453 = vmatprep.mubr.f32.mxu1 %v3929_v35 }
 0x64a   : > { %v3931_v48 = vmax.f32 %v3573_v26, %v3800_v47  ;;  %v3575_v50 = vpop.f32.mrb[79].mxu1  ;;  %v3802_v32 = vpop.f32.mrb[79].mxu0  ;;  %4131 = vmatmul.mubr.f32.gmra.mrb[92].mxu0 %v3928_v33  ;;  %4454 = vmatmul.mubr.f32.gmra.mrb[108].mxu1 %v3928_v33 }
 0x64b   : > { %v3932_v4 = vmax.f32 %v3575_v50, %v3802_v32  ;;  %12548 = vmatpush1.bf16.msra.mxu0 %v12547_v3  ;;  %12644 = vmatpush1.bf16.msra.mxu1 %v12643_v41 }
 0x64c   : > { %12550 = vmatprep.subr.bf16.mxu0 %v12549_v37  ;;  %12646 = vmatprep.subr.bf16.mxu1 %v12645_v43 }
 0x64d   : > { %v11707_v54 = vpop.f32.mrb[80].mxu1  ;;  %4136 = vmatprep.mubr.f32.mxu0 %v3932_v4  ;;  %4459 = vmatprep.mubr.f32.mxu1 %v3932_v4 }
 0x64e   : > { %v3644_v55 = vpop.f32.mrb[81].mxu1  ;;  %4137 = vmatmul.mubr.f32.gmra.mrb[94].mxu0 %v3931_v48  ;;  %4460 = vmatmul.mubr.f32.gmra.mrb[110].mxu1 %v3931_v48 }
 0x64f   : > { %12552 = vmatpush1.bf16.msra.mxu0 %v12551_v52  ;;  %12648 = vmatpush1.bf16.msra.mxu1 %v12647_v53 }
 0x650   : > { %4207 = vmatprep.mubr.f32.mxu0 %v13868_v14  ;;  %4530 = vmatprep.mubr.f32.mxu1 %v13868_v14 }
 0x651   : > { %v11710_v56 = vpop.f32.mrb[82].mxu1 }
 0x652   : > { %v3654_v60 = vpop.f32.mrb[83].mxu1 }
 0x655   : > { %v11713_v51 = vpop.f32.mrb[84].mxu1 }
 0x656   : > { %v3664_v25 = vpop.f32.mrb[85].mxu1 }
 0x659   : > { %v11716_v57 = vpop.f32.mrb[86].mxu1 }
 0x65a   : > { %v3674_v6 = vpop.f32.mrb[87].mxu1 }
 0x66d   : > { %v11751_v58 = vpop.f32.mrb[88].mxu1 }
 0x66e   : > { %v3915_v61 = vmax.f32 %v11707_v54, %v11751_v58  ;;  %v3871_v62 = vpop.f32.mrb[89].mxu1 }
 0x66f   : > { %v3912_v10 = vmax.f32 %v3644_v55, %v3871_v62 }
 0x671   : > { %v11754_v63 = vpop.f32.mrb[90].mxu1  ;;  %4208 = vmatmul.mubr.f32.vlgmr.msra.gmra.mrb[80].mxu0 %v3912_v10  ;;  %4531 = vmatmul.mubr.f32.vlgmr.msra.gmra.mrb[96].mxu1 %v3912_v10 }
 0x672   : > { %v3921_v0 = vmax.f32 %v11710_v56, %v11754_v63  ;;  %v3881_v59 = vpop.f32.mrb[91].mxu1  ;;  %4213 = vmatprep.mubr.f32.mxu0 %v13868_v14  ;;  %4536 = vmatprep.mubr.f32.mxu1 %v13868_v14 }
 0x673   : > { %v3918_v1 = vmax.f32 %v3654_v60, %v3881_v59 }
 0x675   : > { %v11757_v22 = vpop.f32.mrb[92].mxu1  ;;  %4214 = vmatmul.mubr.f32.gmra.mrb[82].mxu0 %v3915_v61  ;;  %4537 = vmatmul.mubr.f32.gmra.mrb[98].mxu1 %v3915_v61 }
 0x676   : > { %v3927_v28 = vmax.f32 %v11713_v51, %v11757_v22  ;;  %v3891_v2 = vpop.f32.mrb[93].mxu1  ;;  %4219 = vmatprep.mubr.f32.mxu0 %v13868_v14  ;;  %4542 = vmatprep.mubr.f32.mxu1 %v13868_v14 }
 0x677   : > { %v3924_v31 = vmax.f32 %v3664_v25, %v3891_v2 }
 0x679   : > { %v11760_v5 = vpop.f32.mrb[94].mxu1  ;;  %4220 = vmatmul.mubr.f32.gmra.mrb[84].mxu0 %v3918_v1  ;;  %4543 = vmatmul.mubr.f32.gmra.mrb[100].mxu1 %v3918_v1 }
 0x67a   : > { %v3933_v17 = vmax.f32 %v11716_v57, %v11760_v5  ;;  %v3901_v39 = vpop.f32.mrb[95].mxu1  ;;  %4225 = vmatprep.mubr.f32.mxu0 %v13868_v14  ;;  %4548 = vmatprep.mubr.f32.mxu1 %v13868_v14 }
 0x67b   : > { %v3930_v12 = vmax.f32 %v3674_v6, %v3901_v39  ;;  %v10107_v39 = vld [vmem:[%s18362_s7 + $0xc8] sm:$0xff] }
 0x67d   : > { %4226 = vmatmul.mubr.f32.gmra.mrb[86].mxu0 %v3921_v0  ;;  %4549 = vmatmul.mubr.f32.gmra.mrb[102].mxu1 %v3921_v0 }
 0x67e   : > { %4231 = vmatprep.mubr.f32.mxu0 %v13868_v14  ;;  %4554 = vmatprep.mubr.f32.mxu1 %v13868_v14 }
 0x681   : > { %4232 = vmatmul.mubr.f32.gmra.mrb[88].mxu0 %v3924_v31  ;;  %4555 = vmatmul.mubr.f32.gmra.mrb[104].mxu1 %v3924_v31 }
 0x682   : > { %4237 = vmatprep.mubr.f32.mxu0 %v13868_v14  ;;  %4560 = vmatprep.mubr.f32.mxu1 %v13868_v14 }
 0x685   : > { %4238 = vmatmul.mubr.f32.gmra.mrb[90].mxu0 %v3927_v28  ;;  %4561 = vmatmul.mubr.f32.gmra.mrb[106].mxu1 %v3927_v28 }
 0x686   : > { %4243 = vmatprep.mubr.f32.mxu0 %v13868_v14  ;;  %4566 = vmatprep.mubr.f32.mxu1 %v13868_v14 }
 0x689   : > { %4244 = vmatmul.mubr.f32.gmra.mrb[92].mxu0 %v3930_v12  ;;  %4567 = vmatmul.mubr.f32.gmra.mrb[108].mxu1 %v3930_v12  ;;  %v4741_v12 = vld [vmem:[%s18362_s7] sm:$0xff] }
 0x68a   : > { %4249 = vmatprep.mubr.f32.mxu0 %v13868_v14  ;;  %4572 = vmatprep.mubr.f32.mxu1 %v13868_v14 }
 0x68d   : > { %4250 = vmatmul.mubr.f32.gmra.mrb[94].mxu0 %v3933_v17  ;;  %4573 = vmatmul.mubr.f32.gmra.mrb[110].mxu1 %v3933_v17  ;;  %v10106_v17 = vld [vmem:[%s18362_s7 + $0xc0] sm:$0xff] }
 0x68e   : > { %4692 = vmatprep.mubr.f32.mxu0 %v13868_v14  ;;  %4862 = vmatprep.mubr.f32.mxu1 %v13868_v14 }
 0x744   : > { %v4209_v7 = vpop.f32.mrb[80].mxu0  ;;  %v4532_v8 = vpop.f32.mrb[96].mxu1 }
 0x745   : > { %v4579_v29 = vmax.f32 %v4209_v7, %v4532_v8  ;;  %v4211_v11 = vpop.f32.mrb[81].mxu0  ;;  %v4534_v13 = vpop.f32.mrb[97].mxu1  ;;  %v4742_v7 = vld [vmem:[%s18362_s7 + $0x8] sm:$0xff]  ;;  %v4595_v8 = vld [vmem:[%s18361_s6] sm:$0xff] }
 0x746   : > { %v4580_v49 = vmax.f32 %v4211_v11, %v4534_v13  ;;  %v12682_v11 = vpack.c.bf16 %v10107_v39, %v10106_v17  ;;  %v13869_v13 = vmov 0.0|0.0   ;;  %v4750_v17 = vld [vmem:[%s18362_s7 + $0x48] sm:$0xff]  ;;  %v4602_v39 = vld [vmem:[%s18361_s6 + $0x38] sm:$0xff] }
 0x748   : > { %v4215_v15 = vpop.f32.mrb[82].mxu0  ;;  %v4538_v16 = vpop.f32.mrb[98].mxu1 }
 0x749   : > { %v4581_v27 = vmax.f32 %v4215_v15, %v4538_v16  ;;  %v4217_v21 = vpop.f32.mrb[83].mxu0  ;;  %v4540_v9 = vpop.f32.mrb[99].mxu1  ;;  %v10109_v15 = vld [vmem:[%s18362_s7 + $0xd8] sm:$0xff]  ;;  %v12718_v16 = vpack.c.bf16 %v4742_v7, %v4741_v12 }
 0x74a   : > { %v4582_v40 = vmax.f32 %v4217_v21, %v4540_v9  ;;  %v10091_v21 = vld [vmem:[%s18361_s6 + $0x48] sm:$0xff]  ;;  %v10097_v12 = vld [vmem:[%s18361_s6 + $0x78] sm:$0xff] }
 0x74b   : > { %v16178_v44 = vpack.c.bf16 %v4581_v27, %v4579_v29  ;;  %v10090_v29 = vld [vmem:[%s18361_s6 + $0x40] sm:$0xff]  ;;  %v4596_v27 = vld [vmem:[%s18361_s6 + $0x8] sm:$0xff] }
 0x74c   : > { %v16180_v23 = vpack.c.bf16 %v4582_v40, %v4580_v49  ;;  %v4221_v30 = vpop.f32.mrb[84].mxu0  ;;  %v4544_v33 = vpop.f32.mrb[100].mxu1  ;;  %v10108_v49 = vld [vmem:[%s18362_s7 + $0xd0] sm:$0xff]  ;;  %v10110_v40 = vld [vmem:[%s18362_s7 + $0xe0] sm:$0xff] }
 0x74d   : > { %v4583_v34 = vmax.f32 %v4221_v30, %v4544_v33  ;;  %v4223_v24 = vpop.f32.mrb[85].mxu0  ;;  %v4546_v35 = vpop.f32.mrb[101].mxu1  ;;  %v12685_v9 = vpack.c.bf16 %v10109_v15, %v10108_v49  ;;  %v10111_v30 = vld [vmem:[%s18362_s7 + $0xe8] sm:$0xff]  ;;  %v4743_v33 = vld [vmem:[%s18362_s7 + $0x10] sm:$0xff]  ;;  %v4752_v15 = vld [vmem:[%s18362_s7 + $0x58] sm:$0xff] }
 0x74e   : > { %v4584_v3 = vmax.f32 %v4223_v24, %v4546_v35  ;;  %12650 = vmatprep.subr.bf16.mxu0 %v16180_v23  ;;  %12666 = vmatprep.subr.bf16.mxu1 %v16180_v23  ;;  %v4597_v24 = vld [vmem:[%s18361_s6 + $0x10] sm:$0xff] }
 0x74f   : > { %12652 = vmatpush1.bf16.msra.mxu0 %v16178_v44  ;;  %12668 = vmatpush1.bf16.msra.mxu1 %v16178_v44  ;;  %v10092_v35 = vld [vmem:[%s18361_s6 + $0x50] sm:$0xff] }
 0x750   : > { %v4227_v41 = vpop.f32.mrb[86].mxu0  ;;  %v4550_v36 = vpop.f32.mrb[102].mxu1  ;;  %v4751_v49 = vld [vmem:[%s18362_s7 + $0x50] sm:$0xff] }
 0x751   : > { %v4585_v37 = vmax.f32 %v4227_v41, %v4550_v36  ;;  %v4229_v43 = vpop.f32.mrb[87].mxu0  ;;  %v4552_v45 = vpop.f32.mrb[103].mxu1  ;;  %v10112_v41 = vld [vmem:[%s18362_s7 + $0xf0] sm:$0xff]  ;;  %v10113_v36 = vld [vmem:[%s18362_s7 + $0xf8] sm:$0xff] }
 0x752   : > { %v4586_v38 = vmax.f32 %v4229_v43, %v4552_v45  ;;  %v4598_v43 = vld [vmem:[%s18361_s6 + $0x18] sm:$0xff] }
 0x753   : > { %v16186_v46 = vpack.c.bf16 %v4585_v37, %v4583_v34  ;;  %v4744_v34 = vld [vmem:[%s18362_s7 + $0x18] sm:$0xff] }
 0x754   : > { %v16188_v26 = vpack.c.bf16 %v4586_v38, %v4584_v3  ;;  %v4233_v47 = vpop.f32.mrb[88].mxu0  ;;  %v4556_v48 = vpop.f32.mrb[104].mxu1  ;;  %v12688_v3 = vpack.c.bf16 %v10111_v30, %v10110_v40  ;;  %v12721_v37 = vpack.c.bf16 %v4744_v34, %v4743_v33  ;;  %v10093_v45 = vld [vmem:[%s18361_s6 + $0x58] sm:$0xff]  ;;  %v12691_v38 = vpack.c.bf16 %v10113_v36, %v10112_v41  ;;  %v4753_v40 = vld [vmem:[%s18362_s7 + $0x60] sm:$0xff]  ;;  %v4754_v30 = vld [vmem:[%s18362_s7 + $0x68] sm:$0xff] }
 0x755   : > { %v4587_v50 = vmax.f32 %v4233_v47, %v4556_v48  ;;  %v4235_v32 = vpop.f32.mrb[89].mxu0  ;;  %v4558_v4 = vpop.f32.mrb[105].mxu1  ;;  %v10114_v47 = vld [vmem:[%s18362_s7 + $0x100] sm:$0xff]  ;;  %v10115_v48 = vld [vmem:[%s18362_s7 + $0x108] sm:$0xff]  ;;  %v4756_v41 = vld [vmem:[%s18362_s7 + $0x78] sm:$0xff] }
 0x756   : > { %v4588_v52 = vmax.f32 %v4235_v32, %v4558_v4  ;;  %12654 = vmatprep.subr.bf16.mxu0 %v16188_v26  ;;  %12670 = vmatprep.subr.bf16.mxu1 %v16188_v26  ;;  %v4746_v32 = vld [vmem:[%s18362_s7 + $0x28] sm:$0xff]  ;;  %v4599_v4 = vld [vmem:[%s18361_s6 + $0x20] sm:$0xff] }
 0x757   : > { %12656 = vmatpush1.bf16.msra.mxu0 %v16186_v46  ;;  %12672 = vmatpush1.bf16.msra.mxu1 %v16186_v46  ;;  %v10126_v34 = vld [vmem:[%s18362_s7 + $0x160] sm:$0xff] }
 0x758   : > { %v4239_v53 = vpop.f32.mrb[90].mxu0  ;;  %v4562_v54 = vpop.f32.mrb[106].mxu1 }
 0x759   : > { %v4589_v55 = vmax.f32 %v4239_v53, %v4562_v54  ;;  %v4241_v56 = vpop.f32.mrb[91].mxu0  ;;  %v4564_v60 = vpop.f32.mrb[107].mxu1  ;;  %v12694_v53 = vpack.c.bf16 %v10115_v48, %v10114_v47  ;;  %v10116_v54 = vld [vmem:[%s18362_s7 + $0x110] sm:$0xff]  ;;  %v4758_v47 = vld [vmem:[%s18362_s7 + $0x88] sm:$0xff] }
 0x75a   : > { %v4590_v51 = vmax.f32 %v4241_v56, %v4564_v60  ;;  %v4600_v60 = vld [vmem:[%s18361_s6 + $0x28] sm:$0xff] }
 0x75b   : > { %v16194_v25 = vpack.c.bf16 %v4589_v55, %v4587_v50  ;;  %v4745_v50 = vld [vmem:[%s18362_s7 + $0x20] sm:$0xff]  ;;  %v10117_v55 = vld [vmem:[%s18362_s7 + $0x118] sm:$0xff] }
 0x75c   : > { %v16196_v57 = vpack.c.bf16 %v4590_v51, %v4588_v52  ;;  %v4245_v6 = vpop.f32.mrb[92].mxu0  ;;  %v4568_v58 = vpop.f32.mrb[108].mxu1  ;;  %v10094_v52 = vld [vmem:[%s18361_s6 + $0x60] sm:$0xff]  ;;  %v12724_v56 = vpack.c.bf16 %v4746_v32, %v4745_v50  ;;  %v10095_v51 = vld [vmem:[%s18361_s6 + $0x68] sm:$0xff]  ;;  %v4759_v32 = vld [vmem:[%s18362_s7 + $0x90] sm:$0xff] }
 0x75d   : > { %v4591_v61 = vmax.f32 %v4245_v6, %v4568_v58  ;;  %v4247_v62 = vpop.f32.mrb[93].mxu0  ;;  %v4570_v10 = vpop.f32.mrb[109].mxu1  ;;  %v12697_v6 = vpack.c.bf16 %v10117_v55, %v10116_v54  ;;  %v10118_v58 = vld [vmem:[%s18362_s7 + $0x120] sm:$0xff]  ;;  %v4762_v54 = vld [vmem:[%s18362_s7 + $0xa8] sm:$0xff] }
 0x75e   : > { %v4592_v63 = vmax.f32 %v4247_v62, %v4570_v10  ;;  %12658 = vmatprep.subr.bf16.mxu0 %v16196_v57  ;;  %12674 = vmatprep.subr.bf16.mxu1 %v16196_v57  ;;  %v4747_v62 = vld [vmem:[%s18362_s7 + $0x30] sm:$0xff]  ;;  %v4748_v10 = vld [vmem:[%s18362_s7 + $0x38] sm:$0xff] }
 0x75f   : > { %12660 = vmatpush1.bf16.msra.mxu0 %v16194_v25  ;;  %12676 = vmatpush1.bf16.msra.mxu1 %v16194_v25 }
 0x760   : > { %v4251_v0 = vpop.f32.mrb[94].mxu0  ;;  %v4574_v59 = vpop.f32.mrb[110].mxu1 }
 0x761   : > { %v4593_v1 = vmax.f32 %v4251_v0, %v4574_v59  ;;  %v4253_v22 = vpop.f32.mrb[95].mxu0  ;;  %v4576_v28 = vpop.f32.mrb[111].mxu1  ;;  %v10096_v0 = vld [vmem:[%s18361_s6 + $0x70] sm:$0xff] }
 0x762   : > { %v4594_v2 = vmax.f32 %v4253_v22, %v4576_v28  ;;  %v10121_v22 = vld [vmem:[%s18362_s7 + $0x138] sm:$0xff]  ;;  %v12727_v28 = vpack.c.bf16 %v4748_v10, %v4747_v62 }
 0x763   : > { %v16202_v31 = vpack.c.bf16 %v4593_v1, %v4591_v61  ;;  %v10119_v61 = vld [vmem:[%s18362_s7 + $0x128] sm:$0xff]  ;;  %v10120_v1 = vld [vmem:[%s18362_s7 + $0x130] sm:$0xff] }
 0x764   : > { %v16204_v5 = vpack.c.bf16 %v4594_v2, %v4592_v63  ;;  %v4601_v63 = vld [vmem:[%s18361_s6 + $0x30] sm:$0xff]  ;;  %v12700_v59 = vpack.c.bf16 %v10119_v61, %v10118_v58  ;;  %v4749_v2 = vld [vmem:[%s18362_s7 + $0x40] sm:$0xff]  ;;  %v12703_v7 = vpack.c.bf16 %v10121_v22, %v10120_v1  ;;  %v10163_v58 = vld [vmem:[%s18362_s7 + $0x188] sm:$0xff] }
 0x765   : > { %v10165_v1 = vld [vmem:[%s18362_s7 + $0x198] sm:$0xff] }
 0x766   : > { %12662 = vmatprep.subr.bf16.mxu0 %v16204_v5  ;;  %12678 = vmatprep.subr.bf16.mxu1 %v16204_v5 }
 0x767   : > { %12664 = vmatpush1.bf16.msra.mxu0 %v16202_v31  ;;  %12680 = vmatpush1.bf16.msra.mxu1 %v16202_v31 }
 0x768   : > { %12681 = vmatprep.subr.bf16.mxu0 %v13869_v13  ;;  %12717 = vmatprep.subr.bf16.mxu1 %v13869_v13 }
 0x76a   : > { %10082 = vmatmul.mubr.msk.f32.vlgmr.msra.gmra.mrb[96].mxu0 %vm4603_vm0, %v4595_v8  ;;  %10098 = vmatmul.mubr.msk.f32.vlgmr.msra.gmra.mrb[112].mxu1 %vm4603_vm0, %v10090_v29  ;;  %v10122_v8 = vld [vmem:[%s18362_s7 + $0x140] sm:$0xff]  ;;  %v10123_v29 = vld [vmem:[%s18362_s7 + $0x148] sm:$0xff] }
 0x76b   : > { %12683 = vmatpush1.bf16.msra.mxu0 %v12682_v11  ;;  %4698 = vmatprep.mubr.f32.mxu0 %v13868_v14  ;;  %v12730_v11 = vpack.c.bf16 %v4750_v17, %v4749_v2 }
 0x76c   : > { %4868 = vmatprep.mubr.f32.mxu1 %v13868_v14  ;;  %12684 = vmatprep.subr.bf16.mxu0 %v13869_v13 }
 0x76d   : > { %12719 = vmatpush1.bf16.msra.mxu1 %v12718_v16  ;;  %v12706_v16 = vpack.c.bf16 %v10123_v29, %v10122_v8 }
 0x76e   : > { %10083 = vmatmul.mubr.msk.f32.gmra.mrb[98].mxu0 %vm4603_vm0, %v4596_v27  ;;  %10099 = vmatmul.mubr.msk.f32.gmra.mrb[114].mxu1 %vm4603_vm0, %v10091_v21  ;;  %v10124_v27 = vld [vmem:[%s18362_s7 + $0x150] sm:$0xff]  ;;  %v10125_v21 = vld [vmem:[%s18362_s7 + $0x158] sm:$0xff] }
 0x76f   : > { %12686 = vmatpush1.bf16.msra.mxu0 %v12685_v9  ;;  %4704 = vmatprep.mubr.f32.mxu0 %v13868_v14  ;;  %v12733_v9 = vpack.c.bf16 %v4752_v15, %v4751_v49  ;;  %v12709_v33 = vpack.c.bf16 %v10125_v21, %v10124_v27  ;;  %v10169_v27 = vld [vmem:[%s18362_s7 + $0x1b8] sm:$0xff] }
 0x770   : > { %4874 = vmatprep.mubr.f32.mxu1 %v13868_v14  ;;  %12687 = vmatprep.subr.bf16.mxu0 %v13869_v13 }
 0x771   : > { %12720 = vmatprep.subr.bf16.mxu1 %v13869_v13 }
 0x772   : > { %10084 = vmatmul.mubr.msk.f32.gmra.mrb[100].mxu0 %vm4603_vm0, %v4597_v24  ;;  %10100 = vmatmul.mubr.msk.f32.gmra.mrb[116].mxu1 %vm4603_vm0, %v10092_v35  ;;  %v10127_v24 = vld [vmem:[%s18362_s7 + $0x168] sm:$0xff]  ;;  %v12736_v35 = vpack.c.bf16 %v4754_v30, %v4753_v40 }
 0x773   : > { %12689 = vmatpush1.bf16.msra.mxu0 %v12688_v3  ;;  %4710 = vmatprep.mubr.f32.mxu0 %v13868_v14  ;;  %v4755_v3 = vld [vmem:[%s18362_s7 + $0x70] sm:$0xff]  ;;  %v12712_v36 = vpack.c.bf16 %v10127_v24, %v10126_v34 }
 0x774   : > { %4880 = vmatprep.mubr.f32.mxu1 %v13868_v14  ;;  %12690 = vmatprep.subr.bf16.mxu0 %v13869_v13 }
 0x775   : > { %12722 = vmatpush1.bf16.msra.mxu1 %v12721_v37  ;;  %v10128_v37 = vld [vmem:[%s18362_s7 + $0x170] sm:$0xff] }
 0x776   : > { %10085 = vmatmul.mubr.msk.f32.gmra.mrb[102].mxu0 %vm4603_vm0, %v4598_v43  ;;  %10101 = vmatmul.mubr.msk.f32.gmra.mrb[118].mxu1 %vm4603_vm0, %v10093_v45  ;;  %v10129_v43 = vld [vmem:[%s18362_s7 + $0x178] sm:$0xff]  ;;  %v12739_v45 = vpack.c.bf16 %v4756_v41, %v4755_v3 }
 0x777   : > { %12692 = vmatpush1.bf16.msra.mxu0 %v12691_v38  ;;  %4716 = vmatprep.mubr.f32.mxu0 %v13868_v14  ;;  %v4757_v38 = vld [vmem:[%s18362_s7 + $0x80] sm:$0xff]  ;;  %v12715_v48 = vpack.c.bf16 %v10129_v43, %v10128_v37 }
 0x778   : > { %4886 = vmatprep.mubr.f32.mxu1 %v13868_v14  ;;  %12693 = vmatprep.subr.bf16.mxu0 %v13869_v13  ;;  %v12742_v50 = vpack.c.bf16 %v4758_v47, %v4757_v38 }
 0x779   : > { %12723 = vmatprep.subr.bf16.mxu1 %v13869_v13 }
 0x77a   : > { %10086 = vmatmul.mubr.msk.f32.gmra.mrb[104].mxu0 %vm4603_vm0, %v4599_v4  ;;  %10102 = vmatmul.mubr.msk.f32.gmra.mrb[120].mxu1 %vm4603_vm0, %v10094_v52  ;;  %v4760_v4 = vld [vmem:[%s18362_s7 + $0x98] sm:$0xff] }
 0x77b   : > { %12695 = vmatpush1.bf16.msra.mxu0 %v12694_v53  ;;  %4722 = vmatprep.mubr.f32.mxu0 %v13868_v14  ;;  %v12745_v52 = vpack.c.bf16 %v4760_v4, %v4759_v32  ;;  %v4761_v53 = vld [vmem:[%s18362_s7 + $0xa0] sm:$0xff] }
 0x77c   : > { %4892 = vmatprep.mubr.f32.mxu1 %v13868_v14  ;;  %12696 = vmatprep.subr.bf16.mxu0 %v13869_v13  ;;  %v12748_v55 = vpack.c.bf16 %v4762_v54, %v4761_v53  ;;  %v10146_v53 = vld [vmem:[%s18361_s6 + $0x80] sm:$0xff]  ;;  %v10147_v54 = vld [vmem:[%s18361_s6 + $0x88] sm:$0xff] }
 0x77d   : > { %12725 = vmatpush1.bf16.msra.mxu1 %v12724_v56  ;;  %v4763_v56 = vld [vmem:[%s18362_s7 + $0xb0] sm:$0xff] }
 0x77e   : > { %10087 = vmatmul.mubr.msk.f32.gmra.mrb[106].mxu0 %vm4603_vm0, %v4600_v60  ;;  %10103 = vmatmul.mubr.msk.f32.gmra.mrb[122].mxu1 %vm4603_vm0, %v10095_v51  ;;  %v4764_v60 = vld [vmem:[%s18362_s7 + $0xb8] sm:$0xff] }
 0x77f   : > { %12698 = vmatpush1.bf16.msra.mxu0 %v12697_v6  ;;  %4728 = vmatprep.mubr.f32.mxu0 %v13868_v14  ;;  %v12751_v51 = vpack.c.bf16 %v4764_v60, %v4763_v56  ;;  %v10162_v6 = vld [vmem:[%s18362_s7 + $0x180] sm:$0xff]  ;;  %v10149_v56 = vld [vmem:[%s18361_s6 + $0x98] sm:$0xff] }
 0x780   : > { %4898 = vmatprep.mubr.f32.mxu1 %v13868_v14  ;;  %12699 = vmatprep.subr.bf16.mxu0 %v13869_v13  ;;  %v12770_v10 = vpack.c.bf16 %v10163_v58, %v10162_v6  ;;  %v10150_v60 = vld [vmem:[%s18361_s6 + $0xa0] sm:$0xff]  ;;  %v10152_v6 = vld [vmem:[%s18361_s6 + $0xb0] sm:$0xff] }
 0x781   : > { %12726 = vmatprep.subr.bf16.mxu1 %v13869_v13  ;;  %v10194_v58 = vld [vmem:[%s18361_s6 + $0xc0] sm:$0xff] }
 0x782   : > { %10088 = vmatmul.mubr.msk.f32.gmra.mrb[108].mxu0 %vm4603_vm0, %v4601_v63  ;;  %10104 = vmatmul.mubr.msk.f32.gmra.mrb[124].mxu1 %vm4603_vm0, %v10096_v0 }
 0x783   : > { %12701 = vmatpush1.bf16.msra.mxu0 %v12700_v59  ;;  %4734 = vmatprep.mubr.f32.mxu0 %v13868_v14  ;;  %v10164_v59 = vld [vmem:[%s18362_s7 + $0x190] sm:$0xff] }
 0x784   : > { %4904 = vmatprep.mubr.f32.mxu1 %v13868_v14  ;;  %12702 = vmatprep.subr.bf16.mxu0 %v13869_v13  ;;  %v12773_v2 = vpack.c.bf16 %v10165_v1, %v10164_v59  ;;  %v10174_v1 = vld [vmem:[%s18362_s7 + $0x1e0] sm:$0xff] }
 0x785   : > { %12728 = vmatpush1.bf16.msra.mxu1 %v12727_v28 }
 0x786   : > { %10089 = vmatmul.mubr.msk.f32.gmra.mrb[110].mxu0 %vm4603_vm0, %v4602_v39  ;;  %10105 = vmatmul.mubr.msk.f32.gmra.mrb[126].mxu1 %vm4603_vm0, %v10097_v12  ;;  %v10166_v12 = vld [vmem:[%s18362_s7 + $0x1a0] sm:$0xff] }
 0x787   : > { %12704 = vmatpush1.bf16.msra.mxu0 %v12703_v7  ;;  %12729 = vmatprep.subr.bf16.mxu1 %v13869_v13  ;;  %v10167_v7 = vld [vmem:[%s18362_s7 + $0x1a8] sm:$0xff] }
 0x788   : > { %12705 = vmatprep.subr.bf16.mxu0 %v13869_v13 }
 0x789   : > { %12731 = vmatpush1.bf16.msra.mxu1 %v12730_v11  ;;  %v12776_v11 = vpack.c.bf16 %v10167_v7, %v10166_v12  ;;  %v10243_v12 = vld [vmem:[%s18361_s6 + $0x108] sm:$0xff] }
 0x78a   : > { %12732 = vmatprep.subr.bf16.mxu1 %v13869_v13 }
 0x78b   : > { %12707 = vmatpush1.bf16.msra.mxu0 %v12706_v16  ;;  %v10168_v16 = vld [vmem:[%s18362_s7 + $0x1b0] sm:$0xff] }
 0x78c   : > { %12708 = vmatprep.subr.bf16.mxu0 %v13869_v13  ;;  %v12779_v40 = vpack.c.bf16 %v10169_v27, %v10168_v16  ;;  %v10181_v16 = vld [vmem:[%s18362_s7 + $0x218] sm:$0xff] }
 0x78d   : > { %12734 = vmatpush1.bf16.msra.mxu1 %v12733_v9  ;;  %v10245_v27 = vld [vmem:[%s18361_s6 + $0x118] sm:$0xff] }
 0x78e   : > { %12735 = vmatprep.subr.bf16.mxu1 %v13869_v13 }
 0x78f   : > { %12710 = vmatpush1.bf16.msra.mxu0 %v12709_v33 }
 0x790   : > { %12711 = vmatprep.subr.bf16.mxu0 %v13869_v13 }
 0x791   : > { %12737 = vmatpush1.bf16.msra.mxu1 %v12736_v35 }
 0x792   : > { %12738 = vmatprep.subr.bf16.mxu1 %v13869_v13 }
 0x793   : > { %12713 = vmatpush1.bf16.msra.mxu0 %v12712_v36 }
 0x794   : > { %12714 = vmatprep.subr.bf16.mxu0 %v13869_v13 }
 0x795   : > { %12740 = vmatpush1.bf16.msra.mxu1 %v12739_v45 }
 0x796   : > { %12741 = vmatprep.subr.bf16.mxu1 %v13869_v13 }
 0x797   : > { %12716 = vmatpush1.bf16.msra.mxu0 %v12715_v48 }
 0x798   : > { %12754 = vmatprep.subr.bf16.mxu0 %v16180_v23 }
 0x799   : > { %12743 = vmatpush1.bf16.msra.mxu1 %v12742_v50 }
 0x79a   : > { %12744 = vmatprep.subr.bf16.mxu1 %v13869_v13 }
 0x79d   : > { %12746 = vmatpush1.bf16.msra.mxu1 %v12745_v52 }
 0x79e   : > { %12747 = vmatprep.subr.bf16.mxu1 %v13869_v13 }
 0x7a1   : > { %12749 = vmatpush1.bf16.msra.mxu1 %v12748_v55  ;;  %v10148_v55 = vld [vmem:[%s18361_s6 + $0x90] sm:$0xff] }
 0x7a2   : > { %12750 = vmatprep.subr.bf16.mxu1 %v13869_v13 }
 0x7a5   : > { %12752 = vmatpush1.bf16.msra.mxu1 %v12751_v51  ;;  %v10151_v51 = vld [vmem:[%s18361_s6 + $0xa8] sm:$0xff] }
 0x7a6   : > { %12769 = vmatprep.subr.bf16.mxu1 %v13869_v13 }
 0x83d   : > { %v4694_v61 = vpop.f32.mrb[96].mxu0  ;;  %v4864_v62 = vpop.f32.mrb[112].mxu1 }
 0x83e   : > { %v4696_v63 = vpop.f32.mrb[97].mxu0  ;;  %v4866_v0 = vpop.f32.mrb[113].mxu1 }
 0x83f   : > { %10130 = vmatprep.mubr.msk.f32.mxu0 %vm4603_vm0, %v4866_v0  ;;  %10138 = vmatprep.mubr.msk.f32.mxu1 %vm4603_vm0, %v4696_v63  ;;  %v10173_v63 = vld [vmem:[%s18362_s7 + $0x1d8] sm:$0xff] }
 0x840   : > { %5025 = vmatmul.mubr.f32.vlgmr.msra.gmra.mrb[112].mxu0 %v4864_v62  ;;  %5154 = vmatmul.mubr.f32.vlgmr.msra.gmra.mrb[128].mxu1 %v4694_v61  ;;  %v10195_v61 = vld [vmem:[%s18361_s6 + $0xc8] sm:$0xff]  ;;  %v10196_v62 = vld [vmem:[%s18361_s6 + $0xd0] sm:$0xff]  ;;  %v10201_v0 = vld [vmem:[%s18361_s6 + $0xf8] sm:$0xff] }
 0x841   : > { %12756 = vmatpush1.bf16.msra.mxu0 %v16178_v44  ;;  %v4700_v22 = vpop.f32.mrb[98].mxu0  ;;  %v4870_v28 = vpop.f32.mrb[114].mxu1  ;;  %12771 = vmatpush1.bf16.msra.mxu1 %v12770_v10  ;;  %v10172_v10 = vld [vmem:[%s18362_s7 + $0x1d0] sm:$0xff] }
 0x842   : > { %12758 = vmatprep.subr.bf16.mxu0 %v16188_v26  ;;  %v4702_v17 = vpop.f32.mrb[99].mxu0  ;;  %v4872_v39 = vpop.f32.mrb[115].mxu1  ;;  %12772 = vmatprep.subr.bf16.mxu1 %v13869_v13  ;;  %v12785_v59 = vpack.c.bf16 %v10173_v63, %v10172_v10  ;;  %v10277_v10 = vld [vmem:[%s18362_s7 + $0x398] sm:$0xff] }
 0x843   : > { %10131 = vmatprep.mubr.msk.f32.mxu0 %vm4603_vm0, %v4872_v39  ;;  %10139 = vmatprep.mubr.msk.f32.mxu1 %vm4603_vm0, %v4702_v17  ;;  %v10176_v17 = vld [vmem:[%s18362_s7 + $0x1f0] sm:$0xff]  ;;  %v10177_v39 = vld [vmem:[%s18362_s7 + $0x1f8] sm:$0xff] }
 0x844   : > { %5030 = vmatmul.mubr.f32.gmra.mrb[114].mxu0 %v4870_v28  ;;  %5159 = vmatmul.mubr.f32.gmra.mrb[130].mxu1 %v4700_v22  ;;  %v10175_v22 = vld [vmem:[%s18362_s7 + $0x1e8] sm:$0xff]  ;;  %v10242_v28 = vld [vmem:[%s18361_s6 + $0x100] sm:$0xff]  ;;  %v12791_v7 = vpack.c.bf16 %v10177_v39, %v10176_v17 }
 0x845   : > { %12760 = vmatpush1.bf16.msra.mxu0 %v16186_v46  ;;  %v4706_v8 = vpop.f32.mrb[100].mxu0  ;;  %v4876_v29 = vpop.f32.mrb[116].mxu1  ;;  %12774 = vmatpush1.bf16.msra.mxu1 %v12773_v2  ;;  %v12788_v2 = vpack.c.bf16 %v10175_v22, %v10174_v1  ;;  %v10280_v22 = vld [vmem:[%s18362_s7 + $0x3b0] sm:$0xff] }
 0x846   : > { %12762 = vmatprep.subr.bf16.mxu0 %v16196_v57  ;;  %v4708_v49 = vpop.f32.mrb[101].mxu0  ;;  %v4878_v15 = vpop.f32.mrb[117].mxu1  ;;  %12775 = vmatprep.subr.bf16.mxu1 %v13869_v13 }
 0x847   : > { %10132 = vmatprep.mubr.msk.f32.mxu0 %vm4603_vm0, %v4878_v15  ;;  %10140 = vmatprep.mubr.msk.f32.mxu1 %vm4603_vm0, %v4708_v49  ;;  %v10180_v15 = vld [vmem:[%s18362_s7 + $0x210] sm:$0xff] }
 0x848   : > { %5035 = vmatmul.mubr.f32.gmra.mrb[116].mxu0 %v4876_v29  ;;  %5164 = vmatmul.mubr.f32.gmra.mrb[132].mxu1 %v4706_v8  ;;  %v10178_v8 = vld [vmem:[%s18362_s7 + $0x200] sm:$0xff]  ;;  %v10179_v29 = vld [vmem:[%s18362_s7 + $0x208] sm:$0xff] }
 0x849   : > { %12764 = vmatpush1.bf16.msra.mxu0 %v16194_v25  ;;  %v4712_v21 = vpop.f32.mrb[102].mxu0  ;;  %v4882_v9 = vpop.f32.mrb[118].mxu1  ;;  %12777 = vmatpush1.bf16.msra.mxu1 %v12776_v11  ;;  %v10244_v11 = vld [vmem:[%s18361_s6 + $0x110] sm:$0xff]  ;;  %v12794_v49 = vpack.c.bf16 %v10179_v29, %v10178_v8 }
 0x84a   : > { %12766 = vmatprep.subr.bf16.mxu0 %v16204_v5  ;;  %v4714_v30 = vpop.f32.mrb[103].mxu0  ;;  %v4884_v33 = vpop.f32.mrb[119].mxu1  ;;  %12778 = vmatprep.subr.bf16.mxu1 %v13869_v13 }
 0x84b   : > { %10133 = vmatprep.mubr.msk.f32.mxu0 %vm4603_vm0, %v4884_v33  ;;  %10141 = vmatprep.mubr.msk.f32.mxu1 %vm4603_vm0, %v4714_v30  ;;  %v10246_v30 = vld [vmem:[%s18361_s6 + $0x120] sm:$0xff] }
 0x84c   : > { %5040 = vmatmul.mubr.f32.gmra.mrb[118].mxu0 %v4882_v9  ;;  %5169 = vmatmul.mubr.f32.gmra.mrb[134].mxu1 %v4712_v21  ;;  %v12797_v21 = vpack.c.bf16 %v10181_v16, %v10180_v15  ;;  %v10182_v9 = vld [vmem:[%s18362_s7 + $0x220] sm:$0xff] }
 0x84d   : > { %12768 = vmatpush1.bf16.msra.mxu0 %v16202_v31  ;;  %v4718_v34 = vpop.f32.mrb[104].mxu0  ;;  %v4888_v24 = vpop.f32.mrb[120].mxu1  ;;  %12780 = vmatpush1.bf16.msra.mxu1 %v12779_v40  ;;  %v10183_v40 = vld [vmem:[%s18362_s7 + $0x228] sm:$0xff] }
 0x84e   : > { %12806 = vmatprep.subr.bf16.mxu0 %v16180_v23  ;;  %v4720_v35 = vpop.f32.mrb[105].mxu0  ;;  %v4890_v3 = vpop.f32.mrb[121].mxu1  ;;  %12781 = vmatprep.subr.bf16.mxu1 %v13869_v13  ;;  %v12800_v33 = vpack.c.bf16 %v10183_v40, %v10182_v9 }
 0x84f   : > { %10134 = vmatprep.mubr.msk.f32.mxu0 %vm4603_vm0, %v4890_v3  ;;  %10142 = vmatprep.mubr.msk.f32.mxu1 %vm4603_vm0, %v4720_v35  ;;  %v10247_v35 = vld [vmem:[%s18361_s6 + $0x128] sm:$0xff] }
 0x850   : > { %5045 = vmatmul.mubr.f32.gmra.mrb[120].mxu0 %v4888_v24  ;;  %5174 = vmatmul.mubr.f32.gmra.mrb[136].mxu1 %v4718_v34  ;;  %v10184_v34 = vld [vmem:[%s18362_s7 + $0x230] sm:$0xff]  ;;  %v10185_v24 = vld [vmem:[%s18362_s7 + $0x238] sm:$0xff] }
 0x851   : > { %v4724_v41 = vpop.f32.mrb[106].mxu0  ;;  %v4894_v36 = vpop.f32.mrb[122].mxu1  ;;  %v12803_v3 = vpack.c.bf16 %v10185_v24, %v10184_v34 }
 0x852   : > { %v4726_v37 = vpop.f32.mrb[107].mxu0  ;;  %v4896_v43 = vpop.f32.mrb[123].mxu1 }
 0x853   : > { %10135 = vmatprep.mubr.msk.f32.mxu0 %vm4603_vm0, %v4896_v43  ;;  %10143 = vmatprep.mubr.msk.f32.mxu1 %vm4603_vm0, %v4726_v37  ;;  %v10258_v37 = vld [vmem:[%s18362_s7 + $0x300] sm:$0xff]  ;;  %v10259_v43 = vld [vmem:[%s18362_s7 + $0x308] sm:$0xff] }
 0x854   : > { %5050 = vmatmul.mubr.f32.gmra.mrb[122].mxu0 %v4894_v36  ;;  %5179 = vmatmul.mubr.f32.gmra.mrb[138].mxu1 %v4724_v41  ;;  %v10248_v41 = vld [vmem:[%s18361_s6 + $0x130] sm:$0xff]  ;;  %v10249_v36 = vld [vmem:[%s18361_s6 + $0x138] sm:$0xff] }
 0x855   : > { %v4730_v45 = vpop.f32.mrb[108].mxu0  ;;  %v4900_v38 = vpop.f32.mrb[124].mxu1 }
 0x856   : > { %v4732_v47 = vpop.f32.mrb[109].mxu0  ;;  %v4902_v48 = vpop.f32.mrb[125].mxu1 }
 0x857   : > { %10136 = vmatprep.mubr.msk.f32.mxu0 %vm4603_vm0, %v4902_v48  ;;  %10144 = vmatprep.mubr.msk.f32.mxu1 %vm4603_vm0, %v4732_v47  ;;  %v10261_v47 = vld [vmem:[%s18362_s7 + $0x318] sm:$0xff] }
 0x858   : > { %5055 = vmatmul.mubr.f32.gmra.mrb[124].mxu0 %v4900_v38  ;;  %5184 = vmatmul.mubr.f32.gmra.mrb[140].mxu1 %v4730_v45  ;;  %v12874_v45 = vpack.c.bf16 %v10259_v43, %v10258_v37  ;;  %v10260_v38 = vld [vmem:[%s18362_s7 + $0x310] sm:$0xff] }
 0x859   : > { %v4736_v50 = vpop.f32.mrb[110].mxu0  ;;  %v4906_v32 = vpop.f32.mrb[126].mxu1  ;;  %v12877_v48 = vpack.c.bf16 %v10261_v47, %v10260_v38 }
 0x85a   : > { %v4738_v4 = vpop.f32.mrb[111].mxu0  ;;  %v4908_v52 = vpop.f32.mrb[127].mxu1 }
 0x85b   : > { %10137 = vmatprep.mubr.msk.f32.mxu0 %vm4603_vm0, %v4908_v52  ;;  %10145 = vmatprep.mubr.msk.f32.mxu1 %vm4603_vm0, %v4738_v4  ;;  %v10264_v52 = vld [vmem:[%s18362_s7 + $0x330] sm:$0xff] }
 0x85c   : > { %5060 = vmatmul.mubr.f32.gmra.mrb[126].mxu0 %v4906_v32  ;;  %5189 = vmatmul.mubr.f32.gmra.mrb[142].mxu1 %v4736_v50  ;;  %v10262_v50 = vld [vmem:[%s18362_s7 + $0x320] sm:$0xff]  ;;  %v10263_v32 = vld [vmem:[%s18362_s7 + $0x328] sm:$0xff] }
 0x85d   : > { %5291 = vmatprep.mubr.f32.mxu0 %v13868_v14  ;;  %v12880_v4 = vpack.c.bf16 %v10263_v32, %v10262_v50 }
 0x860   : > { %10154 = vmatmul.mubr.msk.f32.vlgmr.msra.gmra.mrb[128].mxu0 %vm4603_vm0, %v10146_v53  ;;  %v10265_v53 = vld [vmem:[%s18362_s7 + $0x338] sm:$0xff] }
 0x861   : > { %12808 = vmatpush1.bf16.msra.mxu0 %v16178_v44  ;;  %5297 = vmatprep.mubr.f32.mxu0 %v13868_v14 }
 0x862   : > { %12810 = vmatprep.subr.bf16.mxu0 %v16188_v26 }
 0x864   : > { %10155 = vmatmul.mubr.msk.f32.gmra.mrb[130].mxu0 %vm4603_vm0, %v10147_v54  ;;  %v12883_v54 = vpack.c.bf16 %v10265_v53, %v10264_v52 }
 0x865   : > { %12812 = vmatpush1.bf16.msra.mxu0 %v16186_v46  ;;  %5303 = vmatprep.mubr.f32.mxu0 %v13868_v14 }
 0x866   : > { %12814 = vmatprep.subr.bf16.mxu0 %v16196_v57 }
 0x868   : > { %10156 = vmatmul.mubr.msk.f32.gmra.mrb[132].mxu0 %vm4603_vm0, %v10148_v55  ;;  %v10266_v55 = vld [vmem:[%s18362_s7 + $0x340] sm:$0xff] }
 0x869   : > { %12816 = vmatpush1.bf16.msra.mxu0 %v16194_v25  ;;  %5309 = vmatprep.mubr.f32.mxu0 %v13868_v14 }
 0x86a   : > { %12818 = vmatprep.subr.bf16.mxu0 %v16204_v5 }
 0x86c   : > { %10157 = vmatmul.mubr.msk.f32.gmra.mrb[134].mxu0 %vm4603_vm0, %v10149_v56  ;;  %v10267_v56 = vld [vmem:[%s18362_s7 + $0x348] sm:$0xff] }
 0x86d   : > { %12820 = vmatpush1.bf16.msra.mxu0 %v16202_v31  ;;  %5315 = vmatprep.mubr.f32.mxu0 %v13868_v14 }
 0x86e   : > { %12858 = vmatprep.subr.bf16.mxu0 %v16180_v23  ;;  %v10153_v23 = vld [vmem:[%s18361_s6 + $0xb8] sm:$0xff] }
 0x870   : > { %10158 = vmatmul.mubr.msk.f32.gmra.mrb[136].mxu0 %vm4603_vm0, %v10150_v60  ;;  %v12886_v60 = vpack.c.bf16 %v10267_v56, %v10266_v55 }
 0x871   : > { %5321 = vmatprep.mubr.f32.mxu0 %v13868_v14 }
 0x874   : > { %10159 = vmatmul.mubr.msk.f32.gmra.mrb[138].mxu0 %vm4603_vm0, %v10151_v51  ;;  %v10268_v51 = vld [vmem:[%s18362_s7 + $0x350] sm:$0xff] }
 0x875   : > { %5327 = vmatprep.mubr.f32.mxu0 %v13868_v14 }
 0x878   : > { %10160 = vmatmul.mubr.msk.f32.gmra.mrb[140].mxu0 %vm4603_vm0, %v10152_v6  ;;  %v10269_v6 = vld [vmem:[%s18362_s7 + $0x358] sm:$0xff] }
 0x879   : > { %5333 = vmatprep.mubr.f32.mxu0 %v13868_v14 }
 0x87c   : > { %10161 = vmatmul.mubr.msk.f32.gmra.mrb[142].mxu0 %vm4603_vm0, %v10153_v23  ;;  %v12889_v23 = vpack.c.bf16 %v10269_v6, %v10268_v51 }
 0x87d   : > { %5599 = vmatprep.mubr.f32.mxu0 %v13868_v14 }
 0x880   : > { %10202 = vmatmul.mubr.msk.f32.vlgmr.msra.gmra.mrb[144].mxu0 %vm4603_vm0, %v10194_v58  ;;  %v10270_v58 = vld [vmem:[%s18362_s7 + $0x360] sm:$0xff] }
 0x881   : > { %12860 = vmatpush1.bf16.msra.mxu0 %v16178_v44  ;;  %5605 = vmatprep.mubr.f32.mxu0 %v13868_v14  ;;  %v10197_v44 = vld [vmem:[%s18361_s6 + $0xd8] sm:$0xff] }
 0x882   : > { %12862 = vmatprep.subr.bf16.mxu0 %v16188_v26  ;;  %v10199_v26 = vld [vmem:[%s18361_s6 + $0xe8] sm:$0xff] }
 0x884   : > { %10203 = vmatmul.mubr.msk.f32.gmra.mrb[146].mxu0 %vm4603_vm0, %v10195_v61  ;;  %v10271_v61 = vld [vmem:[%s18362_s7 + $0x368] sm:$0xff] }
 0x885   : > { %12864 = vmatpush1.bf16.msra.mxu0 %v16186_v46  ;;  %5611 = vmatprep.mubr.f32.mxu0 %v13868_v14  ;;  %v10198_v46 = vld [vmem:[%s18361_s6 + $0xe0] sm:$0xff] }
 0x886   : > { %12866 = vmatprep.subr.bf16.mxu0 %v16196_v57  ;;  %v10171_v57 = vld [vmem:[%s18362_s7 + $0x1c8] sm:$0xff] }
 0x888   : > { %10204 = vmatmul.mubr.msk.f32.gmra.mrb[148].mxu0 %vm4603_vm0, %v10196_v62  ;;  %v12892_v62 = vpack.c.bf16 %v10271_v61, %v10270_v58  ;;  %v10211_v58 = vld [vmem:[%s18362_s7 + $0x248] sm:$0xff] }
 0x889   : > { %12868 = vmatpush1.bf16.msra.mxu0 %v16194_v25  ;;  %5617 = vmatprep.mubr.f32.mxu0 %v13868_v14  ;;  %v10170_v25 = vld [vmem:[%s18362_s7 + $0x1c0] sm:$0xff] }
 0x88a   : > { %12870 = vmatprep.subr.bf16.mxu0 %v16204_v5  ;;  %v12782_v5 = vpack.c.bf16 %v10171_v57, %v10170_v25  ;;  %v10274_v25 = vld [vmem:[%s18362_s7 + $0x380] sm:$0xff]  ;;  %v10275_v57 = vld [vmem:[%s18362_s7 + $0x388] sm:$0xff] }
 0x88c   : > { %10205 = vmatmul.mubr.msk.f32.gmra.mrb[150].mxu0 %vm4603_vm0, %v10197_v44  ;;  %12783 = vmatpush1.bf16.msra.mxu1 %v12782_v5  ;;  %v10272_v44 = vld [vmem:[%s18362_s7 + $0x370] sm:$0xff] }
 0x88d   : > { %12872 = vmatpush1.bf16.msra.mxu0 %v16202_v31  ;;  %5623 = vmatprep.mubr.f32.mxu0 %v13868_v14  ;;  %v10200_v31 = vld [vmem:[%s18361_s6 + $0xf0] sm:$0xff] }
 0x88e   : > { %12873 = vmatprep.subr.bf16.mxu0 %v13869_v13  ;;  %12784 = vmatprep.subr.bf16.mxu1 %v13869_v13  ;;  %v10276_v5 = vld [vmem:[%s18362_s7 + $0x390] sm:$0xff] }
 0x88f   : > { %v12901_v63 = vpack.c.bf16 %v10277_v10, %v10276_v5  ;;  %v10214_v10 = vld [vmem:[%s18362_s7 + $0x260] sm:$0xff] }
 0x890   : > { %10206 = vmatmul.mubr.msk.f32.gmra.mrb[152].mxu0 %vm4603_vm0, %v10198_v46  ;;  %12786 = vmatpush1.bf16.msra.mxu1 %v12785_v59  ;;  %v10273_v46 = vld [vmem:[%s18362_s7 + $0x378] sm:$0xff]  ;;  %v10279_v59 = vld [vmem:[%s18362_s7 + $0x3a8] sm:$0xff] }
 0x891   : > { %5629 = vmatprep.mubr.f32.mxu0 %v13868_v14  ;;  %12787 = vmatprep.subr.bf16.mxu1 %v13869_v13 }
 0x894   : > { %10207 = vmatmul.mubr.msk.f32.gmra.mrb[154].mxu0 %vm4603_vm0, %v10199_v26  ;;  %12789 = vmatpush1.bf16.msra.mxu1 %v12788_v2  ;;  %v12895_v26 = vpack.c.bf16 %v10273_v46, %v10272_v44 }
 0x895   : > { %5635 = vmatprep.mubr.f32.mxu0 %v13868_v14  ;;  %12790 = vmatprep.subr.bf16.mxu1 %v13869_v13 }
 0x898   : > { %10208 = vmatmul.mubr.msk.f32.gmra.mrb[156].mxu0 %vm4603_vm0, %v10200_v31  ;;  %12792 = vmatpush1.bf16.msra.mxu1 %v12791_v7  ;;  %v12898_v31 = vpack.c.bf16 %v10275_v57, %v10274_v25  ;;  %v10213_v25 = vld [vmem:[%s18362_s7 + $0x258] sm:$0xff] }
 0x899   : > { %5641 = vmatprep.mubr.f32.mxu0 %v13868_v14  ;;  %12793 = vmatprep.subr.bf16.mxu1 %v13869_v13 }
 0x89c   : > { %10209 = vmatmul.mubr.msk.f32.gmra.mrb[158].mxu0 %vm4603_vm0, %v10201_v0  ;;  %12795 = vmatpush1.bf16.msra.mxu1 %v12794_v49  ;;  %v10278_v0 = vld [vmem:[%s18362_s7 + $0x3a0] sm:$0xff] }
 0x89d   : > { %5907 = vmatprep.mubr.f32.mxu0 %v13868_v14  ;;  %12796 = vmatprep.subr.bf16.mxu1 %v13869_v13  ;;  %v12904_v1 = vpack.c.bf16 %v10279_v59, %v10278_v0 }
 0x8a0   : > { %10250 = vmatmul.mubr.msk.f32.vlgmr.msra.gmra.mrb[160].mxu0 %vm4603_vm0, %v10242_v28  ;;  %12798 = vmatpush1.bf16.msra.mxu1 %v12797_v21  ;;  %v10281_v28 = vld [vmem:[%s18362_s7 + $0x3b8] sm:$0xff] }
 0x8a1   : > { %5913 = vmatprep.mubr.f32.mxu0 %v13868_v14  ;;  %12799 = vmatprep.subr.bf16.mxu1 %v13869_v13  ;;  %v12907_v2 = vpack.c.bf16 %v10281_v28, %v10280_v22  ;;  %v10216_v22 = vld [vmem:[%s18362_s7 + $0x270] sm:$0xff]  ;;  %v10217_v28 = vld [vmem:[%s18362_s7 + $0x278] sm:$0xff] }
 0x8a2   : > { %12875 = vmatpush1.bf16.msra.mxu0 %v12874_v45 }
 0x8a3   : > { %12876 = vmatprep.subr.bf16.mxu0 %v13869_v13 }
 0x8a4   : > { %10251 = vmatmul.mubr.msk.f32.gmra.mrb[162].mxu0 %vm4603_vm0, %v10243_v12  ;;  %12801 = vmatpush1.bf16.msra.mxu1 %v12800_v33 }
 0x8a5   : > { %5919 = vmatprep.mubr.f32.mxu0 %v13868_v14  ;;  %12802 = vmatprep.subr.bf16.mxu1 %v13869_v13 }
 0x8a6   : > { %12878 = vmatpush1.bf16.msra.mxu0 %v12877_v48 }
 0x8a7   : > { %12879 = vmatprep.subr.bf16.mxu0 %v13869_v13 }
 0x8a8   : > { %10252 = vmatmul.mubr.msk.f32.gmra.mrb[164].mxu0 %vm4603_vm0, %v10244_v11  ;;  %12804 = vmatpush1.bf16.msra.mxu1 %v12803_v3 }
 0x8a9   : > { %5925 = vmatprep.mubr.f32.mxu0 %v13868_v14  ;;  %12821 = vmatprep.subr.bf16.mxu1 %v13869_v13 }
 0x8aa   : > { %12881 = vmatpush1.bf16.msra.mxu0 %v12880_v4 }
 0x8ab   : > { %12882 = vmatprep.subr.bf16.mxu0 %v13869_v13 }
 0x8ac   : > { %10253 = vmatmul.mubr.msk.f32.gmra.mrb[166].mxu0 %vm4603_vm0, %v10245_v27 }
 0x8ad   : > { %5931 = vmatprep.mubr.f32.mxu0 %v13868_v14 }
 0x8ae   : > { %12884 = vmatpush1.bf16.msra.mxu0 %v12883_v54 }
 0x8af   : > { %12885 = vmatprep.subr.bf16.mxu0 %v13869_v13 }
 0x8b0   : > { %10254 = vmatmul.mubr.msk.f32.gmra.mrb[168].mxu0 %vm4603_vm0, %v10246_v30 }
 0x8b1   : > { %5937 = vmatprep.mubr.f32.mxu0 %v13868_v14 }
 0x8b2   : > { %12887 = vmatpush1.bf16.msra.mxu0 %v12886_v60 }
 0x8b3   : > { %12888 = vmatprep.subr.bf16.mxu0 %v13869_v13 }
 0x8b4   : > { %10255 = vmatmul.mubr.msk.f32.gmra.mrb[170].mxu0 %vm4603_vm0, %v10247_v35 }
 0x8b5   : > { %5943 = vmatprep.mubr.f32.mxu0 %v13868_v14 }
 0x8b6   : > { %12890 = vmatpush1.bf16.msra.mxu0 %v12889_v23  ;;  %v10210_v23 = vld [vmem:[%s18362_s7 + $0x240] sm:$0xff] }
 0x8b7   : > { %12891 = vmatprep.subr.bf16.mxu0 %v13869_v13  ;;  %v12822_v44 = vpack.c.bf16 %v10211_v58, %v10210_v23  ;;  %v10230_v58 = vld [vmem:[%s18362_s7 + $0x2e0] sm:$0xff] }
 0x8b8   : > { %10256 = vmatmul.mubr.msk.f32.gmra.mrb[172].mxu0 %vm4603_vm0, %v10248_v41 }
 0x8b9   : > { %5949 = vmatprep.mubr.f32.mxu0 %v13868_v14 }
 0x8ba   : > { %12893 = vmatpush1.bf16.msra.mxu0 %v12892_v62 }
 0x8bb   : > { %12894 = vmatprep.subr.bf16.mxu0 %v13869_v13 }
 0x8bc   : > { %10257 = vmatmul.mubr.msk.f32.gmra.mrb[174].mxu0 %vm4603_vm0, %v10249_v36 }
 0x8be   : > { %12896 = vmatpush1.bf16.msra.mxu0 %v12895_v26  ;;  %v10212_v26 = vld [vmem:[%s18362_s7 + $0x250] sm:$0xff] }
 0x8bf   : > { %12897 = vmatprep.subr.bf16.mxu0 %v13869_v13 }
 0x8c2   : > { %12899 = vmatpush1.bf16.msra.mxu0 %v12898_v31  ;;  %v12825_v31 = vpack.c.bf16 %v10213_v25, %v10212_v26  ;;  %v10232_v26 = vld [vmem:[%s18362_s7 + $0x2f0] sm:$0xff]  ;;  %v10233_v25 = vld [vmem:[%s18362_s7 + $0x2f8] sm:$0xff] }
 0x8c3   : > { %12900 = vmatprep.subr.bf16.mxu0 %v13869_v13 }
 0x8c6   : > { %12902 = vmatpush1.bf16.msra.mxu0 %v12901_v63  ;;  %v10215_v63 = vld [vmem:[%s18362_s7 + $0x268] sm:$0xff] }
 0x8c7   : > { %12903 = vmatprep.subr.bf16.mxu0 %v13869_v13  ;;  %v12828_v59 = vpack.c.bf16 %v10215_v63, %v10214_v10 }
 0x8ca   : > { %12905 = vmatpush1.bf16.msra.mxu0 %v12904_v1 }
 0x8cb   : > { %12906 = vmatprep.subr.bf16.mxu0 %v13869_v13 }
 0x8ce   : > { %12908 = vmatpush1.bf16.msra.mxu0 %v12907_v2 }
 0x913   : > { %v5026_v17 = vpop.f32.mrb[112].mxu0  ;;  %v5155_v39 = vpop.f32.mrb[128].mxu1 }
 0x914   : > { %v16785_v12 = vadd.f32 %v5155_v39, %v5026_v17  ;;  %v5028_v7 = vpop.f32.mrb[113].mxu0  ;;  %v5157_v8 = vpop.f32.mrb[129].mxu1  ;;  %v12831_v17 = vpack.c.bf16 %v10217_v28, %v10216_v22 }
 0x915   : > { %v10218_v7 = vld [vmem:[%s18362_s7 + $0x280] sm:$0xff]  ;;  %v10219_v8 = vld [vmem:[%s18362_s7 + $0x288] sm:$0xff] }
 0x917   : > { %v5031_v29 = vpop.f32.mrb[114].mxu0  ;;  %v5160_v11 = vpop.f32.mrb[130].mxu1 }
 0x918   : > { %v16787_v49 = vadd.f32 %v5160_v11, %v5031_v29  ;;  %v5033_v15 = vpop.f32.mrb[115].mxu0  ;;  %v5162_v16 = vpop.f32.mrb[131].mxu1  ;;  %v12834_v11 = vpack.c.bf16 %v10219_v8, %v10218_v7 }
 0x919   : > { %v10220_v16 = vld [vmem:[%s18362_s7 + $0x290] sm:$0xff] }
 0x91b   : > { %v5036_v27 = vpop.f32.mrb[116].mxu0  ;;  %v5165_v21 = vpop.f32.mrb[132].mxu1 }
 0x91c   : > { %v16789_v9 = vadd.f32 %v5165_v21, %v5036_v27  ;;  %v5038_v40 = vpop.f32.mrb[117].mxu0  ;;  %v5167_v30 = vpop.f32.mrb[133].mxu1  ;;  %v10221_v27 = vld [vmem:[%s18362_s7 + $0x298] sm:$0xff] }
 0x91d   : > { %v12837_v40 = vpack.c.bf16 %v10221_v27, %v10220_v16 }
 0x91f   : > { %v5041_v33 = vpop.f32.mrb[118].mxu0  ;;  %v5170_v34 = vpop.f32.mrb[134].mxu1 }
 0x920   : > { %v16791_v24 = vadd.f32 %v5170_v34, %v5041_v33  ;;  %v5043_v35 = vpop.f32.mrb[119].mxu0  ;;  %v5172_v3 = vpop.f32.mrb[135].mxu1  ;;  %v10222_v33 = vld [vmem:[%s18362_s7 + $0x2a0] sm:$0xff]  ;;  %v10223_v34 = vld [vmem:[%s18362_s7 + $0x2a8] sm:$0xff] }
 0x921   : > { %v12840_v3 = vpack.c.bf16 %v10223_v34, %v10222_v33 }
 0x923   : > { %v5046_v41 = vpop.f32.mrb[120].mxu0  ;;  %v5175_v36 = vpop.f32.mrb[136].mxu1 }
 0x924   : > { %v16793_v37 = vadd.f32 %v5175_v36, %v5046_v41  ;;  %v5048_v43 = vpop.f32.mrb[121].mxu0  ;;  %v5177_v45 = vpop.f32.mrb[137].mxu1  ;;  %v10224_v36 = vld [vmem:[%s18362_s7 + $0x2b0] sm:$0xff] }
 0x925   : > { %v10225_v43 = vld [vmem:[%s18362_s7 + $0x2b8] sm:$0xff] }
 0x927   : > { %v5051_v38 = vpop.f32.mrb[122].mxu0  ;;  %v5180_v47 = vpop.f32.mrb[138].mxu1 }
 0x928   : > { %v16795_v48 = vadd.f32 %v5180_v47, %v5051_v38  ;;  %v5053_v50 = vpop.f32.mrb[123].mxu0  ;;  %v5182_v32 = vpop.f32.mrb[139].mxu1  ;;  %v12843_v38 = vpack.c.bf16 %v10225_v43, %v10224_v36  ;;  %v10308_v36 = vld [vmem:[%s18365_s10 + $0x48] sm:$0xff]  ;;  %v10309_v43 = vld [vmem:[%s18365_s10 + $0x50] sm:$0xff] }
 0x929   : > { %v10226_v50 = vld [vmem:[%s18362_s7 + $0x2c0] sm:$0xff]  ;;  %v10227_v32 = vld [vmem:[%s18362_s7 + $0x2c8] sm:$0xff] }
 0x92b   : > { %v5056_v4 = vpop.f32.mrb[124].mxu0  ;;  %v5185_v52 = vpop.f32.mrb[140].mxu1 }
 0x92c   : > { %v16797_v53 = vadd.f32 %v5185_v52, %v5056_v4  ;;  %v5058_v54 = vpop.f32.mrb[125].mxu0  ;;  %v5187_v55 = vpop.f32.mrb[141].mxu1  ;;  %v12846_v52 = vpack.c.bf16 %v10227_v32, %v10226_v50 }
 0x92d   : > { %v10228_v55 = vld [vmem:[%s18362_s7 + $0x2d0] sm:$0xff] }
 0x92f   : > { %v5061_v56 = vpop.f32.mrb[126].mxu0  ;;  %v5190_v60 = vpop.f32.mrb[142].mxu1 }
 0x930   : > { %v16799_v51 = vadd.f32 %v5190_v60, %v5061_v56  ;;  %v5063_v6 = vpop.f32.mrb[127].mxu0  ;;  %v5192_v61 = vpop.f32.mrb[143].mxu1  ;;  %v10229_v56 = vld [vmem:[%s18362_s7 + $0x2d8] sm:$0xff] }
 0x931   : > { %v12849_v6 = vpack.c.bf16 %v10229_v56, %v10228_v55  ;;  %v10231_v61 = vld [vmem:[%s18362_s7 + $0x2e8] sm:$0xff] }
 0x933   : > { %v5293_v62 = vpop.f32.mrb[128].mxu0 }
 0x934   : > { %v5295_v46 = vpop.f32.mrb[129].mxu0 }
 0x935   : > { %10186 = vmatprep.mubr.msk.f32.mxu1 %vm4603_vm0, %v5295_v46 }
 0x936   : > { %5454 = vmatmul.mubr.f32.vlgmr.msra.gmra.mrb[144].mxu1 %v5293_v62 }
 0x937   : > { %12823 = vmatpush1.bf16.msra.mxu1 %v12822_v44  ;;  %v5299_v57 = vpop.f32.mrb[130].mxu0  ;;  %v12852_v44 = vpack.c.bf16 %v10231_v61, %v10230_v58 }
 0x938   : > { %v5301_v5 = vpop.f32.mrb[131].mxu0  ;;  %12824 = vmatprep.subr.bf16.mxu1 %v13869_v13 }
 0x939   : > { %10187 = vmatprep.mubr.msk.f32.mxu1 %vm4603_vm0, %v5301_v5 }
 0x93a   : > { %5459 = vmatmul.mubr.f32.gmra.mrb[146].mxu1 %v5299_v57 }
 0x93b   : > { %12826 = vmatpush1.bf16.msra.mxu1 %v12825_v31  ;;  %v5305_v0 = vpop.f32.mrb[132].mxu0  ;;  %v12855_v31 = vpack.c.bf16 %v10233_v25, %v10232_v26 }
 0x93c   : > { %v5307_v1 = vpop.f32.mrb[133].mxu0  ;;  %12827 = vmatprep.subr.bf16.mxu1 %v13869_v13 }
 0x93d   : > { %10188 = vmatprep.mubr.msk.f32.mxu1 %vm4603_vm0, %v5307_v1 }
 0x93e   : > { %5464 = vmatmul.mubr.f32.gmra.mrb[148].mxu1 %v5305_v0 }
 0x93f   : > { %12829 = vmatpush1.bf16.msra.mxu1 %v12828_v59  ;;  %v5311_v2 = vpop.f32.mrb[134].mxu0 }
 0x940   : > { %v5313_v39 = vpop.f32.mrb[135].mxu0  ;;  %12830 = vmatprep.subr.bf16.mxu1 %v13869_v13 }
 0x941   : > { %10189 = vmatprep.mubr.msk.f32.mxu1 %vm4603_vm0, %v5313_v39 }
 0x942   : > { %5469 = vmatmul.mubr.f32.gmra.mrb[150].mxu1 %v5311_v2 }
 0x943   : > { %12832 = vmatpush1.bf16.msra.mxu1 %v12831_v17  ;;  %v5317_v29 = vpop.f32.mrb[136].mxu0 }
 0x944   : > { %v5319_v15 = vpop.f32.mrb[137].mxu0  ;;  %12833 = vmatprep.subr.bf16.mxu1 %v13869_v13 }
 0x945   : > { %10190 = vmatprep.mubr.msk.f32.mxu1 %vm4603_vm0, %v5319_v15 }
 0x946   : > { %5474 = vmatmul.mubr.f32.gmra.mrb[152].mxu1 %v5317_v29 }
 0x947   : > { %12835 = vmatpush1.bf16.msra.mxu1 %v12834_v11  ;;  %v5323_v21 = vpop.f32.mrb[138].mxu0 }
 0x948   : > { %v5325_v30 = vpop.f32.mrb[139].mxu0  ;;  %12836 = vmatprep.subr.bf16.mxu1 %v13869_v13 }
 0x949   : > { %10191 = vmatprep.mubr.msk.f32.mxu1 %vm4603_vm0, %v5325_v30 }
 0x94a   : > { %5479 = vmatmul.mubr.f32.gmra.mrb[154].mxu1 %v5323_v21 }
 0x94b   : > { %12838 = vmatpush1.bf16.msra.mxu1 %v12837_v40  ;;  %v5329_v35 = vpop.f32.mrb[140].mxu0 }
 0x94c   : > { %v5331_v41 = vpop.f32.mrb[141].mxu0  ;;  %12839 = vmatprep.subr.bf16.mxu1 %v13869_v13 }
 0x94d   : > { %10192 = vmatprep.mubr.msk.f32.mxu1 %vm4603_vm0, %v5331_v41  ;;  %v10307_v41 = vld [vmem:[%s18365_s10 + $0x40] sm:$0xff] }
 0x94e   : > { %5484 = vmatmul.mubr.f32.gmra.mrb[156].mxu1 %v5329_v35 }
 0x94f   : > { %12841 = vmatpush1.bf16.msra.mxu1 %v12840_v3  ;;  %v5335_v45 = vpop.f32.mrb[142].mxu0  ;;  %v6141_v3 = vld [vmem:[%s18364_s9] sm:$0xff] }
 0x950   : > { %v5337_v47 = vpop.f32.mrb[143].mxu0  ;;  %12842 = vmatprep.subr.bf16.mxu1 %v13869_v13 }
 0x951   : > { %10193 = vmatprep.mubr.msk.f32.mxu1 %vm4603_vm0, %v5337_v47 }
 0x952   : > { %5489 = vmatmul.mubr.f32.gmra.mrb[158].mxu1 %v5335_v45  ;;  %v12957_v45 = vpack.c.bf16 %v10308_v36, %v10307_v41 }
 0x953   : > { %12844 = vmatpush1.bf16.msra.mxu1 %v12843_v38  ;;  %v5601_v4 = vpop.f32.mrb[144].mxu0  ;;  %v10310_v38 = vld [vmem:[%s18365_s10 + $0x58] sm:$0xff] }
 0x954   : > { %v5603_v54 = vpop.f32.mrb[145].mxu0  ;;  %12845 = vmatprep.subr.bf16.mxu1 %v13869_v13  ;;  %v12961_v47 = vpack.c.bf16 %v10310_v38, %v10309_v43  ;;  %12958 = vmatprep.subr.bf16.mxu0 %v12957_v45 }
 0x955   : > { %10234 = vmatprep.mubr.msk.f32.mxu1 %vm4603_vm0, %v5603_v54 }
 0x957   : > { %12847 = vmatpush1.bf16.msra.mxu1 %v12846_v52  ;;  %v5607_v60 = vpop.f32.mrb[146].mxu0 }
 0x958   : > { %v5609_v23 = vpop.f32.mrb[147].mxu0  ;;  %12848 = vmatprep.subr.bf16.mxu1 %v13869_v13 }
 0x95b   : > { %12850 = vmatpush1.bf16.msra.mxu1 %v12849_v6  ;;  %v5613_v62 = vpop.f32.mrb[148].mxu0 }
 0x95c   : > { %v5615_v46 = vpop.f32.mrb[149].mxu0  ;;  %12851 = vmatprep.subr.bf16.mxu1 %v13869_v13 }
 0x95f   : > { %12853 = vmatpush1.bf16.msra.mxu1 %v12852_v44  ;;  %v5619_v57 = vpop.f32.mrb[150].mxu0 }
 0x960   : > { %v5621_v5 = vpop.f32.mrb[151].mxu0  ;;  %12854 = vmatprep.subr.bf16.mxu1 %v13869_v13 }
 0x963   : > { %12856 = vmatpush1.bf16.msra.mxu1 %v12855_v31  ;;  %v5625_v10 = vpop.f32.mrb[152].mxu0 }
 0x964   : > { %v5627_v63 = vpop.f32.mrb[153].mxu0 }
 0x966   : > { %5762 = vmatmul.mubr.f32.vlgmr.msra.gmra.mrb[160].mxu1 %v5601_v4 }
 0x967   : > { %10235 = vmatprep.mubr.msk.f32.mxu1 %vm4603_vm0, %v5609_v23  ;;  %v5631_v0 = vpop.f32.mrb[154].mxu0 }
 0x968   : > { %v5633_v59 = vpop.f32.mrb[155].mxu0 }
 0x96a   : > { %5767 = vmatmul.mubr.f32.gmra.mrb[162].mxu1 %v5607_v60 }
 0x96b   : > { %10236 = vmatprep.mubr.msk.f32.mxu1 %vm4603_vm0, %v5615_v46  ;;  %v5637_v1 = vpop.f32.mrb[156].mxu0 }
 0x96c   : > { %v5639_v22 = vpop.f32.mrb[157].mxu0 }
 0x96e   : > { %5772 = vmatmul.mubr.f32.gmra.mrb[164].mxu1 %v5613_v62 }
 0x96f   : > { %10237 = vmatprep.mubr.msk.f32.mxu1 %vm4603_vm0, %v5621_v5  ;;  %v5643_v28 = vpop.f32.mrb[158].mxu0 }
 0x970   : > { %v5645_v2 = vpop.f32.mrb[159].mxu0 }
 0x972   : > { %5777 = vmatmul.mubr.f32.gmra.mrb[166].mxu1 %v5619_v57 }
 0x973   : > { %10238 = vmatprep.mubr.msk.f32.mxu1 %vm4603_vm0, %v5627_v63  ;;  %v5909_v13 = vpop.f32.mrb[160].mxu0 }
 0x974   : > { %v5911_v17 = vpop.f32.mrb[161].mxu0 }
 0x975   : > { %10282 = vmatprep.mubr.msk.f32.mxu0 %vm4603_vm0, %v5911_v17 }
 0x976   : > { %5782 = vmatmul.mubr.f32.gmra.mrb[168].mxu1 %v5625_v10  ;;  %6070 = vmatmul.mubr.f32.vlgmr.msra.gmra.mrb[176].mxu0 %v5909_v13 }
 0x977   : > { %10239 = vmatprep.mubr.msk.f32.mxu1 %vm4603_vm0, %v5633_v59  ;;  %v5915_v39 = vpop.f32.mrb[162].mxu0  ;;  %12960 = vmatpush3.bf16.msra.mxu0 %v12957_v45 }
 0x978   : > { %v5917_v7 = vpop.f32.mrb[163].mxu0  ;;  %12962 = vmatprep.subr.bf16.mxu0 %v12961_v47 }
 0x979   : > { %10283 = vmatprep.mubr.msk.f32.mxu0 %vm4603_vm0, %v5917_v7 }
 0x97a   : > { %5787 = vmatmul.mubr.f32.gmra.mrb[170].mxu1 %v5631_v0  ;;  %6075 = vmatmul.mubr.f32.gmra.mrb[178].mxu0 %v5915_v39 }
 0x97b   : > { %10240 = vmatprep.mubr.msk.f32.mxu1 %vm4603_vm0, %v5639_v22  ;;  %v5921_v8 = vpop.f32.mrb[164].mxu0  ;;  %12964 = vmatpush3.bf16.msra.mxu0 %v12961_v47 }
 0x97c   : > { %v5923_v29 = vpop.f32.mrb[165].mxu0 }
 0x97d   : > { %10284 = vmatprep.mubr.msk.f32.mxu0 %vm4603_vm0, %v5923_v29 }
 0x97e   : > { %5792 = vmatmul.mubr.f32.gmra.mrb[172].mxu1 %v5637_v1  ;;  %6080 = vmatmul.mubr.f32.gmra.mrb[180].mxu0 %v5921_v8 }
 0x97f   : > { %10241 = vmatprep.mubr.msk.f32.mxu1 %vm4603_vm0, %v5645_v2  ;;  %v5927_v11 = vpop.f32.mrb[166].mxu0 }
 0x980   : > { %v5929_v15 = vpop.f32.mrb[167].mxu0 }
 0x981   : > { %10285 = vmatprep.mubr.msk.f32.mxu0 %vm4603_vm0, %v5929_v15 }
 0x982   : > { %5797 = vmatmul.mubr.f32.gmra.mrb[174].mxu1 %v5643_v28  ;;  %6085 = vmatmul.mubr.f32.gmra.mrb[182].mxu0 %v5927_v11 }
 0x983   : > { %v5933_v16 = vpop.f32.mrb[168].mxu0  ;;  %11777 = vmatprep.mubr.msk.f32.mxu1 %vm4603_vm0, %v6141_v3 }
 0x984   : > { %v5935_v27 = vpop.f32.mrb[169].mxu0 }
 0x985   : > { %10286 = vmatprep.mubr.msk.f32.mxu0 %vm4603_vm0, %v5935_v27 }
 0x986   : > { %6090 = vmatmul.mubr.f32.gmra.mrb[184].mxu0 %v5933_v16 }
 0x987   : > { %v5939_v21 = vpop.f32.mrb[170].mxu0 }
 0x988   : > { %v5941_v40 = vpop.f32.mrb[171].mxu0 }
 0x989   : > { %10287 = vmatprep.mubr.msk.f32.mxu0 %vm4603_vm0, %v5941_v40 }
 0x98a   : > { %6095 = vmatmul.mubr.f32.gmra.mrb[186].mxu0 %v5939_v21 }
 0x98b   : > { %v5945_v30 = vpop.f32.mrb[172].mxu0 }
 0x98c   : > { %v5947_v33 = vpop.f32.mrb[173].mxu0 }
 0x98d   : > { %10288 = vmatprep.mubr.msk.f32.mxu0 %vm4603_vm0, %v5947_v33 }
 0x98e   : > { %6100 = vmatmul.mubr.f32.gmra.mrb[188].mxu0 %v5945_v30 }
 0x98f   : > { %v5951_v34 = vpop.f32.mrb[174].mxu0 }
 0x990   : > { %v5953_v35 = vpop.f32.mrb[175].mxu0 }
 0x991   : > { %10289 = vmatprep.mubr.msk.f32.mxu0 %vm4603_vm0, %v5953_v35 }
 0x992   : > { %6105 = vmatmul.mubr.f32.gmra.mrb[190].mxu0 %v5951_v34 }
 0xa09   : > { %v5455_v50 = vpop.f32.mrb[144].mxu1 }
 0xa0a   : > { %v5494_v32 = vadd.f32 %v5455_v50, %v16785_v12  ;;  %v5457_v4 = vpop.f32.mrb[145].mxu1 }
 0xa0d   : > { %v5460_v52 = vpop.f32.mrb[146].mxu1 }
 0xa0e   : > { %v5495_v54 = vadd.f32 %v5460_v52, %v16787_v49  ;;  %v5462_v55 = vpop.f32.mrb[147].mxu1 }
 0xa11   : > { %v5465_v56 = vpop.f32.mrb[148].mxu1 }
 0xa12   : > { %v5496_v60 = vadd.f32 %v5465_v56, %v16789_v9  ;;  %v5467_v6 = vpop.f32.mrb[149].mxu1 }
 0xa15   : > { %v5470_v23 = vpop.f32.mrb[150].mxu1 }
 0xa16   : > { %v5497_v58 = vadd.f32 %v5470_v23, %v16791_v24  ;;  %v5472_v61 = vpop.f32.mrb[151].mxu1 }
 0xa19   : > { %v5475_v62 = vpop.f32.mrb[152].mxu1 }
 0xa1a   : > { %v5498_v44 = vadd.f32 %v5475_v62, %v16793_v37  ;;  %v5477_v12 = vpop.f32.mrb[153].mxu1 }
 0xa1d   : > { %v5480_v46 = vpop.f32.mrb[154].mxu1 }
 0xa1e   : > { %v5499_v26 = vadd.f32 %v5480_v46, %v16795_v48  ;;  %v5482_v25 = vpop.f32.mrb[155].mxu1 }
 0xa21   : > { %v5485_v57 = vpop.f32.mrb[156].mxu1 }
 0xa22   : > { %v5500_v49 = vadd.f32 %v5485_v57, %v16797_v53  ;;  %v5487_v31 = vpop.f32.mrb[157].mxu1 }
 0xa25   : > { %v5490_v5 = vpop.f32.mrb[158].mxu1 }
 0xa26   : > { %v5501_v9 = vadd.f32 %v5490_v5, %v16799_v51  ;;  %v5492_v10 = vpop.f32.mrb[159].mxu1  ;;  %v10290_v51 = vld [vmem:[%s18363_s8] ss:$0 sm:$0xff] }
 0xa39   : > { %v5763_v63 = vpop.f32.mrb[160].mxu1 }
 0xa3a   : > { %v5802_v0 = vadd.f32 %v5763_v63, %v5494_v32  ;;  %v5765_v24 = vpop.f32.mrb[161].mxu1 }
 0xa3d   : > { %v5768_v59 = vpop.f32.mrb[162].mxu1 }
 0xa3e   : > { %v5803_v1 = vadd.f32 %v5768_v59, %v5495_v54  ;;  %v5770_v22 = vpop.f32.mrb[163].mxu1 }
 0xa41   : > { %v5773_v37 = vpop.f32.mrb[164].mxu1 }
 0xa42   : > { %v5804_v28 = vadd.f32 %v5773_v37, %v5496_v60  ;;  %v5775_v2 = vpop.f32.mrb[165].mxu1 }
 0xa45   : > { %v5778_v13 = vpop.f32.mrb[166].mxu1 }
 0xa46   : > { %v5805_v48 = vadd.f32 %v5778_v13, %v5497_v58  ;;  %v5780_v17 = vpop.f32.mrb[167].mxu1 }
 0xa47   : > { %v6143_v17 = vld [vmem:[%s18364_s9 + $0x10] sm:$0xff] }
 0xa49   : > { %v5783_v39 = vpop.f32.mrb[168].mxu1  ;;  %v6071_v7 = vpop.f32.mrb[176].mxu0 }
 0xa4a   : > { %v5806_v53 = vadd.f32 %v5783_v39, %v5498_v44  ;;  %v5785_v8 = vpop.f32.mrb[169].mxu1  ;;  %v6110_v29 = vadd.f32 %v6071_v7, %v5802_v0  ;;  %v6073_v11 = vpop.f32.mrb[177].mxu0  ;;  %v6144_v39 = vld [vmem:[%s18364_s9 + $0x18] sm:$0xff]  ;;  %v10295_v7 = vld [vmem:[%s18364_s9 + $0x20] sm:$0xff] }
 0xa4b   : > { %v10297_v8 = vld [vmem:[%s18364_s9 + $0x30] sm:$0xff]  ;;  %v6348_v11 = vld [vmem:[%s18365_s10] sm:$0xff] }
 0xa4c   : > { %v6125_v27 = vadd.f32 %v10290_v51, %v6110_v29  ;;  %v10298_v29 = vld [vmem:[%s18364_s9 + $0x38] sm:$0xff] }
 0xa4d   : > { %v5788_v15 = vpop.f32.mrb[170].mxu1  ;;  %v6076_v16 = vpop.f32.mrb[178].mxu0 }
 0xa4e   : > { %v5807_v21 = vadd.f32 %v5788_v15, %v5499_v26  ;;  %v5790_v40 = vpop.f32.mrb[171].mxu1  ;;  %v6111_v30 = vadd.f32 %v6076_v16, %v5803_v1  ;;  %v6078_v33 = vpop.f32.mrb[179].mxu0  ;;  %v6133_v41 = vmax.f32 %v6125_v27, 0.0  ;;  %v6350_v16 = vld [vmem:[%s18365_s10 + $0x10] sm:$0xff]  ;;  %v6351_v27 = vld [vmem:[%s18365_s10 + $0x18] sm:$0xff] }
 0xa4f   : > { %v12945_v40 = vpack.c.bf16 %v6351_v27, %v6350_v16  ;;  %v6352_v33 = vld [vmem:[%s18365_s10 + $0x20] sm:$0xff] }
 0xa50   : > { %v6126_v34 = vadd.f32 %v10290_v51, %v6111_v30  ;;  %v10312_v30 = vld [vmem:[%s18365_s10 + $0x68] sm:$0xff]  ;;  %v6555_v16 = vld [vmem:[%s18366_s11 + $0x20] sm:$0xff] }
 0xa51   : > { %v5793_v35 = vpop.f32.mrb[172].mxu1  ;;  %v6081_v3 = vpop.f32.mrb[180].mxu0  ;;  %v6563_v27 = vld [vmem:[%s18366_s11 + $0x60] sm:$0xff] }
 0xa52   : > { %v6134_v36 = vmax.f32 %v6126_v34, 0.0  ;;  %v5808_v43 = vadd.f32 %v5793_v35, %v5500_v49  ;;  %v5795_v45 = vpop.f32.mrb[173].mxu1  ;;  %v6112_v38 = vadd.f32 %v6081_v3, %v5804_v28  ;;  %v6083_v47 = vpop.f32.mrb[181].mxu0  ;;  %v6353_v34 = vld [vmem:[%s18365_s10 + $0x28] sm:$0xff] }
 0xa53   : > { %v12949_v3 = vpack.c.bf16 %v6353_v34, %v6352_v33  ;;  %v6580_v33 = vld [vmem:[%s18366_s11 + $0xe8] sm:$0xff]  ;;  %v6558_v34 = vld [vmem:[%s18366_s11 + $0x38] sm:$0xff] }
 0xa54   : > { %v12909_v50 = vpack.c.bf16 %v6134_v36, %v6133_v41  ;;  %v6127_v52 = vadd.f32 %v10290_v51, %v6112_v38  ;;  %v6354_v41 = vld [vmem:[%s18365_s10 + $0x30] sm:$0xff]  ;;  %v6355_v36 = vld [vmem:[%s18365_s10 + $0x38] sm:$0xff] }
 0xa55   : > { %v5798_v32 = vpop.f32.mrb[174].mxu1  ;;  %v6086_v4 = vpop.f32.mrb[182].mxu0  ;;  %v12953_v45 = vpack.c.bf16 %v6355_v36, %v6354_v41  ;;  %v10314_v38 = vld [vmem:[%s18365_s10 + $0x78] sm:$0xff] }
 0xa56   : > { %v5809_v54 = vadd.f32 %v5798_v32, %v5501_v9  ;;  %v5800_v55 = vpop.f32.mrb[175].mxu1  ;;  %v6113_v56 = vadd.f32 %v6086_v4, %v5805_v48  ;;  %v6088_v60 = vpop.f32.mrb[183].mxu0  ;;  %12910 = vmatprep.subr.bf16.mxu1 %v12909_v50  ;;  %v6135_v58 = vmax.f32 %v6127_v52, 0.0  ;;  %v6142_v48 = vld [vmem:[%s18364_s9 + $0x8] sm:$0xff] }
 0xa57   : > { %12912 = vmatpush3.bf16.msra.mxu1 %v12909_v50  ;;  %v6560_v32 = vld [vmem:[%s18366_s11 + $0x48] sm:$0xff]  ;;  %v6551_v60 = vld [vmem:[%s18366_s11] sm:$0xff] }
 0xa58   : > { %v6128_v6 = vadd.f32 %v10290_v51, %v6113_v56 }
 0xa59   : > { %v6091_v23 = vpop.f32.mrb[184].mxu0 }
 0xa5a   : > { %v6136_v61 = vmax.f32 %v6128_v6, 0.0  ;;  %v6114_v62 = vadd.f32 %v6091_v23, %v5806_v53  ;;  %v6093_v44 = vpop.f32.mrb[185].mxu0  ;;  %v10296_v53 = vld [vmem:[%s18364_s9 + $0x28] sm:$0xff]  ;;  %v6559_v6 = vld [vmem:[%s18366_s11 + $0x40] sm:$0xff] }
 0xa5b   : > { %v12975_v44 = vpack.c.bf16 %v6559_v6, %v6551_v60 }
 0xa5c   : > { %v12913_v12 = vpack.c.bf16 %v6136_v61, %v6135_v58  ;;  %v6129_v26 = vadd.f32 %v10290_v51, %v6114_v62 }
 0xa5d   : > { %v6096_v46 = vpop.f32.mrb[186].mxu0 }
 0xa5e   : > { %v6115_v25 = vadd.f32 %v6096_v46, %v5807_v21  ;;  %v6098_v57 = vpop.f32.mrb[187].mxu0  ;;  %12914 = vmatprep.subr.bf16.mxu1 %v12913_v12  ;;  %v6137_v5 = vmax.f32 %v6129_v26, 0.0  ;;  %v10311_v21 = vld [vmem:[%s18365_s10 + $0x60] sm:$0xff] }
 0xa5f   : > { %12916 = vmatpush3.bf16.msra.mxu1 %v12913_v12  ;;  %v12965_v35 = vpack.c.bf16 %v10312_v30, %v10311_v21  ;;  %v6568_v57 = vld [vmem:[%s18366_s11 + $0x88] sm:$0xff] }
 0xa60   : > { %v6130_v49 = vadd.f32 %v10290_v51, %v6115_v25  ;;  %v6572_v21 = vld [vmem:[%s18366_s11 + $0xa8] sm:$0xff] }
 0xa61   : > { %v6101_v31 = vpop.f32.mrb[188].mxu0  ;;  %12966 = vmatprep.subr.bf16.mxu0 %v12965_v35 }
 0xa62   : > { %v6138_v9 = vmax.f32 %v6130_v49, 0.0  ;;  %v6116_v10 = vadd.f32 %v6101_v31, %v5808_v43  ;;  %v6103_v63 = vpop.f32.mrb[189].mxu0  ;;  %12968 = vmatpush3.bf16.msra.mxu0 %v12965_v35  ;;  %v10313_v43 = vld [vmem:[%s18365_s10 + $0x70] sm:$0xff]  ;;  %v6576_v49 = vld [vmem:[%s18366_s11 + $0xc8] sm:$0xff]  ;;  %v6566_v35 = vld [vmem:[%s18366_s11 + $0x78] sm:$0xff] }
 0xa63   : > { %v12969_v47 = vpack.c.bf16 %v10314_v38, %v10313_v43  ;;  %v12977_v31 = vpack.c.bf16 %v6576_v49, %v6568_v57  ;;  %v6554_v63 = vld [vmem:[%s18366_s11 + $0x18] sm:$0xff]  ;;  %v13322_v57 = vld [vmem:[%s18368_s13 + $0x44] ss:$16 sps:$4 sm:$0xff]   ;;  %v13320_v49 = vld [vmem:[%s18368_s13 + $0x40] ss:$16 sps:$4 sm:$0xff]  }
 0xa64   : > { %v12917_v0 = vpack.c.bf16 %v6138_v9, %v6137_v5  ;;  %v6131_v59 = vadd.f32 %v10290_v51, %v6116_v10  ;;  %v6567_v5 = vld [vmem:[%s18366_s11 + $0x80] sm:$0xff] }
 0xa65   : > { %v6106_v24 = vpop.f32.mrb[190].mxu0  ;;  %12970 = vmatprep.subr.bf16.mxu0 %v12969_v47  ;;  %v6575_v9 = vld [vmem:[%s18366_s11 + $0xc0] sm:$0xff] }
 0xa66   : > { %v6117_v1 = vadd.f32 %v6106_v24, %v5809_v54  ;;  %v6108_v22 = vpop.f32.mrb[191].mxu0  ;;  %12918 = vmatprep.subr.bf16.mxu1 %v12917_v0  ;;  %v6139_v28 = vmax.f32 %v6131_v59, 0.0  ;;  %12972 = vmatpush3.bf16.msra.mxu0 %v12969_v47  ;;  %v12979_v10 = vpack.c.bf16 %v6575_v9, %v6567_v5  ;;  %v6556_v59 = vld [vmem:[%s18366_s11 + $0x28] sm:$0xff]  ;;  %v6571_v47 = vld [vmem:[%s18366_s11 + $0xa0] sm:$0xff] }
 0xa67   : > { %12920 = vmatpush3.bf16.msra.mxu1 %v12917_v0  ;;  %v13311_v5 = vld [vmem:[%s18368_s13 + $0x8] ss:$16 sps:$4 sm:$0xff]   ;;  %v13319_v9 = vld [vmem:[%s18368_s13 + $0x2c] ss:$16 sps:$4 sm:$0xff]  }
 0xa68   : > { %v6132_v37 = vadd.f32 %v10290_v51, %v6117_v1  ;;  %v6349_v51 = vld [vmem:[%s18365_s10 + $0x8] sm:$0xff] }
 0xa69   : > { %v12941_v15 = vpack.c.bf16 %v6349_v51, %v6348_v11  ;;  %v6564_v1 = vld [vmem:[%s18366_s11 + $0x68] sm:$0xff] }
 0xa6a   : > { %v6140_v2 = vmax.f32 %v6132_v37, 0.0  ;;  %v12989_v22 = vpack.c.bf16 %v6564_v1, %v6556_v59  ;;  %v6553_v37 = vld [vmem:[%s18366_s11 + $0x10] sm:$0xff] }
 0xa6b   : > { %v13332_v59 = vld [vmem:[%s18368_s13 + $0x80] ss:$16 sps:$4 sm:$0xff]   ;;  %v13340_v1 = vld [vmem:[%s18368_s13 + $0xa4] ss:$16 sps:$4 sm:$0xff]  }
 0xa6c   : > { %v12921_v13 = vpack.c.bf16 %v6140_v2, %v6139_v28  ;;  %v6561_v28 = vld [vmem:[%s18366_s11 + $0x50] sm:$0xff]  ;;  %v6570_v2 = vld [vmem:[%s18366_s11 + $0x98] sm:$0xff] }
 0xa6e   : > { %12922 = vmatprep.subr.bf16.mxu1 %v12921_v13 }
 0xa6f   : > { %12924 = vmatpush3.bf16.msra.mxu1 %v12921_v13 }
 0xa70   : > { %12926 = vmatprep.subr.bf16.mxu1 %v12909_v50 }
 0xa72   : > { %11778 = vmatmul.mubr.msk.f32.vlgmr.msra.gmra.mrb[176].mxu1 %vm4603_vm0, %v6142_v48 }
 0xa73   : > { %12928 = vmatpush3.bf16.msra.mxu1 %v12909_v50  ;;  %11780 = vmatprep.mubr.msk.f32.mxu1 %vm4603_vm0, %v6143_v17  ;;  %v6552_v50 = vld [vmem:[%s18366_s11 + $0x8] sm:$0xff] }
 0xa74   : > { %12930 = vmatprep.subr.bf16.mxu1 %v12913_v12  ;;  %v12973_v4 = vpack.c.bf16 %v6560_v32, %v6552_v50  ;;  %v6579_v50 = vld [vmem:[%s18366_s11 + $0xe0] sm:$0xff]  ;;  %v12993_v32 = vpack.c.bf16 %v6580_v33, %v6572_v21  ;;  %v13361_v21 = vld [vmem:[%s18368_s13 + $0x10c] ss:$16 sps:$4 sm:$0xff]  }
 0xa75   : > { %v12995_v60 = vpack.c.bf16 %v6579_v50, %v6571_v47  ;;  %v13367_v33 = vld [vmem:[%s18368_s13 + $0x12c] ss:$16 sps:$4 sm:$0xff]   ;;  %v13377_v47 = vld [vmem:[%s18368_s13 + $0x168] ss:$16 sps:$4 sm:$0xff]  }
 0xa76   : > { %11781 = vmatmul.mubr.msk.f32.gmra.mrb[178].mxu1 %vm4603_vm0, %v6144_v39  ;;  %12974 = vmatprep.subr.bf16.mxu0 %v12973_v4  ;;  %v13379_v50 = vld [vmem:[%s18368_s13 + $0x16c] ss:$16 sps:$4 sm:$0xff]  }
 0xa77   : > { %12932 = vmatpush3.bf16.msra.mxu1 %v12913_v12  ;;  %11799 = vmatprep.mubr.msk.f32.mxu1 %vm4603_vm0, %v10295_v7 }
 0xa78   : > { %12934 = vmatprep.subr.bf16.mxu1 %v12917_v0 }
 0xa7b   : > { %12936 = vmatpush3.bf16.msra.mxu1 %v12917_v0  ;;  %v6562_v0 = vld [vmem:[%s18366_s11 + $0x58] sm:$0xff] }
 0xa7c   : > { %12938 = vmatprep.subr.bf16.mxu1 %v12921_v13  ;;  %v12981_v24 = vpack.c.bf16 %v6562_v0, %v6554_v63  ;;  %v13334_v63 = vld [vmem:[%s18368_s13 + $0x84] ss:$16 sps:$4 sm:$0xff]   ;;  %v13317_v0 = vld [vmem:[%s18368_s13 + $0x28] ss:$16 sps:$4 sm:$0xff]  }
 0xa7f   : > { %12940 = vmatpush3.bf16.msra.mxu1 %v12921_v13  ;;  %v6578_v13 = vld [vmem:[%s18366_s11 + $0xd8] sm:$0xff] }
 0xa80   : > { %12942 = vmatprep.subr.bf16.mxu1 %v12941_v15  ;;  %v12985_v51 = vpack.c.bf16 %v6578_v13, %v6570_v2  ;;  %v13346_v2 = vld [vmem:[%s18368_s13 + $0xc4] ss:$16 sps:$4 sm:$0xff]   ;;  %v13329_v13 = vld [vmem:[%s18368_s13 + $0x68] ss:$16 sps:$4 sm:$0xff]  }
 0xa82   : > { %11800 = vmatmul.mubr.msk.f32.vlgmr.msra.gmra.mrb[180].mxu1 %vm4603_vm0, %v10296_v53 }
 0xa83   : > { %11802 = vmatprep.mubr.msk.f32.mxu1 %vm4603_vm0, %v10297_v8  ;;  %12944 = vmatpush3.bf16.msra.mxu1 %v12941_v15  ;;  %v12983_v8 = vpack.c.bf16 %v6561_v28, %v6553_v37  ;;  %v6577_v15 = vld [vmem:[%s18366_s11 + $0xd0] sm:$0xff]  ;;  %v13331_v37 = vld [vmem:[%s18368_s13 + $0x6c] ss:$16 sps:$4 sm:$0xff]  }
 0xa84   : > { %12946 = vmatprep.subr.bf16.mxu1 %v12945_v40  ;;  %v13338_v28 = vld [vmem:[%s18368_s13 + $0xa0] ss:$16 sps:$4 sm:$0xff]  }
 0xa86   : > { %11803 = vmatmul.mubr.msk.f32.gmra.mrb[182].mxu1 %vm4603_vm0, %v10298_v29  ;;  %v6569_v29 = vld [vmem:[%s18366_s11 + $0x90] sm:$0xff] }
 0xa87   : > { %12948 = vmatpush3.bf16.msra.mxu1 %v12945_v40  ;;  %v12987_v43 = vpack.c.bf16 %v6577_v15, %v6569_v29  ;;  %v13341_v29 = vld [vmem:[%s18368_s13 + $0xa8] ss:$16 sps:$4 sm:$0xff]  }
 0xa88   : > { %12950 = vmatprep.subr.bf16.mxu1 %v12949_v3  ;;  %v13347_v15 = vld [vmem:[%s18368_s13 + $0xc8] ss:$16 sps:$4 sm:$0xff]  }
 0xa8b   : > { %12952 = vmatpush3.bf16.msra.mxu1 %v12949_v3 }
 0xa8c   : > { %12954 = vmatprep.subr.bf16.mxu1 %v12953_v45 }
 0xa8f   : > { %12956 = vmatpush3.bf16.msra.mxu1 %v12953_v45  ;;  %v12991_v45 = vpack.c.bf16 %v6563_v27, %v6555_v16  ;;  %v13355_v16 = vld [vmem:[%s18368_s13 + $0xec] ss:$16 sps:$4 sm:$0xff]   ;;  %v13353_v27 = vld [vmem:[%s18368_s13 + $0xe8] ss:$16 sps:$4 sm:$0xff]  }
 0xa90   : > { %13005 = vmatprep.subr.bf16.mxu1 %v12973_v4  ;;  %v12997_v4 = vpack.c.bf16 %v6566_v35, %v6558_v34  ;;  %v13362_v34 = vld [vmem:[%s18368_s13 + $0x120] ss:$16 sps:$4 sm:$0xff]   ;;  %v13365_v35 = vld [vmem:[%s18368_s13 + $0x128] ss:$16 sps:$4 sm:$0xff]  }
 0xb45   : > { %v11779_v52 = vpop.f32.mrb[176].mxu1 }
 0xb46   : > { %v6223_v54 = vpop.f32.mrb[177].mxu1 }
 0xb49   : > { %v11782_v55 = vpop.f32.mrb[178].mxu1 }
 0xb4a   : > { %v6233_v56 = vpop.f32.mrb[179].mxu1 }
 0xb55   : > { %v11801_v23 = vpop.f32.mrb[180].mxu1 }
 0xb56   : > { %v6345_v58 = vmax.f32 %v11779_v52, %v11801_v23  ;;  %v6325_v61 = vpop.f32.mrb[181].mxu1  ;;  %v6557_v52 = vld [vmem:[%s18366_s11 + $0x30] sm:$0xff] }
 0xb57   : > { %v6344_v62 = vmax.f32 %v6223_v54, %v6325_v61  ;;  %v6565_v54 = vld [vmem:[%s18366_s11 + $0x70] sm:$0xff] }
 0xb58   : > { %v12999_v6 = vpack.c.bf16 %v6565_v54, %v6557_v52  ;;  %v6581_v61 = vld [vmem:[%s18366_s11 + $0xf0] sm:$0xff]  ;;  %v13383_v52 = vld [vmem:[%s18368_s13 + $0x188] ss:$16 sps:$4 sm:$0xff]   ;;  %v13385_v54 = vld [vmem:[%s18368_s13 + $0x18c] ss:$16 sps:$4 sm:$0xff]  }
 0xb59   : > { %v11804_v12 = vpop.f32.mrb[182].mxu1  ;;  %11821 = vmatprep.mubr.msk.f32.mxu1 %vm4603_vm0, %v6344_v62  ;;  %11843 = vmatprep.mubr.msk.f32.mxu0 %vm4603_vm0, %v6344_v62  ;;  %v13310_v62 = vld [vmem:[%s18368_s13 + $0x4] ss:$16 sps:$4 sm:$0xff]  }
 0xb5a   : > { %v6347_v46 = vmax.f32 %v11782_v55, %v11804_v12  ;;  %v6335_v26 = vpop.f32.mrb[183].mxu1  ;;  %11822 = vmatmul.mubr.msk.f32.vlgmr.msra.gmra.mrb[184].mxu1 %vm4603_vm0, %v6345_v58  ;;  %11844 = vmatmul.mubr.msk.f32.vlgmr.msra.gmra.mrb[192].mxu0 %vm4603_vm0, %v6345_v58  ;;  %v6574_v55 = vld [vmem:[%s18366_s11 + $0xb8] sm:$0xff]  ;;  %v6573_v58 = vld [vmem:[%s18366_s11 + $0xb0] sm:$0xff] }
 0xb5b   : > { %v6346_v25 = vmax.f32 %v6233_v56, %v6335_v26  ;;  %12976 = vmatpush1.bf16.msra.mxu0 %v12975_v44  ;;  %13007 = vmatpush1.bf16.msra.mxu1 %v12975_v44  ;;  %v6582_v56 = vld [vmem:[%s18366_s11 + $0xf8] sm:$0xff]  ;;  %v13003_v44 = vpack.c.bf16 %v6581_v61, %v6573_v58  ;;  %v13308_v12 = vld [vmem:[%s18368_s13] ss:$16 sps:$4 sm:$0xff]   ;;  %v13316_v26 = vld [vmem:[%s18368_s13 + $0x24] ss:$16 sps:$4 sm:$0xff]  }
 0xb5c   : > { %12978 = vmatprep.subr.bf16.mxu0 %v12977_v31  ;;  %13006 = vmatprep.subr.bf16.mxu1 %v12977_v31  ;;  %v13001_v23 = vpack.c.bf16 %v6582_v56, %v6574_v55  ;;  %v13328_v31 = vld [vmem:[%s18368_s13 + $0x64] ss:$16 sps:$4 sm:$0xff]   ;;  %v13386_v56 = vld [vmem:[%s18368_s13 + $0x1a0] ss:$16 sps:$4 sm:$0xff]   ;;  %v13395_v61 = vld [vmem:[%s18368_s13 + $0x1c8] ss:$16 sps:$4 sm:$0xff]  }
 0xb5d   : > { %11824 = vmatprep.mubr.msk.f32.mxu1 %vm4603_vm0, %v6346_v25  ;;  %11846 = vmatprep.mubr.msk.f32.mxu0 %vm4603_vm0, %v6346_v25  ;;  %v13314_v25 = vld [vmem:[%s18368_s13 + $0x20] ss:$16 sps:$4 sm:$0xff]   ;;  %v13388_v55 = vld [vmem:[%s18368_s13 + $0x1a4] ss:$16 sps:$4 sm:$0xff]  }
 0xb5e   : > { %11825 = vmatmul.mubr.msk.f32.gmra.mrb[186].mxu1 %vm4603_vm0, %v6347_v46  ;;  %11847 = vmatmul.mubr.msk.f32.gmra.mrb[194].mxu0 %vm4603_vm0, %v6347_v46  ;;  %v13313_v46 = vld [vmem:[%s18368_s13 + $0xc] ss:$16 sps:$4 sm:$0xff]   ;;  %v13392_v58 = vld [vmem:[%s18368_s13 + $0x1c0] ss:$16 sps:$4 sm:$0xff]  }
 0xb5f   : > { %6660 = vmatprep.mubr.f32.mxu0 %v13868_v14  ;;  %6672 = vmatprep.mubr.f32.mxu1 %v13868_v14 }
 0xb60   : > { %12980 = vmatpush1.bf16.msra.mxu0 %v12979_v10  ;;  %13008 = vmatpush1.bf16.msra.mxu1 %v12979_v10  ;;  %v13326_v10 = vld [vmem:[%s18368_s13 + $0x60] ss:$16 sps:$4 sm:$0xff]  }
 0xb61   : > { %12982 = vmatprep.subr.bf16.mxu0 %v12981_v24  ;;  %12990 = vmatprep.subr.bf16.mxu1 %v12989_v22  ;;  %v13325_v24 = vld [vmem:[%s18368_s13 + $0x4c] ss:$16 sps:$4 sm:$0xff]   ;;  %v13323_v22 = vld [vmem:[%s18368_s13 + $0x48] ss:$16 sps:$4 sm:$0xff]  }
 0xc2d   : > { %v11823_v48 = vpop.f32.mrb[184].mxu1  ;;  %v11845_v17 = vpop.f32.mrb[192].mxu0 }
 0xc2e   : > { %v17057_v39 = vmax.f32 %v11823_v48, %v11845_v17  ;;  %v6434_v7 = vpop.f32.mrb[185].mxu1  ;;  %v6528_v53 = vpop.f32.mrb[193].mxu0  ;;  %v13337_v48 = vld [vmem:[%s18368_s13 + $0x8c] ss:$16 sps:$4 sm:$0xff]   ;;  %v13344_v17 = vld [vmem:[%s18368_s13 + $0xc0] ss:$16 sps:$4 sm:$0xff]  }
 0xc2f   : > { %v17062_v11 = vmax.f32 %v6434_v7, %v6528_v53  ;;  %v13343_v7 = vld [vmem:[%s18368_s13 + $0xac] ss:$16 sps:$4 sm:$0xff]   ;;  %v13350_v53 = vld [vmem:[%s18368_s13 + $0xe0] ss:$16 sps:$4 sm:$0xff]  }
 0xc31   : > { %v11826_v40 = vpop.f32.mrb[186].mxu1  ;;  %v11848_v30 = vpop.f32.mrb[194].mxu0  ;;  %10319 = vmatmul.mubr.msk.f32.vlgmr.msra.gmra.mrb[196].mxu0 %vm6583_vm1, %v17062_v11 }
 0xc32   : > { %v17087_v3 = vmax.f32 %v11826_v40, %v11848_v30  ;;  %v6444_v41 = vpop.f32.mrb[187].mxu1  ;;  %v6538_v36 = vpop.f32.mrb[195].mxu0  ;;  %12984 = vmatpush1.bf16.msra.mxu0 %v12983_v8  ;;  %6666 = vmatprep.mubr.f32.mxu0 %v13868_v14  ;;  %v13358_v8 = vld [vmem:[%s18368_s13 + $0x104] ss:$16 sps:$4 sm:$0xff]   ;;  %v13359_v40 = vld [vmem:[%s18368_s13 + $0x108] ss:$16 sps:$4 sm:$0xff]  }
 0xc33   : > { %v17090_v38 = vmax.f32 %v6444_v41, %v6538_v36  ;;  %12986 = vmatprep.subr.bf16.mxu0 %v12985_v51  ;;  %v13356_v51 = vld [vmem:[%s18368_s13 + $0x100] ss:$16 sps:$4 sm:$0xff]   ;;  %v13364_v30 = vld [vmem:[%s18368_s13 + $0x124] ss:$16 sps:$4 sm:$0xff]   ;;  %v13373_v41 = vld [vmem:[%s18368_s13 + $0x14c] ss:$16 sps:$4 sm:$0xff]  }
 0xc34   : > { %v13368_v36 = vld [vmem:[%s18368_s13 + $0x140] ss:$16 sps:$4 sm:$0xff]  }
 0xc35   : > { %10320 = vmatmul.mubr.msk.f32.gmra.mrb[198].mxu0 %vm6583_vm1, %v17057_v39  ;;  %10321 = vmatmul.mubr.msk.f32.vlgmr.msra.gmra.mrb[188].mxu1 %vm6583_vm1, %v17090_v38 }
 0xc36   : > { %12988 = vmatpush1.bf16.msra.mxu0 %v12987_v43  ;;  %12992 = vmatpush1.bf16.msra.mxu1 %v12991_v45  ;;  %v13371_v43 = vld [vmem:[%s18368_s13 + $0x148] ss:$16 sps:$4 sm:$0xff]   ;;  %v13376_v45 = vld [vmem:[%s18368_s13 + $0x164] ss:$16 sps:$4 sm:$0xff]  }
 0xc37   : > { %6678 = vmatprep.mubr.f32.mxu1 %v13868_v14  ;;  %6749 = vmatprep.mubr.f32.mxu0 %v13868_v14 }
 0xc38   : > { %12994 = vmatprep.subr.bf16.mxu1 %v12993_v32  ;;  %12998 = vmatprep.subr.bf16.mxu0 %v12997_v4  ;;  %v13382_v32 = vld [vmem:[%s18368_s13 + $0x184] ss:$16 sps:$4 sm:$0xff]   ;;  %v13380_v4 = vld [vmem:[%s18368_s13 + $0x180] ss:$16 sps:$4 sm:$0xff]  }
 0xc39   : > { %10322 = vmatmul.mubr.msk.f32.gmra.mrb[190].mxu1 %vm6583_vm1, %v17087_v3  ;;  %10323 = vmatmul.mubr.msk.f32.vlgmr.msra.gmra.mrb[200].mxu0 %vm6583_vm1, %v17062_v11 }
 0xc3a   : > { %12996 = vmatpush1.bf16.msra.mxu1 %v12995_v60  ;;  %6755 = vmatprep.mubr.f32.mxu0 %v13868_v14  ;;  %v13389_v60 = vld [vmem:[%s18368_s13 + $0x1a8] ss:$16 sps:$4 sm:$0xff]  }
 0xc3b   : > { %6838 = vmatprep.mubr.f32.mxu1 %v13868_v14  ;;  %13000 = vmatpush1.bf16.msra.mxu0 %v12999_v6  ;;  %v13391_v6 = vld [vmem:[%s18368_s13 + $0x1ac] ss:$16 sps:$4 sm:$0xff]  }
 0xc3c   : > { %13002 = vmatprep.subr.bf16.mxu0 %v13001_v23  ;;  %8662 = vmatprep.subr.bf16.mxu1 %v13310_v62  ;;  %v13394_v23 = vld [vmem:[%s18368_s13 + $0x1c4] ss:$16 sps:$4 sm:$0xff]   ;;  %v13397_v62 = vld [vmem:[%s18368_s13 + $0x1cc] ss:$16 sps:$4 sm:$0xff]  }
 0xc3d   : > { %10324 = vmatmul.mubr.msk.f32.gmra.mrb[202].mxu0 %vm6583_vm1, %v17057_v39  ;;  %10327 = vmatmul.mubr.msk.f32.vlgmr.msra.gmra.mrb[192].mxu1 %vm6583_vm1, %v17062_v11 }
 0xc3e   : > { %6761 = vmatprep.mubr.f32.mxu0 %v13868_v14  ;;  %6844 = vmatprep.mubr.f32.mxu1 %v13868_v14 }
 0xc3f   : > { %13004 = vmatpush1.bf16.msra.mxu0 %v13003_v44  ;;  %8663 = vmatpush1.bf16.msra.mxu1 %v13308_v12  ;;  %v13400_v44 = vld [vmem:[%s18368_s13 + $0x1e4] ss:$16 sps:$4 sm:$0xff]   ;;  %v13398_v12 = vld [vmem:[%s18368_s13 + $0x1e0] ss:$16 sps:$4 sm:$0xff]  }
 0xc40   : > { %8826 = vmatprep.subr.bf16.mxu0 %v13313_v46  ;;  %8664 = vmatprep.subr.bf16.mxu1 %v13316_v26  ;;  %v13401_v46 = vld [vmem:[%s18368_s13 + $0x1e8] ss:$16 sps:$4 sm:$0xff]   ;;  %v13403_v26 = vld [vmem:[%s18368_s13 + $0x1ec] ss:$16 sps:$4 sm:$0xff]  }
 0xc41   : > { %10325 = vmatmul.mubr.msk.f32.gmra.mrb[204].mxu0 %vm6583_vm1, %v17090_v38  ;;  %10328 = vmatmul.mubr.msk.f32.gmra.mrb[194].mxu1 %vm6583_vm1, %v17057_v39 }
 0xc42   : > { %6767 = vmatprep.mubr.f32.mxu0 %v13868_v14  ;;  %6850 = vmatprep.mubr.f32.mxu1 %v13868_v14 }
 0xc43   : > { %8665 = vmatpush1.bf16.msra.mxu1 %v13314_v25  ;;  %v13406_v25 = vld [vmem:[%s18368_s13 + $0x204] ss:$16 sps:$4 sm:$0xff]  }
 0xc44   : > { %8666 = vmatprep.subr.bf16.mxu1 %v13322_v57  ;;  %v13409_v57 = vld [vmem:[%s18368_s13 + $0x20c] ss:$16 sps:$4 sm:$0xff]  }
 0xc45   : > { %10326 = vmatmul.mubr.msk.f32.gmra.mrb[206].mxu0 %vm6583_vm1, %v17087_v3  ;;  %10329 = vmatmul.mubr.msk.f32.gmra.mrb[196].mxu1 %vm6583_vm1, %v17090_v38 }
 0xc46   : > { %6856 = vmatprep.mubr.f32.mxu1 %v13868_v14  ;;  %6927 = vmatprep.mubr.f32.mxu0 %v13868_v14 }
 0xc47   : > { %8667 = vmatpush1.bf16.msra.mxu1 %v13320_v49 }
 0xc48   : > { %8668 = vmatprep.subr.bf16.mxu1 %v13328_v31 }
 0xc49   : > { %10330 = vmatmul.mubr.msk.f32.gmra.mrb[198].mxu1 %vm6583_vm1, %v17087_v3  ;;  %10331 = vmatmul.mubr.msk.f32.vlgmr.msra.gmra.mrb[208].mxu0 %vm6583_vm1, %v17062_v11  ;;  %v13349_v11 = vld [vmem:[%s18368_s13 + $0xcc] ss:$16 sps:$4 sm:$0xff]  }
 0xc4a   : > { %6933 = vmatprep.mubr.f32.mxu0 %v13868_v14  ;;  %8827 = vmatpush1.bf16.msra.mxu0 %v13311_v5  ;;  %v6952_v5 = vld [vmem:[%s18367_s12] sm:$0xff] }
 0xc4b   : > { %8828 = vmatprep.subr.bf16.mxu0 %v13319_v9  ;;  %8669 = vmatpush1.bf16.msra.mxu1 %v13326_v10  ;;  %v6960_v9 = vld [vmem:[%s18367_s12 + $0x40] sm:$0xff]  ;;  %v6953_v10 = vld [vmem:[%s18367_s12 + $0x8] sm:$0xff] }
 0xc4c   : > { %8670 = vmatprep.subr.bf16.mxu1 %v13334_v63  ;;  %v6961_v63 = vld [vmem:[%s18367_s12 + $0x48] sm:$0xff] }
 0xc4d   : > { %10332 = vmatmul.mubr.msk.f32.gmra.mrb[210].mxu0 %vm6583_vm1, %v17057_v39  ;;  %v13335_v39 = vld [vmem:[%s18368_s13 + $0x88] ss:$16 sps:$4 sm:$0xff]  }
 0xc4e   : > { %6939 = vmatprep.mubr.f32.mxu0 %v13868_v14  ;;  %8829 = vmatpush1.bf16.msra.mxu0 %v13317_v0 }
 0xc4f   : > { %8830 = vmatprep.subr.bf16.mxu0 %v13325_v24  ;;  %8671 = vmatpush1.bf16.msra.mxu1 %v13332_v59  ;;  %v6968_v59 = vld [vmem:[%s18367_s12 + $0x80] sm:$0xff] }
 0xc50   : > { %8672 = vmatprep.subr.bf16.mxu1 %v13340_v1 }
 0xc51   : > { %10333 = vmatmul.mubr.msk.f32.gmra.mrb[212].mxu0 %vm6583_vm1, %v17090_v38  ;;  %v13374_v38 = vld [vmem:[%s18368_s13 + $0x160] ss:$16 sps:$4 sm:$0xff]  }
 0xc52   : > { %6945 = vmatprep.mubr.f32.mxu0 %v13868_v14  ;;  %8831 = vmatpush1.bf16.msra.mxu0 %v13323_v22  ;;  %v13352_v14 = vld [vmem:[%s18368_s13 + $0xe4] ss:$16 sps:$4 sm:$0xff]  }
 0xc53   : > { %8832 = vmatprep.subr.bf16.mxu0 %v13331_v37  ;;  %8673 = vmatpush1.bf16.msra.mxu1 %v13338_v28 }
 0xc54   : > { %8674 = vmatprep.subr.bf16.mxu1 %v13346_v2  ;;  %v6969_v2 = vld [vmem:[%s18367_s12 + $0x88] sm:$0xff] }
 0xc55   : > { %10334 = vmatmul.mubr.msk.f32.gmra.mrb[214].mxu0 %vm6583_vm1, %v17087_v3  ;;  %v13370_v3 = vld [vmem:[%s18368_s13 + $0x144] ss:$16 sps:$4 sm:$0xff]  }
 0xc56   : > { %8833 = vmatpush1.bf16.msra.mxu0 %v13329_v13 }
 0xc57   : > { %8834 = vmatprep.subr.bf16.mxu0 %v13337_v48  ;;  %8675 = vmatpush1.bf16.msra.mxu1 %v13344_v17  ;;  %v6976_v17 = vld [vmem:[%s18367_s12 + $0xc0] sm:$0xff] }
 0xc58   : > { %8676 = vmatprep.subr.bf16.mxu1 %v13352_v14 }
 0xc5a   : > { %8835 = vmatpush1.bf16.msra.mxu0 %v13335_v39 }
 0xc5b   : > { %8836 = vmatprep.subr.bf16.mxu0 %v13343_v7  ;;  %8677 = vmatpush1.bf16.msra.mxu1 %v13350_v53  ;;  %v6977_v7 = vld [vmem:[%s18367_s12 + $0xc8] sm:$0xff] }
 0xc5c   : > { %8678 = vmatprep.subr.bf16.mxu1 %v13358_v8 }
 0xc5e   : > { %8837 = vmatpush1.bf16.msra.mxu0 %v13341_v29 }
 0xc5f   : > { %8838 = vmatprep.subr.bf16.mxu0 %v13349_v11  ;;  %8679 = vmatpush1.bf16.msra.mxu1 %v13356_v51 }
 0xc60   : > { %8680 = vmatprep.subr.bf16.mxu1 %v13364_v30 }
 0xc62   : > { %8839 = vmatpush1.bf16.msra.mxu0 %v13347_v15 }
 0xc63   : > { %8840 = vmatprep.subr.bf16.mxu0 %v13355_v16  ;;  %8681 = vmatpush1.bf16.msra.mxu1 %v13362_v34 }
 0xc64   : > { %8682 = vmatprep.subr.bf16.mxu1 %v13370_v3  ;;  %v6963_v3 = vld [vmem:[%s18367_s12 + $0x58] sm:$0xff] }
 0xc66   : > { %8841 = vmatpush1.bf16.msra.mxu0 %v13353_v27 }
 0xc67   : > { %8842 = vmatprep.subr.bf16.mxu0 %v13361_v21  ;;  %8683 = vmatpush1.bf16.msra.mxu1 %v13368_v36 }
 0xc68   : > { %8684 = vmatprep.subr.bf16.mxu1 %v13376_v45 }
 0xc6a   : > { %8843 = vmatpush1.bf16.msra.mxu0 %v13359_v40  ;;  %v6954_v40 = vld [vmem:[%s18367_s12 + $0x10] sm:$0xff] }
 0xc6b   : > { %8844 = vmatprep.subr.bf16.mxu0 %v13367_v33  ;;  %8685 = vmatpush1.bf16.msra.mxu1 %v13374_v38  ;;  %v6962_v33 = vld [vmem:[%s18367_s12 + $0x50] sm:$0xff] }
 0xc6c   : > { %8686 = vmatprep.subr.bf16.mxu1 %v13382_v32 }
 0xc6e   : > { %8845 = vmatpush1.bf16.msra.mxu0 %v13365_v35  ;;  %v6955_v35 = vld [vmem:[%s18367_s12 + $0x18] sm:$0xff] }
 0xc6f   : > { %8846 = vmatprep.subr.bf16.mxu0 %v13373_v41  ;;  %8687 = vmatpush1.bf16.msra.mxu1 %v13380_v4 }
 0xc70   : > { %8688 = vmatprep.subr.bf16.mxu1 %v13388_v55 }
 0xc72   : > { %8847 = vmatpush1.bf16.msra.mxu0 %v13371_v43 }
 0xc73   : > { %8848 = vmatprep.subr.bf16.mxu0 %v13379_v50  ;;  %8689 = vmatpush1.bf16.msra.mxu1 %v13386_v56  ;;  %v6970_v56 = vld [vmem:[%s18367_s12 + $0x90] sm:$0xff] }
 0xc74   : > { %8690 = vmatprep.subr.bf16.mxu1 %v13394_v23 }
 0xc76   : > { %8849 = vmatpush1.bf16.msra.mxu0 %v13377_v47 }
 0xc77   : > { %8850 = vmatprep.subr.bf16.mxu0 %v13385_v54  ;;  %8691 = vmatpush1.bf16.msra.mxu1 %v13392_v58  ;;  %v6956_v54 = vld [vmem:[%s18367_s12 + $0x20] sm:$0xff]  ;;  %v6957_v58 = vld [vmem:[%s18367_s12 + $0x28] sm:$0xff] }
 0xc78   : > { %8692 = vmatprep.subr.bf16.mxu1 %v13400_v44 }
 0xc7a   : > { %8851 = vmatpush1.bf16.msra.mxu0 %v13383_v52 }
 0xc7b   : > { %8852 = vmatprep.subr.bf16.mxu0 %v13391_v6  ;;  %8693 = vmatpush1.bf16.msra.mxu1 %v13398_v12 }
 0xc7c   : > { %8703 = vmatprep.subr.bf16.mxu1 %v13406_v25 }
 0xc7e   : > { %8853 = vmatpush1.bf16.msra.mxu0 %v13389_v60  ;;  %v6964_v60 = vld [vmem:[%s18367_s12 + $0x60] sm:$0xff] }
 0xc7f   : > { %8854 = vmatprep.subr.bf16.mxu0 %v13397_v62  ;;  %v6965_v62 = vld [vmem:[%s18367_s12 + $0x68] sm:$0xff] }
 0xc82   : > { %8855 = vmatpush1.bf16.msra.mxu0 %v13395_v61  ;;  %v6971_v61 = vld [vmem:[%s18367_s12 + $0x98] sm:$0xff] }
 0xc83   : > { %8856 = vmatprep.subr.bf16.mxu0 %v13403_v26 }
 0xc86   : > { %8857 = vmatpush1.bf16.msra.mxu0 %v13401_v46 }
 0xc87   : > { %8867 = vmatprep.subr.bf16.mxu0 %v13409_v57 }
 0xd04   : > { %v6662_v49 = vpop.f32.mrb[196].mxu0 }
 0xd05   : > { %v6664_v31 = vpop.f32.mrb[197].mxu0  ;;  %v6984_v1 = vmul.f32 %v6952_v5, %v6662_v49 }
 0xd06   : > { %v6985_v13 = vmul.f32 %v6953_v10, %v6664_v31 }
 0xd08   : > { %v6668_v0 = vpop.f32.mrb[198].mxu0  ;;  %v6674_v24 = vpop.f32.mrb[188].mxu1 }
 0xd09   : > { %v6992_v22 = vmul.f32 %v6960_v9, %v6668_v0  ;;  %v6670_v37 = vpop.f32.mrb[199].mxu0  ;;  %v6676_v28 = vpop.f32.mrb[189].mxu1  ;;  %v7000_v39 = vmul.f32 %v6968_v59, %v6674_v24  ;;  %v6978_v59 = vld [vmem:[%s18367_s12 + $0xd0] sm:$0xff] }
 0xd0a   : > { %v6993_v48 = vmul.f32 %v6961_v63, %v6670_v37  ;;  %v7001_v8 = vmul.f32 %v6969_v2, %v6676_v28  ;;  %v6979_v2 = vld [vmem:[%s18367_s12 + $0xd8] sm:$0xff] }
 0xd0b   : > { %v7016_v14 = vadd.f32 %v6992_v22, %v6984_v1  ;;  %v6972_v1 = vld [vmem:[%s18367_s12 + $0xa0] sm:$0xff] }
 0xd0c   : > { %v7025_v53 = vadd.f32 %v6993_v48, %v6985_v13  ;;  %v6680_v29 = vpop.f32.mrb[190].mxu1  ;;  %v6751_v11 = vpop.f32.mrb[200].mxu0  ;;  %v6973_v13 = vld [vmem:[%s18367_s12 + $0xa8] sm:$0xff] }
 0xd0d   : > { %v7017_v51 = vadd.f32 %v7016_v14, %v7000_v39  ;;  %v7008_v15 = vmul.f32 %v6976_v17, %v6680_v29  ;;  %v6682_v16 = vpop.f32.mrb[191].mxu1  ;;  %v6753_v27 = vpop.f32.mrb[201].mxu0  ;;  %v6986_v38 = vmul.f32 %v6954_v40, %v6751_v11 }
 0xd0e   : > { %v7026_v21 = vadd.f32 %v7025_v53, %v7001_v8  ;;  %v7009_v30 = vmul.f32 %v6977_v7, %v6682_v16  ;;  %v6987_v52 = vmul.f32 %v6955_v35, %v6753_v27  ;;  %v6980_v27 = vld [vmem:[%s18367_s12 + $0xe0] sm:$0xff] }
 0xd0f   : > { %v7018_v34 = vadd.f32 %v7017_v51, %v7008_v15 }
 0xd10   : > { %v7027_v41 = vadd.f32 %v7026_v21, %v7009_v30  ;;  %v6757_v36 = vpop.f32.mrb[202].mxu0  ;;  %v6840_v43 = vpop.f32.mrb[192].mxu1 }
 0xd11   : > { %v7019_v45 = vrot.slane %v7018_v34, 4  ;;  %v6994_v47 = vmul.f32 %v6962_v33, %v6757_v36  ;;  %v6759_v50 = vpop.f32.mrb[203].mxu0  ;;  %v6842_v32 = vpop.f32.mrb[193].mxu1  ;;  %v6988_v57 = vmul.f32 %v6956_v54, %v6840_v43  ;;  %v6966_v54 = vld [vmem:[%s18367_s12 + $0x70] sm:$0xff] }
 0xd12   : > { %v7028_v4 = vrot.slane %v7027_v41, 4  ;;  %v6995_v55 = vmul.f32 %v6963_v3, %v6759_v50  ;;  %v6989_v63 = vmul.f32 %v6957_v58, %v6842_v32 }
 0xd13   : > { %v7020_v6 = vadd.f32 %v7019_v45, %v7018_v34  ;;  %v7034_v23 = vadd.f32 %v6994_v47, %v6986_v38  ;;  %v6981_v34 = vld [vmem:[%s18367_s12 + $0xe8] sm:$0xff] }
 0xd14   : > { %v7029_v44 = vadd.f32 %v7028_v4, %v7027_v41  ;;  %v7043_v12 = vadd.f32 %v6995_v55, %v6987_v52  ;;  %v6763_v46 = vpop.f32.mrb[204].mxu0  ;;  %v6846_v26 = vpop.f32.mrb[194].mxu1  ;;  %v6958_v4 = vld [vmem:[%s18367_s12 + $0x30] sm:$0xff] }
 0xd15   : > { %v7021_v25 = vrot.slane %v7020_v6, 2  ;;  %v7002_v49 = vmul.f32 %v6970_v56, %v6763_v46  ;;  %v6996_v31 = vmul.f32 %v6964_v60, %v6846_v26  ;;  %v6765_v5 = vpop.f32.mrb[205].mxu0  ;;  %v6848_v9 = vpop.f32.mrb[195].mxu1  ;;  %v6959_v60 = vld [vmem:[%s18367_s12 + $0x38] sm:$0xff] }
 0xd16   : > { %v7030_v10 = vrot.slane %v7029_v44, 2  ;;  %v7003_v0 = vmul.f32 %v6971_v61, %v6765_v5  ;;  %v6997_v24 = vmul.f32 %v6965_v62, %v6848_v9 }
 0xd17   : > { %v7022_v22 = vadd.f32 %v7021_v25, %v7020_v6  ;;  %v7035_v37 = vadd.f32 %v7034_v23, %v7002_v49  ;;  %v7052_v28 = vadd.f32 %v6996_v31, %v6988_v57  ;;  %v6967_v6 = vld [vmem:[%s18367_s12 + $0x78] sm:$0xff]  ;;  %v13412_v49 = vld [vmem:[%s18368_s13 + $0x224] ss:$16 sps:$4 sm:$0xff]  }
 0xd18   : > { %v7031_v48 = vadd.f32 %v7030_v10, %v7029_v44  ;;  %v7044_v17 = vadd.f32 %v7043_v12, %v7003_v0  ;;  %v7061_v14 = vadd.f32 %v6997_v24, %v6989_v63  ;;  %v6769_v39 = vpop.f32.mrb[206].mxu0  ;;  %v6852_v7 = vpop.f32.mrb[196].mxu1  ;;  %v13404_v44 = vld [vmem:[%s18368_s13 + $0x200] ss:$16 sps:$4 sm:$0xff]   ;;  %v13407_v12 = vld [vmem:[%s18368_s13 + $0x208] ss:$16 sps:$4 sm:$0xff]  }
 0xd19   : > { %v7023_v53 = vrot.slane %v7022_v22, 1  ;;  %v7010_v8 = vmul.f32 %v6978_v59, %v6769_v39  ;;  %v7004_v29 = vmul.f32 %v6972_v1, %v6852_v7  ;;  %v6771_v11 = vpop.f32.mrb[207].mxu0  ;;  %v6854_v51 = vpop.f32.mrb[197].mxu1  ;;  %v13415_v31 = vld [vmem:[%s18368_s13 + $0x22c] ss:$16 sps:$4 sm:$0xff]   ;;  %v6974_v63 = vld [vmem:[%s18367_s12 + $0xb0] sm:$0xff] }
 0xd1a   : > { %v7011_v15 = vmul.f32 %v6979_v2, %v6771_v11  ;;  %v7005_v16 = vmul.f32 %v6973_v13, %v6854_v51  ;;  %v7032_v21 = vrot.slane %v7031_v48, 1  ;;  %v6975_v24 = vld [vmem:[%s18367_s12 + $0xb8] sm:$0xff]  ;;  %v6982_v39 = vld [vmem:[%s18367_s12 + $0xf0] sm:$0xff] }
 0xd1b   : > { %v7024_v40 = vadd.f32 %v7023_v53, %v7022_v22  ;;  %v17426_v30 = vadd.f32 %v7035_v37, %v7010_v8  ;;  %v7053_v33 = vadd.f32 %v7052_v28, %v7004_v29  ;;  %v13410_v37 = vld [vmem:[%s18368_s13 + $0x220] ss:$16 sps:$4 sm:$0xff]   ;;  %v13413_v28 = vld [vmem:[%s18368_s13 + $0x228] ss:$16 sps:$4 sm:$0xff]  }
 0xd1c   : > { %v7045_v35 = vadd.f32 %v7044_v17, %v7011_v15  ;;  %v7062_v3 = vadd.f32 %v7061_v14, %v7005_v16  ;;  %v6858_v41 = vpop.f32.mrb[198].mxu1  ;;  %v6929_v36 = vpop.f32.mrb[208].mxu0  ;;  %v7033_v43 = vadd.f32 %v7032_v21, %v7031_v48  ;;  %v13418_v48 = vld [vmem:[%s18368_s13 + $0x244] ss:$16 sps:$4 sm:$0xff]   ;;  %v13421_v17 = vld [vmem:[%s18368_s13 + $0x24c] ss:$16 sps:$4 sm:$0xff]  }
 0xd1d   : > { %v7088_v45 = vmax.f32 %v7024_v40, 0.0  ;;  %v7012_v38 = vmul.f32 %v6980_v27, %v6858_v41  ;;  %v6860_v47 = vpop.f32.mrb[199].mxu1  ;;  %v6931_v50 = vpop.f32.mrb[209].mxu0  ;;  %v6990_v26 = vmul.f32 %v6958_v4, %v6929_v36  ;;  %v6983_v8 = vld [vmem:[%s18367_s12 + $0xf8] sm:$0xff]  ;;  %v13416_v51 = vld [vmem:[%s18368_s13 + $0x240] ss:$16 sps:$4 sm:$0xff]  }
 0xd1e   : > { %v7046_v32 = vrot.slane %v7045_v35, 4  ;;  %v7013_v52 = vmul.f32 %v6981_v34, %v6860_v47  ;;  %v7089_v55 = vmax.f32 %v7033_v43, 0.0  ;;  %v6991_v9 = vmul.f32 %v6959_v60, %v6931_v50  ;;  %v13419_v15 = vld [vmem:[%s18368_s13 + $0x248] ss:$16 sps:$4 sm:$0xff]   ;;  %v13424_v40 = vld [vmem:[%s18368_s13 + $0x264] ss:$16 sps:$4 sm:$0xff]  }
 0xd1f   : > { %v17437_v56 = vadd.f32 %v7053_v33, %v7012_v38  ;;  %v7096_v46 = vpack.c.bf16 %v7088_v45, %v7088_v45  ;;  %v13427_v33 = vld [vmem:[%s18368_s13 + $0x26c] ss:$16 sps:$4 sm:$0xff]   ;;  %v13422_v36 = vld [vmem:[%s18368_s13 + $0x260] ss:$16 sps:$4 sm:$0xff]   ;;  %v13425_v45 = vld [vmem:[%s18368_s13 + $0x268] ss:$16 sps:$4 sm:$0xff]  }
 0xd20   : > { %v7047_v23 = vadd.f32 %v7046_v32, %v7045_v35  ;;  %v17445_v58 = vadd.f32 %v7062_v3, %v7013_v52  ;;  %v6935_v61 = vpop.f32.mrb[210].mxu0  ;;  %v7097_v62 = vpack.c.bf16 %v7089_v55, %v7089_v55  ;;  %v13430_v38 = vld [vmem:[%s18368_s13 + $0x284] ss:$16 sps:$4 sm:$0xff]   ;;  %v13433_v47 = vld [vmem:[%s18368_s13 + $0x28c] ss:$16 sps:$4 sm:$0xff]  }
 0xd21   : > { %v6998_v25 = vmul.f32 %v6966_v54, %v6935_v61  ;;  %v6937_v57 = vpop.f32.mrb[211].mxu0  ;;  %v13428_v50 = vld [vmem:[%s18368_s13 + $0x280] ss:$16 sps:$4 sm:$0xff]   ;;  %v13431_v32 = vld [vmem:[%s18368_s13 + $0x288] ss:$16 sps:$4 sm:$0xff]  }
 0xd22   : > { %v7048_v5 = vrot.slane %v7047_v23, 2  ;;  %v6999_v10 = vmul.f32 %v6967_v6, %v6937_v57  ;;  %8694 = vmatprep.mubr.bf16.mxu1 %v7097_v62  ;;  %8858 = vmatprep.mubr.bf16.mxu0 %v7097_v62  ;;  %v13436_v4 = vld [vmem:[%s18368_s13 + $0x2a4] ss:$16 sps:$4 sm:$0xff]   ;;  %v13439_v52 = vld [vmem:[%s18368_s13 + $0x2ac] ss:$16 sps:$4 sm:$0xff]  }
 0xd23   : > { %v7070_v0 = vadd.f32 %v6998_v25, %v6990_v26  ;;  %8695 = vmatmul.mubr.bf16.vlgmr.msra.gmra.mrb[200].mxu1 %v7096_v46  ;;  %8859 = vmatmul.mubr.bf16.vlgmr.msra.gmra.mrb[216].mxu0 %v7096_v46  ;;  %v13434_v54 = vld [vmem:[%s18368_s13 + $0x2a0] ss:$16 sps:$4 sm:$0xff]   ;;  %v13437_v55 = vld [vmem:[%s18368_s13 + $0x2a8] ss:$16 sps:$4 sm:$0xff]   ;;  %v13442_v60 = vld [vmem:[%s18368_s13 + $0x2c4] ss:$16 sps:$4 sm:$0xff]  }
 0xd24   : > { %v7049_v59 = vadd.f32 %v7048_v5, %v7047_v23  ;;  %v7079_v1 = vadd.f32 %v6999_v10, %v6991_v9  ;;  %8704 = vmatpush1.bf16.msra.mxu1 %v13404_v44  ;;  %8868 = vmatpush1.bf16.msra.mxu0 %v13407_v12  ;;  %v6941_v22 = vpop.f32.mrb[212].mxu0  ;;  %v13445_v6 = vld [vmem:[%s18368_s13 + $0x2cc] ss:$16 sps:$4 sm:$0xff]   ;;  %v13440_v23 = vld [vmem:[%s18368_s13 + $0x2c0] ss:$16 sps:$4 sm:$0xff]  }
 0xd25   : > { %v7006_v2 = vmul.f32 %v6974_v63, %v6941_v22  ;;  %v6943_v13 = vpop.f32.mrb[213].mxu0  ;;  %8705 = vmatprep.subr.bf16.mxu1 %v13412_v49  ;;  %8869 = vmatprep.subr.bf16.mxu0 %v13415_v31  ;;  %v13443_v61 = vld [vmem:[%s18368_s13 + $0x2c8] ss:$16 sps:$4 sm:$0xff]   ;;  %v13448_v62 = vld [vmem:[%s18368_s13 + $0x2e4] ss:$16 sps:$4 sm:$0xff]   ;;  %v7037_v63 = vrot.slane %v17426_v30, 4 }
 0xd26   : > { %v7007_v14 = vmul.f32 %v6975_v24, %v6943_v13  ;;  %v7050_v7 = vrot.slane %v7049_v59, 1  ;;  %v13451_v44 = vld [vmem:[%s18368_s13 + $0x2ec] ss:$16 sps:$4 sm:$0xff]   ;;  %v13446_v12 = vld [vmem:[%s18368_s13 + $0x2e0] ss:$16 sps:$4 sm:$0xff]  }
 0xd27   : > { %v7071_v53 = vadd.f32 %v7070_v0, %v7006_v2  ;;  %v13449_v46 = vld [vmem:[%s18368_s13 + $0x2e8] ss:$16 sps:$4 sm:$0xff]   ;;  %v13454_v26 = vld [vmem:[%s18368_s13 + $0x304] ss:$16 sps:$4 sm:$0xff]   ;;  %v13457_v25 = vld [vmem:[%s18368_s13 + $0x30c] ss:$16 sps:$4 sm:$0xff]  }
 0xd28   : > { %v7080_v29 = vadd.f32 %v7079_v1, %v7007_v14  ;;  %8706 = vmatpush1.bf16.msra.mxu1 %v13410_v37  ;;  %8870 = vmatpush1.bf16.msra.mxu0 %v13413_v28  ;;  %v6947_v11 = vpop.f32.mrb[214].mxu0  ;;  %v7051_v16 = vadd.f32 %v7050_v7, %v7049_v59  ;;  %v13452_v57 = vld [vmem:[%s18368_s13 + $0x300] ss:$16 sps:$4 sm:$0xff]   ;;  %v13455_v49 = vld [vmem:[%s18368_s13 + $0x308] ss:$16 sps:$4 sm:$0xff]   ;;  %v7064_v59 = vrot.slane %v17445_v58, 4  ;;  %v7038_v37 = vadd.f32 %v7037_v63, %v17426_v30 }
 0xd29   : > { %v7014_v27 = vmul.f32 %v6982_v39, %v6947_v11  ;;  %v6949_v21 = vpop.f32.mrb[215].mxu0  ;;  %8707 = vmatprep.subr.bf16.mxu1 %v13418_v48  ;;  %8871 = vmatprep.subr.bf16.mxu0 %v13421_v17  ;;  %v13460_v31 = vld [vmem:[%s18368_s13 + $0x324] ss:$16 sps:$4 sm:$0xff]   ;;  %v13463_v5 = vld [vmem:[%s18368_s13 + $0x32c] ss:$16 sps:$4 sm:$0xff]  }
 0xd2a   : > { %v7015_v34 = vmul.f32 %v6983_v8, %v6949_v21  ;;  %v7091_v35 = vmax.f32 %v7051_v16, 0.0  ;;  %v13458_v9 = vld [vmem:[%s18368_s13 + $0x320] ss:$16 sps:$4 sm:$0xff]   ;;  %v13461_v10 = vld [vmem:[%s18368_s13 + $0x328] ss:$16 sps:$4 sm:$0xff]   ;;  %v7065_v13 = vadd.f32 %v7064_v59, %v17445_v58  ;;  %v7039_v17 = vrot.slane %v7038_v37, 2 }
 0xd2b   : > { %v17495_v3 = vadd.f32 %v7071_v53, %v7014_v27  ;;  %v13466_v0 = vld [vmem:[%s18368_s13 + $0x344] ss:$16 sps:$4 sm:$0xff]   ;;  %v13469_v24 = vld [vmem:[%s18368_s13 + $0x34c] ss:$16 sps:$4 sm:$0xff]   ;;  %v13464_v1 = vld [vmem:[%s18368_s13 + $0x340] ss:$16 sps:$4 sm:$0xff]  }
 0xd2c   : > { %v17497_v41 = vadd.f32 %v7080_v29, %v7015_v34  ;;  %8708 = vmatpush1.bf16.msra.mxu1 %v13416_v51  ;;  %8872 = vmatpush1.bf16.msra.mxu0 %v13419_v15  ;;  %v7099_v43 = vpack.c.bf16 %v7091_v35, %v7091_v35  ;;  %v13467_v22 = vld [vmem:[%s18368_s13 + $0x348] ss:$16 sps:$4 sm:$0xff]   ;;  %v13472_v28 = vld [vmem:[%s18368_s13 + $0x364] ss:$16 sps:$4 sm:$0xff]   ;;  %v13475_v2 = vld [vmem:[%s18368_s13 + $0x36c] ss:$16 sps:$4 sm:$0xff]   ;;  %v7040_v8 = vadd.f32 %v7039_v17, %v7038_v37 }
 0xd2d   : > { %8709 = vmatprep.subr.bf16.mxu1 %v13424_v40  ;;  %8873 = vmatprep.subr.bf16.mxu0 %v13427_v33  ;;  %v13470_v48 = vld [vmem:[%s18368_s13 + $0x360] ss:$16 sps:$4 sm:$0xff]   ;;  %v13473_v30 = vld [vmem:[%s18368_s13 + $0x368] ss:$16 sps:$4 sm:$0xff]   ;;  %v13478_v14 = vld [vmem:[%s18368_s13 + $0x384] ss:$16 sps:$4 sm:$0xff]  }
 0xd2e   : > { %8735 = vmatprep.mubr.bf16.mxu1 %v7099_v43  ;;  %8899 = vmatprep.mubr.bf16.mxu0 %v7099_v43  ;;  %v13481_v58 = vld [vmem:[%s18368_s13 + $0x38c] ss:$16 sps:$4 sm:$0xff]   ;;  %v7066_v39 = vrot.slane %v7065_v13, 2  ;;  %v13476_v7 = vld [vmem:[%s18368_s13 + $0x380] ss:$16 sps:$4 sm:$0xff]   ;;  %v7041_v27 = vrot.slane %v7040_v8, 1 }
 0xd2f   : > { %v13479_v53 = vld [vmem:[%s18368_s13 + $0x388] ss:$16 sps:$4 sm:$0xff]   ;;  %v13484_v29 = vld [vmem:[%s18368_s13 + $0x3a4] ss:$16 sps:$4 sm:$0xff]   ;;  %v13487_v11 = vld [vmem:[%s18368_s13 + $0x3ac] ss:$16 sps:$4 sm:$0xff]  }
 0xd30   : > { %8710 = vmatpush1.bf16.msra.mxu1 %v13422_v36  ;;  %8874 = vmatpush1.bf16.msra.mxu0 %v13425_v45  ;;  %v7067_v51 = vadd.f32 %v7066_v39, %v7065_v13  ;;  %v13482_v15 = vld [vmem:[%s18368_s13 + $0x3a0] ss:$16 sps:$4 sm:$0xff]   ;;  %v13485_v16 = vld [vmem:[%s18368_s13 + $0x3a8] ss:$16 sps:$4 sm:$0xff]   ;;  %v13490_v21 = vld [vmem:[%s18368_s13 + $0x3c4] ss:$16 sps:$4 sm:$0xff]   ;;  %v7042_v45 = vadd.f32 %v7041_v27, %v7040_v8 }
 0xd31   : > { %8711 = vmatprep.subr.bf16.mxu1 %v13430_v38  ;;  %8875 = vmatprep.subr.bf16.mxu0 %v13433_v47  ;;  %v13493_v40 = vld [vmem:[%s18368_s13 + $0x3cc] ss:$16 sps:$4 sm:$0xff]   ;;  %v13488_v34 = vld [vmem:[%s18368_s13 + $0x3c0] ss:$16 sps:$4 sm:$0xff]   ;;  %v13491_v35 = vld [vmem:[%s18368_s13 + $0x3c8] ss:$16 sps:$4 sm:$0xff]  }
 0xd32   : > { %v7068_v33 = vrot.slane %v7067_v51, 1  ;;  %v13496_v36 = vld [vmem:[%s18368_s13 + $0x3e4] ss:$16 sps:$4 sm:$0xff]   ;;  %v13499_v43 = vld [vmem:[%s18368_s13 + $0x3ec] ss:$16 sps:$4 sm:$0xff]  }
 0xd33   : > { %v13494_v47 = vld [vmem:[%s18368_s13 + $0x3e0] ss:$16 sps:$4 sm:$0xff]   ;;  %v13529_v63 = vld [vmem:[%s18368_s13 + $0x48c] ss:$16 sps:$4 sm:$0xff]   ;;  %v13532_v59 = vld [vmem:[%s18368_s13 + $0x4a4] ss:$16 sps:$4 sm:$0xff]  }
 0xd34   : > { %8712 = vmatpush1.bf16.msra.mxu1 %v13428_v50  ;;  %8876 = vmatpush1.bf16.msra.mxu0 %v13431_v32  ;;  %v7069_v38 = vadd.f32 %v7068_v33, %v7067_v51  ;;  %v13497_v50 = vld [vmem:[%s18368_s13 + $0x3e8] ss:$16 sps:$4 sm:$0xff]   ;;  %v7090_v32 = vmax.f32 %v7042_v45, 0.0  ;;  %v13536_v13 = vld [vmem:[%s18368_s13 + $0x4c0] ss:$16 sps:$4 sm:$0xff]  }
 0xd35   : > { %8713 = vmatprep.subr.bf16.mxu1 %v13436_v4  ;;  %8877 = vmatprep.subr.bf16.mxu0 %v13439_v52  ;;  %v13502_v4 = vld [vmem:[%s18368_s13 + $0x404] ss:$16 sps:$4 sm:$0xff]   ;;  %v13505_v52 = vld [vmem:[%s18368_s13 + $0x40c] ss:$16 sps:$4 sm:$0xff]   ;;  %v13533_v37 = vld [vmem:[%s18368_s13 + $0x4a8] ss:$16 sps:$4 sm:$0xff]  }
 0xd36   : > { %v13547_v17 = vld [vmem:[%s18368_s13 + $0x4ec] ss:$16 sps:$4 sm:$0xff]   ;;  %v13550_v39 = vld [vmem:[%s18368_s13 + $0x504] ss:$16 sps:$4 sm:$0xff]   ;;  %v13551_v8 = vld [vmem:[%s18368_s13 + $0x508] ss:$16 sps:$4 sm:$0xff]  }
 0xd37   : > { %v13554_v51 = vld [vmem:[%s18368_s13 + $0x520] ss:$16 sps:$4 sm:$0xff]   ;;  %v13562_v27 = vld [vmem:[%s18368_s13 + $0x544] ss:$16 sps:$4 sm:$0xff]  }
 0xd38   : > { %8714 = vmatpush1.bf16.msra.mxu1 %v13434_v54  ;;  %8878 = vmatpush1.bf16.msra.mxu0 %v13437_v55  ;;  %v7093_v54 = vmax.f32 %v7069_v38, 0.0  ;;  %v13500_v55 = vld [vmem:[%s18368_s13 + $0x400] ss:$16 sps:$4 sm:$0xff]  }
 0xd39   : > { %8715 = vmatprep.subr.bf16.mxu1 %v13442_v60  ;;  %8879 = vmatprep.subr.bf16.mxu0 %v13445_v6  ;;  %v7098_v60 = vpack.c.bf16 %v7090_v32, %v7090_v32  ;;  %v13503_v6 = vld [vmem:[%s18368_s13 + $0x408] ss:$16 sps:$4 sm:$0xff]   ;;  %v13560_v33 = vld [vmem:[%s18368_s13 + $0x540] ss:$16 sps:$4 sm:$0xff]  }
 0xd3c   : > { %8716 = vmatpush1.bf16.msra.mxu1 %v13440_v23  ;;  %8880 = vmatpush1.bf16.msra.mxu0 %v13443_v61  ;;  %v7101_v23 = vpack.c.bf16 %v7093_v54, %v7093_v54  ;;  %v13508_v61 = vld [vmem:[%s18368_s13 + $0x424] ss:$16 sps:$4 sm:$0xff]   ;;  %v13575_v54 = vld [vmem:[%s18368_s13 + $0x588] ss:$16 sps:$4 sm:$0xff]  }
 0xd3d   : > { %8717 = vmatprep.subr.bf16.mxu1 %v13448_v62  ;;  %8881 = vmatprep.subr.bf16.mxu0 %v13451_v44  ;;  %v13511_v62 = vld [vmem:[%s18368_s13 + $0x42c] ss:$16 sps:$4 sm:$0xff]   ;;  %v13506_v44 = vld [vmem:[%s18368_s13 + $0x420] ss:$16 sps:$4 sm:$0xff]  }
 0xd40   : > { %8718 = vmatpush1.bf16.msra.mxu1 %v13446_v12  ;;  %8882 = vmatpush1.bf16.msra.mxu0 %v13449_v46  ;;  %v13509_v12 = vld [vmem:[%s18368_s13 + $0x428] ss:$16 sps:$4 sm:$0xff]   ;;  %v13514_v46 = vld [vmem:[%s18368_s13 + $0x444] ss:$16 sps:$4 sm:$0xff]  }
 0xd41   : > { %8719 = vmatprep.subr.bf16.mxu1 %v13454_v26  ;;  %8883 = vmatprep.subr.bf16.mxu0 %v13457_v25  ;;  %v13517_v26 = vld [vmem:[%s18368_s13 + $0x44c] ss:$16 sps:$4 sm:$0xff]   ;;  %v13512_v25 = vld [vmem:[%s18368_s13 + $0x440] ss:$16 sps:$4 sm:$0xff]  }
 0xd44   : > { %8720 = vmatpush1.bf16.msra.mxu1 %v13452_v57  ;;  %8884 = vmatpush1.bf16.msra.mxu0 %v13455_v49  ;;  %v13515_v57 = vld [vmem:[%s18368_s13 + $0x448] ss:$16 sps:$4 sm:$0xff]   ;;  %v13520_v49 = vld [vmem:[%s18368_s13 + $0x464] ss:$16 sps:$4 sm:$0xff]  }
 0xd45   : > { %8721 = vmatprep.subr.bf16.mxu1 %v13460_v31  ;;  %8885 = vmatprep.subr.bf16.mxu0 %v13463_v5  ;;  %v13523_v31 = vld [vmem:[%s18368_s13 + $0x46c] ss:$16 sps:$4 sm:$0xff]   ;;  %v13518_v5 = vld [vmem:[%s18368_s13 + $0x460] ss:$16 sps:$4 sm:$0xff]  }
 0xd48   : > { %8722 = vmatpush1.bf16.msra.mxu1 %v13458_v9  ;;  %8886 = vmatpush1.bf16.msra.mxu0 %v13461_v10  ;;  %v13521_v9 = vld [vmem:[%s18368_s13 + $0x468] ss:$16 sps:$4 sm:$0xff]   ;;  %v13526_v10 = vld [vmem:[%s18368_s13 + $0x484] ss:$16 sps:$4 sm:$0xff]  }
 0xd49   : > { %8723 = vmatprep.subr.bf16.mxu1 %v13466_v0  ;;  %8887 = vmatprep.subr.bf16.mxu0 %v13469_v24  ;;  %v13524_v0 = vld [vmem:[%s18368_s13 + $0x480] ss:$16 sps:$4 sm:$0xff]   ;;  %v13527_v24 = vld [vmem:[%s18368_s13 + $0x488] ss:$16 sps:$4 sm:$0xff]  }
 0xd4c   : > { %8724 = vmatpush1.bf16.msra.mxu1 %v13464_v1  ;;  %8888 = vmatpush1.bf16.msra.mxu0 %v13467_v22  ;;  %v13535_v1 = vld [vmem:[%s18368_s13 + $0x4ac] ss:$16 sps:$4 sm:$0xff]   ;;  %v13530_v22 = vld [vmem:[%s18368_s13 + $0x4a0] ss:$16 sps:$4 sm:$0xff]  }
 0xd4d   : > { %8725 = vmatprep.subr.bf16.mxu1 %v13472_v28  ;;  %8889 = vmatprep.subr.bf16.mxu0 %v13475_v2  ;;  %v13538_v28 = vld [vmem:[%s18368_s13 + $0x4c4] ss:$16 sps:$4 sm:$0xff]   ;;  %v13541_v2 = vld [vmem:[%s18368_s13 + $0x4cc] ss:$16 sps:$4 sm:$0xff]  }
 0xd50   : > { %8726 = vmatpush1.bf16.msra.mxu1 %v13470_v48  ;;  %8890 = vmatpush1.bf16.msra.mxu0 %v13473_v30  ;;  %v13539_v48 = vld [vmem:[%s18368_s13 + $0x4c8] ss:$16 sps:$4 sm:$0xff]   ;;  %v13544_v30 = vld [vmem:[%s18368_s13 + $0x4e4] ss:$16 sps:$4 sm:$0xff]  }
 0xd51   : > { %8727 = vmatprep.subr.bf16.mxu1 %v13478_v14  ;;  %8891 = vmatprep.subr.bf16.mxu0 %v13481_v58  ;;  %v13542_v14 = vld [vmem:[%s18368_s13 + $0x4e0] ss:$16 sps:$4 sm:$0xff]   ;;  %v13545_v58 = vld [vmem:[%s18368_s13 + $0x4e8] ss:$16 sps:$4 sm:$0xff]  }
 0xd54   : > { %8728 = vmatpush1.bf16.msra.mxu1 %v13476_v7  ;;  %8892 = vmatpush1.bf16.msra.mxu0 %v13479_v53  ;;  %v13553_v7 = vld [vmem:[%s18368_s13 + $0x50c] ss:$16 sps:$4 sm:$0xff]   ;;  %v13548_v53 = vld [vmem:[%s18368_s13 + $0x500] ss:$16 sps:$4 sm:$0xff]  }
 0xd55   : > { %8729 = vmatprep.subr.bf16.mxu1 %v13484_v29  ;;  %8893 = vmatprep.subr.bf16.mxu0 %v13487_v11  ;;  %v13556_v29 = vld [vmem:[%s18368_s13 + $0x524] ss:$16 sps:$4 sm:$0xff]   ;;  %v13559_v11 = vld [vmem:[%s18368_s13 + $0x52c] ss:$16 sps:$4 sm:$0xff]  }
 0xd58   : > { %8730 = vmatpush1.bf16.msra.mxu1 %v13482_v15  ;;  %8894 = vmatpush1.bf16.msra.mxu0 %v13485_v16  ;;  %v7055_v15 = vrot.slane %v17437_v56, 4  ;;  %v13557_v16 = vld [vmem:[%s18368_s13 + $0x528] ss:$16 sps:$4 sm:$0xff]  }
 0xd59   : > { %8731 = vmatprep.subr.bf16.mxu1 %v13490_v21  ;;  %8895 = vmatprep.subr.bf16.mxu0 %v13493_v40  ;;  %v13565_v21 = vld [vmem:[%s18368_s13 + $0x54c] ss:$16 sps:$4 sm:$0xff]   ;;  %v7082_v40 = vrot.slane %v17497_v41, 4 }
 0xd5b   : > { %v7083_v45 = vadd.f32 %v7082_v40, %v17497_v41  ;;  %v13577_v41 = vld [vmem:[%s18368_s13 + $0x58c] ss:$16 sps:$4 sm:$0xff]   ;;  %v13626_v40 = vld [vmem:[%s18368_s13 + $0x6a0] ss:$16 sps:$4 sm:$0xff]  }
 0xd5c   : > { %8732 = vmatpush1.bf16.msra.mxu1 %v13488_v34  ;;  %8896 = vmatpush1.bf16.msra.mxu0 %v13491_v35  ;;  %v7056_v34 = vadd.f32 %v7055_v15, %v17437_v56  ;;  %v13563_v35 = vld [vmem:[%s18368_s13 + $0x548] ss:$16 sps:$4 sm:$0xff]   ;;  %v13566_v56 = vld [vmem:[%s18368_s13 + $0x560] ss:$16 sps:$4 sm:$0xff]  }
 0xd5d   : > { %8733 = vmatprep.subr.bf16.mxu1 %v13496_v36  ;;  %8897 = vmatprep.subr.bf16.mxu0 %v13499_v43  ;;  %v13568_v36 = vld [vmem:[%s18368_s13 + $0x564] ss:$16 sps:$4 sm:$0xff]   ;;  %v13571_v43 = vld [vmem:[%s18368_s13 + $0x56c] ss:$16 sps:$4 sm:$0xff]   ;;  %v7084_v32 = vrot.slane %v7083_v45, 2 }
 0xd5e   : > { %v7057_v38 = vrot.slane %v7056_v34, 2  ;;  %v13620_v15 = vld [vmem:[%s18368_s13 + $0x680] ss:$16 sps:$4 sm:$0xff]  }
 0xd60   : > { %8734 = vmatpush1.bf16.msra.mxu1 %v13494_v47  ;;  %8898 = vmatpush1.bf16.msra.mxu0 %v13497_v50  ;;  %v13569_v47 = vld [vmem:[%s18368_s13 + $0x568] ss:$16 sps:$4 sm:$0xff]   ;;  %v13574_v50 = vld [vmem:[%s18368_s13 + $0x584] ss:$16 sps:$4 sm:$0xff]  }
 0xd61   : > { %8744 = vmatprep.subr.bf16.mxu1 %v13502_v4  ;;  %8908 = vmatprep.subr.bf16.mxu0 %v13505_v52  ;;  %v13572_v4 = vld [vmem:[%s18368_s13 + $0x580] ss:$16 sps:$4 sm:$0xff]   ;;  %v7058_v52 = vadd.f32 %v7057_v38, %v7056_v34  ;;  %v13634_v34 = vld [vmem:[%s18368_s13 + $0x6c4] ss:$16 sps:$4 sm:$0xff]  }
 0xd62   : > { %v13638_v38 = vld [vmem:[%s18368_s13 + $0x6e0] ss:$16 sps:$4 sm:$0xff]  }
 0xd63   : > { %8736 = vmatmul.mubr.bf16.vlgmr.msra.gmra.mrb[200].mxu1 %v7098_v60  ;;  %8900 = vmatmul.mubr.bf16.vlgmr.msra.gmra.mrb[216].mxu0 %v7098_v60  ;;  %v13583_v60 = vld [vmem:[%s18368_s13 + $0x5ac] ss:$16 sps:$4 sm:$0xff]  }
 0xd64   : > { %8745 = vmatpush1.bf16.msra.mxu1 %v13500_v55  ;;  %8776 = vmatprep.mubr.bf16.mxu1 %v7101_v23  ;;  %v13580_v55 = vld [vmem:[%s18368_s13 + $0x5a4] ss:$16 sps:$4 sm:$0xff]  }
 0xd65   : > { %8909 = vmatpush1.bf16.msra.mxu0 %v13503_v6  ;;  %8940 = vmatprep.mubr.bf16.mxu0 %v7101_v23  ;;  %v7085_v6 = vadd.f32 %v7084_v32, %v7083_v45  ;;  %v13578_v23 = vld [vmem:[%s18368_s13 + $0x5a0] ss:$16 sps:$4 sm:$0xff]   ;;  %v13640_v45 = vld [vmem:[%s18368_s13 + $0x6e4] ss:$16 sps:$4 sm:$0xff]  }
 0xd66   : > { %8746 = vmatprep.subr.bf16.mxu1 %v13508_v61  ;;  %8910 = vmatprep.subr.bf16.mxu0 %v13511_v62  ;;  %v7059_v61 = vrot.slane %v7058_v52, 1  ;;  %v13581_v62 = vld [vmem:[%s18368_s13 + $0x5a8] ss:$16 sps:$4 sm:$0xff]   ;;  %v13644_v32 = vld [vmem:[%s18368_s13 + $0x700] ss:$16 sps:$4 sm:$0xff]  }
 0xd68   : > { %8747 = vmatpush1.bf16.msra.mxu1 %v13506_v44  ;;  %v13586_v44 = vld [vmem:[%s18368_s13 + $0x5c4] ss:$16 sps:$4 sm:$0xff]  }
 0xd69   : > { %8911 = vmatpush1.bf16.msra.mxu0 %v13509_v12  ;;  %8748 = vmatprep.subr.bf16.mxu1 %v13514_v46  ;;  %v13589_v12 = vld [vmem:[%s18368_s13 + $0x5cc] ss:$16 sps:$4 sm:$0xff]   ;;  %v7086_v46 = vrot.slane %v7085_v6, 1 }
 0xd6a   : > { %8912 = vmatprep.subr.bf16.mxu0 %v13517_v26  ;;  %v13584_v26 = vld [vmem:[%s18368_s13 + $0x5c0] ss:$16 sps:$4 sm:$0xff]  }
 0xd6c   : > { %8749 = vmatpush1.bf16.msra.mxu1 %v13512_v25  ;;  %v13587_v25 = vld [vmem:[%s18368_s13 + $0x5c8] ss:$16 sps:$4 sm:$0xff]  }
 0xd6d   : > { %8913 = vmatpush1.bf16.msra.mxu0 %v13515_v57  ;;  %8750 = vmatprep.subr.bf16.mxu1 %v13520_v49  ;;  %v13592_v57 = vld [vmem:[%s18368_s13 + $0x5e4] ss:$16 sps:$4 sm:$0xff]   ;;  %v7060_v49 = vadd.f32 %v7059_v61, %v7058_v52  ;;  %v13661_v61 = vld [vmem:[%s18368_s13 + $0x74c] ss:$16 sps:$4 sm:$0xff]  }
 0xd6e   : > { %8914 = vmatprep.subr.bf16.mxu0 %v13523_v31  ;;  %v13595_v31 = vld [vmem:[%s18368_s13 + $0x5ec] ss:$16 sps:$4 sm:$0xff]   ;;  %v13652_v52 = vld [vmem:[%s18368_s13 + $0x724] ss:$16 sps:$4 sm:$0xff]  }
 0xd70   : > { %8751 = vmatpush1.bf16.msra.mxu1 %v13518_v5  ;;  %v7087_v5 = vadd.f32 %v7086_v46, %v7085_v6  ;;  %v13653_v6 = vld [vmem:[%s18368_s13 + $0x728] ss:$16 sps:$4 sm:$0xff]   ;;  %v13664_v46 = vld [vmem:[%s18368_s13 + $0x764] ss:$16 sps:$4 sm:$0xff]  }
 0xd71   : > { %8915 = vmatpush1.bf16.msra.mxu0 %v13521_v9  ;;  %8752 = vmatprep.subr.bf16.mxu1 %v13526_v10  ;;  %v13590_v9 = vld [vmem:[%s18368_s13 + $0x5e0] ss:$16 sps:$4 sm:$0xff]   ;;  %v13593_v10 = vld [vmem:[%s18368_s13 + $0x5e8] ss:$16 sps:$4 sm:$0xff]  }
 0xd72   : > { %8916 = vmatprep.subr.bf16.mxu0 %v13529_v63  ;;  %v7092_v63 = vmax.f32 %v7060_v49, 0.0  ;;  %v13670_v49 = vld [vmem:[%s18368_s13 + $0x784] ss:$16 sps:$4 sm:$0xff]  }
 0xd74   : > { %8753 = vmatpush1.bf16.msra.mxu1 %v13524_v0  ;;  %v13598_v0 = vld [vmem:[%s18368_s13 + $0x604] ss:$16 sps:$4 sm:$0xff]  }
 0xd75   : > { %8917 = vmatpush1.bf16.msra.mxu0 %v13527_v24  ;;  %8754 = vmatprep.subr.bf16.mxu1 %v13532_v59  ;;  %v13601_v24 = vld [vmem:[%s18368_s13 + $0x60c] ss:$16 sps:$4 sm:$0xff]   ;;  %v7095_v59 = vmax.f32 %v7087_v5, 0.0  ;;  %v13668_v5 = vld [vmem:[%s18368_s13 + $0x780] ss:$16 sps:$4 sm:$0xff]  }
 0xd76   : > { %8918 = vmatprep.subr.bf16.mxu0 %v13535_v1  ;;  %v13596_v1 = vld [vmem:[%s18368_s13 + $0x600] ss:$16 sps:$4 sm:$0xff]  }
 0xd78   : > { %8755 = vmatpush1.bf16.msra.mxu1 %v13530_v22  ;;  %v7100_v22 = vpack.c.bf16 %v7092_v63, %v7092_v63  ;;  %v13676_v63 = vld [vmem:[%s18368_s13 + $0x7a4] ss:$16 sps:$4 sm:$0xff]  }
 0xd79   : > { %8919 = vmatpush1.bf16.msra.mxu0 %v13533_v37  ;;  %8756 = vmatprep.subr.bf16.mxu1 %v13538_v28  ;;  %v13599_v37 = vld [vmem:[%s18368_s13 + $0x608] ss:$16 sps:$4 sm:$0xff]   ;;  %v13604_v28 = vld [vmem:[%s18368_s13 + $0x624] ss:$16 sps:$4 sm:$0xff]  }
 0xd7a   : > { %8920 = vmatprep.subr.bf16.mxu0 %v13541_v2  ;;  %v7103_v2 = vpack.c.bf16 %v7095_v59, %v7095_v59 }
 0xd7c   : > { %8757 = vmatpush1.bf16.msra.mxu1 %v13536_v13  ;;  %v13607_v13 = vld [vmem:[%s18368_s13 + $0x62c] ss:$16 sps:$4 sm:$0xff]  }
 0xd7d   : > { %8921 = vmatpush1.bf16.msra.mxu0 %v13539_v48  ;;  %8758 = vmatprep.subr.bf16.mxu1 %v13544_v30  ;;  %v13602_v48 = vld [vmem:[%s18368_s13 + $0x620] ss:$16 sps:$4 sm:$0xff]   ;;  %v13605_v30 = vld [vmem:[%s18368_s13 + $0x628] ss:$16 sps:$4 sm:$0xff]  }
 0xd7e   : > { %8922 = vmatprep.subr.bf16.mxu0 %v13547_v17  ;;  %v13610_v17 = vld [vmem:[%s18368_s13 + $0x644] ss:$16 sps:$4 sm:$0xff]  }
 0xd80   : > { %8759 = vmatpush1.bf16.msra.mxu1 %v13542_v14  ;;  %v13613_v14 = vld [vmem:[%s18368_s13 + $0x64c] ss:$16 sps:$4 sm:$0xff]  }
 0xd81   : > { %8923 = vmatpush1.bf16.msra.mxu0 %v13545_v58  ;;  %8760 = vmatprep.subr.bf16.mxu1 %v13550_v39  ;;  %v13608_v58 = vld [vmem:[%s18368_s13 + $0x640] ss:$16 sps:$4 sm:$0xff]   ;;  %v13611_v39 = vld [vmem:[%s18368_s13 + $0x648] ss:$16 sps:$4 sm:$0xff]  }
 0xd82   : > { %8924 = vmatprep.subr.bf16.mxu0 %v13553_v7  ;;  %v13616_v7 = vld [vmem:[%s18368_s13 + $0x664] ss:$16 sps:$4 sm:$0xff]  }
 0xd84   : > { %8761 = vmatpush1.bf16.msra.mxu1 %v13548_v53  ;;  %v13619_v53 = vld [vmem:[%s18368_s13 + $0x66c] ss:$16 sps:$4 sm:$0xff]  }
 0xd85   : > { %8925 = vmatpush1.bf16.msra.mxu0 %v13551_v8  ;;  %8762 = vmatprep.subr.bf16.mxu1 %v13556_v29  ;;  %v13614_v8 = vld [vmem:[%s18368_s13 + $0x660] ss:$16 sps:$4 sm:$0xff]   ;;  %v13617_v29 = vld [vmem:[%s18368_s13 + $0x668] ss:$16 sps:$4 sm:$0xff]  }
 0xd86   : > { %8926 = vmatprep.subr.bf16.mxu0 %v13559_v11  ;;  %v13622_v11 = vld [vmem:[%s18368_s13 + $0x684] ss:$16 sps:$4 sm:$0xff]  }
 0xd88   : > { %8763 = vmatpush1.bf16.msra.mxu1 %v13554_v51  ;;  %v13625_v51 = vld [vmem:[%s18368_s13 + $0x68c] ss:$16 sps:$4 sm:$0xff]  }
 0xd89   : > { %8927 = vmatpush1.bf16.msra.mxu0 %v13557_v16  ;;  %8764 = vmatprep.subr.bf16.mxu1 %v13562_v27  ;;  %v13623_v16 = vld [vmem:[%s18368_s13 + $0x688] ss:$16 sps:$4 sm:$0xff]   ;;  %v13628_v27 = vld [vmem:[%s18368_s13 + $0x6a4] ss:$16 sps:$4 sm:$0xff]  }
 0xd8a   : > { %8928 = vmatprep.subr.bf16.mxu0 %v13565_v21  ;;  %v13631_v21 = vld [vmem:[%s18368_s13 + $0x6ac] ss:$16 sps:$4 sm:$0xff]  }
 0xd8c   : > { %8765 = vmatpush1.bf16.msra.mxu1 %v13560_v33  ;;  %v13629_v33 = vld [vmem:[%s18368_s13 + $0x6a8] ss:$16 sps:$4 sm:$0xff]  }
 0xd8d   : > { %8929 = vmatpush1.bf16.msra.mxu0 %v13563_v35  ;;  %8766 = vmatprep.subr.bf16.mxu1 %v13568_v36  ;;  %v13637_v35 = vld [vmem:[%s18368_s13 + $0x6cc] ss:$16 sps:$4 sm:$0xff]   ;;  %v13632_v36 = vld [vmem:[%s18368_s13 + $0x6c0] ss:$16 sps:$4 sm:$0xff]  }
 0xd8e   : > { %8930 = vmatprep.subr.bf16.mxu0 %v13571_v43  ;;  %v13635_v43 = vld [vmem:[%s18368_s13 + $0x6c8] ss:$16 sps:$4 sm:$0xff]  }
 0xd90   : > { %8767 = vmatpush1.bf16.msra.mxu1 %v13566_v56  ;;  %v13643_v56 = vld [vmem:[%s18368_s13 + $0x6ec] ss:$16 sps:$4 sm:$0xff]  }
 0xd91   : > { %8931 = vmatpush1.bf16.msra.mxu0 %v13569_v47  ;;  %8768 = vmatprep.subr.bf16.mxu1 %v13574_v50  ;;  %v13641_v47 = vld [vmem:[%s18368_s13 + $0x6e8] ss:$16 sps:$4 sm:$0xff]   ;;  %v13646_v50 = vld [vmem:[%s18368_s13 + $0x704] ss:$16 sps:$4 sm:$0xff]  }
 0xd92   : > { %8932 = vmatprep.subr.bf16.mxu0 %v13577_v41  ;;  %v13649_v41 = vld [vmem:[%s18368_s13 + $0x70c] ss:$16 sps:$4 sm:$0xff]  }
 0xd94   : > { %8769 = vmatpush1.bf16.msra.mxu1 %v13572_v4  ;;  %v13647_v4 = vld [vmem:[%s18368_s13 + $0x708] ss:$16 sps:$4 sm:$0xff]  }
 0xd95   : > { %8933 = vmatpush1.bf16.msra.mxu0 %v13575_v54  ;;  %8770 = vmatprep.subr.bf16.mxu1 %v13580_v55  ;;  %v13655_v54 = vld [vmem:[%s18368_s13 + $0x72c] ss:$16 sps:$4 sm:$0xff]   ;;  %v13650_v55 = vld [vmem:[%s18368_s13 + $0x720] ss:$16 sps:$4 sm:$0xff]  }
 0xd96   : > { %8934 = vmatprep.subr.bf16.mxu0 %v13583_v60  ;;  %v7073_v60 = vrot.slane %v17495_v3, 4 }
 0xd98   : > { %8771 = vmatpush1.bf16.msra.mxu1 %v13578_v23  ;;  %v13658_v23 = vld [vmem:[%s18368_s13 + $0x744] ss:$16 sps:$4 sm:$0xff]  }
 0xd99   : > { %8935 = vmatpush1.bf16.msra.mxu0 %v13581_v62  ;;  %8772 = vmatprep.subr.bf16.mxu1 %v13586_v44  ;;  %v13656_v62 = vld [vmem:[%s18368_s13 + $0x740] ss:$16 sps:$4 sm:$0xff]   ;;  %v7074_v44 = vadd.f32 %v7073_v60, %v17495_v3 }
 0xd9a   : > { %8936 = vmatprep.subr.bf16.mxu0 %v13589_v12  ;;  %v13659_v12 = vld [vmem:[%s18368_s13 + $0x748] ss:$16 sps:$4 sm:$0xff]   ;;  %v13662_v3 = vld [vmem:[%s18368_s13 + $0x760] ss:$16 sps:$4 sm:$0xff]  }
 0xd9b   : > { %v13731_v60 = vld [vmem:[%s18370_s15 + $0xd0] ss:$8 sps:$4 sm:$0xff]  }
 0xd9c   : > { %8773 = vmatpush1.bf16.msra.mxu1 %v13584_v26  ;;  %v13667_v26 = vld [vmem:[%s18368_s13 + $0x76c] ss:$16 sps:$4 sm:$0xff]  }
 0xd9d   : > { %8937 = vmatpush1.bf16.msra.mxu0 %v13587_v25  ;;  %8774 = vmatprep.subr.bf16.mxu1 %v13592_v57  ;;  %v7075_v25 = vrot.slane %v7074_v44, 2  ;;  %v13665_v57 = vld [vmem:[%s18368_s13 + $0x768] ss:$16 sps:$4 sm:$0xff]  }
 0xd9e   : > { %8938 = vmatprep.subr.bf16.mxu0 %v13595_v31  ;;  %v13673_v31 = vld [vmem:[%s18368_s13 + $0x78c] ss:$16 sps:$4 sm:$0xff]  }
 0xda0   : > { %8775 = vmatpush1.bf16.msra.mxu1 %v13590_v9  ;;  %v7076_v9 = vadd.f32 %v7075_v25, %v7074_v44  ;;  %v13742_v44 = vld [vmem:[%s18370_s15 + $0x104] ss:$8 sps:$4 sm:$0xff]   ;;  %v13792_v25 = vld [vmem:[%s18372_s17 + $0x50] sm:$0xff]  }
 0xda1   : > { %8939 = vmatpush1.bf16.msra.mxu0 %v13593_v10  ;;  %8785 = vmatprep.subr.bf16.mxu1 %v13598_v0  ;;  %v13671_v10 = vld [vmem:[%s18368_s13 + $0x788] ss:$16 sps:$4 sm:$0xff]   ;;  %v13679_v0 = vld [vmem:[%s18368_s13 + $0x7ac] ss:$16 sps:$4 sm:$0xff]  }
 0xda2   : > { %8949 = vmatprep.subr.bf16.mxu0 %v13601_v24  ;;  %v13674_v24 = vld [vmem:[%s18368_s13 + $0x7a0] ss:$16 sps:$4 sm:$0xff]   ;;  %v7077_v59 = vrot.slane %v7076_v9, 1 }
 0xda3   : > { %8777 = vmatmul.mubr.bf16.vlgmr.msra.gmra.mrb[200].mxu1 %v7100_v22 }
 0xda4   : > { %8941 = vmatmul.mubr.bf16.vlgmr.msra.gmra.mrb[216].mxu0 %v7100_v22  ;;  %8786 = vmatpush1.bf16.msra.mxu1 %v13596_v1  ;;  %v13677_v1 = vld [vmem:[%s18368_s13 + $0x7a8] ss:$16 sps:$4 sm:$0xff]   ;;  %v13682_v22 = vld [vmem:[%s18368_s13 + $0x7c4] ss:$16 sps:$4 sm:$0xff]  }
 0xda5   : > { %8817 = vmatprep.mubr.bf16.mxu1 %v7103_v2  ;;  %8950 = vmatpush1.bf16.msra.mxu0 %v13599_v37  ;;  %v13685_v37 = vld [vmem:[%s18368_s13 + $0x7cc] ss:$16 sps:$4 sm:$0xff]  }
 0xda6   : > { %8981 = vmatprep.mubr.bf16.mxu0 %v7103_v2  ;;  %8787 = vmatprep.subr.bf16.mxu1 %v13604_v28  ;;  %v13680_v28 = vld [vmem:[%s18368_s13 + $0x7c0] ss:$16 sps:$4 sm:$0xff]   ;;  %v13683_v2 = vld [vmem:[%s18368_s13 + $0x7c8] ss:$16 sps:$4 sm:$0xff]  }
 0xda7   : > { %8951 = vmatprep.subr.bf16.mxu0 %v13607_v13  ;;  %v13688_v13 = vld [vmem:[%s18368_s13 + $0x7e4] ss:$16 sps:$4 sm:$0xff]  }
 0xda8   : > { %8788 = vmatpush1.bf16.msra.mxu1 %v13602_v48  ;;  %v7078_v48 = vadd.f32 %v7077_v59, %v7076_v9  ;;  %v13797_v9 = vld [vmem:[%s18372_s17 + $0x20] sm:$0xff]   ;;  %v8656_v59 = vsub.s32 3, %v15344_v18  ;;  %v13785_v18 = vld [vmem:[%s18370_s15 + $0x1f0] ss:$8 sps:$4 sm:$0xff]  }
 0xda9   : > { %8952 = vmatpush1.bf16.msra.mxu0 %v13605_v30  ;;  %8789 = vmatprep.subr.bf16.mxu1 %v13610_v17  ;;  %v13691_v30 = vld [vmem:[%s18368_s13 + $0x7ec] ss:$16 sps:$4 sm:$0xff]   ;;  %v13686_v17 = vld [vmem:[%s18368_s13 + $0x7e0] ss:$16 sps:$4 sm:$0xff]  }
 0xdaa   : > { %8953 = vmatprep.subr.bf16.mxu0 %v13613_v14  ;;  %v13689_v14 = vld [vmem:[%s18368_s13 + $0x7e8] ss:$16 sps:$4 sm:$0xff]  }
 0xdac   : > { %8790 = vmatpush1.bf16.msra.mxu1 %v13608_v58  ;;  %v7094_v58 = vmax.f32 %v7078_v48, 0.0 }
 0xdad   : > { %8954 = vmatpush1.bf16.msra.mxu0 %v13611_v39  ;;  %8791 = vmatprep.subr.bf16.mxu1 %v13616_v7  ;;  %v13694_v39 = vld [vmem:[%s18370_s15 + $0x4] ss:$8 sps:$4 sm:$0xff]   ;;  %v13692_v7 = vld [vmem:[%s18370_s15] ss:$8 sps:$4 sm:$0xff]  }
 0xdae   : > { %8955 = vmatprep.subr.bf16.mxu0 %v13619_v53  ;;  %v7102_v53 = vpack.c.bf16 %v7094_v58, %v7094_v58 }
 0xdb0   : > { %8792 = vmatpush1.bf16.msra.mxu1 %v13614_v8  ;;  %v13697_v8 = vld [vmem:[%s18370_s15 + $0x14] ss:$8 sps:$4 sm:$0xff]  }
 0xdb1   : > { %8956 = vmatpush1.bf16.msra.mxu0 %v13617_v29  ;;  %8793 = vmatprep.subr.bf16.mxu1 %v13622_v11  ;;  %v13695_v29 = vld [vmem:[%s18370_s15 + $0x10] ss:$8 sps:$4 sm:$0xff]   ;;  %v13700_v11 = vld [vmem:[%s18370_s15 + $0x24] ss:$8 sps:$4 sm:$0xff]  }
 0xdb2   : > { %8957 = vmatprep.subr.bf16.mxu0 %v13625_v51  ;;  %v13698_v51 = vld [vmem:[%s18370_s15 + $0x20] ss:$8 sps:$4 sm:$0xff]  }
 0xdb4   : > { %8794 = vmatpush1.bf16.msra.mxu1 %v13620_v15  ;;  %v13703_v15 = vld [vmem:[%s18370_s15 + $0x34] ss:$8 sps:$4 sm:$0xff]  }
 0xdb5   : > { %8958 = vmatpush1.bf16.msra.mxu0 %v13623_v16  ;;  %8795 = vmatprep.subr.bf16.mxu1 %v13628_v27  ;;  %v13701_v16 = vld [vmem:[%s18370_s15 + $0x30] ss:$8 sps:$4 sm:$0xff]   ;;  %v13706_v27 = vld [vmem:[%s18370_s15 + $0x44] ss:$8 sps:$4 sm:$0xff]  }
 0xdb6   : > { %8959 = vmatprep.subr.bf16.mxu0 %v13631_v21  ;;  %v13704_v21 = vld [vmem:[%s18370_s15 + $0x40] ss:$8 sps:$4 sm:$0xff]  }
 0xdb8   : > { %8796 = vmatpush1.bf16.msra.mxu1 %v13626_v40  ;;  %v13709_v40 = vld [vmem:[%s18370_s15 + $0x54] ss:$8 sps:$4 sm:$0xff]  }
 0xdb9   : > { %8960 = vmatpush1.bf16.msra.mxu0 %v13629_v33  ;;  %8797 = vmatprep.subr.bf16.mxu1 %v13634_v34  ;;  %v13707_v33 = vld [vmem:[%s18370_s15 + $0x50] ss:$8 sps:$4 sm:$0xff]   ;;  %v13712_v34 = vld [vmem:[%s18370_s15 + $0x64] ss:$8 sps:$4 sm:$0xff]  }
 0xdba   : > { %8961 = vmatprep.subr.bf16.mxu0 %v13637_v35  ;;  %v13710_v35 = vld [vmem:[%s18370_s15 + $0x60] ss:$8 sps:$4 sm:$0xff]  }
 0xdbc   : > { %8798 = vmatpush1.bf16.msra.mxu1 %v13632_v36  ;;  %v13715_v36 = vld [vmem:[%s18370_s15 + $0x74] ss:$8 sps:$4 sm:$0xff]  }
 0xdbd   : > { %8962 = vmatpush1.bf16.msra.mxu0 %v13635_v43  ;;  %8799 = vmatprep.subr.bf16.mxu1 %v13640_v45  ;;  %v13713_v43 = vld [vmem:[%s18370_s15 + $0x70] ss:$8 sps:$4 sm:$0xff]   ;;  %v13718_v45 = vld [vmem:[%s18370_s15 + $0x84] ss:$8 sps:$4 sm:$0xff]  }
 0xdbe   : > { %8963 = vmatprep.subr.bf16.mxu0 %v13643_v56  ;;  %v13716_v56 = vld [vmem:[%s18370_s15 + $0x80] ss:$8 sps:$4 sm:$0xff]  }
 0xdc0   : > { %8800 = vmatpush1.bf16.msra.mxu1 %v13638_v38  ;;  %v13721_v38 = vld [vmem:[%s18370_s15 + $0x94] ss:$8 sps:$4 sm:$0xff]  }
 0xdc1   : > { %8964 = vmatpush1.bf16.msra.mxu0 %v13641_v47  ;;  %8801 = vmatprep.subr.bf16.mxu1 %v13646_v50  ;;  %v13719_v47 = vld [vmem:[%s18370_s15 + $0x90] ss:$8 sps:$4 sm:$0xff]   ;;  %v13724_v50 = vld [vmem:[%s18370_s15 + $0xa4] ss:$8 sps:$4 sm:$0xff]  }
 0xdc2   : > { %8965 = vmatprep.subr.bf16.mxu0 %v13649_v41  ;;  %v13722_v41 = vld [vmem:[%s18370_s15 + $0xa0] ss:$8 sps:$4 sm:$0xff]  }
 0xdc4   : > { %8802 = vmatpush1.bf16.msra.mxu1 %v13644_v32  ;;  %v13727_v32 = vld [vmem:[%s18370_s15 + $0xb4] ss:$8 sps:$4 sm:$0xff]  }
 0xdc5   : > { %8966 = vmatpush1.bf16.msra.mxu0 %v13647_v4  ;;  %8803 = vmatprep.subr.bf16.mxu1 %v13652_v52  ;;  %v13725_v4 = vld [vmem:[%s18370_s15 + $0xb0] ss:$8 sps:$4 sm:$0xff]   ;;  %v13730_v52 = vld [vmem:[%s18370_s15 + $0xc4] ss:$8 sps:$4 sm:$0xff]  }
 0xdc6   : > { %8967 = vmatprep.subr.bf16.mxu0 %v13655_v54  ;;  %v13728_v54 = vld [vmem:[%s18370_s15 + $0xc0] ss:$8 sps:$4 sm:$0xff]  }
 0xdc8   : > { %8804 = vmatpush1.bf16.msra.mxu1 %v13650_v55  ;;  %v13733_v55 = vld [vmem:[%s18370_s15 + $0xd4] ss:$8 sps:$4 sm:$0xff]  }
 0xdc9   : > { %8968 = vmatpush1.bf16.msra.mxu0 %v13653_v6  ;;  %8805 = vmatprep.subr.bf16.mxu1 %v13658_v23  ;;  %v13736_v6 = vld [vmem:[%s18370_s15 + $0xe4] ss:$8 sps:$4 sm:$0xff]   ;;  %v13734_v23 = vld [vmem:[%s18370_s15 + $0xe0] ss:$8 sps:$4 sm:$0xff]  }
 0xdca   : > { %8969 = vmatprep.subr.bf16.mxu0 %v13661_v61  ;;  %v13739_v61 = vld [vmem:[%s18370_s15 + $0xf4] ss:$8 sps:$4 sm:$0xff]  }
 0xdcc   : > { %8806 = vmatpush1.bf16.msra.mxu1 %v13656_v62  ;;  %v13737_v62 = vld [vmem:[%s18370_s15 + $0xf0] ss:$8 sps:$4 sm:$0xff]  }
 0xdcd   : > { %8970 = vmatpush1.bf16.msra.mxu0 %v13659_v12  ;;  %8807 = vmatprep.subr.bf16.mxu1 %v13664_v46  ;;  %v13788_v12 = vld [vmem:[%s18372_s17 + $0x40] sm:$0xff]  }
 0xdce   : > { %8971 = vmatprep.subr.bf16.mxu0 %v13667_v26  ;;  %v13789_v46 = vld [vmem:[%s18372_s17] sm:$0xff]   ;;  %v13790_v26 = vld [vmem:[%s18372_s17 + $0x48] sm:$0xff]  }
 0xdd0   : > { %8808 = vmatpush1.bf16.msra.mxu1 %v13662_v3  ;;  %v13791_v3 = vld [vmem:[%s18372_s17 + $0x8] sm:$0xff]  }
 0xdd1   : > { %8972 = vmatpush1.bf16.msra.mxu0 %v13665_v57  ;;  %8809 = vmatprep.subr.bf16.mxu1 %v13670_v49  ;;  %v13793_v57 = vld [vmem:[%s18372_s17 + $0x10] sm:$0xff]   ;;  %v13794_v49 = vld [vmem:[%s18372_s17 + $0x58] sm:$0xff]  }
 0xdd2   : > { %8973 = vmatprep.subr.bf16.mxu0 %v13673_v31  ;;  %v13795_v31 = vld [vmem:[%s18372_s17 + $0x18] sm:$0xff]  }
 0xdd4   : > { %8810 = vmatpush1.bf16.msra.mxu1 %v13668_v5  ;;  %v13796_v5 = vld [vmem:[%s18372_s17 + $0x60] sm:$0xff]  }
 0xdd5   : > { %8974 = vmatpush1.bf16.msra.mxu0 %v13671_v10  ;;  %8811 = vmatprep.subr.bf16.mxu1 %v13676_v63  ;;  %v13798_v10 = vld [vmem:[%s18372_s17 + $0x68] sm:$0xff]  }
 0xdd6   : > { %8975 = vmatprep.subr.bf16.mxu0 %v13679_v0  ;;  %v13799_v63 = vld [vmem:[%s18372_s17 + $0x28] sm:$0xff]   ;;  %v13800_v0 = vld [vmem:[%s18372_s17 + $0x70] sm:$0xff]  }
 0xdd8   : > { %8812 = vmatpush1.bf16.msra.mxu1 %v13674_v24  ;;  %v18184_v24 = vld [vmem:[%s18369_s14] sm:$0xf] }
 0xdd9   : > { %8976 = vmatpush1.bf16.msra.mxu0 %v13677_v1  ;;  %8813 = vmatprep.subr.bf16.mxu1 %v13682_v22  ;;  %v8645_v1 = vrot.slane %v18184_v24, %v15351_v20  ;;  %v8649_v22 = vrot.slane %v18184_v24, %v15354_v42 }
 0xdda   : > { %8977 = vmatprep.subr.bf16.mxu0 %v13685_v37  ;;  %v8657_v37 = vrot.slane %v18184_v24, %v8656_v59 }
 0xddc   : > { %8814 = vmatpush1.bf16.msra.mxu1 %v13680_v28 }
 0xddd   : > { %8978 = vmatpush1.bf16.msra.mxu0 %v13683_v2  ;;  %8815 = vmatprep.subr.bf16.mxu1 %v13688_v13 }
 0xdde   : > { %8979 = vmatprep.subr.bf16.mxu0 %v13691_v30 }
 0xde0   : > { %8816 = vmatpush1.bf16.msra.mxu1 %v13686_v17 }
 0xde1   : > { %8980 = vmatpush1.bf16.msra.mxu0 %v13689_v14  ;;  %9394 = vmatprep.subr.bf16.mxu1 %v13694_v39 }
 0xde2   : > { %11091 = vmatprep.subr.bf16.mxu0 %v13788_v12  ;;  %v13781_v12 = vld [vmem:[%s18370_s15 + $0x1d4] ss:$8 sps:$4 sm:$0xff]  }
 0xde3   : > { %8818 = vmatmul.mubr.bf16.vlgmr.msra.gmra.mrb[200].mxu1 %v7102_v53 }
 0xde4   : > { %8982 = vmatmul.mubr.bf16.vlgmr.msra.gmra.mrb[216].mxu0 %v7102_v53  ;;  %9395 = vmatpush1.bf16.msra.mxu1 %v13692_v7 }
 0xde5   : > { %9396 = vmatprep.subr.bf16.mxu1 %v13697_v8  ;;  %11092 = vmatpush3.bf16.msra.mxu0 %v13789_v46  ;;  %v13779_v46 = vld [vmem:[%s18370_s15 + $0x1d0] ss:$8 sps:$4 sm:$0xff]  }
 0xde6   : > { %11093 = vmatprep.subr.bf16.mxu0 %v13790_v26  ;;  %v8653_v26 = vrot.slane %v18184_v24, %v3356_v19 }
 0xde8   : > { %9397 = vmatpush1.bf16.msra.mxu1 %v13695_v29 }
 0xde9   : > { %9398 = vmatprep.subr.bf16.mxu1 %v13700_v11  ;;  %11094 = vmatpush3.bf16.msra.mxu0 %v13791_v3  ;;  %v13784_v3 = vld [vmem:[%s18370_s15 + $0x1e4] ss:$8 sps:$4 sm:$0xff]  }
 0xdea   : > { %11095 = vmatprep.subr.bf16.mxu0 %v13792_v25  ;;  %v13782_v25 = vld [vmem:[%s18370_s15 + $0x1e0] ss:$8 sps:$4 sm:$0xff]  }
 0xdec   : > { %9399 = vmatpush1.bf16.msra.mxu1 %v13698_v51 }
 0xded   : > { %9400 = vmatprep.subr.bf16.mxu1 %v13703_v15  ;;  %11096 = vmatpush3.bf16.msra.mxu0 %v13793_v57  ;;  %v13740_v15 = vld [vmem:[%s18370_s15 + $0x100] ss:$8 sps:$4 sm:$0xff]  }
 0xdee   : > { %11097 = vmatprep.subr.bf16.mxu0 %v13794_v49  ;;  %v13787_v49 = vld [vmem:[%s18370_s15 + $0x1f4] ss:$8 sps:$4 sm:$0xff]  }
 0xdf0   : > { %9401 = vmatpush1.bf16.msra.mxu1 %v13701_v16 }
 0xdf1   : > { %9402 = vmatprep.subr.bf16.mxu1 %v13706_v27  ;;  %11098 = vmatpush3.bf16.msra.mxu0 %v13795_v31  ;;  %v13745_v27 = vld [vmem:[%s18370_s15 + $0x114] ss:$8 sps:$4 sm:$0xff]  }
 0xdf2   : > { %11099 = vmatprep.subr.bf16.mxu0 %v13796_v5  ;;  %v13801_v5 = vld [vmem:[%s18372_s17 + $0x30] sm:$0xff]  }
 0xdf4   : > { %9403 = vmatpush1.bf16.msra.mxu1 %v13704_v21 }
 0xdf5   : > { %9404 = vmatprep.subr.bf16.mxu1 %v13709_v40  ;;  %11100 = vmatpush3.bf16.msra.mxu0 %v13797_v9  ;;  %v13743_v40 = vld [vmem:[%s18370_s15 + $0x110] ss:$8 sps:$4 sm:$0xff]  }
 0xdf6   : > { %11101 = vmatprep.subr.bf16.mxu0 %v13798_v10  ;;  %v13802_v9 = vld [vmem:[%s18372_s17 + $0x78] sm:$0xff]  }
 0xdf7   : > { %v13803_v10 = vld [vmem:[%s18372_s17 + $0x38] sm:$0xff]  }
 0xdf8   : > { %9405 = vmatpush1.bf16.msra.mxu1 %v13707_v33  ;;  %v13748_v33 = vld [vmem:[%s18370_s15 + $0x124] ss:$8 sps:$4 sm:$0xff]  }
 0xdf9   : > { %9406 = vmatprep.subr.bf16.mxu1 %v13712_v34  ;;  %11102 = vmatpush3.bf16.msra.mxu0 %v13799_v63  ;;  %v13746_v34 = vld [vmem:[%s18370_s15 + $0x120] ss:$8 sps:$4 sm:$0xff]  }
 0xdfa   : > { %11103 = vmatprep.subr.bf16.mxu0 %v13800_v0  ;;  %v9062_v63 = vld [vmem:[%s18371_s16] sm:$0x3] }
 0xdfb   : > { %v9387_v0 = vrot.slane %v9062_v63, %v15351_v20  ;;  %v9391_v24 = vrot.slane %v9062_v63, %v15354_v42  ;;  %v9510_v20 = vld [vmem:[%s18373_s18] sm:$0x1] }
 0xdfc   : > { %9407 = vmatpush1.bf16.msra.mxu1 %v13710_v35  ;;  %v13751_v35 = vld [vmem:[%s18370_s15 + $0x134] ss:$8 sps:$4 sm:$0xff]  }
 0xdfd   : > { %9408 = vmatprep.subr.bf16.mxu1 %v13715_v36  ;;  %v13749_v36 = vld [vmem:[%s18370_s15 + $0x130] ss:$8 sps:$4 sm:$0xff]   ;;  %11104 = vmatpush3.bf16.msra.mxu0 %v13801_v5 }
 0xdfe   : > { %11105 = vmatprep.subr.bf16.mxu0 %v13802_v9 }
 0xe00   : > { %9409 = vmatpush1.bf16.msra.mxu1 %v13713_v43  ;;  %v13754_v43 = vld [vmem:[%s18370_s15 + $0x144] ss:$8 sps:$4 sm:$0xff]  }
 0xe01   : > { %9410 = vmatprep.subr.bf16.mxu1 %v13718_v45  ;;  %v13752_v45 = vld [vmem:[%s18370_s15 + $0x140] ss:$8 sps:$4 sm:$0xff]   ;;  %11106 = vmatpush3.bf16.msra.mxu0 %v13803_v10 }
 0xe04   : > { %9411 = vmatpush1.bf16.msra.mxu1 %v13716_v56  ;;  %v13757_v56 = vld [vmem:[%s18370_s15 + $0x154] ss:$8 sps:$4 sm:$0xff]  }
 0xe05   : > { %9412 = vmatprep.subr.bf16.mxu1 %v13721_v38  ;;  %v13755_v38 = vld [vmem:[%s18370_s15 + $0x150] ss:$8 sps:$4 sm:$0xff]  }
 0xe08   : > { %9413 = vmatpush1.bf16.msra.mxu1 %v13719_v47  ;;  %v13760_v47 = vld [vmem:[%s18370_s15 + $0x164] ss:$8 sps:$4 sm:$0xff]  }
 0xe09   : > { %9414 = vmatprep.subr.bf16.mxu1 %v13724_v50  ;;  %v13758_v50 = vld [vmem:[%s18370_s15 + $0x160] ss:$8 sps:$4 sm:$0xff]  }
 0xe0c   : > { %9415 = vmatpush1.bf16.msra.mxu1 %v13722_v41  ;;  %v13763_v41 = vld [vmem:[%s18370_s15 + $0x174] ss:$8 sps:$4 sm:$0xff]  }
 0xe0d   : > { %9416 = vmatprep.subr.bf16.mxu1 %v13727_v32  ;;  %v13761_v32 = vld [vmem:[%s18370_s15 + $0x170] ss:$8 sps:$4 sm:$0xff]  }
 0xe10   : > { %9417 = vmatpush1.bf16.msra.mxu1 %v13725_v4  ;;  %v13766_v4 = vld [vmem:[%s18370_s15 + $0x184] ss:$8 sps:$4 sm:$0xff]  }
 0xe11   : > { %9418 = vmatprep.subr.bf16.mxu1 %v13730_v52  ;;  %v13764_v52 = vld [vmem:[%s18370_s15 + $0x180] ss:$8 sps:$4 sm:$0xff]  }
 0xe14   : > { %9419 = vmatpush1.bf16.msra.mxu1 %v13728_v54  ;;  %v13769_v54 = vld [vmem:[%s18370_s15 + $0x194] ss:$8 sps:$4 sm:$0xff]  }
 0xe15   : > { %9420 = vmatprep.subr.bf16.mxu1 %v13733_v55  ;;  %v13767_v55 = vld [vmem:[%s18370_s15 + $0x190] ss:$8 sps:$4 sm:$0xff]  }
 0xe18   : > { %9421 = vmatpush1.bf16.msra.mxu1 %v13731_v60  ;;  %v13772_v60 = vld [vmem:[%s18370_s15 + $0x1a4] ss:$8 sps:$4 sm:$0xff]  }
 0xe19   : > { %9422 = vmatprep.subr.bf16.mxu1 %v13736_v6  ;;  %v13770_v6 = vld [vmem:[%s18370_s15 + $0x1a0] ss:$8 sps:$4 sm:$0xff]  }
 0xe1c   : > { %9423 = vmatpush1.bf16.msra.mxu1 %v13734_v23  ;;  %v13775_v23 = vld [vmem:[%s18370_s15 + $0x1b4] ss:$8 sps:$4 sm:$0xff]  }
 0xe1d   : > { %9424 = vmatprep.subr.bf16.mxu1 %v13739_v61  ;;  %v13773_v61 = vld [vmem:[%s18370_s15 + $0x1b0] ss:$8 sps:$4 sm:$0xff]  }
 0xe20   : > { %9425 = vmatpush1.bf16.msra.mxu1 %v13737_v62  ;;  %v13778_v62 = vld [vmem:[%s18370_s15 + $0x1c4] ss:$8 sps:$4 sm:$0xff]  }
 0xe21   : > { %9435 = vmatprep.subr.bf16.mxu1 %v13742_v44  ;;  %v13776_v44 = vld [vmem:[%s18370_s15 + $0x1c0] ss:$8 sps:$4 sm:$0xff]  }
 0xeb6   : > { %v8819_v28 = vpop.f32.mrb[200].mxu1 }
 0xeb7   : > { %v13009_v2 = vadd.f32 %v8819_v28, %v8645_v1  ;;  %v18192_v13 = vpop.f32.mrb[216].mxu0  ;;  %v8821_v48 = vpop.f32.mrb[201].mxu1 }
 0xeb8   : > { %v13010_v30 = vadd.f32 %v8821_v48, %v8649_v22  ;;  %v8985_v17 = vpop.f32.mrb[217].mxu0  ;;  %v8823_v14 = vpop.f32.mrb[202].mxu1  ;;  %v13011_v57 = vadd.f32 %v18192_v13, %v8653_v26 }
 0xeb9   : > { %v8990_v58 = vmax.f32 %v13009_v2, 0.0  ;;  %v13012_v39 = vadd.f32 %v8985_v17, %v8657_v37  ;;  %v8987_v7 = vpop.f32.mrb[218].mxu0  ;;  %v8824_v53 = vpop.f32.mrb[203].mxu1 }
 0xeba   : > { %v8991_v8 = vmax.f32 %v13010_v30, 0.0  ;;  %v8988_v29 = vpop.f32.mrb[219].mxu0  ;;  %v8992_v19 = vmax.f32 %v13011_v57, 0.0 }
 0xebb   : > { %v8993_v11 = vmax.f32 %v13012_v39, 0.0  ;;  %v8994_v16 = vpack.c.bf16 %v8990_v58, %v8990_v58 }
 0xebc   : > { %v8995_v51 = vpack.c.bf16 %v8991_v8, %v8991_v8  ;;  %v8996_v31 = vpack.c.bf16 %v8992_v19, %v8992_v19 }
 0xebd   : > { %v8997_v21 = vpack.c.bf16 %v8993_v11, %v8993_v11 }
 0xebe   : > { %9426 = vmatprep.mubr.bf16.mxu1 %v8995_v51 }
 0xebf   : > { %9427 = vmatmul.mubr.bf16.vlgmr.msra.gmra.mrb[204].mxu1 %v8994_v16 }
 0xec0   : > { %9436 = vmatpush1.bf16.msra.mxu1 %v13740_v15  ;;  %9467 = vmatprep.mubr.bf16.mxu1 %v8997_v21 }
 0xec1   : > { %9437 = vmatprep.subr.bf16.mxu1 %v13745_v27 }
 0xec4   : > { %9438 = vmatpush1.bf16.msra.mxu1 %v13743_v40 }
 0xec5   : > { %9439 = vmatprep.subr.bf16.mxu1 %v13748_v33 }
 0xec8   : > { %9440 = vmatpush1.bf16.msra.mxu1 %v13746_v34 }
 0xec9   : > { %9441 = vmatprep.subr.bf16.mxu1 %v13751_v35 }
 0xecc   : > { %9442 = vmatpush1.bf16.msra.mxu1 %v13749_v36 }
 0xecd   : > { %9443 = vmatprep.subr.bf16.mxu1 %v13754_v43 }
 0xed0   : > { %9444 = vmatpush1.bf16.msra.mxu1 %v13752_v45 }
 0xed1   : > { %9445 = vmatprep.subr.bf16.mxu1 %v13757_v56 }
 0xed4   : > { %9446 = vmatpush1.bf16.msra.mxu1 %v13755_v38 }
 0xed5   : > { %9447 = vmatprep.subr.bf16.mxu1 %v13760_v47 }
 0xed8   : > { %9448 = vmatpush1.bf16.msra.mxu1 %v13758_v50 }
 0xed9   : > { %9449 = vmatprep.subr.bf16.mxu1 %v13763_v41 }
 0xedc   : > { %9450 = vmatpush1.bf16.msra.mxu1 %v13761_v32 }
 0xedd   : > { %9451 = vmatprep.subr.bf16.mxu1 %v13766_v4 }
 0xee0   : > { %9452 = vmatpush1.bf16.msra.mxu1 %v13764_v52 }
 0xee1   : > { %9453 = vmatprep.subr.bf16.mxu1 %v13769_v54 }
 0xee4   : > { %9454 = vmatpush1.bf16.msra.mxu1 %v13767_v55 }
 0xee5   : > { %9455 = vmatprep.subr.bf16.mxu1 %v13772_v60 }
 0xee8   : > { %9456 = vmatpush1.bf16.msra.mxu1 %v13770_v6 }
 0xee9   : > { %9457 = vmatprep.subr.bf16.mxu1 %v13775_v23 }
 0xeec   : > { %9458 = vmatpush1.bf16.msra.mxu1 %v13773_v61 }
 0xeed   : > { %9459 = vmatprep.subr.bf16.mxu1 %v13778_v62 }
 0xef0   : > { %9460 = vmatpush1.bf16.msra.mxu1 %v13776_v44 }
 0xef1   : > { %9461 = vmatprep.subr.bf16.mxu1 %v13781_v12 }
 0xef4   : > { %9462 = vmatpush1.bf16.msra.mxu1 %v13779_v46 }
 0xef5   : > { %9463 = vmatprep.subr.bf16.mxu1 %v13784_v3 }
 0xef8   : > { %9464 = vmatpush1.bf16.msra.mxu1 %v13782_v25 }
 0xef9   : > { %9465 = vmatprep.subr.bf16.mxu1 %v13787_v49 }
 0xefc   : > { %9466 = vmatpush1.bf16.msra.mxu1 %v13785_v18 }
 0xeff   : > { %9468 = vmatmul.mubr.bf16.vlgmr.msra.gmra.mrb[204].mxu1 %v8996_v31 }
 0xfd2   : > { %v9469_v59 = vpop.f32.mrb[204].mxu1 }
 0xfd3   : > { %v13013_v1 = vadd.f32 %v9469_v59, %v9387_v0  ;;  %v9471_v22 = vpop.f32.mrb[205].mxu1 }
 0xfd4   : > { %v13014_v37 = vadd.f32 %v9471_v22, %v9391_v24  ;;  %v9473_v28 = vpop.f32.mrb[206].mxu1 }
 0xfd5   : > { %v9474_v2 = vpop.f32.mrb[207].mxu1  ;;  %v9476_v48 = vpack.c.bf16 %v13013_v1, %v13013_v1 }
 0xfd6   : > { %v9477_v13 = vpack.c.bf16 %v13014_v37, %v13014_v37 }
 0xfd8   : > { %9639 = vmatprep.mubr.bf16.mxu0 %v9477_v13 }
 0xfd9   : > { %9640 = vmatmul.mubr.bf16.vlgmr.msra.gmra.mrb[220].mxu0 %v9476_v48 }
0x10ac   : > { %v11107_v30 = vpop.f32.mrb[220].mxu0 }
0x10ad   : > { %v11108_v17 = vpop.f32.mrb[221].mxu0 }
0x10ae   : > { %v11109_v42 = vadd.f32 %v11108_v17, %v11107_v30  ;;  %v11110_v14 = vpop.f32.mrb[222].mxu0 }
0x10af   : > { %v11111_v58 = vpop.f32.mrb[223].mxu0 }
0x10b0   : > { %v9642_v39 = vadd.f32 %v11109_v42, %v9510_v20 }
0x10b2   : > { %9647 = vst [vmem:[%s594_s3] sm:$0x1] %v9642_v39 }
0x10b3   : > { %13817 = shalt.err (!%p13814_p3)
}
0x10b4   : > { %s13818_s23 = scalar_lea.hbm %s18313_s22, 16  ;;  %s13822_s21 = scalar_lea.hbm %s18408_s28, 32 }
0x10b5   : > { %p13819_p4 = scmp.ne.s32.totalorder %s18313_s22, %s13818_s23  ;;  %p13823_p9 = scmp.lt.u32.totalorder %s18313_s22, %s18408_s28 }
0x10b6   : > { %p13824_p10 = scmp.lt.u32.totalorder %s13822_s21, %s13818_s23  ;;  %p13826_p12 = scmp.lt.u32.totalorder %s13818_s23, %s18313_s22 }
0x10b7   : > { %p13820_p7 = pnand %p13819_p4, %p14009_p5 }
0x10b8   : > { %p13825_p11 = por %p13824_p10, %p13823_p9 }
0x10b9   : > { %p13821_p8 = pneg %p13820_p7 }
0x10ba   : > { %p13827_p13 = por %p13826_p12, %p13825_p11 }
0x10bc   : > { %p13828_p0 = pnand %p13827_p13, %p13821_p8 }
0x10be   : > { %13831 = shalt.err (!%p13828_p0)
}
0x10bf   : > { %13267 = dma.vmem_to_hbm [thread:$0]  (%p14009_p5), %s18315_s2, 16, %s18313_s22, %s9649_s19  }
0x10c0 PF: > { %s18409_s4 = sld [smem:[#allocation7_spill]]  ;;  %s18410_s24 = sld [smem:[#allocation5_spill]] }
0x10c6   : > { %p13273_p1 = scmp.ge.s32.totalorder %s18409_s4, 2  ;;  %s9673_s27 = sand.u32 1, %s18410_s24  }
0x10c7   : > { %s9674_s3 = scalar_lea.sflag [#allocation3], %s9673_s27 }
0x10c8   : > { %p13270_p2 = pnand %p13273_p1, %p14013_p6 }
0x10ca   : > { %13849 = dma.done.wait (!%p13270_p2), %s9674_s3, 16  }
0x10cb   : > { %13851 = vsyncadd (!%p13270_p2), %s9674_s3, 4294967280  ;;  %s18412_s21 = sld [smem:[#allocation8_spill]]  ;;  %s18413_s23 = sld [smem:[#allocation6_spill]] }
0x10cc   : > { %s18414_s20 = sld [smem:[#allocation9_spill]]  ;;  %s18415_s0 = smov %s13858_s30 }
0x10d1   : > { %p29_p3 = scmp.ge.s32.totalorder %s18412_s21, 4   ;;  %s18416_s30 = smov %s18413_s23 }
0x10d3   :  { %31 = sbr.rel (!%p29_p3) target bundleno = 10 (0xa), region = 151 }
0x10da   :  { %9678 = vsyncpa [#allocation3], 1 }
0x10db   :  { %9680 = vsyncpa [#allocation3 + $0x1], 1 }

</bundles_post_ra>
